<compile_context>
chip_gen: v7x
topology: tpu7x:2x2x1
jax: 0.10.0
libtpu: 0.0.40
codegen_flags: <defaults>
</compile_context>

<pallas_src>
import jax
import jax.numpy as jnp
from jax.experimental import pallas as pl
from jax.experimental.pallas import tpu as pltpu

IN = 3072          # 3 * 32 * 32
H1, H2, OUT = 800, 800, 100
H1P, H2P, OUTP = 896, 896, 128   # lane-padded (multiples of 128)


def _student_mlp_kernel(x_ref, w1_ref, b1_ref, w2_ref, b2_ref, w3_ref, b3_ref,
                        o_ref):
    # x tile arrives as (TM, 3072) float32; cast to bf16 in-kernel right before
    # the MXU (removes a whole wrapper-side HBM cast pass).
    x = x_ref[...].astype(jnp.bfloat16)
    h1 = jnp.dot(x, w1_ref[...], preferred_element_type=jnp.float32)
    h1 = jnp.maximum(h1 + b1_ref[...], 0.0)                       # f32 ReLU
    h2 = jnp.dot(h1.astype(jnp.bfloat16), w2_ref[...],
                 preferred_element_type=jnp.float32)
    h2 = jnp.maximum(h2 + b2_ref[...], 0.0)                       # f32 ReLU
    o_ref[...] = (jnp.dot(h2.astype(jnp.bfloat16), w3_ref[...],
                          preferred_element_type=jnp.float32)
                  + b3_ref[...])                                  # (TM, 128) f32


def init_student_params(key):
    """Deterministic init mimicking nn.Linear default (U[-1/sqrt(fan_in), ...]).

    Weights stored transposed as (in_features, out_features), biases as
    (1, out_features), both float32 ("master" copy).
    """
    dims = [(IN, H1), (H1, H2), (H2, OUT)]
    params = []
    for i, (fan_in, fan_out) in enumerate(dims):
        kw, kb = jax.random.split(jax.random.fold_in(key, i))
        bound = 1.0 / jnp.sqrt(fan_in)
        w = jax.random.uniform(kw, (fan_in, fan_out), jnp.float32, -bound, bound)
        b = jax.random.uniform(kb, (1, fan_out), jnp.float32, -bound, bound)
        params.append((w, b))
    return params


def prepare_params(params):
    """One-time prep: cast weights to bf16 and zero-pad to lane multiples."""
    (w1, b1), (w2, b2), (w3, b3) = params
    w1p = jnp.pad(w1, ((0, 0), (0, H1P - H1))).astype(jnp.bfloat16)           # (3072, 896)
    b1p = jnp.pad(b1, ((0, 0), (0, H1P - H1))).astype(jnp.float32)            # (1, 896)
    w2p = jnp.pad(w2, ((0, H1P - H1), (0, H2P - H2))).astype(jnp.bfloat16)    # (896, 896)
    b2p = jnp.pad(b2, ((0, 0), (0, H2P - H2))).astype(jnp.float32)            # (1, 896)
    w3p = jnp.pad(w3, ((0, H2P - H2), (0, OUTP - OUT))).astype(jnp.bfloat16)  # (896, 128)
    b3p = jnp.pad(b3, ((0, 0), (0, OUTP - OUT))).astype(jnp.float32)          # (1, 128)
    return (w1p, b1p, w2p, b2p, w3p, b3p)


def _choose_tile(B, tile_m):
    """Pick (tile rows, padded batch) for the batch-tiled grid."""
    if B <= tile_m:
        if B >= 16:
            # Guarantee >= 2 grid steps so ("parallel",) shards the batch axis
            # across both v7x TensorCores (no-op cost on v5e/v6e: one extra
            # ~0.35us grid step).
            tm = ((-(-B // 2)) + 7) // 8 * 8      # ceil(B/2), rounded up to 8
            return tm, 2 * tm
        # Tiny batch: single full-extent tile (block dim == array dim is legal).
        return B, B
    tm = tile_m
    return tm, pl.cdiv(B, tm) * tm


def student_forward(x, prepared_params, *, tile_m=512):
    # Matches the PyTorch forward preamble: crop then flatten (row-major C,H,W).
    if x.shape[-3:] != (3, 32, 32):
        x = x[:, :3, :32, :32]
    B = x.shape[0]
    xf = jnp.reshape(x, (B, IN))           # kept in f32; kernel casts to bf16

    w1, b1, w2, b2, w3, b3 = prepared_params

    tm, bp = _choose_tile(B, tile_m)
    if bp != B:
        # Single wrapper-side copy, only for ragged batches (the bf16 cast copy
        # that used to precede this is now fused into the kernel).
        xf = jnp.pad(xf, ((0, bp - B), (0, 0)))

    grid = (bp // tm,)

    flops = 2 * bp * (IN * H1P + H1P * H2P + H2P * OUTP)
    bytes_accessed = (
        bp * IN * 4                                   # x (f32)
        + (w1.size + w2.size + w3.size) * 2           # weights (bf16)
        + (b1.size + b2.size + b3.size) * 4           # biases (f32)
        + bp * OUTP * 4)                              # out (f32)

    # ~14.5 MiB double-buffered weights + 2x f32 x tiles + f32 intermediates:
    # ~33 MiB at TM=512 -> 48 MiB budget; TM=1024 (v5e/v6e only) -> 64 MiB.
    vmem_limit_bytes = (48 if tm <= 512 else 64) * 1024 * 1024

    out = pl.pallas_call(
        _student_mlp_kernel,
        out_shape=jax.ShapeDtypeStruct((bp, OUTP), jnp.float32),
        grid=grid,
        in_specs=[
            pl.BlockSpec((tm, IN), lambda i: (i, 0)),      # x: batch-tiled, f32
            pl.BlockSpec((IN, H1P), lambda i: (0, 0)),     # w1: VMEM-resident
            pl.BlockSpec((1, H1P), lambda i: (0, 0)),      # b1: resident
            pl.BlockSpec((H1P, H2P), lambda i: (0, 0)),    # w2: resident
            pl.BlockSpec((1, H2P), lambda i: (0, 0)),      # b2: resident
            pl.BlockSpec((H2P, OUTP), lambda i: (0, 0)),   # w3: resident
            pl.BlockSpec((1, OUTP), lambda i: (0, 0)),     # b3: resident
        ],
        out_specs=pl.BlockSpec((tm, OUTP), lambda i: (i, 0)),
        compiler_params=pltpu.CompilerParams(
            dimension_semantics=("parallel",),             # megacore on v7x
            vmem_limit_bytes=vmem_limit_bytes,
        ),
        cost_estimate=pl.CostEstimate(
            flops=flops, transcendentals=0, bytes_accessed=bytes_accessed),
    )(xf, w1, b1, w2, b2, w3, b3)

    return out[:B, :OUT]


def _reference(x, params):
    """Pure-JAX reference mimicking the kernel's bf16-in / f32-accumulate math."""
    def bf16(a):
        return a.astype(jnp.bfloat16).astype(jnp.float32)

    (w1, b1), (w2, b2), (w3, b3) = params
    xf = x.reshape(x.shape[0], -1)
    h1 = jnp.maximum(bf16(xf) @ bf16(w1) + b1, 0.0)
    h2 = jnp.maximum(bf16(h1) @ bf16(w2) + b2, 0.0)
    return bf16(h2) @ bf16(w3) + b3


if __name__ == "__main__":
    key = jax.random.PRNGKey(0)
    kx, kx2, kp = jax.random.split(key, 3)

    params = init_student_params(kp)
    prepared = prepare_params(params)

    # 1) Tiny batch (single full-extent tile path).
    B = 2
    x = jax.random.normal(kx, (B, 3, 32, 32), dtype=jnp.float32)
    y = jax.block_until_ready(student_forward(x, prepared))
    assert y.shape == (B, OUT)
    ref = _reference(x, params)
    assert jnp.allclose(y, ref, atol=1e-2, rtol=1e-2), (
        float(jnp.max(jnp.abs(y - ref))))

    # 2) Medium batch exercising the 2-tile (megacore-friendly) grid path.
    B2 = 48
    x2 = jax.random.normal(kx2, (B2, 3, 32, 32), dtype=jnp.float32)
    y2 = jax.block_until_ready(student_forward(x2, prepared))
    assert y2.shape == (B2, OUT)
    ref2 = _reference(x2, params)
    assert jnp.allclose(y2, ref2, atol=1e-2, rtol=1e-2), (
        float(jnp.max(jnp.abs(y2 - ref2))))

    print("KERNEL_OK")
</pallas_src>

<mosaic_0001>
module attributes {stable_mosaic.version = 11 : i64} {
  func.func @_student_mlp_kernel(%arg0: i32, %arg1: memref<2x3072xf32, #tpu.memory_space<vmem>>, %arg2: memref<3072x896xbf16, #tpu.memory_space<vmem>>, %arg3: memref<1x896xf32, #tpu.memory_space<vmem>>, %arg4: memref<896x896xbf16, #tpu.memory_space<vmem>>, %arg5: memref<1x896xf32, #tpu.memory_space<vmem>>, %arg6: memref<896x128xbf16, #tpu.memory_space<vmem>>, %arg7: memref<1x128xf32, #tpu.memory_space<vmem>>, %arg8: memref<2x128xf32, #tpu.memory_space<vmem>>) attributes {dimension_semantics = [#tpu.dimension_semantics<parallel>], iteration_bounds = array<i64: 1>, scalar_prefetch = 0 : i64, scratch_operands = 0 : i64, tpu.core_type = #tpu.core_type<tc>, window_params = [{transform_indices = @transform_0, window_bounds = array<i64: 2, 3072>}, {pipeline_mode = #tpu.pipeline_mode<synchronous>, transform_indices = @transform_1, window_bounds = array<i64: 3072, 896>}, {pipeline_mode = #tpu.pipeline_mode<synchronous>, transform_indices = @transform_2, window_bounds = array<i64: 1, 896>}, {pipeline_mode = #tpu.pipeline_mode<synchronous>, transform_indices = @transform_3, window_bounds = array<i64: 896, 896>}, {pipeline_mode = #tpu.pipeline_mode<synchronous>, transform_indices = @transform_4, window_bounds = array<i64: 1, 896>}, {pipeline_mode = #tpu.pipeline_mode<synchronous>, transform_indices = @transform_5, window_bounds = array<i64: 896, 128>}, {pipeline_mode = #tpu.pipeline_mode<synchronous>, transform_indices = @transform_6, window_bounds = array<i64: 1, 128>}, {transform_indices = @transform_7, window_bounds = array<i64: 2, 128>}]} {
    %c0 = arith.constant 0 : index
    %c0_0 = arith.constant 0 : index
    %0 = vector.load %arg1[%c0, %c0_0] : memref<2x3072xf32, #tpu.memory_space<vmem>>, vector<2x3072xf32>
    %1 = arith.truncf %0 : vector<2x3072xf32> to vector<2x3072xbf16>
    %c0_1 = arith.constant 0 : index
    %c0_2 = arith.constant 0 : index
    %2 = vector.load %arg2[%c0_1, %c0_2] : memref<3072x896xbf16, #tpu.memory_space<vmem>>, vector<3072x896xbf16>
    %cst = arith.constant dense<0.000000e+00> : vector<2x896xf32>
    %3 = tpu.matmul %1, %2, %cst {dimension_numbers = #tpu.dot_dimension_numbers<[1], [0], [0], [1], [0, 0, 1, 1], [], []>} : vector<2x3072xbf16>, vector<3072x896xbf16>, vector<2x896xf32> -> vector<2x896xf32>
    %c0_3 = arith.constant 0 : index
    %c0_4 = arith.constant 0 : index
    %4 = vector.load %arg3[%c0_3, %c0_4] : memref<1x896xf32, #tpu.memory_space<vmem>>, vector<1x896xf32>
    %5 = vector.broadcast %4 : vector<1x896xf32> to vector<2x896xf32>
    %6 = arith.addf %3, %5 : vector<2x896xf32>
    %cst_5 = arith.constant 0.000000e+00 : f32
    %7 = vector.broadcast %cst_5 : f32 to vector<2x896xf32>
    %8 = arith.maximumf %6, %7 : vector<2x896xf32>
    %9 = arith.truncf %8 : vector<2x896xf32> to vector<2x896xbf16>
    %c0_6 = arith.constant 0 : index
    %c0_7 = arith.constant 0 : index
    %10 = vector.load %arg4[%c0_6, %c0_7] : memref<896x896xbf16, #tpu.memory_space<vmem>>, vector<896x896xbf16>
    %cst_8 = arith.constant dense<0.000000e+00> : vector<2x896xf32>
    %11 = tpu.matmul %9, %10, %cst_8 {dimension_numbers = #tpu.dot_dimension_numbers<[1], [0], [0], [1], [0, 0, 1, 1], [], []>} : vector<2x896xbf16>, vector<896x896xbf16>, vector<2x896xf32> -> vector<2x896xf32>
    %c0_9 = arith.constant 0 : index
    %c0_10 = arith.constant 0 : index
    %12 = vector.load %arg5[%c0_9, %c0_10] : memref<1x896xf32, #tpu.memory_space<vmem>>, vector<1x896xf32>
    %13 = vector.broadcast %12 : vector<1x896xf32> to vector<2x896xf32>
    %14 = arith.addf %11, %13 : vector<2x896xf32>
    %cst_11 = arith.constant 0.000000e+00 : f32
    %15 = vector.broadcast %cst_11 : f32 to vector<2x896xf32>
    %16 = arith.maximumf %14, %15 : vector<2x896xf32>
    %17 = arith.truncf %16 : vector<2x896xf32> to vector<2x896xbf16>
    %c0_12 = arith.constant 0 : index
    %c0_13 = arith.constant 0 : index
    %18 = vector.load %arg6[%c0_12, %c0_13] : memref<896x128xbf16, #tpu.memory_space<vmem>>, vector<896x128xbf16>
    %cst_14 = arith.constant dense<0.000000e+00> : vector<2x128xf32>
    %19 = tpu.matmul %17, %18, %cst_14 {dimension_numbers = #tpu.dot_dimension_numbers<[1], [0], [0], [1], [0, 0, 1, 1], [], []>} : vector<2x896xbf16>, vector<896x128xbf16>, vector<2x128xf32> -> vector<2x128xf32>
    %c0_15 = arith.constant 0 : index
    %c0_16 = arith.constant 0 : index
    %20 = vector.load %arg7[%c0_15, %c0_16] : memref<1x128xf32, #tpu.memory_space<vmem>>, vector<1x128xf32>
    %21 = vector.broadcast %20 : vector<1x128xf32> to vector<2x128xf32>
    %22 = arith.addf %19, %21 : vector<2x128xf32>
    %c0_17 = arith.constant 0 : index
    %c0_18 = arith.constant 0 : index
    %23 = vector.load %arg8[%c0_17, %c0_18] : memref<2x128xf32, #tpu.memory_space<vmem>>, vector<2x128xf32>
    tpu.vector_store %arg8[%c0_17, %c0_18], %22 {strides = array<i32>} : memref<2x128xf32, #tpu.memory_space<vmem>>, vector<2x128xf32>,
    return
  }
  func.func @transform_0(%arg0: i32) -> (i32, i32) {
    %c0_i32 = arith.constant 0 : i32
    %c0_i32_0 = arith.constant 0 : i32
    return %arg0, %c0_i32 : i32, i32
  }
  func.func @transform_1(%arg0: i32) -> (i32, i32) {
    %c0_i32 = arith.constant 0 : i32
    %c0_i32_0 = arith.constant 0 : i32
    %c0_i32_1 = arith.constant 0 : i32
    return %c0_i32, %c0_i32_0 : i32, i32
  }
  func.func @transform_2(%arg0: i32) -> (i32, i32) {
    %c0_i32 = arith.constant 0 : i32
    %c0_i32_0 = arith.constant 0 : i32
    %c0_i32_1 = arith.constant 0 : i32
    return %c0_i32, %c0_i32_0 : i32, i32
  }
  func.func @transform_3(%arg0: i32) -> (i32, i32) {
    %c0_i32 = arith.constant 0 : i32
    %c0_i32_0 = arith.constant 0 : i32
    %c0_i32_1 = arith.constant 0 : i32
    return %c0_i32, %c0_i32_0 : i32, i32
  }
  func.func @transform_4(%arg0: i32) -> (i32, i32) {
    %c0_i32 = arith.constant 0 : i32
    %c0_i32_0 = arith.constant 0 : i32
    %c0_i32_1 = arith.constant 0 : i32
    return %c0_i32, %c0_i32_0 : i32, i32
  }
  func.func @transform_5(%arg0: i32) -> (i32, i32) {
    %c0_i32 = arith.constant 0 : i32
    %c0_i32_0 = arith.constant 0 : i32
    %c0_i32_1 = arith.constant 0 : i32
    return %c0_i32, %c0_i32_0 : i32, i32
  }
  func.func @transform_6(%arg0: i32) -> (i32, i32) {
    %c0_i32 = arith.constant 0 : i32
    %c0_i32_0 = arith.constant 0 : i32
    %c0_i32_1 = arith.constant 0 : i32
    return %c0_i32, %c0_i32_0 : i32, i32
  }
  func.func @transform_7(%arg0: i32) -> (i32, i32) {
    %c0_i32 = arith.constant 0 : i32
    %c0_i32_0 = arith.constant 0 : i32
    return %arg0, %c0_i32 : i32, i32
  }
}

</mosaic_0001>

<bundles_post_ra>
// kernel: tpu_custom_call.1
= control target key start
LH: loop header
LB: loop body
LE: loop exit
PB: predicated region body
PF: predicated region fallthrough
CT: control target
= control target key end

     0   :  { %12 = vsyncpa [#allocation3], 0  ;;  %s20252_s0 = inlined_call_operand.hbm [shape: f32[2,3072], index: 0, kind: input, shape index: {}]   ;;  %s20253_s1 = inlined_call_operand.hbm [shape: bf16[3072,896], index: 1, kind: input, shape index: {}]   ;;  %s20254_s2 = inlined_call_operand.hbm [shape: f32[1,896], index: 2, kind: input, shape index: {}]   ;;  %s20255_s3 = inlined_call_operand.hbm [shape: bf16[896,896], index: 3, kind: input, shape index: {}]   ;;  %s20256_s4 = inlined_call_operand.hbm [shape: f32[1,896], index: 4, kind: input, shape index: {}]   ;;  %s20257_s5 = inlined_call_operand.hbm [shape: bf16[896,128], index: 5, kind: input, shape index: {}]   ;;  %s20258_s6 = inlined_call_operand.hbm [shape: f32[1,128], index: 6, kind: input, shape index: {}]   ;;  %s20259_s7 = inlined_call_operand.hbm [shape: f32[2,128], index: 7, kind: output, shape index: {}]  }
   0x1   :  { %13 = vsyncpa [#allocation6], 0 }
   0x2   :  { %14 = vsyncpa [#allocation9], 0 }
   0x3   :  { %15 = vsyncpa [#allocation12], 0 }
   0x4   :  { %16 = vsyncpa [#allocation4], 0  ;;  %s19705_s24 = smov [#allocation5]   ;;  %s19519_s28 = scalar_lea.hbm %s20253_s1, 172032 }
   0x5   :  { %s32_s25 = sshll.u32 %s19705_s24, 4  ;;  %p19520_p0 = scmp.ne.s32.totalorder %s20253_s1, %s19519_s28  ;;  %s33_s25 = int_to_ptr.vmem [resolvable:$true] %s32_s25 }
   0x6   :  { %p19523_p1 = scmp.lt.u32.totalorder %s19519_s28, %s20253_s1 }
   0x8   :  { %p19525_p2 = pnand %p19523_p1, %p19520_p0 }
   0xa   :  { %19528 = shalt.err (!%p19525_p2)
}
   0xb   :  { %s19529_s10 = scalar_lea.vmem %s33_s25, 172032  ;;  %p19534_p4 = scmp.lt.s32.totalorder %s33_s25, %s33_s25 }
   0xc   :  { %p19530_p3 = scmp.ne.s32.totalorder %s33_s25, %s19529_s10  ;;  %p19535_p5 = scmp.lt.s32.totalorder %s19529_s10, %s19529_s10 }
   0xe   :  { %p19536_p6 = por %p19535_p5, %p19534_p4 }
  0x10   :  { %p19537_p7 = pnand %p19536_p6, %p19530_p3 }
  0x12   :  { %19540 = shalt.err (!%p19537_p7)
}
  0x13   :  { %s19706_s11 = smov 448   ;;  %s19707_s12 = smov 28  }
  0x14   :  { %38 = dma.hbm_to_vmem [thread:$0]  %s20253_s1, 172032, %s33_s25, [#allocation6], %s19706_s11, %s19706_s11, %s19707_s12  }
  0x15   :  { %s19708_s15 = smov [#allocation8]   ;;  %s19709_s17 = smov [#allocation11]  }
  0x16   :  { %s54_s16 = sshll.u32 %s19708_s15, 4  ;;  %s76_s18 = sshll.u32 %s19709_s17, 4  ;;  %s55_s16 = int_to_ptr.vmem [resolvable:$true] %s54_s16  ;;  %s77_s18 = int_to_ptr.vmem [resolvable:$true] %s76_s18 }
  0x17   :  { %s19541_s21 = scalar_lea.hbm %s20255_s3, 50176 }
  0x18   :  { %p19542_p8 = scmp.ne.s32.totalorder %s20255_s3, %s19541_s21  ;;  %p19545_p9 = scmp.lt.u32.totalorder %s19541_s21, %s20255_s3 }
  0x1a   :  { %p19547_p10 = pnand %p19545_p9, %p19542_p8 }
  0x1c   :  { %19550 = shalt.err (!%p19547_p10)
}
  0x1d   :  { %s19551_s1 = scalar_lea.vmem %s55_s16, 50176  ;;  %p19556_p12 = scmp.lt.s32.totalorder %s55_s16, %s55_s16 }
  0x1e   :  { %p19552_p11 = scmp.ne.s32.totalorder %s55_s16, %s19551_s1  ;;  %p19557_p13 = scmp.lt.s32.totalorder %s19551_s1, %s19551_s1 }
  0x20   :  { %p19558_p0 = por %p19557_p13, %p19556_p12 }
  0x22   :  { %p19559_p1 = pnand %p19558_p0, %p19552_p11 }
  0x24   :  { %19562 = shalt.err (!%p19559_p1)
}
  0x25   :  { %60 = dma.hbm_to_vmem [thread:$0]  %s20255_s3, 50176, %s55_s16, [#allocation9], %s19706_s11, %s19706_s11, %s19707_s12  }
  0x26   :  { %s19563_s30 = scalar_lea.hbm %s20257_s5, 7168 }
  0x27   :  { %p19564_p2 = scmp.ne.s32.totalorder %s20257_s5, %s19563_s30  ;;  %p19567_p3 = scmp.lt.u32.totalorder %s19563_s30, %s20257_s5 }
  0x29   :  { %p19569_p4 = pnand %p19567_p3, %p19564_p2 }
  0x2b   :  { %19572 = shalt.err (!%p19569_p4)
}
  0x2c   :  { %s19573_s14 = scalar_lea.vmem %s77_s18, 7168  ;;  %p19578_p6 = scmp.lt.s32.totalorder %s77_s18, %s77_s18 }
  0x2d   :  { %p19574_p5 = scmp.ne.s32.totalorder %s77_s18, %s19573_s14  ;;  %p19579_p7 = scmp.lt.s32.totalorder %s19573_s14, %s19573_s14 }
  0x2f   :  { %p19580_p8 = por %p19579_p7, %p19578_p6 }
  0x31   :  { %p19581_p9 = pnand %p19580_p8, %p19574_p5 }
  0x33   :  { %19584 = shalt.err (!%p19581_p9)
}
  0x34   :  { %s19710_s3 = smov 64   ;;  %s19711_s11 = smov 4  }
  0x35   :  { %82 = dma.hbm_to_vmem [thread:$0]  %s20257_s5, 7168, %s77_s18, [#allocation12], %s19710_s3, %s19710_s3, %s19711_s11  }
  0x36   :  { %s19712_s16 = smov [#allocation2]   ;;  %s19713_s19 = smov [#allocation7]  }
  0x37   :  { %s23_s17 = sshll.u32 %s19712_s16, 4  ;;  %s45_s20 = sshll.u32 %s19713_s19, 4  ;;  %s24_s17 = int_to_ptr.vmem [resolvable:$true] %s23_s17  ;;  %s46_s20 = int_to_ptr.vmem [resolvable:$true] %s45_s20 }
  0x38   :  { %s19585_s23 = scalar_lea.hbm %s20252_s0, 768 }
  0x39   :  { %p19586_p10 = scmp.ne.s32.totalorder %s20252_s0, %s19585_s23  ;;  %p19589_p11 = scmp.lt.u32.totalorder %s19585_s23, %s20252_s0 }
  0x3b   :  { %p19591_p12 = pnand %p19589_p11, %p19586_p10 }
  0x3d   :  { %19594 = shalt.err (!%p19591_p12)
}
  0x3e   :  { %s19595_s5 = scalar_lea.vmem %s24_s17, 768  ;;  %p19600_p0 = scmp.lt.s32.totalorder %s24_s17, %s24_s17 }
  0x3f   :  { %p19596_p13 = scmp.ne.s32.totalorder %s24_s17, %s19595_s5  ;;  %p19601_p1 = scmp.lt.s32.totalorder %s19595_s5, %s19595_s5 }
  0x41   :  { %p19602_p2 = por %p19601_p1, %p19600_p0 }
  0x43   :  { %p19603_p3 = pnand %p19602_p2, %p19596_p13 }
  0x45   :  { %19606 = shalt.err (!%p19603_p3)
}
  0x46   :  { %26 = dma.hbm_to_vmem [thread:$0]  %s20252_s0, 768, %s24_s17, [#allocation3]  }
  0x47   :  { %s19607_s30 = scalar_lea.hbm %s20254_s2, 112 }
  0x48   :  { %p19608_p4 = scmp.ne.s32.totalorder %s20254_s2, %s19607_s30  ;;  %p19611_p5 = scmp.lt.u32.totalorder %s19607_s30, %s20254_s2 }
  0x4a   :  { %p19613_p6 = pnand %p19611_p5, %p19608_p4 }
  0x4c   :  { %19616 = shalt.err (!%p19613_p6)
}
  0x4d   :  { %s19617_s14 = scalar_lea.vmem %s46_s20, 112  ;;  %s19621_s3 = scalar_lea.vmem %s46_s20, 128 }
  0x4e   :  { %p19618_p7 = scmp.ne.s32.totalorder %s46_s20, %s19617_s14  ;;  %p19622_p8 = scmp.lt.s32.totalorder %s46_s20, %s46_s20 }
  0x4f   :  { %p19623_p9 = scmp.lt.s32.totalorder %s19621_s3, %s19617_s14 }
  0x51   :  { %p19624_p10 = por %p19623_p9, %p19622_p8 }
  0x53   :  { %p19625_p11 = pnand %p19624_p10, %p19618_p7 }
  0x55   :  { %19628 = shalt.err (!%p19625_p11)
}
  0x56   :  { %48 = dma.hbm_to_vmem [thread:$0]  %s20254_s2, 112, %s46_s20, [#allocation6]  }
  0x57   :  { %s19714_s12 = smov [#allocation10]   ;;  %s19715_s16 = smov [#allocation13]  }
  0x58   :  { %s67_s15 = sshll.u32 %s19714_s12, 4  ;;  %s89_s17 = sshll.u32 %s19715_s16, 4  ;;  %s68_s15 = int_to_ptr.vmem [resolvable:$true] %s67_s15  ;;  %s90_s17 = int_to_ptr.vmem [resolvable:$true] %s89_s17 }
  0x59   :  { %s19629_s22 = scalar_lea.hbm %s20256_s4, 112 }
  0x5a   :  { %p19630_p12 = scmp.ne.s32.totalorder %s20256_s4, %s19629_s22  ;;  %p19633_p13 = scmp.lt.u32.totalorder %s19629_s22, %s20256_s4 }
  0x5c   :  { %p19635_p0 = pnand %p19633_p13, %p19630_p12 }
  0x5e   :  { %19638 = shalt.err (!%p19635_p0)
}
  0x5f   :  { %s19639_s2 = scalar_lea.vmem %s68_s15, 112  ;;  %s19643_s20 = scalar_lea.vmem %s68_s15, 128 }
  0x60   :  { %p19640_p1 = scmp.ne.s32.totalorder %s68_s15, %s19639_s2  ;;  %p19644_p2 = scmp.lt.s32.totalorder %s68_s15, %s68_s15 }
  0x61   :  { %p19645_p3 = scmp.lt.s32.totalorder %s19643_s20, %s19639_s2 }
  0x63   :  { %p19646_p4 = por %p19645_p3, %p19644_p2 }
  0x65   :  { %p19647_p5 = pnand %p19646_p4, %p19640_p1 }
  0x67   :  { %19650 = shalt.err (!%p19647_p5)
}
  0x68   :  { %70 = dma.hbm_to_vmem [thread:$0]  %s20256_s4, 112, %s68_s15, [#allocation9]  }
  0x69   :  { %s19651_s28 = scalar_lea.hbm %s20258_s6, 16 }
  0x6a   :  { %p19652_p6 = scmp.ne.s32.totalorder %s20258_s6, %s19651_s28  ;;  %p19655_p7 = scmp.lt.u32.totalorder %s19651_s28, %s20258_s6 }
  0x6c   :  { %p19657_p8 = pnand %p19655_p7, %p19652_p6 }
  0x6e   :  { %19660 = shalt.err (!%p19657_p8)
}
  0x6f   :  { %s19661_s10 = scalar_lea.vmem %s90_s17, 16  ;;  %s19665_s13 = scalar_lea.vmem %s90_s17, 32 }
  0x70   :  { %p19662_p9 = scmp.ne.s32.totalorder %s90_s17, %s19661_s10  ;;  %p19666_p10 = scmp.lt.s32.totalorder %s90_s17, %s90_s17 }
  0x71   :  { %p19667_p11 = scmp.lt.s32.totalorder %s19665_s13, %s19661_s10 }
  0x73   :  { %p19668_p12 = por %p19667_p11, %p19666_p10 }
  0x75   :  { %p19669_p13 = pnand %p19668_p12, %p19662_p9 }
  0x77   :  { %19672 = shalt.err (!%p19669_p13)
}
  0x78   :  { %92 = dma.hbm_to_vmem [thread:$0]  %s20258_s6, 16, %s90_s17, [#allocation12]  }
  0x79   :  { %19695 = dma.done.wait [#allocation3], 768  }
  0x7a   :  { %19696 = vsyncadd [#allocation3], 4294966528 }
  0x7b   :  { %19697 = dma.done.wait [#allocation6], 172144  }
  0x7c   :  { %19698 = vsyncadd [#allocation6], 4294795152 }
  0x7d   :  { %19699 = dma.done.wait [#allocation9], 50288  }
  0x7e   :  { %19700 = vsyncadd [#allocation9], 4294917008 }
  0x7f   :  { %19701 = dma.done.wait [#allocation12], 7184  }
  0x80   :  { %19702 = vsyncadd [#allocation12], 4294960112  ;;  %v16976_v0 = vld [vmem:[#allocation5 + $0x4] ss:$28 sps:$4 sm:$0xff]   ;;  %v16978_v1 = vld [vmem:[#allocation5 + $0xc] ss:$28 sps:$4 sm:$0xff]   ;;  %v131_v38 = vlaneseq }
  0x81   :  { %8762 = vmatprep.subr.bf16.mxu0 %v16976_v0  ;;  %v16980_v2 = vld [vmem:[#allocation5] ss:$28 sps:$4 sm:$0xff]   ;;  %v16981_v3 = vld [vmem:[#allocation5 + $0x8] ss:$28 sps:$4 sm:$0xff]   ;;  %9254 = vmatprep.subr.bf16.mxu1 %v16978_v1  ;;  %v16986_v6 = vld [vmem:[#allocation5 + $0x38] ss:$28 sps:$4 sm:$0xff]  }
  0x82   :  { %v16982_v4 = vld [vmem:[#allocation5 + $0x3c] ss:$28 sps:$4 sm:$0xff]   ;;  %8763 = vmatpush1.bf16.msra.mxu0 %v16980_v2  ;;  %9255 = vmatpush1.bf16.msra.mxu1 %v16981_v3  ;;  %v16984_v5 = vld [vmem:[#allocation5 + $0x44] ss:$28 sps:$4 sm:$0xff]   ;;  %v16988_v8 = vld [vmem:[#allocation5 + $0x74] ss:$28 sps:$4 sm:$0xff]  }
  0x83   :  { %8764 = vmatprep.subr.bf16.mxu0 %v16982_v4  ;;  %v16987_v7 = vld [vmem:[#allocation5 + $0x40] ss:$28 sps:$4 sm:$0xff]   ;;  %9256 = vmatprep.subr.bf16.mxu1 %v16984_v5  ;;  %v16992_v10 = vld [vmem:[#allocation5 + $0x70] ss:$28 sps:$4 sm:$0xff]   ;;  %v16993_v11 = vld [vmem:[#allocation5 + $0x78] ss:$28 sps:$4 sm:$0xff]  }
  0x84   :  { %v16990_v9 = vld [vmem:[#allocation5 + $0x7c] ss:$28 sps:$4 sm:$0xff]   ;;  %v16994_v12 = vld [vmem:[#allocation5 + $0xac] ss:$28 sps:$4 sm:$0xff]   ;;  %v16996_v13 = vld [vmem:[#allocation5 + $0xb4] ss:$28 sps:$4 sm:$0xff]  }
  0x85   :  { %v16998_v14 = vld [vmem:[#allocation5 + $0xa8] ss:$28 sps:$4 sm:$0xff]   ;;  %v16999_v15 = vld [vmem:[#allocation5 + $0xb0] ss:$28 sps:$4 sm:$0xff]   ;;  %v17004_v18 = vld [vmem:[#allocation5 + $0xe0] ss:$28 sps:$4 sm:$0xff]  }
  0x86   :  { %8765 = vmatpush1.bf16.msra.mxu0 %v16986_v6  ;;  %9257 = vmatpush1.bf16.msra.mxu1 %v16987_v7  ;;  %v17000_v16 = vld [vmem:[#allocation5 + $0xe4] ss:$28 sps:$4 sm:$0xff]   ;;  %v17002_v17 = vld [vmem:[#allocation5 + $0xec] ss:$28 sps:$4 sm:$0xff]   ;;  %v17006_v20 = vld [vmem:[#allocation5 + $0x11c] ss:$28 sps:$4 sm:$0xff]  }
  0x87   :  { %8766 = vmatprep.subr.bf16.mxu0 %v16988_v8  ;;  %9258 = vmatprep.subr.bf16.mxu1 %v16990_v9  ;;  %v17005_v19 = vld [vmem:[#allocation5 + $0xe8] ss:$28 sps:$4 sm:$0xff]   ;;  %v17010_v22 = vld [vmem:[#allocation5 + $0x118] ss:$28 sps:$4 sm:$0xff]   ;;  %v17011_v23 = vld [vmem:[#allocation5 + $0x120] ss:$28 sps:$4 sm:$0xff]  }
  0x88   :  { %v17008_v21 = vld [vmem:[#allocation5 + $0x124] ss:$28 sps:$4 sm:$0xff]   ;;  %v17012_v24 = vld [vmem:[#allocation5 + $0x154] ss:$28 sps:$4 sm:$0xff]   ;;  %v17014_v25 = vld [vmem:[#allocation5 + $0x15c] ss:$28 sps:$4 sm:$0xff]  }
  0x89   :  { %v17016_v26 = vld [vmem:[#allocation5 + $0x150] ss:$28 sps:$4 sm:$0xff]   ;;  %v17017_v27 = vld [vmem:[#allocation5 + $0x158] ss:$28 sps:$4 sm:$0xff]   ;;  %v17022_v30 = vld [vmem:[#allocation5 + $0x188] ss:$28 sps:$4 sm:$0xff]  }
  0x8a   :  { %8767 = vmatpush1.bf16.msra.mxu0 %v16992_v10  ;;  %9259 = vmatpush1.bf16.msra.mxu1 %v16993_v11  ;;  %v17018_v28 = vld [vmem:[#allocation5 + $0x18c] ss:$28 sps:$4 sm:$0xff]   ;;  %v17020_v29 = vld [vmem:[#allocation5 + $0x194] ss:$28 sps:$4 sm:$0xff]   ;;  %v17024_v32 = vld [vmem:[#allocation5 + $0x1c4] ss:$28 sps:$4 sm:$0xff]  }
  0x8b   :  { %8768 = vmatprep.subr.bf16.mxu0 %v16994_v12  ;;  %9260 = vmatprep.subr.bf16.mxu1 %v16996_v13  ;;  %v17023_v31 = vld [vmem:[#allocation5 + $0x190] ss:$28 sps:$4 sm:$0xff]   ;;  %v17028_v34 = vld [vmem:[#allocation5 + $0x1c0] ss:$28 sps:$4 sm:$0xff]   ;;  %v17029_v35 = vld [vmem:[#allocation5 + $0x1c8] ss:$28 sps:$4 sm:$0xff]  }
  0x8c   :  { %v17026_v33 = vld [vmem:[#allocation5 + $0x1cc] ss:$28 sps:$4 sm:$0xff]   ;;  %v19716_v36 = vmov 1983009808   ;;  %v17030_v39 = vld [vmem:[#allocation5 + $0x1fc] ss:$28 sps:$4 sm:$0xff]  }
  0x8d   :  { %v129_v37 = vunpack.c.l.s4 %v19716_v36  ;;  %v17032_v40 = vld [vmem:[#allocation5 + $0x204] ss:$28 sps:$4 sm:$0xff]   ;;  %v17034_v41 = vld [vmem:[#allocation5 + $0x1f8] ss:$28 sps:$4 sm:$0xff]   ;;  %v19845_v43 = vshrl.u32 %v131_v38, 7  ;;  %vm19719_vm0 = vmmov 0  }
  0x8e   :  { %8769 = vmatpush1.bf16.msra.mxu0 %v16998_v14  ;;  %9261 = vmatpush1.bf16.msra.mxu1 %v16999_v15  ;;  %v17035_v44 = vld [vmem:[#allocation5 + $0x200] ss:$28 sps:$4 sm:$0xff]   ;;  %v17036_v45 = vld [vmem:[#allocation5 + $0x234] ss:$28 sps:$4 sm:$0xff]   ;;  %v17042_v50 = vld [vmem:[#allocation5 + $0x26c] ss:$28 sps:$4 sm:$0xff]  }
  0x8f   :  { %8770 = vmatprep.subr.bf16.mxu0 %v17000_v16  ;;  %9262 = vmatprep.subr.bf16.mxu1 %v17002_v17  ;;  %v130_v42 = vunpack.c.0.s8 %v129_v37  ;;  %v17038_v46 = vld [vmem:[#allocation5 + $0x23c] ss:$28 sps:$4 sm:$0xff]   ;;  %v17040_v47 = vld [vmem:[#allocation5 + $0x230] ss:$28 sps:$4 sm:$0xff]   ;;  %v17046_v53 = vld [vmem:[#allocation5 + $0x268] ss:$28 sps:$4 sm:$0xff]  }
  0x90   :  { %v17041_v48 = vld [vmem:[#allocation5 + $0x238] ss:$28 sps:$4 sm:$0xff]   ;;  %v17047_v55 = vld [vmem:[#allocation5 + $0x270] ss:$28 sps:$4 sm:$0xff]   ;;  %v17048_v56 = vld [vmem:[#allocation5 + $0x2a4] ss:$28 sps:$4 sm:$0xff]  }
  0x91   :  { %v19848_v49 = vsub.s32 %v130_v42, %v19845_v43  ;;  %v17044_v51 = vld [vmem:[#allocation5 + $0x274] ss:$28 sps:$4 sm:$0xff]   ;;  %v17050_v57 = vld [vmem:[#allocation5 + $0x2ac] ss:$28 sps:$4 sm:$0xff]   ;;  %v17052_v59 = vld [vmem:[#allocation5 + $0x2a0] ss:$28 sps:$4 sm:$0xff]  }
  0x92   :  { %8771 = vmatpush1.bf16.msra.mxu0 %v17004_v18  ;;  %9263 = vmatpush1.bf16.msra.mxu1 %v17005_v19  ;;  %v115_v52 = vld [vmem:[#allocation2] sm:$0xff]  ;;  %v17053_v61 = vld [vmem:[#allocation5 + $0x2a8] ss:$28 sps:$4 sm:$0xff]   ;;  %v17054_v62 = vld [vmem:[#allocation5 + $0x2dc] ss:$28 sps:$4 sm:$0xff]   ;;  %s19720_s6 = smov [#allocation14]  }
  0x93   :  { %8772 = vmatprep.subr.bf16.mxu0 %v17006_v20  ;;  %9264 = vmatprep.subr.bf16.mxu1 %v17008_v21  ;;  %v134_v54 = vrot.slane %v115_v52, %v19848_v49  ;;  %v17056_v63 = vld [vmem:[#allocation5 + $0x2e4] ss:$28 sps:$4 sm:$0xff]   ;;  %v17058_v0 = vld [vmem:[#allocation5 + $0x2d8] ss:$28 sps:$4 sm:$0xff]   ;;  %v127_v4 = vcombine.high %v115_v52, %v115_v52  ;;  %v17064_v5 = vld [vmem:[#allocation5 + $0x310] ss:$28 sps:$4 sm:$0xff]  }
  0x94   :  { %v17059_v1 = vld [vmem:[#allocation5 + $0x2e0] ss:$28 sps:$4 sm:$0xff]   ;;  %v17060_v2 = vld [vmem:[#allocation5 + $0x314] ss:$28 sps:$4 sm:$0xff]   ;;  %v17066_v7 = vld [vmem:[#allocation5 + $0x34c] ss:$28 sps:$4 sm:$0xff]  }
  0x95   :  { %v142_v58 = vcombine.high %v134_v54, %v134_v54  ;;  %v17062_v3 = vld [vmem:[#allocation5 + $0x31c] ss:$28 sps:$4 sm:$0xff]   ;;  %v17068_v8 = vld [vmem:[#allocation5 + $0x354] ss:$28 sps:$4 sm:$0xff]   ;;  %v19856_v9 = vrot.slane %v127_v4, %v19848_v49  ;;  %v17070_v10 = vld [vmem:[#allocation5 + $0x348] ss:$28 sps:$4 sm:$0xff]   ;;  %v19860_v16 = vpack.c.bf16 %v134_v54, %v134_v54 }
  0x96   :  { %8773 = vmatpush1.bf16.msra.mxu0 %v17010_v22  ;;  %9265 = vmatpush1.bf16.msra.mxu1 %v17011_v23  ;;  %v17065_v6 = vld [vmem:[#allocation5 + $0x318] ss:$28 sps:$4 sm:$0xff]   ;;  %v17071_v11 = vld [vmem:[#allocation5 + $0x350] ss:$28 sps:$4 sm:$0xff]   ;;  %v17074_v12 = vld [vmem:[#allocation5 + $0x384] ss:$28 sps:$4 sm:$0xff]  }
  0x97   :  { %8774 = vmatprep.subr.bf16.mxu0 %v17012_v24  ;;  %9266 = vmatprep.subr.bf16.mxu1 %v17014_v25  ;;  %v19851_v60 = vpack.c.bf16 %v142_v58, %v142_v58  ;;  %v17077_v13 = vld [vmem:[#allocation5 + $0x38c] ss:$28 sps:$4 sm:$0xff]   ;;  %v143_v14 = vcombine.high %v19856_v9, %v19856_v9  ;;  %v17072_v15 = vld [vmem:[#allocation5 + $0x380] ss:$28 sps:$4 sm:$0xff]   ;;  %v17078_v21 = vld [vmem:[#allocation5 + $0x3b8] ss:$28 sps:$4 sm:$0xff]  }
  0x98   :  { %v17075_v17 = vld [vmem:[#allocation5 + $0x388] ss:$28 sps:$4 sm:$0xff]   ;;  %v17080_v18 = vld [vmem:[#allocation5 + $0x3bc] ss:$28 sps:$4 sm:$0xff]   ;;  %v17086_v23 = vld [vmem:[#allocation5 + $0x3f4] ss:$28 sps:$4 sm:$0xff]  }
  0x99   :  { %8794 = vmatprep.mubr.bf16.mxu0 %v19851_v60  ;;  %9286 = vmatprep.mubr.bf16.mxu1 %v19851_v60  ;;  %v17083_v19 = vld [vmem:[#allocation5 + $0x3c4] ss:$28 sps:$4 sm:$0xff]   ;;  %v19862_v20 = vpack.c.bf16 %v143_v14, %v143_v14  ;;  %v17089_v24 = vld [vmem:[#allocation5 + $0x3fc] ss:$28 sps:$4 sm:$0xff]   ;;  %v17084_v25 = vld [vmem:[#allocation5 + $0x3f0] ss:$28 sps:$4 sm:$0xff]  }
  0x9a   :  { %8775 = vmatpush1.bf16.msra.mxu0 %v17016_v26  ;;  %9267 = vmatpush1.bf16.msra.mxu1 %v17017_v27  ;;  %v17081_v22 = vld [vmem:[#allocation5 + $0x3c0] ss:$28 sps:$4 sm:$0xff]   ;;  %v17087_v26 = vld [vmem:[#allocation5 + $0x3f8] ss:$28 sps:$4 sm:$0xff]   ;;  %v17092_v27 = vld [vmem:[#allocation5 + $0x42c] ss:$28 sps:$4 sm:$0xff]  }
  0x9b   :  { %8776 = vmatprep.subr.bf16.mxu0 %v17018_v28  ;;  %9268 = vmatprep.subr.bf16.mxu1 %v17020_v29  ;;  %v17095_v28 = vld [vmem:[#allocation5 + $0x434] ss:$28 sps:$4 sm:$0xff]   ;;  %v17090_v29 = vld [vmem:[#allocation5 + $0x428] ss:$28 sps:$4 sm:$0xff]   ;;  %v17105_v38 = vld [vmem:[#allocation5 + $0x4a0] ss:$28 sps:$4 sm:$0xff]  }
  0x9c   :  { %v17107_v36 = vld [vmem:[#allocation5 + $0x4a4] ss:$28 sps:$4 sm:$0xff]   ;;  %v17102_v37 = vld [vmem:[#allocation5 + $0x498] ss:$28 sps:$4 sm:$0xff]   ;;  %s14521_s3 = sshll.u32 %s19720_s6, 4  ;;  %s14522_s3 = int_to_ptr.vmem [resolvable:$true] %s14521_s3 }
  0x9d   :  { %v17111_v42 = vld [vmem:[#allocation5 + $0x4d8] ss:$28 sps:$4 sm:$0xff]   ;;  %v17123_v52 = vld [vmem:[#allocation5 + $0x548] ss:$28 sps:$4 sm:$0xff]   ;;  %v17144_v4 = vld [vmem:[#allocation5 + $0x620] ss:$28 sps:$4 sm:$0xff]   ;;  %p19678_p1 = scmp.lt.s32.totalorder %s14522_s3, %s14522_s3 }
  0x9e   :  { %8777 = vmatpush1.bf16.msra.mxu0 %v17022_v30  ;;  %9269 = vmatpush1.bf16.msra.mxu1 %v17023_v31  ;;  %v17093_v30 = vld [vmem:[#allocation5 + $0x430] ss:$28 sps:$4 sm:$0xff]   ;;  %v17098_v31 = vld [vmem:[#allocation5 + $0x464] ss:$28 sps:$4 sm:$0xff]   ;;  %v17137_v58 = vld [vmem:[#allocation5 + $0x5bc] ss:$28 sps:$4 sm:$0xff]  }
  0x9f   :  { %8778 = vmatprep.subr.bf16.mxu0 %v17024_v32  ;;  %9270 = vmatprep.subr.bf16.mxu1 %v17026_v33  ;;  %v17101_v32 = vld [vmem:[#allocation5 + $0x46c] ss:$28 sps:$4 sm:$0xff]   ;;  %v17096_v33 = vld [vmem:[#allocation5 + $0x460] ss:$28 sps:$4 sm:$0xff]   ;;  %v17159_v14 = vld [vmem:[#allocation5 + $0x698] ss:$28 sps:$4 sm:$0xff]  }
  0xa0   :  { %v17131_v54 = vld [vmem:[#allocation5 + $0x584] ss:$28 sps:$4 sm:$0xff]   ;;  %s19673_s0 = scalar_lea.vmem %s14522_s3, 32 }
  0xa1   :  { %p19674_p0 = scmp.ne.s32.totalorder %s14522_s3, %s19673_s0  ;;  %p19679_p2 = scmp.lt.s32.totalorder %s19673_s0, %s19673_s0 }
  0xa2   :  { %8779 = vmatpush1.bf16.msra.mxu0 %v17028_v34  ;;  %9271 = vmatpush1.bf16.msra.mxu1 %v17029_v35  ;;  %v17099_v34 = vld [vmem:[#allocation5 + $0x468] ss:$28 sps:$4 sm:$0xff]   ;;  %v17104_v35 = vld [vmem:[#allocation5 + $0x49c] ss:$28 sps:$4 sm:$0xff]  }
  0xa3   :  { %8780 = vmatprep.subr.bf16.mxu0 %v17030_v39  ;;  %9272 = vmatprep.subr.bf16.mxu1 %v17032_v40  ;;  %v17110_v39 = vld [vmem:[#allocation5 + $0x4d4] ss:$28 sps:$4 sm:$0xff]   ;;  %v17113_v40 = vld [vmem:[#allocation5 + $0x4dc] ss:$28 sps:$4 sm:$0xff]   ;;  %p19680_p3 = por %p19679_p2, %p19678_p1 }
  0xa5   :  { %p19681_p4 = pnand %p19680_p3, %p19674_p0 }
  0xa6   :  { %8781 = vmatpush1.bf16.msra.mxu0 %v17034_v41  ;;  %9273 = vmatpush1.bf16.msra.mxu1 %v17035_v44  ;;  %v17108_v41 = vld [vmem:[#allocation5 + $0x4d0] ss:$28 sps:$4 sm:$0xff]  }
  0xa7   :  { %8782 = vmatprep.subr.bf16.mxu0 %v17036_v45  ;;  %9274 = vmatprep.subr.bf16.mxu1 %v17038_v46  ;;  %v17116_v44 = vld [vmem:[#allocation5 + $0x50c] ss:$28 sps:$4 sm:$0xff]   ;;  %v17119_v45 = vld [vmem:[#allocation5 + $0x514] ss:$28 sps:$4 sm:$0xff]  }
  0xa8   :  { %v17114_v46 = vld [vmem:[#allocation5 + $0x508] ss:$28 sps:$4 sm:$0xff]  }
  0xaa   :  { %8783 = vmatpush1.bf16.msra.mxu0 %v17040_v47  ;;  %9275 = vmatpush1.bf16.msra.mxu1 %v17041_v48  ;;  %v17117_v47 = vld [vmem:[#allocation5 + $0x510] ss:$28 sps:$4 sm:$0xff]   ;;  %v17122_v48 = vld [vmem:[#allocation5 + $0x544] ss:$28 sps:$4 sm:$0xff]  }
  0xab   :  { %8784 = vmatprep.subr.bf16.mxu0 %v17042_v50  ;;  %9276 = vmatprep.subr.bf16.mxu1 %v17044_v51  ;;  %v17125_v50 = vld [vmem:[#allocation5 + $0x54c] ss:$28 sps:$4 sm:$0xff]   ;;  %v17120_v51 = vld [vmem:[#allocation5 + $0x540] ss:$28 sps:$4 sm:$0xff]  }
  0xae   :  { %8785 = vmatpush1.bf16.msra.mxu0 %v17046_v53  ;;  %9277 = vmatpush1.bf16.msra.mxu1 %v17047_v55  ;;  %v17128_v53 = vld [vmem:[#allocation5 + $0x57c] ss:$28 sps:$4 sm:$0xff]  }
  0xaf   :  { %8786 = vmatprep.subr.bf16.mxu0 %v17048_v56  ;;  %9278 = vmatprep.subr.bf16.mxu1 %v17050_v57  ;;  %v17126_v55 = vld [vmem:[#allocation5 + $0x578] ss:$28 sps:$4 sm:$0xff]   ;;  %v17129_v56 = vld [vmem:[#allocation5 + $0x580] ss:$28 sps:$4 sm:$0xff]  }
  0xb0   :  { %v17134_v57 = vld [vmem:[#allocation5 + $0x5b4] ss:$28 sps:$4 sm:$0xff]  }
  0xb2   :  { %8787 = vmatpush1.bf16.msra.mxu0 %v17052_v59  ;;  %9279 = vmatpush1.bf16.msra.mxu1 %v17053_v61  ;;  %v17132_v59 = vld [vmem:[#allocation5 + $0x5b0] ss:$28 sps:$4 sm:$0xff]   ;;  %v17135_v61 = vld [vmem:[#allocation5 + $0x5b8] ss:$28 sps:$4 sm:$0xff]  }
  0xb3   :  { %8788 = vmatprep.subr.bf16.mxu0 %v17054_v62  ;;  %9280 = vmatprep.subr.bf16.mxu1 %v17056_v63  ;;  %v17140_v62 = vld [vmem:[#allocation5 + $0x5ec] ss:$28 sps:$4 sm:$0xff]   ;;  %v17143_v63 = vld [vmem:[#allocation5 + $0x5f4] ss:$28 sps:$4 sm:$0xff]  }
  0xb6   :  { %8789 = vmatpush1.bf16.msra.mxu0 %v17058_v0  ;;  %9281 = vmatpush1.bf16.msra.mxu1 %v17059_v1  ;;  %v17138_v0 = vld [vmem:[#allocation5 + $0x5e8] ss:$28 sps:$4 sm:$0xff]   ;;  %v17141_v1 = vld [vmem:[#allocation5 + $0x5f0] ss:$28 sps:$4 sm:$0xff]  }
  0xb7   :  { %8790 = vmatprep.subr.bf16.mxu0 %v17060_v2  ;;  %9282 = vmatprep.subr.bf16.mxu1 %v17062_v3  ;;  %v17146_v2 = vld [vmem:[#allocation5 + $0x624] ss:$28 sps:$4 sm:$0xff]   ;;  %v17149_v3 = vld [vmem:[#allocation5 + $0x62c] ss:$28 sps:$4 sm:$0xff]  }
  0xba   :  { %8791 = vmatpush1.bf16.msra.mxu0 %v17064_v5  ;;  %9283 = vmatpush1.bf16.msra.mxu1 %v17065_v6  ;;  %v17147_v5 = vld [vmem:[#allocation5 + $0x628] ss:$28 sps:$4 sm:$0xff]   ;;  %v17152_v6 = vld [vmem:[#allocation5 + $0x65c] ss:$28 sps:$4 sm:$0xff]  }
  0xbb   :  { %8792 = vmatprep.subr.bf16.mxu0 %v17066_v7  ;;  %9284 = vmatprep.subr.bf16.mxu1 %v17068_v8  ;;  %v17155_v7 = vld [vmem:[#allocation5 + $0x664] ss:$28 sps:$4 sm:$0xff]   ;;  %v17150_v8 = vld [vmem:[#allocation5 + $0x658] ss:$28 sps:$4 sm:$0xff]  }
  0xbe   :  { %8793 = vmatpush1.bf16.msra.mxu0 %v17070_v10  ;;  %9285 = vmatpush1.bf16.msra.mxu1 %v17071_v11  ;;  %v17153_v10 = vld [vmem:[#allocation5 + $0x660] ss:$28 sps:$4 sm:$0xff]   ;;  %v17158_v11 = vld [vmem:[#allocation5 + $0x694] ss:$28 sps:$4 sm:$0xff]  }
  0xbf   :  { %8803 = vmatprep.subr.bf16.mxu0 %v17074_v12  ;;  %9295 = vmatprep.subr.bf16.mxu1 %v17077_v13  ;;  %v17161_v12 = vld [vmem:[#allocation5 + $0x69c] ss:$28 sps:$4 sm:$0xff]   ;;  %v17156_v13 = vld [vmem:[#allocation5 + $0x690] ss:$28 sps:$4 sm:$0xff]  }
  0xc1   :  { %8795 = vmatmul.mubr.bf16.vlgmr.msra.gmra.mrb[0].mxu0 %v19860_v16  ;;  %9287 = vmatmul.mubr.bf16.vlgmr.msra.gmra.mrb[0].mxu1 %v19860_v16 }
  0xc2   :  { %8804 = vmatpush1.bf16.msra.mxu0 %v17072_v15  ;;  %9296 = vmatpush1.bf16.msra.mxu1 %v17075_v17  ;;  %v17164_v15 = vld [vmem:[#allocation5 + $0x6cc] ss:$28 sps:$4 sm:$0xff]   ;;  %v17167_v17 = vld [vmem:[#allocation5 + $0x6d4] ss:$28 sps:$4 sm:$0xff]  }
  0xc3   :  { %8805 = vmatprep.subr.bf16.mxu0 %v17080_v18  ;;  %9297 = vmatprep.subr.bf16.mxu1 %v17083_v19  ;;  %v17162_v18 = vld [vmem:[#allocation5 + $0x6c8] ss:$28 sps:$4 sm:$0xff]   ;;  %v17165_v19 = vld [vmem:[#allocation5 + $0x6d0] ss:$28 sps:$4 sm:$0xff]  }
  0xc4   :  { %8835 = vmatprep.mubr.bf16.mxu0 %v19862_v20  ;;  %9327 = vmatprep.mubr.bf16.mxu1 %v19862_v20 }
  0xc6   :  { %8806 = vmatpush1.bf16.msra.mxu0 %v17078_v21  ;;  %9298 = vmatpush1.bf16.msra.mxu1 %v17081_v22  ;;  %v17171_v21 = vld [vmem:[#allocation5 + $0x704] ss:$28 sps:$4 sm:$0xff]   ;;  %v17174_v22 = vld [vmem:[#allocation5 + $0x70c] ss:$28 sps:$4 sm:$0xff]  }
  0xc7   :  { %8807 = vmatprep.subr.bf16.mxu0 %v17086_v23  ;;  %9299 = vmatprep.subr.bf16.mxu1 %v17089_v24  ;;  %v17169_v23 = vld [vmem:[#allocation5 + $0x700] ss:$28 sps:$4 sm:$0xff]   ;;  %v19870_v24 = vpack.c.bf16 %v19856_v9, %v19856_v9 }
  0xca   :  { %8808 = vmatpush1.bf16.msra.mxu0 %v17084_v25  ;;  %9300 = vmatpush1.bf16.msra.mxu1 %v17087_v26  ;;  %v17172_v25 = vld [vmem:[#allocation5 + $0x708] ss:$28 sps:$4 sm:$0xff]   ;;  %v19872_v26 = vld [vmem:[#allocation2 + $0x8] sm:$0xff] }
  0xcb   :  { %8809 = vmatprep.subr.bf16.mxu0 %v17092_v27  ;;  %9301 = vmatprep.subr.bf16.mxu1 %v17095_v28  ;;  %v17177_v27 = vld [vmem:[#allocation5 + $0x73c] ss:$28 sps:$4 sm:$0xff]   ;;  %v17180_v28 = vld [vmem:[#allocation5 + $0x744] ss:$28 sps:$4 sm:$0xff]  }
  0xce   :  { %8810 = vmatpush1.bf16.msra.mxu0 %v17090_v29  ;;  %9302 = vmatpush1.bf16.msra.mxu1 %v17093_v30  ;;  %v19876_v29 = vrot.slane %v19872_v26, %v19848_v49  ;;  %v17175_v30 = vld [vmem:[#allocation5 + $0x738] ss:$28 sps:$4 sm:$0xff]  }
  0xcf   :  { %8811 = vmatprep.subr.bf16.mxu0 %v17098_v31  ;;  %9303 = vmatprep.subr.bf16.mxu1 %v17101_v32  ;;  %v17178_v31 = vld [vmem:[#allocation5 + $0x740] ss:$28 sps:$4 sm:$0xff]   ;;  %v17183_v32 = vld [vmem:[#allocation5 + $0x774] ss:$28 sps:$4 sm:$0xff]  }
  0xd0   :  { %v159_v9 = vcombine.high %v19876_v29, %v19876_v29 }
  0xd2   :  { %8812 = vmatpush1.bf16.msra.mxu0 %v17096_v33  ;;  %9304 = vmatpush1.bf16.msra.mxu1 %v17099_v34  ;;  %v17186_v33 = vld [vmem:[#allocation5 + $0x77c] ss:$28 sps:$4 sm:$0xff]   ;;  %v19882_v34 = vpack.c.bf16 %v159_v9, %v159_v9 }
  0xd3   :  { %8813 = vmatprep.subr.bf16.mxu0 %v17104_v35  ;;  %9305 = vmatprep.subr.bf16.mxu1 %v17107_v36  ;;  %v17181_v35 = vld [vmem:[#allocation5 + $0x770] ss:$28 sps:$4 sm:$0xff]   ;;  %v17184_v36 = vld [vmem:[#allocation5 + $0x778] ss:$28 sps:$4 sm:$0xff]  }
  0xd4   :  { %v17256_v9 = vld [vmem:[#allocation5 + $0xa18] ss:$28 sps:$4 sm:$0xff]  }
  0xd6   :  { %8814 = vmatpush1.bf16.msra.mxu0 %v17102_v37  ;;  %9306 = vmatpush1.bf16.msra.mxu1 %v17105_v38  ;;  %v17189_v37 = vld [vmem:[#allocation5 + $0x7ac] ss:$28 sps:$4 sm:$0xff]   ;;  %v17192_v38 = vld [vmem:[#allocation5 + $0x7b4] ss:$28 sps:$4 sm:$0xff]  }
  0xd7   :  { %8815 = vmatprep.subr.bf16.mxu0 %v17110_v39  ;;  %9307 = vmatprep.subr.bf16.mxu1 %v17113_v40  ;;  %v17187_v39 = vld [vmem:[#allocation5 + $0x7a8] ss:$28 sps:$4 sm:$0xff]   ;;  %v17190_v40 = vld [vmem:[#allocation5 + $0x7b0] ss:$28 sps:$4 sm:$0xff]  }
  0xda   :  { %8816 = vmatpush1.bf16.msra.mxu0 %v17108_v41  ;;  %9308 = vmatpush1.bf16.msra.mxu1 %v17111_v42  ;;  %v17195_v41 = vld [vmem:[#allocation5 + $0x7e4] ss:$28 sps:$4 sm:$0xff]   ;;  %v17198_v42 = vld [vmem:[#allocation5 + $0x7ec] ss:$28 sps:$4 sm:$0xff]  }
  0xdb   :  { %8817 = vmatprep.subr.bf16.mxu0 %v17116_v44  ;;  %9309 = vmatprep.subr.bf16.mxu1 %v17119_v45  ;;  %v17193_v44 = vld [vmem:[#allocation5 + $0x7e0] ss:$28 sps:$4 sm:$0xff]   ;;  %v17196_v45 = vld [vmem:[#allocation5 + $0x7e8] ss:$28 sps:$4 sm:$0xff]  }
  0xde   :  { %8818 = vmatpush1.bf16.msra.mxu0 %v17114_v46  ;;  %9310 = vmatpush1.bf16.msra.mxu1 %v17117_v47  ;;  %v17201_v46 = vld [vmem:[#allocation5 + $0x81c] ss:$28 sps:$4 sm:$0xff]   ;;  %v17204_v47 = vld [vmem:[#allocation5 + $0x824] ss:$28 sps:$4 sm:$0xff]  }
  0xdf   :  { %8819 = vmatprep.subr.bf16.mxu0 %v17122_v48  ;;  %9311 = vmatprep.subr.bf16.mxu1 %v17125_v50  ;;  %v17199_v48 = vld [vmem:[#allocation5 + $0x818] ss:$28 sps:$4 sm:$0xff]   ;;  %v17202_v50 = vld [vmem:[#allocation5 + $0x820] ss:$28 sps:$4 sm:$0xff]  }
  0xe2   :  { %8820 = vmatpush1.bf16.msra.mxu0 %v17120_v51  ;;  %9312 = vmatpush1.bf16.msra.mxu1 %v17123_v52  ;;  %v17207_v51 = vld [vmem:[#allocation5 + $0x854] ss:$28 sps:$4 sm:$0xff]   ;;  %v17210_v52 = vld [vmem:[#allocation5 + $0x85c] ss:$28 sps:$4 sm:$0xff]  }
  0xe3   :  { %8821 = vmatprep.subr.bf16.mxu0 %v17128_v53  ;;  %9313 = vmatprep.subr.bf16.mxu1 %v17131_v54  ;;  %v17205_v53 = vld [vmem:[#allocation5 + $0x850] ss:$28 sps:$4 sm:$0xff]   ;;  %v17208_v54 = vld [vmem:[#allocation5 + $0x858] ss:$28 sps:$4 sm:$0xff]  }
  0xe6   :  { %8822 = vmatpush1.bf16.msra.mxu0 %v17126_v55  ;;  %9314 = vmatpush1.bf16.msra.mxu1 %v17129_v56  ;;  %v17213_v55 = vld [vmem:[#allocation5 + $0x88c] ss:$28 sps:$4 sm:$0xff]   ;;  %v17216_v56 = vld [vmem:[#allocation5 + $0x894] ss:$28 sps:$4 sm:$0xff]  }
  0xe7   :  { %8823 = vmatprep.subr.bf16.mxu0 %v17134_v57  ;;  %9315 = vmatprep.subr.bf16.mxu1 %v17137_v58  ;;  %v17211_v57 = vld [vmem:[#allocation5 + $0x888] ss:$28 sps:$4 sm:$0xff]   ;;  %v17214_v58 = vld [vmem:[#allocation5 + $0x890] ss:$28 sps:$4 sm:$0xff]  }
  0xea   :  { %8824 = vmatpush1.bf16.msra.mxu0 %v17132_v59  ;;  %9316 = vmatpush1.bf16.msra.mxu1 %v17135_v61  ;;  %v17219_v59 = vld [vmem:[#allocation5 + $0x8c4] ss:$28 sps:$4 sm:$0xff]   ;;  %v17222_v61 = vld [vmem:[#allocation5 + $0x8cc] ss:$28 sps:$4 sm:$0xff]  }
  0xeb   :  { %8825 = vmatprep.subr.bf16.mxu0 %v17140_v62  ;;  %9317 = vmatprep.subr.bf16.mxu1 %v17143_v63  ;;  %v17217_v62 = vld [vmem:[#allocation5 + $0x8c0] ss:$28 sps:$4 sm:$0xff]   ;;  %v17220_v63 = vld [vmem:[#allocation5 + $0x8c8] ss:$28 sps:$4 sm:$0xff]  }
  0xee   :  { %8826 = vmatpush1.bf16.msra.mxu0 %v17138_v0  ;;  %9318 = vmatpush1.bf16.msra.mxu1 %v17141_v1  ;;  %v17225_v0 = vld [vmem:[#allocation5 + $0x8fc] ss:$28 sps:$4 sm:$0xff]   ;;  %v17228_v1 = vld [vmem:[#allocation5 + $0x904] ss:$28 sps:$4 sm:$0xff]  }
  0xef   :  { %8827 = vmatprep.subr.bf16.mxu0 %v17146_v2  ;;  %9319 = vmatprep.subr.bf16.mxu1 %v17149_v3  ;;  %v17223_v2 = vld [vmem:[#allocation5 + $0x8f8] ss:$28 sps:$4 sm:$0xff]   ;;  %v17226_v3 = vld [vmem:[#allocation5 + $0x900] ss:$28 sps:$4 sm:$0xff]  }
  0xf2   :  { %8828 = vmatpush1.bf16.msra.mxu0 %v17144_v4  ;;  %9320 = vmatpush1.bf16.msra.mxu1 %v17147_v5  ;;  %v17231_v4 = vld [vmem:[#allocation5 + $0x934] ss:$28 sps:$4 sm:$0xff]   ;;  %v17234_v5 = vld [vmem:[#allocation5 + $0x93c] ss:$28 sps:$4 sm:$0xff]  }
  0xf3   :  { %8829 = vmatprep.subr.bf16.mxu0 %v17152_v6  ;;  %9321 = vmatprep.subr.bf16.mxu1 %v17155_v7  ;;  %v17229_v6 = vld [vmem:[#allocation5 + $0x930] ss:$28 sps:$4 sm:$0xff]   ;;  %v17232_v7 = vld [vmem:[#allocation5 + $0x938] ss:$28 sps:$4 sm:$0xff]  }
  0xf6   :  { %8830 = vmatpush1.bf16.msra.mxu0 %v17150_v8  ;;  %9322 = vmatpush1.bf16.msra.mxu1 %v17153_v10  ;;  %v17237_v8 = vld [vmem:[#allocation5 + $0x96c] ss:$28 sps:$4 sm:$0xff]   ;;  %v17240_v10 = vld [vmem:[#allocation5 + $0x974] ss:$28 sps:$4 sm:$0xff]  }
  0xf7   :  { %8831 = vmatprep.subr.bf16.mxu0 %v17158_v11  ;;  %9323 = vmatprep.subr.bf16.mxu1 %v17161_v12  ;;  %v17235_v11 = vld [vmem:[#allocation5 + $0x968] ss:$28 sps:$4 sm:$0xff]   ;;  %v17238_v12 = vld [vmem:[#allocation5 + $0x970] ss:$28 sps:$4 sm:$0xff]  }
  0xfa   :  { %8832 = vmatpush1.bf16.msra.mxu0 %v17156_v13  ;;  %9324 = vmatpush1.bf16.msra.mxu1 %v17159_v14  ;;  %v17243_v13 = vld [vmem:[#allocation5 + $0x9a4] ss:$28 sps:$4 sm:$0xff]   ;;  %v17246_v14 = vld [vmem:[#allocation5 + $0x9ac] ss:$28 sps:$4 sm:$0xff]  }
  0xfb   :  { %8833 = vmatprep.subr.bf16.mxu0 %v17164_v15  ;;  %9325 = vmatprep.subr.bf16.mxu1 %v17167_v17  ;;  %v17241_v15 = vld [vmem:[#allocation5 + $0x9a0] ss:$28 sps:$4 sm:$0xff]   ;;  %v17244_v17 = vld [vmem:[#allocation5 + $0x9a8] ss:$28 sps:$4 sm:$0xff]  }
  0xfe   :  { %8834 = vmatpush1.bf16.msra.mxu0 %v17162_v18  ;;  %9326 = vmatpush1.bf16.msra.mxu1 %v17165_v19  ;;  %v17249_v18 = vld [vmem:[#allocation5 + $0x9dc] ss:$28 sps:$4 sm:$0xff]   ;;  %v17252_v19 = vld [vmem:[#allocation5 + $0x9e4] ss:$28 sps:$4 sm:$0xff]  }
  0xff   :  { %8844 = vmatprep.subr.bf16.mxu0 %v17171_v21  ;;  %9336 = vmatprep.subr.bf16.mxu1 %v17174_v22  ;;  %v17247_v21 = vld [vmem:[#allocation5 + $0x9d8] ss:$28 sps:$4 sm:$0xff]   ;;  %v17250_v22 = vld [vmem:[#allocation5 + $0x9e0] ss:$28 sps:$4 sm:$0xff]  }
 0x101   :  { %8836 = vmatmul.mubr.bf16.vlgmr.msra.gmra.mrb[0].mxu0 %v19870_v24  ;;  %9328 = vmatmul.mubr.bf16.vlgmr.msra.gmra.mrb[0].mxu1 %v19870_v24 }
 0x102   :  { %8845 = vmatpush1.bf16.msra.mxu0 %v17169_v23  ;;  %9337 = vmatpush1.bf16.msra.mxu1 %v17172_v25  ;;  %v17255_v23 = vld [vmem:[#allocation5 + $0xa14] ss:$28 sps:$4 sm:$0xff]   ;;  %v17258_v25 = vld [vmem:[#allocation5 + $0xa1c] ss:$28 sps:$4 sm:$0xff]  }
 0x103   :  { %8846 = vmatprep.subr.bf16.mxu0 %v17177_v27  ;;  %9338 = vmatprep.subr.bf16.mxu1 %v17180_v28  ;;  %v144_v27 = vcombine.high %v19872_v26, %v19872_v26  ;;  %v17253_v28 = vld [vmem:[#allocation5 + $0xa10] ss:$28 sps:$4 sm:$0xff]  }
 0x104   :  { %8876 = vmatprep.mubr.bf16.mxu0 %v19882_v34  ;;  %9368 = vmatprep.mubr.bf16.mxu1 %v19882_v34 }
 0x106   :  { %8847 = vmatpush1.bf16.msra.mxu0 %v17175_v30  ;;  %9339 = vmatpush1.bf16.msra.mxu1 %v17178_v31  ;;  %v17261_v30 = vld [vmem:[#allocation5 + $0xa4c] ss:$28 sps:$4 sm:$0xff]   ;;  %v17264_v31 = vld [vmem:[#allocation5 + $0xa54] ss:$28 sps:$4 sm:$0xff]  }
 0x107   :  { %8848 = vmatprep.subr.bf16.mxu0 %v17183_v32  ;;  %9340 = vmatprep.subr.bf16.mxu1 %v17186_v33  ;;  %v19889_v32 = vrot.slane %v144_v27, %v19848_v49  ;;  %v17259_v33 = vld [vmem:[#allocation5 + $0xa48] ss:$28 sps:$4 sm:$0xff]  }
 0x108   :  { %v17331_v27 = vld [vmem:[#allocation5 + $0xce8] ss:$28 sps:$4 sm:$0xff]  }
 0x109   :  { %v160_v26 = vcombine.high %v19889_v32, %v19889_v32 }
 0x10a   :  { %8849 = vmatpush1.bf16.msra.mxu0 %v17181_v35  ;;  %9341 = vmatpush1.bf16.msra.mxu1 %v17184_v36  ;;  %v17262_v35 = vld [vmem:[#allocation5 + $0xa50] ss:$28 sps:$4 sm:$0xff]   ;;  %v17267_v36 = vld [vmem:[#allocation5 + $0xa84] ss:$28 sps:$4 sm:$0xff]  }
 0x10b   :  { %8850 = vmatprep.subr.bf16.mxu0 %v17189_v37  ;;  %9342 = vmatprep.subr.bf16.mxu1 %v17192_v38  ;;  %v17270_v37 = vld [vmem:[#allocation5 + $0xa8c] ss:$28 sps:$4 sm:$0xff]   ;;  %v19895_v38 = vpack.c.bf16 %v19876_v29, %v19876_v29  ;;  %v17279_v29 = vld [vmem:[#allocation5 + $0xaf4] ss:$28 sps:$4 sm:$0xff]  }
 0x10e   :  { %8851 = vmatpush1.bf16.msra.mxu0 %v17187_v39  ;;  %9343 = vmatpush1.bf16.msra.mxu1 %v17190_v40  ;;  %v17265_v39 = vld [vmem:[#allocation5 + $0xa80] ss:$28 sps:$4 sm:$0xff]   ;;  %v17268_v40 = vld [vmem:[#allocation5 + $0xa88] ss:$28 sps:$4 sm:$0xff]  }
 0x10f   :  { %8852 = vmatprep.subr.bf16.mxu0 %v17195_v41  ;;  %9344 = vmatprep.subr.bf16.mxu1 %v17198_v42  ;;  %v17273_v41 = vld [vmem:[#allocation5 + $0xabc] ss:$28 sps:$4 sm:$0xff]   ;;  %v17276_v42 = vld [vmem:[#allocation5 + $0xac4] ss:$28 sps:$4 sm:$0xff]  }
 0x112   :  { %8853 = vmatpush1.bf16.msra.mxu0 %v17193_v44  ;;  %9345 = vmatpush1.bf16.msra.mxu1 %v17196_v45  ;;  %v19897_v44 = vpack.c.bf16 %v160_v26, %v160_v26  ;;  %v17271_v45 = vld [vmem:[#allocation5 + $0xab8] ss:$28 sps:$4 sm:$0xff]   ;;  %v17346_v26 = vld [vmem:[#allocation5 + $0xd60] ss:$28 sps:$4 sm:$0xff]  }
 0x113   :  { %8854 = vmatprep.subr.bf16.mxu0 %v17201_v46  ;;  %9346 = vmatprep.subr.bf16.mxu1 %v17204_v47  ;;  %v17274_v46 = vld [vmem:[#allocation5 + $0xac0] ss:$28 sps:$4 sm:$0xff]  }
 0x114   :  { %v17282_v47 = vld [vmem:[#allocation5 + $0xafc] ss:$28 sps:$4 sm:$0xff]  }
 0x116   :  { %8855 = vmatpush1.bf16.msra.mxu0 %v17199_v48  ;;  %9347 = vmatpush1.bf16.msra.mxu1 %v17202_v50  ;;  %v17277_v48 = vld [vmem:[#allocation5 + $0xaf0] ss:$28 sps:$4 sm:$0xff]   ;;  %v17280_v50 = vld [vmem:[#allocation5 + $0xaf8] ss:$28 sps:$4 sm:$0xff]  }
 0x117   :  { %8856 = vmatprep.subr.bf16.mxu0 %v17207_v51  ;;  %9348 = vmatprep.subr.bf16.mxu1 %v17210_v52  ;;  %v17285_v51 = vld [vmem:[#allocation5 + $0xb2c] ss:$28 sps:$4 sm:$0xff]   ;;  %v17288_v52 = vld [vmem:[#allocation5 + $0xb34] ss:$28 sps:$4 sm:$0xff]  }
 0x11a   :  { %8857 = vmatpush1.bf16.msra.mxu0 %v17205_v53  ;;  %9349 = vmatpush1.bf16.msra.mxu1 %v17208_v54  ;;  %v17283_v53 = vld [vmem:[#allocation5 + $0xb28] ss:$28 sps:$4 sm:$0xff]   ;;  %v17286_v54 = vld [vmem:[#allocation5 + $0xb30] ss:$28 sps:$4 sm:$0xff]  }
 0x11b   :  { %8858 = vmatprep.subr.bf16.mxu0 %v17213_v55  ;;  %9350 = vmatprep.subr.bf16.mxu1 %v17216_v56  ;;  %v17291_v55 = vld [vmem:[#allocation5 + $0xb64] ss:$28 sps:$4 sm:$0xff]   ;;  %v17294_v56 = vld [vmem:[#allocation5 + $0xb6c] ss:$28 sps:$4 sm:$0xff]  }
 0x11e   :  { %8859 = vmatpush1.bf16.msra.mxu0 %v17211_v57  ;;  %9351 = vmatpush1.bf16.msra.mxu1 %v17214_v58  ;;  %v17289_v57 = vld [vmem:[#allocation5 + $0xb60] ss:$28 sps:$4 sm:$0xff]   ;;  %v17292_v58 = vld [vmem:[#allocation5 + $0xb68] ss:$28 sps:$4 sm:$0xff]  }
 0x11f   :  { %8860 = vmatprep.subr.bf16.mxu0 %v17219_v59  ;;  %9352 = vmatprep.subr.bf16.mxu1 %v17222_v61  ;;  %v17297_v59 = vld [vmem:[#allocation5 + $0xb9c] ss:$28 sps:$4 sm:$0xff]   ;;  %v17300_v61 = vld [vmem:[#allocation5 + $0xba4] ss:$28 sps:$4 sm:$0xff]  }
 0x122   :  { %8861 = vmatpush1.bf16.msra.mxu0 %v17217_v62  ;;  %9353 = vmatpush1.bf16.msra.mxu1 %v17220_v63  ;;  %v17295_v62 = vld [vmem:[#allocation5 + $0xb98] ss:$28 sps:$4 sm:$0xff]   ;;  %v17298_v63 = vld [vmem:[#allocation5 + $0xba0] ss:$28 sps:$4 sm:$0xff]  }
 0x123   :  { %8862 = vmatprep.subr.bf16.mxu0 %v17225_v0  ;;  %9354 = vmatprep.subr.bf16.mxu1 %v17228_v1  ;;  %v17303_v0 = vld [vmem:[#allocation5 + $0xbd4] ss:$28 sps:$4 sm:$0xff]   ;;  %v17306_v1 = vld [vmem:[#allocation5 + $0xbdc] ss:$28 sps:$4 sm:$0xff]  }
 0x126   :  { %8863 = vmatpush1.bf16.msra.mxu0 %v17223_v2  ;;  %9355 = vmatpush1.bf16.msra.mxu1 %v17226_v3  ;;  %v17301_v2 = vld [vmem:[#allocation5 + $0xbd0] ss:$28 sps:$4 sm:$0xff]   ;;  %v17304_v3 = vld [vmem:[#allocation5 + $0xbd8] ss:$28 sps:$4 sm:$0xff]  }
 0x127   :  { %8864 = vmatprep.subr.bf16.mxu0 %v17231_v4  ;;  %9356 = vmatprep.subr.bf16.mxu1 %v17234_v5  ;;  %v17309_v4 = vld [vmem:[#allocation5 + $0xc0c] ss:$28 sps:$4 sm:$0xff]   ;;  %v17312_v5 = vld [vmem:[#allocation5 + $0xc14] ss:$28 sps:$4 sm:$0xff]  }
 0x12a   :  { %8865 = vmatpush1.bf16.msra.mxu0 %v17229_v6  ;;  %9357 = vmatpush1.bf16.msra.mxu1 %v17232_v7  ;;  %v17307_v6 = vld [vmem:[#allocation5 + $0xc08] ss:$28 sps:$4 sm:$0xff]   ;;  %v17310_v7 = vld [vmem:[#allocation5 + $0xc10] ss:$28 sps:$4 sm:$0xff]  }
 0x12b   :  { %8866 = vmatprep.subr.bf16.mxu0 %v17237_v8  ;;  %9358 = vmatprep.subr.bf16.mxu1 %v17240_v10  ;;  %v17315_v8 = vld [vmem:[#allocation5 + $0xc44] ss:$28 sps:$4 sm:$0xff]   ;;  %v17318_v10 = vld [vmem:[#allocation5 + $0xc4c] ss:$28 sps:$4 sm:$0xff]  }
 0x12e   :  { %8867 = vmatpush1.bf16.msra.mxu0 %v17235_v11  ;;  %9359 = vmatpush1.bf16.msra.mxu1 %v17238_v12  ;;  %v17313_v11 = vld [vmem:[#allocation5 + $0xc40] ss:$28 sps:$4 sm:$0xff]   ;;  %v17316_v12 = vld [vmem:[#allocation5 + $0xc48] ss:$28 sps:$4 sm:$0xff]  }
 0x12f   :  { %8868 = vmatprep.subr.bf16.mxu0 %v17243_v13  ;;  %9360 = vmatprep.subr.bf16.mxu1 %v17246_v14  ;;  %v17321_v13 = vld [vmem:[#allocation5 + $0xc7c] ss:$28 sps:$4 sm:$0xff]   ;;  %v17324_v14 = vld [vmem:[#allocation5 + $0xc84] ss:$28 sps:$4 sm:$0xff]  }
 0x132   :  { %8869 = vmatpush1.bf16.msra.mxu0 %v17241_v15  ;;  %9361 = vmatpush1.bf16.msra.mxu1 %v17244_v17  ;;  %v17319_v15 = vld [vmem:[#allocation5 + $0xc78] ss:$28 sps:$4 sm:$0xff]   ;;  %v17322_v17 = vld [vmem:[#allocation5 + $0xc80] ss:$28 sps:$4 sm:$0xff]  }
 0x133   :  { %8870 = vmatprep.subr.bf16.mxu0 %v17249_v18  ;;  %9362 = vmatprep.subr.bf16.mxu1 %v17252_v19  ;;  %v17327_v18 = vld [vmem:[#allocation5 + $0xcb4] ss:$28 sps:$4 sm:$0xff]   ;;  %v17330_v19 = vld [vmem:[#allocation5 + $0xcbc] ss:$28 sps:$4 sm:$0xff]  }
 0x136   :  { %8871 = vmatpush1.bf16.msra.mxu0 %v17247_v21  ;;  %9363 = vmatpush1.bf16.msra.mxu1 %v17250_v22  ;;  %v17325_v21 = vld [vmem:[#allocation5 + $0xcb0] ss:$28 sps:$4 sm:$0xff]   ;;  %v17328_v22 = vld [vmem:[#allocation5 + $0xcb8] ss:$28 sps:$4 sm:$0xff]  }
 0x137   :  { %8872 = vmatprep.subr.bf16.mxu0 %v17255_v23  ;;  %9364 = vmatprep.subr.bf16.mxu1 %v17258_v25  ;;  %v17333_v23 = vld [vmem:[#allocation5 + $0xcec] ss:$28 sps:$4 sm:$0xff]   ;;  %v17336_v25 = vld [vmem:[#allocation5 + $0xcf4] ss:$28 sps:$4 sm:$0xff]  }
 0x13a   :  { %8873 = vmatpush1.bf16.msra.mxu0 %v17253_v28  ;;  %9365 = vmatpush1.bf16.msra.mxu1 %v17256_v9  ;;  %v17334_v28 = vld [vmem:[#allocation5 + $0xcf0] ss:$28 sps:$4 sm:$0xff]   ;;  %v17339_v9 = vld [vmem:[#allocation5 + $0xd24] ss:$28 sps:$4 sm:$0xff]  }
 0x13b   :  { %8874 = vmatprep.subr.bf16.mxu0 %v17261_v30  ;;  %9366 = vmatprep.subr.bf16.mxu1 %v17264_v31  ;;  %v17342_v30 = vld [vmem:[#allocation5 + $0xd2c] ss:$28 sps:$4 sm:$0xff]   ;;  %v17337_v31 = vld [vmem:[#allocation5 + $0xd20] ss:$28 sps:$4 sm:$0xff]  }
 0x13e   :  { %8875 = vmatpush1.bf16.msra.mxu0 %v17259_v33  ;;  %9367 = vmatpush1.bf16.msra.mxu1 %v17262_v35  ;;  %v17340_v33 = vld [vmem:[#allocation5 + $0xd28] ss:$28 sps:$4 sm:$0xff]   ;;  %v17345_v35 = vld [vmem:[#allocation5 + $0xd5c] ss:$28 sps:$4 sm:$0xff]  }
 0x13f   :  { %8885 = vmatprep.subr.bf16.mxu0 %v17267_v36  ;;  %9377 = vmatprep.subr.bf16.mxu1 %v17270_v37  ;;  %v17348_v36 = vld [vmem:[#allocation5 + $0xd64] ss:$28 sps:$4 sm:$0xff]   ;;  %v17343_v37 = vld [vmem:[#allocation5 + $0xd58] ss:$28 sps:$4 sm:$0xff]  }
 0x141   :  { %8877 = vmatmul.mubr.bf16.vlgmr.msra.gmra.mrb[0].mxu0 %v19895_v38  ;;  %9369 = vmatmul.mubr.bf16.vlgmr.msra.gmra.mrb[0].mxu1 %v19895_v38 }
 0x142   :  { %8886 = vmatpush1.bf16.msra.mxu0 %v17265_v39  ;;  %9378 = vmatpush1.bf16.msra.mxu1 %v17268_v40  ;;  %v17351_v39 = vld [vmem:[#allocation5 + $0xd94] ss:$28 sps:$4 sm:$0xff]   ;;  %v17354_v40 = vld [vmem:[#allocation5 + $0xd9c] ss:$28 sps:$4 sm:$0xff]  }
 0x143   :  { %8887 = vmatprep.subr.bf16.mxu0 %v17273_v41  ;;  %9379 = vmatprep.subr.bf16.mxu1 %v17276_v42  ;;  %v17349_v41 = vld [vmem:[#allocation5 + $0xd90] ss:$28 sps:$4 sm:$0xff]   ;;  %v19903_v42 = vld [vmem:[#allocation2 + $0x10] sm:$0xff] }
 0x144   :  { %8917 = vmatprep.mubr.bf16.mxu0 %v19897_v44  ;;  %9409 = vmatprep.mubr.bf16.mxu1 %v19897_v44 }
 0x146   :  { %8888 = vmatpush1.bf16.msra.mxu0 %v17271_v45  ;;  %9380 = vmatpush1.bf16.msra.mxu1 %v17274_v46  ;;  %v17352_v45 = vld [vmem:[#allocation5 + $0xd98] ss:$28 sps:$4 sm:$0xff]   ;;  %v17357_v46 = vld [vmem:[#allocation5 + $0xdcc] ss:$28 sps:$4 sm:$0xff]  }
 0x147   :  { %8889 = vmatprep.subr.bf16.mxu0 %v17279_v29  ;;  %9381 = vmatprep.subr.bf16.mxu1 %v17282_v47  ;;  %v17360_v29 = vld [vmem:[#allocation5 + $0xdd4] ss:$28 sps:$4 sm:$0xff]   ;;  %v19907_v47 = vrot.slane %v19903_v42, %v19848_v49 }
 0x14a   :  { %8890 = vmatpush1.bf16.msra.mxu0 %v17277_v48  ;;  %9382 = vmatpush1.bf16.msra.mxu1 %v17280_v50  ;;  %v17355_v48 = vld [vmem:[#allocation5 + $0xdc8] ss:$28 sps:$4 sm:$0xff]   ;;  %v17358_v50 = vld [vmem:[#allocation5 + $0xdd0] ss:$28 sps:$4 sm:$0xff]  }
 0x14b   :  { %8891 = vmatprep.subr.bf16.mxu0 %v17285_v51  ;;  %9383 = vmatprep.subr.bf16.mxu1 %v17288_v52  ;;  %v17364_v51 = vld [vmem:[#allocation5 + $0xe04] ss:$28 sps:$4 sm:$0xff]   ;;  %v17367_v52 = vld [vmem:[#allocation5 + $0xe0c] ss:$28 sps:$4 sm:$0xff]  }
 0x14e   :  { %8892 = vmatpush1.bf16.msra.mxu0 %v17283_v53  ;;  %9384 = vmatpush1.bf16.msra.mxu1 %v17286_v54  ;;  %v176_v53 = vcombine.high %v19907_v47, %v19907_v47  ;;  %v17362_v54 = vld [vmem:[#allocation5 + $0xe00] ss:$28 sps:$4 sm:$0xff]  }
 0x14f   :  { %8893 = vmatprep.subr.bf16.mxu0 %v17291_v55  ;;  %9385 = vmatprep.subr.bf16.mxu1 %v17294_v56  ;;  %v19913_v55 = vpack.c.bf16 %v19889_v32, %v19889_v32  ;;  %v17365_v56 = vld [vmem:[#allocation5 + $0xe08] ss:$28 sps:$4 sm:$0xff]   ;;  %v17379_v32 = vld [vmem:[#allocation5 + $0xe7c] ss:$28 sps:$4 sm:$0xff]  }
 0x152   :  { %8894 = vmatpush1.bf16.msra.mxu0 %v17289_v57  ;;  %9386 = vmatpush1.bf16.msra.mxu1 %v17292_v58  ;;  %v17370_v57 = vld [vmem:[#allocation5 + $0xe3c] ss:$28 sps:$4 sm:$0xff]   ;;  %v17373_v58 = vld [vmem:[#allocation5 + $0xe44] ss:$28 sps:$4 sm:$0xff]  }
 0x153   :  { %8895 = vmatprep.subr.bf16.mxu0 %v17297_v59  ;;  %9387 = vmatprep.subr.bf16.mxu1 %v17300_v61  ;;  %v19915_v59 = vpack.c.bf16 %v176_v53, %v176_v53  ;;  %v17368_v61 = vld [vmem:[#allocation5 + $0xe38] ss:$28 sps:$4 sm:$0xff]  }
 0x154   :  { %v17442_v53 = vld [vmem:[#allocation5 + $0x10dc] ss:$28 sps:$4 sm:$0xff]  }
 0x156   :  { %8896 = vmatpush1.bf16.msra.mxu0 %v17295_v62  ;;  %9388 = vmatpush1.bf16.msra.mxu1 %v17298_v63  ;;  %v17371_v62 = vld [vmem:[#allocation5 + $0xe40] ss:$28 sps:$4 sm:$0xff]   ;;  %v17376_v63 = vld [vmem:[#allocation5 + $0xe74] ss:$28 sps:$4 sm:$0xff]  }
 0x157   :  { %8897 = vmatprep.subr.bf16.mxu0 %v17303_v0  ;;  %9389 = vmatprep.subr.bf16.mxu1 %v17306_v1  ;;  %v17374_v0 = vld [vmem:[#allocation5 + $0xe70] ss:$28 sps:$4 sm:$0xff]   ;;  %v17377_v1 = vld [vmem:[#allocation5 + $0xe78] ss:$28 sps:$4 sm:$0xff]  }
 0x15a   :  { %8898 = vmatpush1.bf16.msra.mxu0 %v17301_v2  ;;  %9390 = vmatpush1.bf16.msra.mxu1 %v17304_v3  ;;  %v17382_v2 = vld [vmem:[#allocation5 + $0xeac] ss:$28 sps:$4 sm:$0xff]   ;;  %v17385_v3 = vld [vmem:[#allocation5 + $0xeb4] ss:$28 sps:$4 sm:$0xff]  }
 0x15b   :  { %8899 = vmatprep.subr.bf16.mxu0 %v17309_v4  ;;  %9391 = vmatprep.subr.bf16.mxu1 %v17312_v5  ;;  %v17380_v4 = vld [vmem:[#allocation5 + $0xea8] ss:$28 sps:$4 sm:$0xff]   ;;  %v17383_v5 = vld [vmem:[#allocation5 + $0xeb0] ss:$28 sps:$4 sm:$0xff]  }
 0x15e   :  { %8900 = vmatpush1.bf16.msra.mxu0 %v17307_v6  ;;  %9392 = vmatpush1.bf16.msra.mxu1 %v17310_v7  ;;  %v17388_v6 = vld [vmem:[#allocation5 + $0xee4] ss:$28 sps:$4 sm:$0xff]   ;;  %v17391_v7 = vld [vmem:[#allocation5 + $0xeec] ss:$28 sps:$4 sm:$0xff]  }
 0x15f   :  { %8901 = vmatprep.subr.bf16.mxu0 %v17315_v8  ;;  %9393 = vmatprep.subr.bf16.mxu1 %v17318_v10  ;;  %v17386_v8 = vld [vmem:[#allocation5 + $0xee0] ss:$28 sps:$4 sm:$0xff]   ;;  %v17389_v10 = vld [vmem:[#allocation5 + $0xee8] ss:$28 sps:$4 sm:$0xff]  }
 0x162   :  { %8902 = vmatpush1.bf16.msra.mxu0 %v17313_v11  ;;  %9394 = vmatpush1.bf16.msra.mxu1 %v17316_v12  ;;  %v17394_v11 = vld [vmem:[#allocation5 + $0xf1c] ss:$28 sps:$4 sm:$0xff]   ;;  %v17397_v12 = vld [vmem:[#allocation5 + $0xf24] ss:$28 sps:$4 sm:$0xff]  }
 0x163   :  { %8903 = vmatprep.subr.bf16.mxu0 %v17321_v13  ;;  %9395 = vmatprep.subr.bf16.mxu1 %v17324_v14  ;;  %v17392_v13 = vld [vmem:[#allocation5 + $0xf18] ss:$28 sps:$4 sm:$0xff]   ;;  %v17395_v14 = vld [vmem:[#allocation5 + $0xf20] ss:$28 sps:$4 sm:$0xff]  }
 0x166   :  { %8904 = vmatpush1.bf16.msra.mxu0 %v17319_v15  ;;  %9396 = vmatpush1.bf16.msra.mxu1 %v17322_v17  ;;  %v17400_v15 = vld [vmem:[#allocation5 + $0xf54] ss:$28 sps:$4 sm:$0xff]   ;;  %v17403_v17 = vld [vmem:[#allocation5 + $0xf5c] ss:$28 sps:$4 sm:$0xff]  }
 0x167   :  { %8905 = vmatprep.subr.bf16.mxu0 %v17327_v18  ;;  %9397 = vmatprep.subr.bf16.mxu1 %v17330_v19  ;;  %v17398_v18 = vld [vmem:[#allocation5 + $0xf50] ss:$28 sps:$4 sm:$0xff]   ;;  %v17401_v19 = vld [vmem:[#allocation5 + $0xf58] ss:$28 sps:$4 sm:$0xff]  }
 0x16a   :  { %8906 = vmatpush1.bf16.msra.mxu0 %v17325_v21  ;;  %9398 = vmatpush1.bf16.msra.mxu1 %v17328_v22  ;;  %v17406_v21 = vld [vmem:[#allocation5 + $0xf8c] ss:$28 sps:$4 sm:$0xff]   ;;  %v17409_v22 = vld [vmem:[#allocation5 + $0xf94] ss:$28 sps:$4 sm:$0xff]  }
 0x16b   :  { %8907 = vmatprep.subr.bf16.mxu0 %v17333_v23  ;;  %9399 = vmatprep.subr.bf16.mxu1 %v17336_v25  ;;  %v17404_v23 = vld [vmem:[#allocation5 + $0xf88] ss:$28 sps:$4 sm:$0xff]   ;;  %v17407_v25 = vld [vmem:[#allocation5 + $0xf90] ss:$28 sps:$4 sm:$0xff]  }
 0x16e   :  { %8908 = vmatpush1.bf16.msra.mxu0 %v17331_v27  ;;  %9400 = vmatpush1.bf16.msra.mxu1 %v17334_v28  ;;  %v17412_v27 = vld [vmem:[#allocation5 + $0xfc4] ss:$28 sps:$4 sm:$0xff]   ;;  %v17415_v28 = vld [vmem:[#allocation5 + $0xfcc] ss:$28 sps:$4 sm:$0xff]  }
 0x16f   :  { %8909 = vmatprep.subr.bf16.mxu0 %v17339_v9  ;;  %9401 = vmatprep.subr.bf16.mxu1 %v17342_v30  ;;  %v17410_v9 = vld [vmem:[#allocation5 + $0xfc0] ss:$28 sps:$4 sm:$0xff]   ;;  %v17413_v30 = vld [vmem:[#allocation5 + $0xfc8] ss:$28 sps:$4 sm:$0xff]  }
 0x172   :  { %8910 = vmatpush1.bf16.msra.mxu0 %v17337_v31  ;;  %9402 = vmatpush1.bf16.msra.mxu1 %v17340_v33  ;;  %v17418_v31 = vld [vmem:[#allocation5 + $0xffc] ss:$28 sps:$4 sm:$0xff]   ;;  %v17421_v33 = vld [vmem:[#allocation5 + $0x1004] ss:$28 sps:$4 sm:$0xff]  }
 0x173   :  { %8911 = vmatprep.subr.bf16.mxu0 %v17345_v35  ;;  %9403 = vmatprep.subr.bf16.mxu1 %v17348_v36  ;;  %v17416_v35 = vld [vmem:[#allocation5 + $0xff8] ss:$28 sps:$4 sm:$0xff]   ;;  %v17419_v36 = vld [vmem:[#allocation5 + $0x1000] ss:$28 sps:$4 sm:$0xff]  }
 0x176   :  { %8912 = vmatpush1.bf16.msra.mxu0 %v17343_v37  ;;  %9404 = vmatpush1.bf16.msra.mxu1 %v17346_v26  ;;  %v17424_v37 = vld [vmem:[#allocation5 + $0x1034] ss:$28 sps:$4 sm:$0xff]   ;;  %v17427_v26 = vld [vmem:[#allocation5 + $0x103c] ss:$28 sps:$4 sm:$0xff]  }
 0x177   :  { %8913 = vmatprep.subr.bf16.mxu0 %v17351_v39  ;;  %9405 = vmatprep.subr.bf16.mxu1 %v17354_v40  ;;  %v17422_v39 = vld [vmem:[#allocation5 + $0x1030] ss:$28 sps:$4 sm:$0xff]   ;;  %v17425_v40 = vld [vmem:[#allocation5 + $0x1038] ss:$28 sps:$4 sm:$0xff]  }
 0x17a   :  { %8914 = vmatpush1.bf16.msra.mxu0 %v17349_v41  ;;  %9406 = vmatpush1.bf16.msra.mxu1 %v17352_v45  ;;  %v17430_v41 = vld [vmem:[#allocation5 + $0x106c] ss:$28 sps:$4 sm:$0xff]   ;;  %v17433_v45 = vld [vmem:[#allocation5 + $0x1074] ss:$28 sps:$4 sm:$0xff]  }
 0x17b   :  { %8915 = vmatprep.subr.bf16.mxu0 %v17357_v46  ;;  %9407 = vmatprep.subr.bf16.mxu1 %v17360_v29  ;;  %v17428_v46 = vld [vmem:[#allocation5 + $0x1068] ss:$28 sps:$4 sm:$0xff]   ;;  %v17431_v29 = vld [vmem:[#allocation5 + $0x1070] ss:$28 sps:$4 sm:$0xff]  }
 0x17e   :  { %8916 = vmatpush1.bf16.msra.mxu0 %v17355_v48  ;;  %9408 = vmatpush1.bf16.msra.mxu1 %v17358_v50  ;;  %v17436_v48 = vld [vmem:[#allocation5 + $0x10a4] ss:$28 sps:$4 sm:$0xff]   ;;  %v17439_v50 = vld [vmem:[#allocation5 + $0x10ac] ss:$28 sps:$4 sm:$0xff]  }
 0x17f   :  { %8926 = vmatprep.subr.bf16.mxu0 %v17364_v51  ;;  %9418 = vmatprep.subr.bf16.mxu1 %v17367_v52  ;;  %v17434_v51 = vld [vmem:[#allocation5 + $0x10a0] ss:$28 sps:$4 sm:$0xff]   ;;  %v17437_v52 = vld [vmem:[#allocation5 + $0x10a8] ss:$28 sps:$4 sm:$0xff]  }
 0x181   :  { %8918 = vmatmul.mubr.bf16.vlgmr.msra.gmra.mrb[0].mxu0 %v19913_v55  ;;  %9410 = vmatmul.mubr.bf16.vlgmr.msra.gmra.mrb[0].mxu1 %v19913_v55 }
 0x182   :  { %8927 = vmatpush1.bf16.msra.mxu0 %v17362_v54  ;;  %9419 = vmatpush1.bf16.msra.mxu1 %v17365_v56  ;;  %v17445_v54 = vld [vmem:[#allocation5 + $0x10e4] ss:$28 sps:$4 sm:$0xff]   ;;  %v17440_v56 = vld [vmem:[#allocation5 + $0x10d8] ss:$28 sps:$4 sm:$0xff]  }
 0x183   :  { %8928 = vmatprep.subr.bf16.mxu0 %v17370_v57  ;;  %9420 = vmatprep.subr.bf16.mxu1 %v17373_v58  ;;  %v17443_v57 = vld [vmem:[#allocation5 + $0x10e0] ss:$28 sps:$4 sm:$0xff]   ;;  %v17448_v58 = vld [vmem:[#allocation5 + $0x1114] ss:$28 sps:$4 sm:$0xff]  }
 0x184   :  { %8958 = vmatprep.mubr.bf16.mxu0 %v19915_v59  ;;  %9450 = vmatprep.mubr.bf16.mxu1 %v19915_v59 }
 0x186   :  { %8929 = vmatpush1.bf16.msra.mxu0 %v17368_v61  ;;  %9421 = vmatpush1.bf16.msra.mxu1 %v17371_v62  ;;  %v17451_v61 = vld [vmem:[#allocation5 + $0x111c] ss:$28 sps:$4 sm:$0xff]   ;;  %v161_v62 = vcombine.high %v19903_v42, %v19903_v42 }
 0x187   :  { %8930 = vmatprep.subr.bf16.mxu0 %v17376_v63  ;;  %9422 = vmatprep.subr.bf16.mxu1 %v17379_v32  ;;  %v17446_v63 = vld [vmem:[#allocation5 + $0x1110] ss:$28 sps:$4 sm:$0xff]   ;;  %v17449_v32 = vld [vmem:[#allocation5 + $0x1118] ss:$28 sps:$4 sm:$0xff]  }
 0x18a   :  { %8931 = vmatpush1.bf16.msra.mxu0 %v17374_v0  ;;  %9423 = vmatpush1.bf16.msra.mxu1 %v17377_v1  ;;  %v17454_v0 = vld [vmem:[#allocation5 + $0x114c] ss:$28 sps:$4 sm:$0xff]   ;;  %v17457_v1 = vld [vmem:[#allocation5 + $0x1154] ss:$28 sps:$4 sm:$0xff]  }
 0x18b   :  { %8932 = vmatprep.subr.bf16.mxu0 %v17382_v2  ;;  %9424 = vmatprep.subr.bf16.mxu1 %v17385_v3  ;;  %v19924_v2 = vrot.slane %v161_v62, %v19848_v49  ;;  %v17452_v3 = vld [vmem:[#allocation5 + $0x1148] ss:$28 sps:$4 sm:$0xff]   ;;  %v17518_v62 = vld [vmem:[#allocation5 + $0x13b0] ss:$28 sps:$4 sm:$0xff]  }
 0x18d   :  { %v177_v42 = vcombine.high %v19924_v2, %v19924_v2 }
 0x18e   :  { %8933 = vmatpush1.bf16.msra.mxu0 %v17380_v4  ;;  %9425 = vmatpush1.bf16.msra.mxu1 %v17383_v5  ;;  %v17455_v4 = vld [vmem:[#allocation5 + $0x1150] ss:$28 sps:$4 sm:$0xff]   ;;  %v17460_v5 = vld [vmem:[#allocation5 + $0x1184] ss:$28 sps:$4 sm:$0xff]  }
 0x18f   :  { %8934 = vmatprep.subr.bf16.mxu0 %v17388_v6  ;;  %9426 = vmatprep.subr.bf16.mxu1 %v17391_v7  ;;  %v17463_v6 = vld [vmem:[#allocation5 + $0x118c] ss:$28 sps:$4 sm:$0xff]   ;;  %v19930_v7 = vpack.c.bf16 %v19907_v47, %v19907_v47  ;;  %v17472_v47 = vld [vmem:[#allocation5 + $0x11f4] ss:$28 sps:$4 sm:$0xff]  }
 0x192   :  { %8935 = vmatpush1.bf16.msra.mxu0 %v17386_v8  ;;  %9427 = vmatpush1.bf16.msra.mxu1 %v17389_v10  ;;  %v17458_v8 = vld [vmem:[#allocation5 + $0x1180] ss:$28 sps:$4 sm:$0xff]   ;;  %v17461_v10 = vld [vmem:[#allocation5 + $0x1188] ss:$28 sps:$4 sm:$0xff]  }
 0x193   :  { %8936 = vmatprep.subr.bf16.mxu0 %v17394_v11  ;;  %9428 = vmatprep.subr.bf16.mxu1 %v17397_v12  ;;  %v17466_v11 = vld [vmem:[#allocation5 + $0x11bc] ss:$28 sps:$4 sm:$0xff]   ;;  %v17469_v12 = vld [vmem:[#allocation5 + $0x11c4] ss:$28 sps:$4 sm:$0xff]  }
 0x196   :  { %8937 = vmatpush1.bf16.msra.mxu0 %v17392_v13  ;;  %9429 = vmatpush1.bf16.msra.mxu1 %v17395_v14  ;;  %v19932_v13 = vpack.c.bf16 %v177_v42, %v177_v42  ;;  %v17464_v14 = vld [vmem:[#allocation5 + $0x11b8] ss:$28 sps:$4 sm:$0xff]   ;;  %v17533_v42 = vld [vmem:[#allocation5 + $0x1428] ss:$28 sps:$4 sm:$0xff]  }
 0x197   :  { %8938 = vmatprep.subr.bf16.mxu0 %v17400_v15  ;;  %9430 = vmatprep.subr.bf16.mxu1 %v17403_v17  ;;  %v17467_v15 = vld [vmem:[#allocation5 + $0x11c0] ss:$28 sps:$4 sm:$0xff]  }
 0x198   :  { %v17475_v17 = vld [vmem:[#allocation5 + $0x11fc] ss:$28 sps:$4 sm:$0xff]  }
 0x19a   :  { %8939 = vmatpush1.bf16.msra.mxu0 %v17398_v18  ;;  %9431 = vmatpush1.bf16.msra.mxu1 %v17401_v19  ;;  %v17470_v18 = vld [vmem:[#allocation5 + $0x11f0] ss:$28 sps:$4 sm:$0xff]   ;;  %v17473_v19 = vld [vmem:[#allocation5 + $0x11f8] ss:$28 sps:$4 sm:$0xff]  }
 0x19b   :  { %8940 = vmatprep.subr.bf16.mxu0 %v17406_v21  ;;  %9432 = vmatprep.subr.bf16.mxu1 %v17409_v22  ;;  %v17478_v21 = vld [vmem:[#allocation5 + $0x122c] ss:$28 sps:$4 sm:$0xff]   ;;  %v17481_v22 = vld [vmem:[#allocation5 + $0x1234] ss:$28 sps:$4 sm:$0xff]  }
 0x19e   :  { %8941 = vmatpush1.bf16.msra.mxu0 %v17404_v23  ;;  %9433 = vmatpush1.bf16.msra.mxu1 %v17407_v25  ;;  %v17476_v23 = vld [vmem:[#allocation5 + $0x1228] ss:$28 sps:$4 sm:$0xff]   ;;  %v17479_v25 = vld [vmem:[#allocation5 + $0x1230] ss:$28 sps:$4 sm:$0xff]  }
 0x19f   :  { %8942 = vmatprep.subr.bf16.mxu0 %v17412_v27  ;;  %9434 = vmatprep.subr.bf16.mxu1 %v17415_v28  ;;  %v17484_v27 = vld [vmem:[#allocation5 + $0x1264] ss:$28 sps:$4 sm:$0xff]   ;;  %v17487_v28 = vld [vmem:[#allocation5 + $0x126c] ss:$28 sps:$4 sm:$0xff]  }
 0x1a2   :  { %8943 = vmatpush1.bf16.msra.mxu0 %v17410_v9  ;;  %9435 = vmatpush1.bf16.msra.mxu1 %v17413_v30  ;;  %v17482_v9 = vld [vmem:[#allocation5 + $0x1260] ss:$28 sps:$4 sm:$0xff]   ;;  %v17485_v30 = vld [vmem:[#allocation5 + $0x1268] ss:$28 sps:$4 sm:$0xff]  }
 0x1a3   :  { %8944 = vmatprep.subr.bf16.mxu0 %v17418_v31  ;;  %9436 = vmatprep.subr.bf16.mxu1 %v17421_v33  ;;  %v17490_v31 = vld [vmem:[#allocation5 + $0x129c] ss:$28 sps:$4 sm:$0xff]   ;;  %v17493_v33 = vld [vmem:[#allocation5 + $0x12a4] ss:$28 sps:$4 sm:$0xff]  }
 0x1a6   :  { %8945 = vmatpush1.bf16.msra.mxu0 %v17416_v35  ;;  %9437 = vmatpush1.bf16.msra.mxu1 %v17419_v36  ;;  %v17488_v35 = vld [vmem:[#allocation5 + $0x1298] ss:$28 sps:$4 sm:$0xff]   ;;  %v17491_v36 = vld [vmem:[#allocation5 + $0x12a0] ss:$28 sps:$4 sm:$0xff]  }
 0x1a7   :  { %8946 = vmatprep.subr.bf16.mxu0 %v17424_v37  ;;  %9438 = vmatprep.subr.bf16.mxu1 %v17427_v26  ;;  %v17496_v37 = vld [vmem:[#allocation5 + $0x12d4] ss:$28 sps:$4 sm:$0xff]   ;;  %v17499_v26 = vld [vmem:[#allocation5 + $0x12dc] ss:$28 sps:$4 sm:$0xff]  }
 0x1aa   :  { %8947 = vmatpush1.bf16.msra.mxu0 %v17422_v39  ;;  %9439 = vmatpush1.bf16.msra.mxu1 %v17425_v40  ;;  %v17494_v39 = vld [vmem:[#allocation5 + $0x12d0] ss:$28 sps:$4 sm:$0xff]   ;;  %v17497_v40 = vld [vmem:[#allocation5 + $0x12d8] ss:$28 sps:$4 sm:$0xff]  }
 0x1ab   :  { %8948 = vmatprep.subr.bf16.mxu0 %v17430_v41  ;;  %9440 = vmatprep.subr.bf16.mxu1 %v17433_v45  ;;  %v17502_v41 = vld [vmem:[#allocation5 + $0x130c] ss:$28 sps:$4 sm:$0xff]   ;;  %v17505_v45 = vld [vmem:[#allocation5 + $0x1314] ss:$28 sps:$4 sm:$0xff]  }
 0x1ae   :  { %8949 = vmatpush1.bf16.msra.mxu0 %v17428_v46  ;;  %9441 = vmatpush1.bf16.msra.mxu1 %v17431_v29  ;;  %v17500_v46 = vld [vmem:[#allocation5 + $0x1308] ss:$28 sps:$4 sm:$0xff]   ;;  %v17503_v29 = vld [vmem:[#allocation5 + $0x1310] ss:$28 sps:$4 sm:$0xff]  }
 0x1af   :  { %8950 = vmatprep.subr.bf16.mxu0 %v17436_v48  ;;  %9442 = vmatprep.subr.bf16.mxu1 %v17439_v50  ;;  %v17508_v48 = vld [vmem:[#allocation5 + $0x1344] ss:$28 sps:$4 sm:$0xff]   ;;  %v17511_v50 = vld [vmem:[#allocation5 + $0x134c] ss:$28 sps:$4 sm:$0xff]  }
 0x1b2   :  { %8951 = vmatpush1.bf16.msra.mxu0 %v17434_v51  ;;  %9443 = vmatpush1.bf16.msra.mxu1 %v17437_v52  ;;  %v17506_v51 = vld [vmem:[#allocation5 + $0x1340] ss:$28 sps:$4 sm:$0xff]   ;;  %v17509_v52 = vld [vmem:[#allocation5 + $0x1348] ss:$28 sps:$4 sm:$0xff]  }
 0x1b3   :  { %8952 = vmatprep.subr.bf16.mxu0 %v17442_v53  ;;  %9444 = vmatprep.subr.bf16.mxu1 %v17445_v54  ;;  %v17514_v53 = vld [vmem:[#allocation5 + $0x137c] ss:$28 sps:$4 sm:$0xff]   ;;  %v17517_v54 = vld [vmem:[#allocation5 + $0x1384] ss:$28 sps:$4 sm:$0xff]  }
 0x1b6   :  { %8953 = vmatpush1.bf16.msra.mxu0 %v17440_v56  ;;  %9445 = vmatpush1.bf16.msra.mxu1 %v17443_v57  ;;  %v17512_v56 = vld [vmem:[#allocation5 + $0x1378] ss:$28 sps:$4 sm:$0xff]   ;;  %v17515_v57 = vld [vmem:[#allocation5 + $0x1380] ss:$28 sps:$4 sm:$0xff]  }
 0x1b7   :  { %8954 = vmatprep.subr.bf16.mxu0 %v17448_v58  ;;  %9446 = vmatprep.subr.bf16.mxu1 %v17451_v61  ;;  %v17520_v58 = vld [vmem:[#allocation5 + $0x13b4] ss:$28 sps:$4 sm:$0xff]   ;;  %v17523_v61 = vld [vmem:[#allocation5 + $0x13bc] ss:$28 sps:$4 sm:$0xff]  }
 0x1ba   :  { %8955 = vmatpush1.bf16.msra.mxu0 %v17446_v63  ;;  %9447 = vmatpush1.bf16.msra.mxu1 %v17449_v32  ;;  %v17521_v63 = vld [vmem:[#allocation5 + $0x13b8] ss:$28 sps:$4 sm:$0xff]   ;;  %v17526_v32 = vld [vmem:[#allocation5 + $0x13ec] ss:$28 sps:$4 sm:$0xff]  }
 0x1bb   :  { %8956 = vmatprep.subr.bf16.mxu0 %v17454_v0  ;;  %9448 = vmatprep.subr.bf16.mxu1 %v17457_v1  ;;  %v17529_v0 = vld [vmem:[#allocation5 + $0x13f4] ss:$28 sps:$4 sm:$0xff]   ;;  %v17524_v1 = vld [vmem:[#allocation5 + $0x13e8] ss:$28 sps:$4 sm:$0xff]  }
 0x1be   :  { %8957 = vmatpush1.bf16.msra.mxu0 %v17452_v3  ;;  %9449 = vmatpush1.bf16.msra.mxu1 %v17455_v4  ;;  %v17527_v3 = vld [vmem:[#allocation5 + $0x13f0] ss:$28 sps:$4 sm:$0xff]   ;;  %v17532_v4 = vld [vmem:[#allocation5 + $0x1424] ss:$28 sps:$4 sm:$0xff]  }
 0x1bf   :  { %8967 = vmatprep.subr.bf16.mxu0 %v17460_v5  ;;  %9459 = vmatprep.subr.bf16.mxu1 %v17463_v6  ;;  %v17535_v5 = vld [vmem:[#allocation5 + $0x142c] ss:$28 sps:$4 sm:$0xff]   ;;  %v17530_v6 = vld [vmem:[#allocation5 + $0x1420] ss:$28 sps:$4 sm:$0xff]  }
 0x1c1   :  { %8959 = vmatmul.mubr.bf16.vlgmr.msra.gmra.mrb[0].mxu0 %v19930_v7  ;;  %9451 = vmatmul.mubr.bf16.vlgmr.msra.gmra.mrb[0].mxu1 %v19930_v7 }
 0x1c2   :  { %8968 = vmatpush1.bf16.msra.mxu0 %v17458_v8  ;;  %9460 = vmatpush1.bf16.msra.mxu1 %v17461_v10  ;;  %v17538_v8 = vld [vmem:[#allocation5 + $0x145c] ss:$28 sps:$4 sm:$0xff]   ;;  %v17541_v10 = vld [vmem:[#allocation5 + $0x1464] ss:$28 sps:$4 sm:$0xff]  }
 0x1c3   :  { %8969 = vmatprep.subr.bf16.mxu0 %v17466_v11  ;;  %9461 = vmatprep.subr.bf16.mxu1 %v17469_v12  ;;  %v17536_v11 = vld [vmem:[#allocation5 + $0x1458] ss:$28 sps:$4 sm:$0xff]   ;;  %v17539_v12 = vld [vmem:[#allocation5 + $0x1460] ss:$28 sps:$4 sm:$0xff]  }
 0x1c4   :  { %8999 = vmatprep.mubr.bf16.mxu0 %v19932_v13  ;;  %9491 = vmatprep.mubr.bf16.mxu1 %v19932_v13 }
 0x1c6   :  { %8970 = vmatpush1.bf16.msra.mxu0 %v17464_v14  ;;  %9462 = vmatpush1.bf16.msra.mxu1 %v17467_v15  ;;  %v17544_v14 = vld [vmem:[#allocation5 + $0x1494] ss:$28 sps:$4 sm:$0xff]   ;;  %v17547_v15 = vld [vmem:[#allocation5 + $0x149c] ss:$28 sps:$4 sm:$0xff]  }
 0x1c7   :  { %8971 = vmatprep.subr.bf16.mxu0 %v17472_v47  ;;  %9463 = vmatprep.subr.bf16.mxu1 %v17475_v17  ;;  %v19938_v47 = vld [vmem:[#allocation2 + $0x18] sm:$0xff] }
 0x1c8   :  { %v17542_v17 = vld [vmem:[#allocation5 + $0x1490] ss:$28 sps:$4 sm:$0xff]  }
 0x1ca   :  { %8972 = vmatpush1.bf16.msra.mxu0 %v17470_v18  ;;  %9464 = vmatpush1.bf16.msra.mxu1 %v17473_v19  ;;  %v17545_v18 = vld [vmem:[#allocation5 + $0x1498] ss:$28 sps:$4 sm:$0xff]   ;;  %v17550_v19 = vld [vmem:[#allocation5 + $0x14cc] ss:$28 sps:$4 sm:$0xff]  }
 0x1cb   :  { %8973 = vmatprep.subr.bf16.mxu0 %v17478_v21  ;;  %9465 = vmatprep.subr.bf16.mxu1 %v17481_v22  ;;  %v17553_v21 = vld [vmem:[#allocation5 + $0x14d4] ss:$28 sps:$4 sm:$0xff]   ;;  %v19942_v22 = vrot.slane %v19938_v47, %v19848_v49 }
 0x1ce   :  { %8974 = vmatpush1.bf16.msra.mxu0 %v17476_v23  ;;  %9466 = vmatpush1.bf16.msra.mxu1 %v17479_v25  ;;  %v17548_v23 = vld [vmem:[#allocation5 + $0x14c8] ss:$28 sps:$4 sm:$0xff]   ;;  %v17551_v25 = vld [vmem:[#allocation5 + $0x14d0] ss:$28 sps:$4 sm:$0xff]  }
 0x1cf   :  { %8975 = vmatprep.subr.bf16.mxu0 %v17484_v27  ;;  %9467 = vmatprep.subr.bf16.mxu1 %v17487_v28  ;;  %v17557_v27 = vld [vmem:[#allocation5 + $0x1504] ss:$28 sps:$4 sm:$0xff]   ;;  %v17560_v28 = vld [vmem:[#allocation5 + $0x150c] ss:$28 sps:$4 sm:$0xff]  }
 0x1d2   :  { %8976 = vmatpush1.bf16.msra.mxu0 %v17482_v9  ;;  %9468 = vmatpush1.bf16.msra.mxu1 %v17485_v30  ;;  %v193_v9 = vcombine.high %v19942_v22, %v19942_v22  ;;  %v19948_v30 = vpack.c.bf16 %v19924_v2, %v19924_v2  ;;  %v17569_v2 = vld [vmem:[#allocation5 + $0x1574] ss:$28 sps:$4 sm:$0xff]  }
 0x1d3   :  { %8977 = vmatprep.subr.bf16.mxu0 %v17490_v31  ;;  %9469 = vmatprep.subr.bf16.mxu1 %v17493_v33  ;;  %v17555_v31 = vld [vmem:[#allocation5 + $0x1500] ss:$28 sps:$4 sm:$0xff]   ;;  %v17558_v33 = vld [vmem:[#allocation5 + $0x1508] ss:$28 sps:$4 sm:$0xff]  }
 0x1d6   :  { %8978 = vmatpush1.bf16.msra.mxu0 %v17488_v35  ;;  %9470 = vmatpush1.bf16.msra.mxu1 %v17491_v36  ;;  %v17563_v35 = vld [vmem:[#allocation5 + $0x153c] ss:$28 sps:$4 sm:$0xff]   ;;  %v17566_v36 = vld [vmem:[#allocation5 + $0x1544] ss:$28 sps:$4 sm:$0xff]  }
 0x1d7   :  { %8979 = vmatprep.subr.bf16.mxu0 %v17496_v37  ;;  %9471 = vmatprep.subr.bf16.mxu1 %v17499_v26  ;;  %v19950_v37 = vpack.c.bf16 %v193_v9, %v193_v9  ;;  %v17561_v26 = vld [vmem:[#allocation5 + $0x1538] ss:$28 sps:$4 sm:$0xff]   ;;  %v17629_v9 = vld [vmem:[#allocation5 + $0x17a4] ss:$28 sps:$4 sm:$0xff]  }
 0x1da   :  { %8980 = vmatpush1.bf16.msra.mxu0 %v17494_v39  ;;  %9472 = vmatpush1.bf16.msra.mxu1 %v17497_v40  ;;  %v17564_v39 = vld [vmem:[#allocation5 + $0x1540] ss:$28 sps:$4 sm:$0xff]  }
 0x1db   :  { %8981 = vmatprep.subr.bf16.mxu0 %v17502_v41  ;;  %9473 = vmatprep.subr.bf16.mxu1 %v17505_v45  ;;  %v17572_v40 = vld [vmem:[#allocation5 + $0x157c] ss:$28 sps:$4 sm:$0xff]   ;;  %v17567_v41 = vld [vmem:[#allocation5 + $0x1570] ss:$28 sps:$4 sm:$0xff]  }
 0x1dc   :  { %v17570_v45 = vld [vmem:[#allocation5 + $0x1578] ss:$28 sps:$4 sm:$0xff]  }
 0x1de   :  { %8982 = vmatpush1.bf16.msra.mxu0 %v17500_v46  ;;  %9474 = vmatpush1.bf16.msra.mxu1 %v17503_v29  ;;  %v17575_v46 = vld [vmem:[#allocation5 + $0x15ac] ss:$28 sps:$4 sm:$0xff]   ;;  %v17578_v29 = vld [vmem:[#allocation5 + $0x15b4] ss:$28 sps:$4 sm:$0xff]  }
 0x1df   :  { %8983 = vmatprep.subr.bf16.mxu0 %v17508_v48  ;;  %9475 = vmatprep.subr.bf16.mxu1 %v17511_v50  ;;  %v17573_v48 = vld [vmem:[#allocation5 + $0x15a8] ss:$28 sps:$4 sm:$0xff]   ;;  %v17576_v50 = vld [vmem:[#allocation5 + $0x15b0] ss:$28 sps:$4 sm:$0xff]  }
 0x1e2   :  { %8984 = vmatpush1.bf16.msra.mxu0 %v17506_v51  ;;  %9476 = vmatpush1.bf16.msra.mxu1 %v17509_v52  ;;  %v17581_v51 = vld [vmem:[#allocation5 + $0x15e4] ss:$28 sps:$4 sm:$0xff]   ;;  %v17584_v52 = vld [vmem:[#allocation5 + $0x15ec] ss:$28 sps:$4 sm:$0xff]  }
 0x1e3   :  { %8985 = vmatprep.subr.bf16.mxu0 %v17514_v53  ;;  %9477 = vmatprep.subr.bf16.mxu1 %v17517_v54  ;;  %v17579_v53 = vld [vmem:[#allocation5 + $0x15e0] ss:$28 sps:$4 sm:$0xff]   ;;  %v17582_v54 = vld [vmem:[#allocation5 + $0x15e8] ss:$28 sps:$4 sm:$0xff]  }
 0x1e6   :  { %8986 = vmatpush1.bf16.msra.mxu0 %v17512_v56  ;;  %9478 = vmatpush1.bf16.msra.mxu1 %v17515_v57  ;;  %v17587_v56 = vld [vmem:[#allocation5 + $0x161c] ss:$28 sps:$4 sm:$0xff]   ;;  %v17590_v57 = vld [vmem:[#allocation5 + $0x1624] ss:$28 sps:$4 sm:$0xff]  }
 0x1e7   :  { %8987 = vmatprep.subr.bf16.mxu0 %v17520_v58  ;;  %9479 = vmatprep.subr.bf16.mxu1 %v17523_v61  ;;  %v17585_v58 = vld [vmem:[#allocation5 + $0x1618] ss:$28 sps:$4 sm:$0xff]   ;;  %v17588_v61 = vld [vmem:[#allocation5 + $0x1620] ss:$28 sps:$4 sm:$0xff]  }
 0x1ea   :  { %8988 = vmatpush1.bf16.msra.mxu0 %v17518_v62  ;;  %9480 = vmatpush1.bf16.msra.mxu1 %v17521_v63  ;;  %v17593_v62 = vld [vmem:[#allocation5 + $0x1654] ss:$28 sps:$4 sm:$0xff]   ;;  %v17596_v63 = vld [vmem:[#allocation5 + $0x165c] ss:$28 sps:$4 sm:$0xff]  }
 0x1eb   :  { %8989 = vmatprep.subr.bf16.mxu0 %v17526_v32  ;;  %9481 = vmatprep.subr.bf16.mxu1 %v17529_v0  ;;  %v17591_v32 = vld [vmem:[#allocation5 + $0x1650] ss:$28 sps:$4 sm:$0xff]   ;;  %v17594_v0 = vld [vmem:[#allocation5 + $0x1658] ss:$28 sps:$4 sm:$0xff]  }
 0x1ee   :  { %8990 = vmatpush1.bf16.msra.mxu0 %v17524_v1  ;;  %9482 = vmatpush1.bf16.msra.mxu1 %v17527_v3  ;;  %v17599_v1 = vld [vmem:[#allocation5 + $0x168c] ss:$28 sps:$4 sm:$0xff]   ;;  %v17602_v3 = vld [vmem:[#allocation5 + $0x1694] ss:$28 sps:$4 sm:$0xff]  }
 0x1ef   :  { %8991 = vmatprep.subr.bf16.mxu0 %v17532_v4  ;;  %9483 = vmatprep.subr.bf16.mxu1 %v17535_v5  ;;  %v17597_v4 = vld [vmem:[#allocation5 + $0x1688] ss:$28 sps:$4 sm:$0xff]   ;;  %v17600_v5 = vld [vmem:[#allocation5 + $0x1690] ss:$28 sps:$4 sm:$0xff]  }
 0x1f2   :  { %8992 = vmatpush1.bf16.msra.mxu0 %v17530_v6  ;;  %9484 = vmatpush1.bf16.msra.mxu1 %v17533_v42  ;;  %v17605_v6 = vld [vmem:[#allocation5 + $0x16c4] ss:$28 sps:$4 sm:$0xff]   ;;  %v17608_v42 = vld [vmem:[#allocation5 + $0x16cc] ss:$28 sps:$4 sm:$0xff]  }
 0x1f3   :  { %8993 = vmatprep.subr.bf16.mxu0 %v17538_v8  ;;  %9485 = vmatprep.subr.bf16.mxu1 %v17541_v10  ;;  %v17603_v8 = vld [vmem:[#allocation5 + $0x16c0] ss:$28 sps:$4 sm:$0xff]   ;;  %v17606_v10 = vld [vmem:[#allocation5 + $0x16c8] ss:$28 sps:$4 sm:$0xff]  }
 0x1f6   :  { %8994 = vmatpush1.bf16.msra.mxu0 %v17536_v11  ;;  %9486 = vmatpush1.bf16.msra.mxu1 %v17539_v12  ;;  %v17611_v11 = vld [vmem:[#allocation5 + $0x16fc] ss:$28 sps:$4 sm:$0xff]   ;;  %v17614_v12 = vld [vmem:[#allocation5 + $0x1704] ss:$28 sps:$4 sm:$0xff]  }
 0x1f7   :  { %8995 = vmatprep.subr.bf16.mxu0 %v17544_v14  ;;  %9487 = vmatprep.subr.bf16.mxu1 %v17547_v15  ;;  %v17609_v14 = vld [vmem:[#allocation5 + $0x16f8] ss:$28 sps:$4 sm:$0xff]   ;;  %v17612_v15 = vld [vmem:[#allocation5 + $0x1700] ss:$28 sps:$4 sm:$0xff]  }
 0x1fa   :  { %8996 = vmatpush1.bf16.msra.mxu0 %v17542_v17  ;;  %9488 = vmatpush1.bf16.msra.mxu1 %v17545_v18  ;;  %v17617_v17 = vld [vmem:[#allocation5 + $0x1734] ss:$28 sps:$4 sm:$0xff]   ;;  %v17620_v18 = vld [vmem:[#allocation5 + $0x173c] ss:$28 sps:$4 sm:$0xff]  }
 0x1fb   :  { %8997 = vmatprep.subr.bf16.mxu0 %v17550_v19  ;;  %9489 = vmatprep.subr.bf16.mxu1 %v17553_v21  ;;  %v17615_v19 = vld [vmem:[#allocation5 + $0x1730] ss:$28 sps:$4 sm:$0xff]   ;;  %v17618_v21 = vld [vmem:[#allocation5 + $0x1738] ss:$28 sps:$4 sm:$0xff]  }
 0x1fe   :  { %8998 = vmatpush1.bf16.msra.mxu0 %v17548_v23  ;;  %9490 = vmatpush1.bf16.msra.mxu1 %v17551_v25  ;;  %v17623_v23 = vld [vmem:[#allocation5 + $0x176c] ss:$28 sps:$4 sm:$0xff]   ;;  %v17626_v25 = vld [vmem:[#allocation5 + $0x1774] ss:$28 sps:$4 sm:$0xff]  }
 0x1ff   :  { %9008 = vmatprep.subr.bf16.mxu0 %v17557_v27  ;;  %9500 = vmatprep.subr.bf16.mxu1 %v17560_v28  ;;  %v17621_v27 = vld [vmem:[#allocation5 + $0x1768] ss:$28 sps:$4 sm:$0xff]   ;;  %v17624_v28 = vld [vmem:[#allocation5 + $0x1770] ss:$28 sps:$4 sm:$0xff]  }
 0x201   :  { %9000 = vmatmul.mubr.bf16.vlgmr.msra.gmra.mrb[0].mxu0 %v19948_v30  ;;  %9492 = vmatmul.mubr.bf16.vlgmr.msra.gmra.mrb[0].mxu1 %v19948_v30 }
 0x202   :  { %9009 = vmatpush1.bf16.msra.mxu0 %v17555_v31  ;;  %9501 = vmatpush1.bf16.msra.mxu1 %v17558_v33  ;;  %v17632_v31 = vld [vmem:[#allocation5 + $0x17ac] ss:$28 sps:$4 sm:$0xff]   ;;  %v17627_v33 = vld [vmem:[#allocation5 + $0x17a0] ss:$28 sps:$4 sm:$0xff]  }
 0x203   :  { %9010 = vmatprep.subr.bf16.mxu0 %v17563_v35  ;;  %9502 = vmatprep.subr.bf16.mxu1 %v17566_v36  ;;  %v17630_v35 = vld [vmem:[#allocation5 + $0x17a8] ss:$28 sps:$4 sm:$0xff]   ;;  %v17635_v36 = vld [vmem:[#allocation5 + $0x17dc] ss:$28 sps:$4 sm:$0xff]  }
 0x204   :  { %9040 = vmatprep.mubr.bf16.mxu0 %v19950_v37  ;;  %9532 = vmatprep.mubr.bf16.mxu1 %v19950_v37 }
 0x206   :  { %9011 = vmatpush1.bf16.msra.mxu0 %v17561_v26  ;;  %9503 = vmatpush1.bf16.msra.mxu1 %v17564_v39  ;;  %v17638_v26 = vld [vmem:[#allocation5 + $0x17e4] ss:$28 sps:$4 sm:$0xff]   ;;  %v17633_v39 = vld [vmem:[#allocation5 + $0x17d8] ss:$28 sps:$4 sm:$0xff]  }
 0x207   :  { %9012 = vmatprep.subr.bf16.mxu0 %v17569_v2  ;;  %9504 = vmatprep.subr.bf16.mxu1 %v17572_v40  ;;  %v17636_v2 = vld [vmem:[#allocation5 + $0x17e0] ss:$28 sps:$4 sm:$0xff]   ;;  %v17641_v40 = vld [vmem:[#allocation5 + $0x1814] ss:$28 sps:$4 sm:$0xff]  }
 0x20a   :  { %9013 = vmatpush1.bf16.msra.mxu0 %v17567_v41  ;;  %9505 = vmatpush1.bf16.msra.mxu1 %v17570_v45  ;;  %v17644_v41 = vld [vmem:[#allocation5 + $0x181c] ss:$28 sps:$4 sm:$0xff]   ;;  %v178_v45 = vcombine.high %v19938_v47, %v19938_v47 }
 0x20b   :  { %9014 = vmatprep.subr.bf16.mxu0 %v17575_v46  ;;  %9506 = vmatprep.subr.bf16.mxu1 %v17578_v29  ;;  %v17639_v46 = vld [vmem:[#allocation5 + $0x1810] ss:$28 sps:$4 sm:$0xff]   ;;  %v17642_v29 = vld [vmem:[#allocation5 + $0x1818] ss:$28 sps:$4 sm:$0xff]  }
 0x20e   :  { %9015 = vmatpush1.bf16.msra.mxu0 %v17573_v48  ;;  %9507 = vmatpush1.bf16.msra.mxu1 %v17576_v50  ;;  %v17647_v48 = vld [vmem:[#allocation5 + $0x184c] ss:$28 sps:$4 sm:$0xff]   ;;  %v17650_v50 = vld [vmem:[#allocation5 + $0x1854] ss:$28 sps:$4 sm:$0xff]  }
 0x20f   :  { %9016 = vmatprep.subr.bf16.mxu0 %v17581_v51  ;;  %9508 = vmatprep.subr.bf16.mxu1 %v17584_v52  ;;  %v19959_v51 = vrot.slane %v178_v45, %v19848_v49  ;;  %v17645_v52 = vld [vmem:[#allocation5 + $0x1848] ss:$28 sps:$4 sm:$0xff]   ;;  %v17705_v45 = vld [vmem:[#allocation5 + $0x1a78] ss:$28 sps:$4 sm:$0xff]  }
 0x211   :  { %v194_v47 = vcombine.high %v19959_v51, %v19959_v51 }
 0x212   :  { %9017 = vmatpush1.bf16.msra.mxu0 %v17579_v53  ;;  %9509 = vmatpush1.bf16.msra.mxu1 %v17582_v54  ;;  %v17648_v53 = vld [vmem:[#allocation5 + $0x1850] ss:$28 sps:$4 sm:$0xff]   ;;  %v17653_v54 = vld [vmem:[#allocation5 + $0x1884] ss:$28 sps:$4 sm:$0xff]  }
 0x213   :  { %9018 = vmatprep.subr.bf16.mxu0 %v17587_v56  ;;  %9510 = vmatprep.subr.bf16.mxu1 %v17590_v57  ;;  %v17656_v56 = vld [vmem:[#allocation5 + $0x188c] ss:$28 sps:$4 sm:$0xff]   ;;  %v19965_v57 = vpack.c.bf16 %v19942_v22, %v19942_v22  ;;  %v17665_v22 = vld [vmem:[#allocation5 + $0x18f4] ss:$28 sps:$4 sm:$0xff]  }
 0x216   :  { %9019 = vmatpush1.bf16.msra.mxu0 %v17585_v58  ;;  %9511 = vmatpush1.bf16.msra.mxu1 %v17588_v61  ;;  %v17651_v58 = vld [vmem:[#allocation5 + $0x1880] ss:$28 sps:$4 sm:$0xff]   ;;  %v17654_v61 = vld [vmem:[#allocation5 + $0x1888] ss:$28 sps:$4 sm:$0xff]  }
 0x217   :  { %9020 = vmatprep.subr.bf16.mxu0 %v17593_v62  ;;  %9512 = vmatprep.subr.bf16.mxu1 %v17596_v63  ;;  %v17659_v62 = vld [vmem:[#allocation5 + $0x18bc] ss:$28 sps:$4 sm:$0xff]   ;;  %v17662_v63 = vld [vmem:[#allocation5 + $0x18c4] ss:$28 sps:$4 sm:$0xff]  }
 0x21a   :  { %9021 = vmatpush1.bf16.msra.mxu0 %v17591_v32  ;;  %9513 = vmatpush1.bf16.msra.mxu1 %v17594_v0  ;;  %v19967_v32 = vpack.c.bf16 %v194_v47, %v194_v47  ;;  %v17657_v0 = vld [vmem:[#allocation5 + $0x18b8] ss:$28 sps:$4 sm:$0xff]   ;;  %v17720_v47 = vld [vmem:[#allocation5 + $0x1af0] ss:$28 sps:$4 sm:$0xff]  }
 0x21b   :  { %9022 = vmatprep.subr.bf16.mxu0 %v17599_v1  ;;  %9514 = vmatprep.subr.bf16.mxu1 %v17602_v3  ;;  %v17660_v1 = vld [vmem:[#allocation5 + $0x18c0] ss:$28 sps:$4 sm:$0xff]  }
 0x21c   :  { %v17668_v3 = vld [vmem:[#allocation5 + $0x18fc] ss:$28 sps:$4 sm:$0xff]  }
 0x21e   :  { %9023 = vmatpush1.bf16.msra.mxu0 %v17597_v4  ;;  %9515 = vmatpush1.bf16.msra.mxu1 %v17600_v5  ;;  %v17663_v4 = vld [vmem:[#allocation5 + $0x18f0] ss:$28 sps:$4 sm:$0xff]   ;;  %v17666_v5 = vld [vmem:[#allocation5 + $0x18f8] ss:$28 sps:$4 sm:$0xff]  }
 0x21f   :  { %9024 = vmatprep.subr.bf16.mxu0 %v17605_v6  ;;  %9516 = vmatprep.subr.bf16.mxu1 %v17608_v42  ;;  %v17671_v6 = vld [vmem:[#allocation5 + $0x192c] ss:$28 sps:$4 sm:$0xff]   ;;  %v17674_v42 = vld [vmem:[#allocation5 + $0x1934] ss:$28 sps:$4 sm:$0xff]  }
 0x222   :  { %9025 = vmatpush1.bf16.msra.mxu0 %v17603_v8  ;;  %9517 = vmatpush1.bf16.msra.mxu1 %v17606_v10  ;;  %v17669_v8 = vld [vmem:[#allocation5 + $0x1928] ss:$28 sps:$4 sm:$0xff]   ;;  %v17672_v10 = vld [vmem:[#allocation5 + $0x1930] ss:$28 sps:$4 sm:$0xff]  }
 0x223   :  { %9026 = vmatprep.subr.bf16.mxu0 %v17611_v11  ;;  %9518 = vmatprep.subr.bf16.mxu1 %v17614_v12  ;;  %v17677_v11 = vld [vmem:[#allocation5 + $0x1964] ss:$28 sps:$4 sm:$0xff]   ;;  %v17680_v12 = vld [vmem:[#allocation5 + $0x196c] ss:$28 sps:$4 sm:$0xff]  }
 0x226   :  { %9027 = vmatpush1.bf16.msra.mxu0 %v17609_v14  ;;  %9519 = vmatpush1.bf16.msra.mxu1 %v17612_v15  ;;  %v17675_v14 = vld [vmem:[#allocation5 + $0x1960] ss:$28 sps:$4 sm:$0xff]   ;;  %v17678_v15 = vld [vmem:[#allocation5 + $0x1968] ss:$28 sps:$4 sm:$0xff]  }
 0x227   :  { %9028 = vmatprep.subr.bf16.mxu0 %v17617_v17  ;;  %9520 = vmatprep.subr.bf16.mxu1 %v17620_v18  ;;  %v17683_v17 = vld [vmem:[#allocation5 + $0x199c] ss:$28 sps:$4 sm:$0xff]   ;;  %v17686_v18 = vld [vmem:[#allocation5 + $0x19a4] ss:$28 sps:$4 sm:$0xff]  }
 0x22a   :  { %9029 = vmatpush1.bf16.msra.mxu0 %v17615_v19  ;;  %9521 = vmatpush1.bf16.msra.mxu1 %v17618_v21  ;;  %v17681_v19 = vld [vmem:[#allocation5 + $0x1998] ss:$28 sps:$4 sm:$0xff]   ;;  %v17684_v21 = vld [vmem:[#allocation5 + $0x19a0] ss:$28 sps:$4 sm:$0xff]  }
 0x22b   :  { %9030 = vmatprep.subr.bf16.mxu0 %v17623_v23  ;;  %9522 = vmatprep.subr.bf16.mxu1 %v17626_v25  ;;  %v17689_v23 = vld [vmem:[#allocation5 + $0x19d4] ss:$28 sps:$4 sm:$0xff]   ;;  %v17692_v25 = vld [vmem:[#allocation5 + $0x19dc] ss:$28 sps:$4 sm:$0xff]  }
 0x22e   :  { %9031 = vmatpush1.bf16.msra.mxu0 %v17621_v27  ;;  %9523 = vmatpush1.bf16.msra.mxu1 %v17624_v28  ;;  %v17687_v27 = vld [vmem:[#allocation5 + $0x19d0] ss:$28 sps:$4 sm:$0xff]   ;;  %v17690_v28 = vld [vmem:[#allocation5 + $0x19d8] ss:$28 sps:$4 sm:$0xff]  }
 0x22f   :  { %9032 = vmatprep.subr.bf16.mxu0 %v17629_v9  ;;  %9524 = vmatprep.subr.bf16.mxu1 %v17632_v31  ;;  %v17695_v9 = vld [vmem:[#allocation5 + $0x1a0c] ss:$28 sps:$4 sm:$0xff]   ;;  %v17698_v31 = vld [vmem:[#allocation5 + $0x1a14] ss:$28 sps:$4 sm:$0xff]  }
 0x232   :  { %9033 = vmatpush1.bf16.msra.mxu0 %v17627_v33  ;;  %9525 = vmatpush1.bf16.msra.mxu1 %v17630_v35  ;;  %v17693_v33 = vld [vmem:[#allocation5 + $0x1a08] ss:$28 sps:$4 sm:$0xff]   ;;  %v17696_v35 = vld [vmem:[#allocation5 + $0x1a10] ss:$28 sps:$4 sm:$0xff]  }
 0x233   :  { %9034 = vmatprep.subr.bf16.mxu0 %v17635_v36  ;;  %9526 = vmatprep.subr.bf16.mxu1 %v17638_v26  ;;  %v17701_v36 = vld [vmem:[#allocation5 + $0x1a44] ss:$28 sps:$4 sm:$0xff]   ;;  %v17704_v26 = vld [vmem:[#allocation5 + $0x1a4c] ss:$28 sps:$4 sm:$0xff]  }
 0x236   :  { %9035 = vmatpush1.bf16.msra.mxu0 %v17633_v39  ;;  %9527 = vmatpush1.bf16.msra.mxu1 %v17636_v2  ;;  %v17699_v39 = vld [vmem:[#allocation5 + $0x1a40] ss:$28 sps:$4 sm:$0xff]   ;;  %v17702_v2 = vld [vmem:[#allocation5 + $0x1a48] ss:$28 sps:$4 sm:$0xff]  }
 0x237   :  { %9036 = vmatprep.subr.bf16.mxu0 %v17641_v40  ;;  %9528 = vmatprep.subr.bf16.mxu1 %v17644_v41  ;;  %v17707_v40 = vld [vmem:[#allocation5 + $0x1a7c] ss:$28 sps:$4 sm:$0xff]   ;;  %v17710_v41 = vld [vmem:[#allocation5 + $0x1a84] ss:$28 sps:$4 sm:$0xff]  }
 0x23a   :  { %9037 = vmatpush1.bf16.msra.mxu0 %v17639_v46  ;;  %9529 = vmatpush1.bf16.msra.mxu1 %v17642_v29  ;;  %v17708_v46 = vld [vmem:[#allocation5 + $0x1a80] ss:$28 sps:$4 sm:$0xff]   ;;  %v17713_v29 = vld [vmem:[#allocation5 + $0x1ab4] ss:$28 sps:$4 sm:$0xff]  }
 0x23b   :  { %9038 = vmatprep.subr.bf16.mxu0 %v17647_v48  ;;  %9530 = vmatprep.subr.bf16.mxu1 %v17650_v50  ;;  %v17716_v48 = vld [vmem:[#allocation5 + $0x1abc] ss:$28 sps:$4 sm:$0xff]   ;;  %v17711_v50 = vld [vmem:[#allocation5 + $0x1ab0] ss:$28 sps:$4 sm:$0xff]  }
 0x23e   :  { %9039 = vmatpush1.bf16.msra.mxu0 %v17645_v52  ;;  %9531 = vmatpush1.bf16.msra.mxu1 %v17648_v53  ;;  %v17714_v52 = vld [vmem:[#allocation5 + $0x1ab8] ss:$28 sps:$4 sm:$0xff]   ;;  %v17719_v53 = vld [vmem:[#allocation5 + $0x1aec] ss:$28 sps:$4 sm:$0xff]  }
 0x23f   :  { %9049 = vmatprep.subr.bf16.mxu0 %v17653_v54  ;;  %9541 = vmatprep.subr.bf16.mxu1 %v17656_v56  ;;  %v17722_v54 = vld [vmem:[#allocation5 + $0x1af4] ss:$28 sps:$4 sm:$0xff]   ;;  %v17717_v56 = vld [vmem:[#allocation5 + $0x1ae8] ss:$28 sps:$4 sm:$0xff]  }
 0x241   :  { %9041 = vmatmul.mubr.bf16.vlgmr.msra.gmra.mrb[0].mxu0 %v19965_v57  ;;  %9533 = vmatmul.mubr.bf16.vlgmr.msra.gmra.mrb[0].mxu1 %v19965_v57 }
 0x242   :  { %9050 = vmatpush1.bf16.msra.mxu0 %v17651_v58  ;;  %9542 = vmatpush1.bf16.msra.mxu1 %v17654_v61  ;;  %v17725_v58 = vld [vmem:[#allocation5 + $0x1b24] ss:$28 sps:$4 sm:$0xff]   ;;  %v17728_v61 = vld [vmem:[#allocation5 + $0x1b2c] ss:$28 sps:$4 sm:$0xff]  }
 0x243   :  { %9051 = vmatprep.subr.bf16.mxu0 %v17659_v62  ;;  %9543 = vmatprep.subr.bf16.mxu1 %v17662_v63  ;;  %v17723_v62 = vld [vmem:[#allocation5 + $0x1b20] ss:$28 sps:$4 sm:$0xff]   ;;  %v17726_v63 = vld [vmem:[#allocation5 + $0x1b28] ss:$28 sps:$4 sm:$0xff]  }
 0x244   :  { %9081 = vmatprep.mubr.bf16.mxu0 %v19967_v32  ;;  %9573 = vmatprep.mubr.bf16.mxu1 %v19967_v32 }
 0x246   :  { %9052 = vmatpush1.bf16.msra.mxu0 %v17657_v0  ;;  %9544 = vmatpush1.bf16.msra.mxu1 %v17660_v1  ;;  %v17731_v0 = vld [vmem:[#allocation5 + $0x1b5c] ss:$28 sps:$4 sm:$0xff]   ;;  %v17734_v1 = vld [vmem:[#allocation5 + $0x1b64] ss:$28 sps:$4 sm:$0xff]  }
 0x247   :  { %9053 = vmatprep.subr.bf16.mxu0 %v17665_v22  ;;  %9545 = vmatprep.subr.bf16.mxu1 %v17668_v3  ;;  %v17729_v22 = vld [vmem:[#allocation5 + $0x1b58] ss:$28 sps:$4 sm:$0xff]   ;;  %v17732_v3 = vld [vmem:[#allocation5 + $0x1b60] ss:$28 sps:$4 sm:$0xff]  }
 0x24a   :  { %9054 = vmatpush1.bf16.msra.mxu0 %v17663_v4  ;;  %9546 = vmatpush1.bf16.msra.mxu1 %v17666_v5  ;;  %v17737_v4 = vld [vmem:[#allocation5 + $0x1b94] ss:$28 sps:$4 sm:$0xff]   ;;  %v17740_v5 = vld [vmem:[#allocation5 + $0x1b9c] ss:$28 sps:$4 sm:$0xff]  }
 0x24b   :  { %9055 = vmatprep.subr.bf16.mxu0 %v17671_v6  ;;  %9547 = vmatprep.subr.bf16.mxu1 %v17674_v42  ;;  %v19973_v6 = vld [vmem:[#allocation2 + $0x20] sm:$0xff] }
 0x24c   :  { %v17735_v42 = vld [vmem:[#allocation5 + $0x1b90] ss:$28 sps:$4 sm:$0xff]  }
 0x24e   :  { %9056 = vmatpush1.bf16.msra.mxu0 %v17669_v8  ;;  %9548 = vmatpush1.bf16.msra.mxu1 %v17672_v10  ;;  %v17738_v8 = vld [vmem:[#allocation5 + $0x1b98] ss:$28 sps:$4 sm:$0xff]   ;;  %v17743_v10 = vld [vmem:[#allocation5 + $0x1bcc] ss:$28 sps:$4 sm:$0xff]  }
 0x24f   :  { %9057 = vmatprep.subr.bf16.mxu0 %v17677_v11  ;;  %9549 = vmatprep.subr.bf16.mxu1 %v17680_v12  ;;  %v17746_v11 = vld [vmem:[#allocation5 + $0x1bd4] ss:$28 sps:$4 sm:$0xff]   ;;  %v19977_v12 = vrot.slane %v19973_v6, %v19848_v49 }
 0x252   :  { %9058 = vmatpush1.bf16.msra.mxu0 %v17675_v14  ;;  %9550 = vmatpush1.bf16.msra.mxu1 %v17678_v15  ;;  %v17741_v14 = vld [vmem:[#allocation5 + $0x1bc8] ss:$28 sps:$4 sm:$0xff]   ;;  %v17744_v15 = vld [vmem:[#allocation5 + $0x1bd0] ss:$28 sps:$4 sm:$0xff]  }
 0x253   :  { %9059 = vmatprep.subr.bf16.mxu0 %v17683_v17  ;;  %9551 = vmatprep.subr.bf16.mxu1 %v17686_v18  ;;  %v17750_v17 = vld [vmem:[#allocation5 + $0x1c04] ss:$28 sps:$4 sm:$0xff]   ;;  %v17753_v18 = vld [vmem:[#allocation5 + $0x1c0c] ss:$28 sps:$4 sm:$0xff]  }
 0x256   :  { %9060 = vmatpush1.bf16.msra.mxu0 %v17681_v19  ;;  %9552 = vmatpush1.bf16.msra.mxu1 %v17684_v21  ;;  %v210_v19 = vcombine.high %v19977_v12, %v19977_v12  ;;  %v19983_v21 = vpack.c.bf16 %v19959_v51, %v19959_v51  ;;  %v17762_v51 = vld [vmem:[#allocation5 + $0x1c74] ss:$28 sps:$4 sm:$0xff]  }
 0x257   :  { %9061 = vmatprep.subr.bf16.mxu0 %v17689_v23  ;;  %9553 = vmatprep.subr.bf16.mxu1 %v17692_v25  ;;  %v17748_v23 = vld [vmem:[#allocation5 + $0x1c00] ss:$28 sps:$4 sm:$0xff]   ;;  %v17751_v25 = vld [vmem:[#allocation5 + $0x1c08] ss:$28 sps:$4 sm:$0xff]  }
 0x25a   :  { %9062 = vmatpush1.bf16.msra.mxu0 %v17687_v27  ;;  %9554 = vmatpush1.bf16.msra.mxu1 %v17690_v28  ;;  %v17756_v27 = vld [vmem:[#allocation5 + $0x1c3c] ss:$28 sps:$4 sm:$0xff]   ;;  %v17759_v28 = vld [vmem:[#allocation5 + $0x1c44] ss:$28 sps:$4 sm:$0xff]  }
 0x25b   :  { %9063 = vmatprep.subr.bf16.mxu0 %v17695_v9  ;;  %9555 = vmatprep.subr.bf16.mxu1 %v17698_v31  ;;  %v19985_v9 = vpack.c.bf16 %v210_v19, %v210_v19  ;;  %v17754_v31 = vld [vmem:[#allocation5 + $0x1c38] ss:$28 sps:$4 sm:$0xff]   ;;  %v17816_v19 = vld [vmem:[#allocation5 + $0x1e6c] ss:$28 sps:$4 sm:$0xff]  }
 0x25e   :  { %9064 = vmatpush1.bf16.msra.mxu0 %v17693_v33  ;;  %9556 = vmatpush1.bf16.msra.mxu1 %v17696_v35  ;;  %v17757_v33 = vld [vmem:[#allocation5 + $0x1c40] ss:$28 sps:$4 sm:$0xff]  }
 0x25f   :  { %9065 = vmatprep.subr.bf16.mxu0 %v17701_v36  ;;  %9557 = vmatprep.subr.bf16.mxu1 %v17704_v26  ;;  %v17765_v35 = vld [vmem:[#allocation5 + $0x1c7c] ss:$28 sps:$4 sm:$0xff]   ;;  %v17760_v36 = vld [vmem:[#allocation5 + $0x1c70] ss:$28 sps:$4 sm:$0xff]  }
 0x260   :  { %v17763_v26 = vld [vmem:[#allocation5 + $0x1c78] ss:$28 sps:$4 sm:$0xff]  }
 0x262   :  { %9066 = vmatpush1.bf16.msra.mxu0 %v17699_v39  ;;  %9558 = vmatpush1.bf16.msra.mxu1 %v17702_v2  ;;  %v17768_v39 = vld [vmem:[#allocation5 + $0x1cac] ss:$28 sps:$4 sm:$0xff]   ;;  %v17771_v2 = vld [vmem:[#allocation5 + $0x1cb4] ss:$28 sps:$4 sm:$0xff]  }
 0x263   :  { %9067 = vmatprep.subr.bf16.mxu0 %v17707_v40  ;;  %9559 = vmatprep.subr.bf16.mxu1 %v17710_v41  ;;  %v17766_v40 = vld [vmem:[#allocation5 + $0x1ca8] ss:$28 sps:$4 sm:$0xff]   ;;  %v17769_v41 = vld [vmem:[#allocation5 + $0x1cb0] ss:$28 sps:$4 sm:$0xff]  }
 0x266   :  { %9068 = vmatpush1.bf16.msra.mxu0 %v17705_v45  ;;  %9560 = vmatpush1.bf16.msra.mxu1 %v17708_v46  ;;  %v17774_v45 = vld [vmem:[#allocation5 + $0x1ce4] ss:$28 sps:$4 sm:$0xff]   ;;  %v17777_v46 = vld [vmem:[#allocation5 + $0x1cec] ss:$28 sps:$4 sm:$0xff]  }
 0x267   :  { %9069 = vmatprep.subr.bf16.mxu0 %v17713_v29  ;;  %9561 = vmatprep.subr.bf16.mxu1 %v17716_v48  ;;  %v17772_v29 = vld [vmem:[#allocation5 + $0x1ce0] ss:$28 sps:$4 sm:$0xff]   ;;  %v17775_v48 = vld [vmem:[#allocation5 + $0x1ce8] ss:$28 sps:$4 sm:$0xff]  }
 0x26a   :  { %9070 = vmatpush1.bf16.msra.mxu0 %v17711_v50  ;;  %9562 = vmatpush1.bf16.msra.mxu1 %v17714_v52  ;;  %v17780_v50 = vld [vmem:[#allocation5 + $0x1d1c] ss:$28 sps:$4 sm:$0xff]   ;;  %v17783_v52 = vld [vmem:[#allocation5 + $0x1d24] ss:$28 sps:$4 sm:$0xff]  }
 0x26b   :  { %9071 = vmatprep.subr.bf16.mxu0 %v17719_v53  ;;  %9563 = vmatprep.subr.bf16.mxu1 %v17722_v54  ;;  %v17778_v53 = vld [vmem:[#allocation5 + $0x1d18] ss:$28 sps:$4 sm:$0xff]   ;;  %v17781_v54 = vld [vmem:[#allocation5 + $0x1d20] ss:$28 sps:$4 sm:$0xff]  }
 0x26e   :  { %9072 = vmatpush1.bf16.msra.mxu0 %v17717_v56  ;;  %9564 = vmatpush1.bf16.msra.mxu1 %v17720_v47  ;;  %v17786_v56 = vld [vmem:[#allocation5 + $0x1d54] ss:$28 sps:$4 sm:$0xff]   ;;  %v17789_v47 = vld [vmem:[#allocation5 + $0x1d5c] ss:$28 sps:$4 sm:$0xff]  }
 0x26f   :  { %9073 = vmatprep.subr.bf16.mxu0 %v17725_v58  ;;  %9565 = vmatprep.subr.bf16.mxu1 %v17728_v61  ;;  %v17784_v58 = vld [vmem:[#allocation5 + $0x1d50] ss:$28 sps:$4 sm:$0xff]   ;;  %v17787_v61 = vld [vmem:[#allocation5 + $0x1d58] ss:$28 sps:$4 sm:$0xff]  }
 0x272   :  { %9074 = vmatpush1.bf16.msra.mxu0 %v17723_v62  ;;  %9566 = vmatpush1.bf16.msra.mxu1 %v17726_v63  ;;  %v17792_v62 = vld [vmem:[#allocation5 + $0x1d8c] ss:$28 sps:$4 sm:$0xff]   ;;  %v17795_v63 = vld [vmem:[#allocation5 + $0x1d94] ss:$28 sps:$4 sm:$0xff]  }
 0x273   :  { %9075 = vmatprep.subr.bf16.mxu0 %v17731_v0  ;;  %9567 = vmatprep.subr.bf16.mxu1 %v17734_v1  ;;  %v17790_v0 = vld [vmem:[#allocation5 + $0x1d88] ss:$28 sps:$4 sm:$0xff]   ;;  %v17793_v1 = vld [vmem:[#allocation5 + $0x1d90] ss:$28 sps:$4 sm:$0xff]  }
 0x276   :  { %9076 = vmatpush1.bf16.msra.mxu0 %v17729_v22  ;;  %9568 = vmatpush1.bf16.msra.mxu1 %v17732_v3  ;;  %v17798_v22 = vld [vmem:[#allocation5 + $0x1dc4] ss:$28 sps:$4 sm:$0xff]   ;;  %v17801_v3 = vld [vmem:[#allocation5 + $0x1dcc] ss:$28 sps:$4 sm:$0xff]  }
 0x277   :  { %9077 = vmatprep.subr.bf16.mxu0 %v17737_v4  ;;  %9569 = vmatprep.subr.bf16.mxu1 %v17740_v5  ;;  %v17796_v4 = vld [vmem:[#allocation5 + $0x1dc0] ss:$28 sps:$4 sm:$0xff]   ;;  %v17799_v5 = vld [vmem:[#allocation5 + $0x1dc8] ss:$28 sps:$4 sm:$0xff]  }
 0x27a   :  { %9078 = vmatpush1.bf16.msra.mxu0 %v17735_v42  ;;  %9570 = vmatpush1.bf16.msra.mxu1 %v17738_v8  ;;  %v17804_v42 = vld [vmem:[#allocation5 + $0x1dfc] ss:$28 sps:$4 sm:$0xff]   ;;  %v17807_v8 = vld [vmem:[#allocation5 + $0x1e04] ss:$28 sps:$4 sm:$0xff]  }
 0x27b   :  { %9079 = vmatprep.subr.bf16.mxu0 %v17743_v10  ;;  %9571 = vmatprep.subr.bf16.mxu1 %v17746_v11  ;;  %v17802_v10 = vld [vmem:[#allocation5 + $0x1df8] ss:$28 sps:$4 sm:$0xff]   ;;  %v17805_v11 = vld [vmem:[#allocation5 + $0x1e00] ss:$28 sps:$4 sm:$0xff]  }
 0x27e   :  { %9080 = vmatpush1.bf16.msra.mxu0 %v17741_v14  ;;  %9572 = vmatpush1.bf16.msra.mxu1 %v17744_v15  ;;  %v17810_v14 = vld [vmem:[#allocation5 + $0x1e34] ss:$28 sps:$4 sm:$0xff]   ;;  %v17813_v15 = vld [vmem:[#allocation5 + $0x1e3c] ss:$28 sps:$4 sm:$0xff]  }
 0x27f   :  { %9090 = vmatprep.subr.bf16.mxu0 %v17750_v17  ;;  %9582 = vmatprep.subr.bf16.mxu1 %v17753_v18  ;;  %v17808_v17 = vld [vmem:[#allocation5 + $0x1e30] ss:$28 sps:$4 sm:$0xff]   ;;  %v17811_v18 = vld [vmem:[#allocation5 + $0x1e38] ss:$28 sps:$4 sm:$0xff]  }
 0x281   :  { %9082 = vmatmul.mubr.bf16.vlgmr.msra.gmra.mrb[0].mxu0 %v19983_v21  ;;  %9574 = vmatmul.mubr.bf16.vlgmr.msra.gmra.mrb[0].mxu1 %v19983_v21 }
 0x282   :  { %9091 = vmatpush1.bf16.msra.mxu0 %v17748_v23  ;;  %9583 = vmatpush1.bf16.msra.mxu1 %v17751_v25  ;;  %v17819_v23 = vld [vmem:[#allocation5 + $0x1e74] ss:$28 sps:$4 sm:$0xff]   ;;  %v17814_v25 = vld [vmem:[#allocation5 + $0x1e68] ss:$28 sps:$4 sm:$0xff]  }
 0x283   :  { %9092 = vmatprep.subr.bf16.mxu0 %v17756_v27  ;;  %9584 = vmatprep.subr.bf16.mxu1 %v17759_v28  ;;  %v17817_v27 = vld [vmem:[#allocation5 + $0x1e70] ss:$28 sps:$4 sm:$0xff]   ;;  %v17822_v28 = vld [vmem:[#allocation5 + $0x1ea4] ss:$28 sps:$4 sm:$0xff]  }
 0x284   :  { %9122 = vmatprep.mubr.bf16.mxu0 %v19985_v9  ;;  %9614 = vmatprep.mubr.bf16.mxu1 %v19985_v9 }
 0x286   :  { %9093 = vmatpush1.bf16.msra.mxu0 %v17754_v31  ;;  %9585 = vmatpush1.bf16.msra.mxu1 %v17757_v33  ;;  %v17825_v31 = vld [vmem:[#allocation5 + $0x1eac] ss:$28 sps:$4 sm:$0xff]   ;;  %v17820_v33 = vld [vmem:[#allocation5 + $0x1ea0] ss:$28 sps:$4 sm:$0xff]  }
 0x287   :  { %9094 = vmatprep.subr.bf16.mxu0 %v17762_v51  ;;  %9586 = vmatprep.subr.bf16.mxu1 %v17765_v35  ;;  %v17823_v51 = vld [vmem:[#allocation5 + $0x1ea8] ss:$28 sps:$4 sm:$0xff]   ;;  %v17828_v35 = vld [vmem:[#allocation5 + $0x1edc] ss:$28 sps:$4 sm:$0xff]  }
 0x28a   :  { %9095 = vmatpush1.bf16.msra.mxu0 %v17760_v36  ;;  %9587 = vmatpush1.bf16.msra.mxu1 %v17763_v26  ;;  %v17831_v36 = vld [vmem:[#allocation5 + $0x1ee4] ss:$28 sps:$4 sm:$0xff]   ;;  %v17826_v26 = vld [vmem:[#allocation5 + $0x1ed8] ss:$28 sps:$4 sm:$0xff]  }
 0x28b   :  { %9096 = vmatprep.subr.bf16.mxu0 %v17768_v39  ;;  %9588 = vmatprep.subr.bf16.mxu1 %v17771_v2  ;;  %v17829_v39 = vld [vmem:[#allocation5 + $0x1ee0] ss:$28 sps:$4 sm:$0xff]   ;;  %v17834_v2 = vld [vmem:[#allocation5 + $0x1f14] ss:$28 sps:$4 sm:$0xff]  }
 0x28e   :  { %9097 = vmatpush1.bf16.msra.mxu0 %v17766_v40  ;;  %9589 = vmatpush1.bf16.msra.mxu1 %v17769_v41  ;;  %v17837_v40 = vld [vmem:[#allocation5 + $0x1f1c] ss:$28 sps:$4 sm:$0xff]   ;;  %v195_v41 = vcombine.high %v19973_v6, %v19973_v6 }
 0x28f   :  { %9098 = vmatprep.subr.bf16.mxu0 %v17774_v45  ;;  %9590 = vmatprep.subr.bf16.mxu1 %v17777_v46  ;;  %v17832_v45 = vld [vmem:[#allocation5 + $0x1f10] ss:$28 sps:$4 sm:$0xff]   ;;  %v17835_v46 = vld [vmem:[#allocation5 + $0x1f18] ss:$28 sps:$4 sm:$0xff]  }
 0x292   :  { %9099 = vmatpush1.bf16.msra.mxu0 %v17772_v29  ;;  %9591 = vmatpush1.bf16.msra.mxu1 %v17775_v48  ;;  %v17840_v29 = vld [vmem:[#allocation5 + $0x1f4c] ss:$28 sps:$4 sm:$0xff]   ;;  %v17843_v48 = vld [vmem:[#allocation5 + $0x1f54] ss:$28 sps:$4 sm:$0xff]  }
 0x293   :  { %9100 = vmatprep.subr.bf16.mxu0 %v17780_v50  ;;  %9592 = vmatprep.subr.bf16.mxu1 %v17783_v52  ;;  %v19994_v50 = vrot.slane %v195_v41, %v19848_v49  ;;  %v17838_v52 = vld [vmem:[#allocation5 + $0x1f48] ss:$28 sps:$4 sm:$0xff]   ;;  %v17892_v41 = vld [vmem:[#allocation5 + $0x2140] ss:$28 sps:$4 sm:$0xff]  }
 0x295   :  { %v211_v6 = vcombine.high %v19994_v50, %v19994_v50 }
 0x296   :  { %9101 = vmatpush1.bf16.msra.mxu0 %v17778_v53  ;;  %9593 = vmatpush1.bf16.msra.mxu1 %v17781_v54  ;;  %v17841_v53 = vld [vmem:[#allocation5 + $0x1f50] ss:$28 sps:$4 sm:$0xff]   ;;  %v17846_v54 = vld [vmem:[#allocation5 + $0x1f84] ss:$28 sps:$4 sm:$0xff]  }
 0x297   :  { %9102 = vmatprep.subr.bf16.mxu0 %v17786_v56  ;;  %9594 = vmatprep.subr.bf16.mxu1 %v17789_v47  ;;  %v17849_v56 = vld [vmem:[#allocation5 + $0x1f8c] ss:$28 sps:$4 sm:$0xff]   ;;  %v20000_v47 = vpack.c.bf16 %v19977_v12, %v19977_v12  ;;  %v17858_v12 = vld [vmem:[#allocation5 + $0x1ff4] ss:$28 sps:$4 sm:$0xff]  }
 0x29a   :  { %9103 = vmatpush1.bf16.msra.mxu0 %v17784_v58  ;;  %9595 = vmatpush1.bf16.msra.mxu1 %v17787_v61  ;;  %v17844_v58 = vld [vmem:[#allocation5 + $0x1f80] ss:$28 sps:$4 sm:$0xff]   ;;  %v17847_v61 = vld [vmem:[#allocation5 + $0x1f88] ss:$28 sps:$4 sm:$0xff]  }
 0x29b   :  { %9104 = vmatprep.subr.bf16.mxu0 %v17792_v62  ;;  %9596 = vmatprep.subr.bf16.mxu1 %v17795_v63  ;;  %v17852_v62 = vld [vmem:[#allocation5 + $0x1fbc] ss:$28 sps:$4 sm:$0xff]   ;;  %v17855_v63 = vld [vmem:[#allocation5 + $0x1fc4] ss:$28 sps:$4 sm:$0xff]  }
 0x29e   :  { %9105 = vmatpush1.bf16.msra.mxu0 %v17790_v0  ;;  %9597 = vmatpush1.bf16.msra.mxu1 %v17793_v1  ;;  %v20002_v0 = vpack.c.bf16 %v211_v6, %v211_v6  ;;  %v17850_v1 = vld [vmem:[#allocation5 + $0x1fb8] ss:$28 sps:$4 sm:$0xff]  }
 0x29f   :  { %9106 = vmatprep.subr.bf16.mxu0 %v17798_v22  ;;  %9598 = vmatprep.subr.bf16.mxu1 %v17801_v3  ;;  %v17853_v22 = vld [vmem:[#allocation5 + $0x1fc0] ss:$28 sps:$4 sm:$0xff]   ;;  %v17907_v6 = vld [vmem:[#allocation5 + $0x21b8] ss:$28 sps:$4 sm:$0xff]  }
 0x2a0   :  { %v17861_v3 = vld [vmem:[#allocation5 + $0x1ffc] ss:$28 sps:$4 sm:$0xff]  }
 0x2a2   :  { %9107 = vmatpush1.bf16.msra.mxu0 %v17796_v4  ;;  %9599 = vmatpush1.bf16.msra.mxu1 %v17799_v5  ;;  %v17856_v4 = vld [vmem:[#allocation5 + $0x1ff0] ss:$28 sps:$4 sm:$0xff]   ;;  %v17859_v5 = vld [vmem:[#allocation5 + $0x1ff8] ss:$28 sps:$4 sm:$0xff]  }
 0x2a3   :  { %9108 = vmatprep.subr.bf16.mxu0 %v17804_v42  ;;  %9600 = vmatprep.subr.bf16.mxu1 %v17807_v8  ;;  %v17864_v42 = vld [vmem:[#allocation5 + $0x202c] ss:$28 sps:$4 sm:$0xff]   ;;  %v17867_v8 = vld [vmem:[#allocation5 + $0x2034] ss:$28 sps:$4 sm:$0xff]  }
 0x2a6   :  { %9109 = vmatpush1.bf16.msra.mxu0 %v17802_v10  ;;  %9601 = vmatpush1.bf16.msra.mxu1 %v17805_v11  ;;  %v17862_v10 = vld [vmem:[#allocation5 + $0x2028] ss:$28 sps:$4 sm:$0xff]   ;;  %v17865_v11 = vld [vmem:[#allocation5 + $0x2030] ss:$28 sps:$4 sm:$0xff]  }
 0x2a7   :  { %9110 = vmatprep.subr.bf16.mxu0 %v17810_v14  ;;  %9602 = vmatprep.subr.bf16.mxu1 %v17813_v15  ;;  %v17870_v14 = vld [vmem:[#allocation5 + $0x2064] ss:$28 sps:$4 sm:$0xff]   ;;  %v17873_v15 = vld [vmem:[#allocation5 + $0x206c] ss:$28 sps:$4 sm:$0xff]  }
 0x2aa   :  { %9111 = vmatpush1.bf16.msra.mxu0 %v17808_v17  ;;  %9603 = vmatpush1.bf16.msra.mxu1 %v17811_v18  ;;  %v17868_v17 = vld [vmem:[#allocation5 + $0x2060] ss:$28 sps:$4 sm:$0xff]   ;;  %v17871_v18 = vld [vmem:[#allocation5 + $0x2068] ss:$28 sps:$4 sm:$0xff]  }
 0x2ab   :  { %9112 = vmatprep.subr.bf16.mxu0 %v17816_v19  ;;  %9604 = vmatprep.subr.bf16.mxu1 %v17819_v23  ;;  %v17876_v19 = vld [vmem:[#allocation5 + $0x209c] ss:$28 sps:$4 sm:$0xff]   ;;  %v17879_v23 = vld [vmem:[#allocation5 + $0x20a4] ss:$28 sps:$4 sm:$0xff]  }
 0x2ae   :  { %9113 = vmatpush1.bf16.msra.mxu0 %v17814_v25  ;;  %9605 = vmatpush1.bf16.msra.mxu1 %v17817_v27  ;;  %v17874_v25 = vld [vmem:[#allocation5 + $0x2098] ss:$28 sps:$4 sm:$0xff]   ;;  %v17877_v27 = vld [vmem:[#allocation5 + $0x20a0] ss:$28 sps:$4 sm:$0xff]  }
 0x2af   :  { %9114 = vmatprep.subr.bf16.mxu0 %v17822_v28  ;;  %9606 = vmatprep.subr.bf16.mxu1 %v17825_v31  ;;  %v17882_v28 = vld [vmem:[#allocation5 + $0x20d4] ss:$28 sps:$4 sm:$0xff]   ;;  %v17885_v31 = vld [vmem:[#allocation5 + $0x20dc] ss:$28 sps:$4 sm:$0xff]  }
 0x2b2   :  { %9115 = vmatpush1.bf16.msra.mxu0 %v17820_v33  ;;  %9607 = vmatpush1.bf16.msra.mxu1 %v17823_v51  ;;  %v17880_v33 = vld [vmem:[#allocation5 + $0x20d0] ss:$28 sps:$4 sm:$0xff]   ;;  %v17883_v51 = vld [vmem:[#allocation5 + $0x20d8] ss:$28 sps:$4 sm:$0xff]  }
 0x2b3   :  { %9116 = vmatprep.subr.bf16.mxu0 %v17828_v35  ;;  %9608 = vmatprep.subr.bf16.mxu1 %v17831_v36  ;;  %v17888_v35 = vld [vmem:[#allocation5 + $0x210c] ss:$28 sps:$4 sm:$0xff]   ;;  %v17891_v36 = vld [vmem:[#allocation5 + $0x2114] ss:$28 sps:$4 sm:$0xff]  }
 0x2b6   :  { %9117 = vmatpush1.bf16.msra.mxu0 %v17826_v26  ;;  %9609 = vmatpush1.bf16.msra.mxu1 %v17829_v39  ;;  %v17886_v26 = vld [vmem:[#allocation5 + $0x2108] ss:$28 sps:$4 sm:$0xff]   ;;  %v17889_v39 = vld [vmem:[#allocation5 + $0x2110] ss:$28 sps:$4 sm:$0xff]  }
 0x2b7   :  { %9118 = vmatprep.subr.bf16.mxu0 %v17834_v2  ;;  %9610 = vmatprep.subr.bf16.mxu1 %v17837_v40  ;;  %v17894_v2 = vld [vmem:[#allocation5 + $0x2144] ss:$28 sps:$4 sm:$0xff]   ;;  %v17897_v40 = vld [vmem:[#allocation5 + $0x214c] ss:$28 sps:$4 sm:$0xff]  }
 0x2ba   :  { %9119 = vmatpush1.bf16.msra.mxu0 %v17832_v45  ;;  %9611 = vmatpush1.bf16.msra.mxu1 %v17835_v46  ;;  %v17895_v45 = vld [vmem:[#allocation5 + $0x2148] ss:$28 sps:$4 sm:$0xff]   ;;  %v17900_v46 = vld [vmem:[#allocation5 + $0x217c] ss:$28 sps:$4 sm:$0xff]  }
 0x2bb   :  { %9120 = vmatprep.subr.bf16.mxu0 %v17840_v29  ;;  %9612 = vmatprep.subr.bf16.mxu1 %v17843_v48  ;;  %v17903_v29 = vld [vmem:[#allocation5 + $0x2184] ss:$28 sps:$4 sm:$0xff]   ;;  %v17898_v48 = vld [vmem:[#allocation5 + $0x2178] ss:$28 sps:$4 sm:$0xff]  }
 0x2be   :  { %9121 = vmatpush1.bf16.msra.mxu0 %v17838_v52  ;;  %9613 = vmatpush1.bf16.msra.mxu1 %v17841_v53  ;;  %v17901_v52 = vld [vmem:[#allocation5 + $0x2180] ss:$28 sps:$4 sm:$0xff]   ;;  %v17906_v53 = vld [vmem:[#allocation5 + $0x21b4] ss:$28 sps:$4 sm:$0xff]  }
 0x2bf   :  { %9131 = vmatprep.subr.bf16.mxu0 %v17846_v54  ;;  %9623 = vmatprep.subr.bf16.mxu1 %v17849_v56  ;;  %v17909_v54 = vld [vmem:[#allocation5 + $0x21bc] ss:$28 sps:$4 sm:$0xff]   ;;  %v17904_v56 = vld [vmem:[#allocation5 + $0x21b0] ss:$28 sps:$4 sm:$0xff]  }
 0x2c1   :  { %9123 = vmatmul.mubr.bf16.vlgmr.msra.gmra.mrb[0].mxu0 %v20000_v47  ;;  %9615 = vmatmul.mubr.bf16.vlgmr.msra.gmra.mrb[0].mxu1 %v20000_v47 }
 0x2c2   :  { %9132 = vmatpush1.bf16.msra.mxu0 %v17844_v58  ;;  %9624 = vmatpush1.bf16.msra.mxu1 %v17847_v61  ;;  %v17912_v58 = vld [vmem:[#allocation5 + $0x21ec] ss:$28 sps:$4 sm:$0xff]   ;;  %v17915_v61 = vld [vmem:[#allocation5 + $0x21f4] ss:$28 sps:$4 sm:$0xff]  }
 0x2c3   :  { %9133 = vmatprep.subr.bf16.mxu0 %v17852_v62  ;;  %9625 = vmatprep.subr.bf16.mxu1 %v17855_v63  ;;  %v17910_v62 = vld [vmem:[#allocation5 + $0x21e8] ss:$28 sps:$4 sm:$0xff]   ;;  %v17913_v63 = vld [vmem:[#allocation5 + $0x21f0] ss:$28 sps:$4 sm:$0xff]  }
 0x2c4   :  { %9163 = vmatprep.mubr.bf16.mxu0 %v20002_v0  ;;  %9655 = vmatprep.mubr.bf16.mxu1 %v20002_v0 }
 0x2c6   :  { %9134 = vmatpush1.bf16.msra.mxu0 %v17850_v1  ;;  %9626 = vmatpush1.bf16.msra.mxu1 %v17853_v22  ;;  %v17918_v1 = vld [vmem:[#allocation5 + $0x2224] ss:$28 sps:$4 sm:$0xff]   ;;  %v17921_v22 = vld [vmem:[#allocation5 + $0x222c] ss:$28 sps:$4 sm:$0xff]  }
 0x2c7   :  { %9135 = vmatprep.subr.bf16.mxu0 %v17858_v12  ;;  %9627 = vmatprep.subr.bf16.mxu1 %v17861_v3  ;;  %v17916_v12 = vld [vmem:[#allocation5 + $0x2220] ss:$28 sps:$4 sm:$0xff]   ;;  %v17919_v3 = vld [vmem:[#allocation5 + $0x2228] ss:$28 sps:$4 sm:$0xff]  }
 0x2ca   :  { %9136 = vmatpush1.bf16.msra.mxu0 %v17856_v4  ;;  %9628 = vmatpush1.bf16.msra.mxu1 %v17859_v5  ;;  %v17924_v4 = vld [vmem:[#allocation5 + $0x225c] ss:$28 sps:$4 sm:$0xff]   ;;  %v17927_v5 = vld [vmem:[#allocation5 + $0x2264] ss:$28 sps:$4 sm:$0xff]  }
 0x2cb   :  { %9137 = vmatprep.subr.bf16.mxu0 %v17864_v42  ;;  %9629 = vmatprep.subr.bf16.mxu1 %v17867_v8  ;;  %v17922_v42 = vld [vmem:[#allocation5 + $0x2258] ss:$28 sps:$4 sm:$0xff]   ;;  %v17925_v8 = vld [vmem:[#allocation5 + $0x2260] ss:$28 sps:$4 sm:$0xff]  }
 0x2ce   :  { %9138 = vmatpush1.bf16.msra.mxu0 %v17862_v10  ;;  %9630 = vmatpush1.bf16.msra.mxu1 %v17865_v11  ;;  %v17930_v10 = vld [vmem:[#allocation5 + $0x2294] ss:$28 sps:$4 sm:$0xff]   ;;  %v17933_v11 = vld [vmem:[#allocation5 + $0x229c] ss:$28 sps:$4 sm:$0xff]  }
 0x2cf   :  { %9139 = vmatprep.subr.bf16.mxu0 %v17870_v14  ;;  %9631 = vmatprep.subr.bf16.mxu1 %v17873_v15  ;;  %v20008_v14 = vld [vmem:[#allocation2 + $0x28] sm:$0xff]  ;;  %v17928_v15 = vld [vmem:[#allocation5 + $0x2290] ss:$28 sps:$4 sm:$0xff]  }
 0x2d2   :  { %9140 = vmatpush1.bf16.msra.mxu0 %v17868_v17  ;;  %9632 = vmatpush1.bf16.msra.mxu1 %v17871_v18  ;;  %v17931_v17 = vld [vmem:[#allocation5 + $0x2298] ss:$28 sps:$4 sm:$0xff]   ;;  %v17936_v18 = vld [vmem:[#allocation5 + $0x22cc] ss:$28 sps:$4 sm:$0xff]  }
 0x2d3   :  { %9141 = vmatprep.subr.bf16.mxu0 %v17876_v19  ;;  %9633 = vmatprep.subr.bf16.mxu1 %v17879_v23  ;;  %v17939_v19 = vld [vmem:[#allocation5 + $0x22d4] ss:$28 sps:$4 sm:$0xff]   ;;  %v20012_v23 = vrot.slane %v20008_v14, %v19848_v49 }
 0x2d6   :  { %9142 = vmatpush1.bf16.msra.mxu0 %v17874_v25  ;;  %9634 = vmatpush1.bf16.msra.mxu1 %v17877_v27  ;;  %v17934_v25 = vld [vmem:[#allocation5 + $0x22c8] ss:$28 sps:$4 sm:$0xff]   ;;  %v17937_v27 = vld [vmem:[#allocation5 + $0x22d0] ss:$28 sps:$4 sm:$0xff]  }
 0x2d7   :  { %9143 = vmatprep.subr.bf16.mxu0 %v17882_v28  ;;  %9635 = vmatprep.subr.bf16.mxu1 %v17885_v31  ;;  %v17943_v28 = vld [vmem:[#allocation5 + $0x2304] ss:$28 sps:$4 sm:$0xff]   ;;  %v17946_v31 = vld [vmem:[#allocation5 + $0x230c] ss:$28 sps:$4 sm:$0xff]  }
 0x2da   :  { %9144 = vmatpush1.bf16.msra.mxu0 %v17880_v33  ;;  %9636 = vmatpush1.bf16.msra.mxu1 %v17883_v51  ;;  %v17941_v33 = vld [vmem:[#allocation5 + $0x2300] ss:$28 sps:$4 sm:$0xff]   ;;  %v17944_v51 = vld [vmem:[#allocation5 + $0x2308] ss:$28 sps:$4 sm:$0xff]  }
 0x2db   :  { %9145 = vmatprep.subr.bf16.mxu0 %v17888_v35  ;;  %9637 = vmatprep.subr.bf16.mxu1 %v17891_v36  ;;  %v227_v35 = vcombine.high %v20012_v23, %v20012_v23  ;;  %v20018_v36 = vpack.c.bf16 %v19994_v50, %v19994_v50  ;;  %v17958_v50 = vld [vmem:[#allocation5 + $0x237c] ss:$28 sps:$4 sm:$0xff]  }
 0x2de   :  { %9146 = vmatpush1.bf16.msra.mxu0 %v17886_v26  ;;  %9638 = vmatpush1.bf16.msra.mxu1 %v17889_v39  ;;  %v17949_v26 = vld [vmem:[#allocation5 + $0x233c] ss:$28 sps:$4 sm:$0xff]   ;;  %v17952_v39 = vld [vmem:[#allocation5 + $0x2344] ss:$28 sps:$4 sm:$0xff]  }
 0x2df   :  { %9147 = vmatprep.subr.bf16.mxu0 %v17894_v2  ;;  %9639 = vmatprep.subr.bf16.mxu1 %v17897_v40  ;;  %v17947_v2 = vld [vmem:[#allocation5 + $0x2338] ss:$28 sps:$4 sm:$0xff]   ;;  %v20020_v40 = vpack.c.bf16 %v227_v35, %v227_v35  ;;  %v18001_v35 = vld [vmem:[#allocation5 + $0x2530] ss:$28 sps:$4 sm:$0xff]  }
 0x2e2   :  { %9148 = vmatpush1.bf16.msra.mxu0 %v17892_v41  ;;  %9640 = vmatpush1.bf16.msra.mxu1 %v17895_v45  ;;  %v17950_v41 = vld [vmem:[#allocation5 + $0x2340] ss:$28 sps:$4 sm:$0xff]   ;;  %v17955_v45 = vld [vmem:[#allocation5 + $0x2374] ss:$28 sps:$4 sm:$0xff]  }
 0x2e3   :  { %9149 = vmatprep.subr.bf16.mxu0 %v17900_v46  ;;  %9641 = vmatprep.subr.bf16.mxu1 %v17903_v29  ;;  %v17953_v46 = vld [vmem:[#allocation5 + $0x2370] ss:$28 sps:$4 sm:$0xff]   ;;  %v17956_v29 = vld [vmem:[#allocation5 + $0x2378] ss:$28 sps:$4 sm:$0xff]  }
 0x2e6   :  { %9150 = vmatpush1.bf16.msra.mxu0 %v17898_v48  ;;  %9642 = vmatpush1.bf16.msra.mxu1 %v17901_v52  ;;  %v17961_v48 = vld [vmem:[#allocation5 + $0x23ac] ss:$28 sps:$4 sm:$0xff]   ;;  %v17964_v52 = vld [vmem:[#allocation5 + $0x23b4] ss:$28 sps:$4 sm:$0xff]  }
 0x2e7   :  { %9151 = vmatprep.subr.bf16.mxu0 %v17906_v53  ;;  %9643 = vmatprep.subr.bf16.mxu1 %v17909_v54  ;;  %v17959_v53 = vld [vmem:[#allocation5 + $0x23a8] ss:$28 sps:$4 sm:$0xff]   ;;  %v17962_v54 = vld [vmem:[#allocation5 + $0x23b0] ss:$28 sps:$4 sm:$0xff]  }
 0x2ea   :  { %9152 = vmatpush1.bf16.msra.mxu0 %v17904_v56  ;;  %9644 = vmatpush1.bf16.msra.mxu1 %v17907_v6  ;;  %v17967_v56 = vld [vmem:[#allocation5 + $0x23e4] ss:$28 sps:$4 sm:$0xff]   ;;  %v17970_v6 = vld [vmem:[#allocation5 + $0x23ec] ss:$28 sps:$4 sm:$0xff]  }
 0x2eb   :  { %9153 = vmatprep.subr.bf16.mxu0 %v17912_v58  ;;  %9645 = vmatprep.subr.bf16.mxu1 %v17915_v61  ;;  %v17965_v58 = vld [vmem:[#allocation5 + $0x23e0] ss:$28 sps:$4 sm:$0xff]   ;;  %v17968_v61 = vld [vmem:[#allocation5 + $0x23e8] ss:$28 sps:$4 sm:$0xff]  }
 0x2ee   :  { %9154 = vmatpush1.bf16.msra.mxu0 %v17910_v62  ;;  %9646 = vmatpush1.bf16.msra.mxu1 %v17913_v63  ;;  %v17973_v62 = vld [vmem:[#allocation5 + $0x241c] ss:$28 sps:$4 sm:$0xff]   ;;  %v17976_v63 = vld [vmem:[#allocation5 + $0x2424] ss:$28 sps:$4 sm:$0xff]  }
 0x2ef   :  { %9155 = vmatprep.subr.bf16.mxu0 %v17918_v1  ;;  %9647 = vmatprep.subr.bf16.mxu1 %v17921_v22  ;;  %v17971_v1 = vld [vmem:[#allocation5 + $0x2418] ss:$28 sps:$4 sm:$0xff]   ;;  %v17974_v22 = vld [vmem:[#allocation5 + $0x2420] ss:$28 sps:$4 sm:$0xff]  }
 0x2f2   :  { %9156 = vmatpush1.bf16.msra.mxu0 %v17916_v12  ;;  %9648 = vmatpush1.bf16.msra.mxu1 %v17919_v3  ;;  %v17979_v12 = vld [vmem:[#allocation5 + $0x2454] ss:$28 sps:$4 sm:$0xff]   ;;  %v17982_v3 = vld [vmem:[#allocation5 + $0x245c] ss:$28 sps:$4 sm:$0xff]  }
 0x2f3   :  { %9157 = vmatprep.subr.bf16.mxu0 %v17924_v4  ;;  %9649 = vmatprep.subr.bf16.mxu1 %v17927_v5  ;;  %v17977_v4 = vld [vmem:[#allocation5 + $0x2450] ss:$28 sps:$4 sm:$0xff]   ;;  %v17980_v5 = vld [vmem:[#allocation5 + $0x2458] ss:$28 sps:$4 sm:$0xff]  }
 0x2f6   :  { %9158 = vmatpush1.bf16.msra.mxu0 %v17922_v42  ;;  %9650 = vmatpush1.bf16.msra.mxu1 %v17925_v8  ;;  %v17985_v42 = vld [vmem:[#allocation5 + $0x248c] ss:$28 sps:$4 sm:$0xff]   ;;  %v17988_v8 = vld [vmem:[#allocation5 + $0x2494] ss:$28 sps:$4 sm:$0xff]  }
 0x2f7   :  { %9159 = vmatprep.subr.bf16.mxu0 %v17930_v10  ;;  %9651 = vmatprep.subr.bf16.mxu1 %v17933_v11  ;;  %v17983_v10 = vld [vmem:[#allocation5 + $0x2488] ss:$28 sps:$4 sm:$0xff]   ;;  %v17986_v11 = vld [vmem:[#allocation5 + $0x2490] ss:$28 sps:$4 sm:$0xff]  }
 0x2fa   :  { %9160 = vmatpush1.bf16.msra.mxu0 %v17928_v15  ;;  %9652 = vmatpush1.bf16.msra.mxu1 %v17931_v17  ;;  %v17991_v15 = vld [vmem:[#allocation5 + $0x24c4] ss:$28 sps:$4 sm:$0xff]   ;;  %v17994_v17 = vld [vmem:[#allocation5 + $0x24cc] ss:$28 sps:$4 sm:$0xff]  }
 0x2fb   :  { %9161 = vmatprep.subr.bf16.mxu0 %v17936_v18  ;;  %9653 = vmatprep.subr.bf16.mxu1 %v17939_v19  ;;  %v17989_v18 = vld [vmem:[#allocation5 + $0x24c0] ss:$28 sps:$4 sm:$0xff]   ;;  %v17992_v19 = vld [vmem:[#allocation5 + $0x24c8] ss:$28 sps:$4 sm:$0xff]  }
 0x2fe   :  { %9162 = vmatpush1.bf16.msra.mxu0 %v17934_v25  ;;  %9654 = vmatpush1.bf16.msra.mxu1 %v17937_v27  ;;  %v17997_v25 = vld [vmem:[#allocation5 + $0x24fc] ss:$28 sps:$4 sm:$0xff]   ;;  %v18000_v27 = vld [vmem:[#allocation5 + $0x2504] ss:$28 sps:$4 sm:$0xff]  }
 0x2ff   :  { %9172 = vmatprep.subr.bf16.mxu0 %v17943_v28  ;;  %9664 = vmatprep.subr.bf16.mxu1 %v17946_v31  ;;  %v17995_v28 = vld [vmem:[#allocation5 + $0x24f8] ss:$28 sps:$4 sm:$0xff]   ;;  %v17998_v31 = vld [vmem:[#allocation5 + $0x2500] ss:$28 sps:$4 sm:$0xff]  }
 0x301   :  { %9164 = vmatmul.mubr.bf16.vlgmr.msra.gmra.mrb[0].mxu0 %v20018_v36  ;;  %9656 = vmatmul.mubr.bf16.vlgmr.msra.gmra.mrb[0].mxu1 %v20018_v36 }
 0x302   :  { %9173 = vmatpush1.bf16.msra.mxu0 %v17941_v33  ;;  %9665 = vmatpush1.bf16.msra.mxu1 %v17944_v51  ;;  %v18003_v33 = vld [vmem:[#allocation5 + $0x2534] ss:$28 sps:$4 sm:$0xff]   ;;  %v18006_v51 = vld [vmem:[#allocation5 + $0x253c] ss:$28 sps:$4 sm:$0xff]  }
 0x303   :  { %9174 = vmatprep.subr.bf16.mxu0 %v17949_v26  ;;  %9666 = vmatprep.subr.bf16.mxu1 %v17952_v39  ;;  %v18004_v26 = vld [vmem:[#allocation5 + $0x2538] ss:$28 sps:$4 sm:$0xff]   ;;  %v18009_v39 = vld [vmem:[#allocation5 + $0x256c] ss:$28 sps:$4 sm:$0xff]  }
 0x304   :  { %9204 = vmatprep.mubr.bf16.mxu0 %v20020_v40  ;;  %9696 = vmatprep.mubr.bf16.mxu1 %v20020_v40 }
 0x306   :  { %9175 = vmatpush1.bf16.msra.mxu0 %v17947_v2  ;;  %9667 = vmatpush1.bf16.msra.mxu1 %v17950_v41  ;;  %v18012_v2 = vld [vmem:[#allocation5 + $0x2574] ss:$28 sps:$4 sm:$0xff]   ;;  %v18007_v41 = vld [vmem:[#allocation5 + $0x2568] ss:$28 sps:$4 sm:$0xff]  }
 0x307   :  { %9176 = vmatprep.subr.bf16.mxu0 %v17955_v45  ;;  %9668 = vmatprep.subr.bf16.mxu1 %v17958_v50  ;;  %v18010_v45 = vld [vmem:[#allocation5 + $0x2570] ss:$28 sps:$4 sm:$0xff]   ;;  %v18015_v50 = vld [vmem:[#allocation5 + $0x25a4] ss:$28 sps:$4 sm:$0xff]  }
 0x30a   :  { %9177 = vmatpush1.bf16.msra.mxu0 %v17953_v46  ;;  %9669 = vmatpush1.bf16.msra.mxu1 %v17956_v29  ;;  %v18018_v46 = vld [vmem:[#allocation5 + $0x25ac] ss:$28 sps:$4 sm:$0xff]   ;;  %v18013_v29 = vld [vmem:[#allocation5 + $0x25a0] ss:$28 sps:$4 sm:$0xff]  }
 0x30b   :  { %9178 = vmatprep.subr.bf16.mxu0 %v17961_v48  ;;  %9670 = vmatprep.subr.bf16.mxu1 %v17964_v52  ;;  %v18016_v48 = vld [vmem:[#allocation5 + $0x25a8] ss:$28 sps:$4 sm:$0xff]   ;;  %v18021_v52 = vld [vmem:[#allocation5 + $0x25dc] ss:$28 sps:$4 sm:$0xff]  }
 0x30e   :  { %9179 = vmatpush1.bf16.msra.mxu0 %v17959_v53  ;;  %9671 = vmatpush1.bf16.msra.mxu1 %v17962_v54  ;;  %v18024_v53 = vld [vmem:[#allocation5 + $0x25e4] ss:$28 sps:$4 sm:$0xff]   ;;  %v18019_v54 = vld [vmem:[#allocation5 + $0x25d8] ss:$28 sps:$4 sm:$0xff]  }
 0x30f   :  { %9180 = vmatprep.subr.bf16.mxu0 %v17967_v56  ;;  %9672 = vmatprep.subr.bf16.mxu1 %v17970_v6  ;;  %v18022_v56 = vld [vmem:[#allocation5 + $0x25e0] ss:$28 sps:$4 sm:$0xff]   ;;  %v18027_v6 = vld [vmem:[#allocation5 + $0x2614] ss:$28 sps:$4 sm:$0xff]  }
 0x312   :  { %9181 = vmatpush1.bf16.msra.mxu0 %v17965_v58  ;;  %9673 = vmatpush1.bf16.msra.mxu1 %v17968_v61  ;;  %v18030_v58 = vld [vmem:[#allocation5 + $0x261c] ss:$28 sps:$4 sm:$0xff]   ;;  %v18025_v61 = vld [vmem:[#allocation5 + $0x2610] ss:$28 sps:$4 sm:$0xff]  }
 0x313   :  { %9182 = vmatprep.subr.bf16.mxu0 %v17973_v62  ;;  %9674 = vmatprep.subr.bf16.mxu1 %v17976_v63  ;;  %v212_v62 = vcombine.high %v20008_v14, %v20008_v14  ;;  %v18028_v63 = vld [vmem:[#allocation5 + $0x2618] ss:$28 sps:$4 sm:$0xff]  }
 0x316   :  { %9183 = vmatpush1.bf16.msra.mxu0 %v17971_v1  ;;  %9675 = vmatpush1.bf16.msra.mxu1 %v17974_v22  ;;  %v18033_v1 = vld [vmem:[#allocation5 + $0x264c] ss:$28 sps:$4 sm:$0xff]   ;;  %v18036_v22 = vld [vmem:[#allocation5 + $0x2654] ss:$28 sps:$4 sm:$0xff]  }
 0x317   :  { %9184 = vmatprep.subr.bf16.mxu0 %v17979_v12  ;;  %9676 = vmatprep.subr.bf16.mxu1 %v17982_v3  ;;  %v18031_v12 = vld [vmem:[#allocation5 + $0x2648] ss:$28 sps:$4 sm:$0xff]   ;;  %v20029_v3 = vrot.slane %v212_v62, %v19848_v49  ;;  %v18045_v49 = vld [vmem:[#allocation5 + $0x26bc] ss:$28 sps:$4 sm:$0xff]  }
 0x318   :  { %v18087_v62 = vld [vmem:[#allocation5 + $0x2844] ss:$28 sps:$4 sm:$0xff]  }
 0x319   :  { %v228_v14 = vcombine.high %v20029_v3, %v20029_v3 }
 0x31a   :  { %9185 = vmatpush1.bf16.msra.mxu0 %v17977_v4  ;;  %9677 = vmatpush1.bf16.msra.mxu1 %v17980_v5  ;;  %v18034_v4 = vld [vmem:[#allocation5 + $0x2650] ss:$28 sps:$4 sm:$0xff]   ;;  %v18039_v5 = vld [vmem:[#allocation5 + $0x2684] ss:$28 sps:$4 sm:$0xff]  }
 0x31b   :  { %9186 = vmatprep.subr.bf16.mxu0 %v17985_v42  ;;  %9678 = vmatprep.subr.bf16.mxu1 %v17988_v8  ;;  %v18042_v42 = vld [vmem:[#allocation5 + $0x268c] ss:$28 sps:$4 sm:$0xff]   ;;  %v18037_v8 = vld [vmem:[#allocation5 + $0x2680] ss:$28 sps:$4 sm:$0xff]  }
 0x31e   :  { %9187 = vmatpush1.bf16.msra.mxu0 %v17983_v10  ;;  %9679 = vmatpush1.bf16.msra.mxu1 %v17986_v11  ;;  %v20035_v10 = vpack.c.bf16 %v20012_v23, %v20012_v23  ;;  %v18040_v11 = vld [vmem:[#allocation5 + $0x2688] ss:$28 sps:$4 sm:$0xff]   ;;  %v18054_v23 = vld [vmem:[#allocation5 + $0x26fc] ss:$28 sps:$4 sm:$0xff]  }
 0x31f   :  { %9188 = vmatprep.subr.bf16.mxu0 %v17991_v15  ;;  %9680 = vmatprep.subr.bf16.mxu1 %v17994_v17  ;;  %v18048_v15 = vld [vmem:[#allocation5 + $0x26c4] ss:$28 sps:$4 sm:$0xff]   ;;  %v18043_v17 = vld [vmem:[#allocation5 + $0x26b8] ss:$28 sps:$4 sm:$0xff]  }
 0x322   :  { %9189 = vmatpush1.bf16.msra.mxu0 %v17989_v18  ;;  %9681 = vmatpush1.bf16.msra.mxu1 %v17992_v19  ;;  %v20037_v18 = vpack.c.bf16 %v228_v14, %v228_v14  ;;  %v18046_v19 = vld [vmem:[#allocation5 + $0x26c0] ss:$28 sps:$4 sm:$0xff]  }
 0x323   :  { %9190 = vmatprep.subr.bf16.mxu0 %v17997_v25  ;;  %9682 = vmatprep.subr.bf16.mxu1 %v18000_v27  ;;  %v18051_v25 = vld [vmem:[#allocation5 + $0x26f4] ss:$28 sps:$4 sm:$0xff]   ;;  %v18102_v14 = vld [vmem:[#allocation5 + $0x28bc] ss:$28 sps:$4 sm:$0xff]  }
 0x324   :  { %v18049_v27 = vld [vmem:[#allocation5 + $0x26f0] ss:$28 sps:$4 sm:$0xff]  }
 0x326   :  { %9191 = vmatpush1.bf16.msra.mxu0 %v17995_v28  ;;  %9683 = vmatpush1.bf16.msra.mxu1 %v17998_v31  ;;  %v18052_v28 = vld [vmem:[#allocation5 + $0x26f8] ss:$28 sps:$4 sm:$0xff]   ;;  %v18057_v31 = vld [vmem:[#allocation5 + $0x272c] ss:$28 sps:$4 sm:$0xff]  }
 0x327   :  { %9192 = vmatprep.subr.bf16.mxu0 %v18003_v33  ;;  %9684 = vmatprep.subr.bf16.mxu1 %v18006_v51  ;;  %v18060_v33 = vld [vmem:[#allocation5 + $0x2734] ss:$28 sps:$4 sm:$0xff]   ;;  %v18055_v51 = vld [vmem:[#allocation5 + $0x2728] ss:$28 sps:$4 sm:$0xff]  }
 0x32a   :  { %9193 = vmatpush1.bf16.msra.mxu0 %v18001_v35  ;;  %9685 = vmatpush1.bf16.msra.mxu1 %v18004_v26  ;;  %v18058_v35 = vld [vmem:[#allocation5 + $0x2730] ss:$28 sps:$4 sm:$0xff]   ;;  %v18063_v26 = vld [vmem:[#allocation5 + $0x2764] ss:$28 sps:$4 sm:$0xff]  }
 0x32b   :  { %9194 = vmatprep.subr.bf16.mxu0 %v18009_v39  ;;  %9686 = vmatprep.subr.bf16.mxu1 %v18012_v2  ;;  %v18066_v39 = vld [vmem:[#allocation5 + $0x276c] ss:$28 sps:$4 sm:$0xff]   ;;  %v18061_v2 = vld [vmem:[#allocation5 + $0x2760] ss:$28 sps:$4 sm:$0xff]  }
 0x32e   :  { %9195 = vmatpush1.bf16.msra.mxu0 %v18007_v41  ;;  %9687 = vmatpush1.bf16.msra.mxu1 %v18010_v45  ;;  %v18064_v41 = vld [vmem:[#allocation5 + $0x2768] ss:$28 sps:$4 sm:$0xff]   ;;  %v18069_v45 = vld [vmem:[#allocation5 + $0x279c] ss:$28 sps:$4 sm:$0xff]  }
 0x32f   :  { %9196 = vmatprep.subr.bf16.mxu0 %v18015_v50  ;;  %9688 = vmatprep.subr.bf16.mxu1 %v18018_v46  ;;  %v18072_v50 = vld [vmem:[#allocation5 + $0x27a4] ss:$28 sps:$4 sm:$0xff]   ;;  %v18067_v46 = vld [vmem:[#allocation5 + $0x2798] ss:$28 sps:$4 sm:$0xff]  }
 0x332   :  { %9197 = vmatpush1.bf16.msra.mxu0 %v18013_v29  ;;  %9689 = vmatpush1.bf16.msra.mxu1 %v18016_v48  ;;  %v18070_v29 = vld [vmem:[#allocation5 + $0x27a0] ss:$28 sps:$4 sm:$0xff]   ;;  %v18075_v48 = vld [vmem:[#allocation5 + $0x27d4] ss:$28 sps:$4 sm:$0xff]  }
 0x333   :  { %9198 = vmatprep.subr.bf16.mxu0 %v18021_v52  ;;  %9690 = vmatprep.subr.bf16.mxu1 %v18024_v53  ;;  %v18078_v52 = vld [vmem:[#allocation5 + $0x27dc] ss:$28 sps:$4 sm:$0xff]   ;;  %v18073_v53 = vld [vmem:[#allocation5 + $0x27d0] ss:$28 sps:$4 sm:$0xff]  }
 0x336   :  { %9199 = vmatpush1.bf16.msra.mxu0 %v18019_v54  ;;  %9691 = vmatpush1.bf16.msra.mxu1 %v18022_v56  ;;  %v18076_v54 = vld [vmem:[#allocation5 + $0x27d8] ss:$28 sps:$4 sm:$0xff]   ;;  %v18081_v56 = vld [vmem:[#allocation5 + $0x280c] ss:$28 sps:$4 sm:$0xff]  }
 0x337   :  { %9200 = vmatprep.subr.bf16.mxu0 %v18027_v6  ;;  %9692 = vmatprep.subr.bf16.mxu1 %v18030_v58  ;;  %v18084_v6 = vld [vmem:[#allocation5 + $0x2814] ss:$28 sps:$4 sm:$0xff]   ;;  %v18079_v58 = vld [vmem:[#allocation5 + $0x2808] ss:$28 sps:$4 sm:$0xff]  }
 0x33a   :  { %9201 = vmatpush1.bf16.msra.mxu0 %v18025_v61  ;;  %9693 = vmatpush1.bf16.msra.mxu1 %v18028_v63  ;;  %v18082_v61 = vld [vmem:[#allocation5 + $0x2810] ss:$28 sps:$4 sm:$0xff]  }
 0x33b   :  { %9202 = vmatprep.subr.bf16.mxu0 %v18033_v1  ;;  %9694 = vmatprep.subr.bf16.mxu1 %v18036_v22  ;;  %v18090_v63 = vld [vmem:[#allocation5 + $0x284c] ss:$28 sps:$4 sm:$0xff]   ;;  %v18085_v1 = vld [vmem:[#allocation5 + $0x2840] ss:$28 sps:$4 sm:$0xff]  }
 0x33c   :  { %v18088_v22 = vld [vmem:[#allocation5 + $0x2848] ss:$28 sps:$4 sm:$0xff]  }
 0x33e   :  { %9203 = vmatpush1.bf16.msra.mxu0 %v18031_v12  ;;  %9695 = vmatpush1.bf16.msra.mxu1 %v18034_v4  ;;  %v18093_v12 = vld [vmem:[#allocation5 + $0x287c] ss:$28 sps:$4 sm:$0xff]   ;;  %v18096_v4 = vld [vmem:[#allocation5 + $0x2884] ss:$28 sps:$4 sm:$0xff]  }
 0x33f   :  { %9213 = vmatprep.subr.bf16.mxu0 %v18039_v5  ;;  %9705 = vmatprep.subr.bf16.mxu1 %v18042_v42  ;;  %v18091_v5 = vld [vmem:[#allocation5 + $0x2878] ss:$28 sps:$4 sm:$0xff]   ;;  %v18094_v42 = vld [vmem:[#allocation5 + $0x2880] ss:$28 sps:$4 sm:$0xff]  }
 0x341   :  { %9205 = vmatmul.mubr.bf16.vlgmr.msra.gmra.mrb[0].mxu0 %v20035_v10  ;;  %9697 = vmatmul.mubr.bf16.vlgmr.msra.gmra.mrb[0].mxu1 %v20035_v10 }
 0x342   :  { %9214 = vmatpush1.bf16.msra.mxu0 %v18037_v8  ;;  %9706 = vmatpush1.bf16.msra.mxu1 %v18040_v11  ;;  %v18099_v8 = vld [vmem:[#allocation5 + $0x28b4] ss:$28 sps:$4 sm:$0xff]  }
 0x343   :  { %9215 = vmatprep.subr.bf16.mxu0 %v18045_v49  ;;  %9707 = vmatprep.subr.bf16.mxu1 %v18048_v15  ;;  %v18097_v11 = vld [vmem:[#allocation5 + $0x28b0] ss:$28 sps:$4 sm:$0xff]   ;;  %v18100_v49 = vld [vmem:[#allocation5 + $0x28b8] ss:$28 sps:$4 sm:$0xff]  }
 0x344   :  { %9245 = vmatprep.mubr.bf16.mxu0 %v20037_v18  ;;  %9737 = vmatprep.mubr.bf16.mxu1 %v20037_v18  ;;  %v18105_v15 = vld [vmem:[#allocation5 + $0x28ec] ss:$28 sps:$4 sm:$0xff]  }
 0x346   :  { %9216 = vmatpush1.bf16.msra.mxu0 %v18043_v17  ;;  %9708 = vmatpush1.bf16.msra.mxu1 %v18046_v19  ;;  %v18108_v17 = vld [vmem:[#allocation5 + $0x28f4] ss:$28 sps:$4 sm:$0xff]   ;;  %v18103_v19 = vld [vmem:[#allocation5 + $0x28e8] ss:$28 sps:$4 sm:$0xff]  }
 0x347   :  { %9217 = vmatprep.subr.bf16.mxu0 %v18051_v25  ;;  %9709 = vmatprep.subr.bf16.mxu1 %v18054_v23  ;;  %v18106_v25 = vld [vmem:[#allocation5 + $0x28f0] ss:$28 sps:$4 sm:$0xff]   ;;  %v18111_v23 = vld [vmem:[#allocation5 + $0x2924] ss:$28 sps:$4 sm:$0xff]  }
 0x34a   :  { %9218 = vmatpush1.bf16.msra.mxu0 %v18049_v27  ;;  %9710 = vmatpush1.bf16.msra.mxu1 %v18052_v28  ;;  %v18114_v27 = vld [vmem:[#allocation5 + $0x292c] ss:$28 sps:$4 sm:$0xff]   ;;  %v18109_v28 = vld [vmem:[#allocation5 + $0x2920] ss:$28 sps:$4 sm:$0xff]  }
 0x34b   :  { %9219 = vmatprep.subr.bf16.mxu0 %v18057_v31  ;;  %9711 = vmatprep.subr.bf16.mxu1 %v18060_v33  ;;  %v18112_v31 = vld [vmem:[#allocation5 + $0x2928] ss:$28 sps:$4 sm:$0xff]   ;;  %v18117_v33 = vld [vmem:[#allocation5 + $0x295c] ss:$28 sps:$4 sm:$0xff]  }
 0x34e   :  { %9220 = vmatpush1.bf16.msra.mxu0 %v18055_v51  ;;  %9712 = vmatpush1.bf16.msra.mxu1 %v18058_v35  ;;  %v18120_v51 = vld [vmem:[#allocation5 + $0x2964] ss:$28 sps:$4 sm:$0xff]   ;;  %v18115_v35 = vld [vmem:[#allocation5 + $0x2958] ss:$28 sps:$4 sm:$0xff]  }
 0x34f   :  { %9221 = vmatprep.subr.bf16.mxu0 %v18063_v26  ;;  %9713 = vmatprep.subr.bf16.mxu1 %v18066_v39  ;;  %v18118_v26 = vld [vmem:[#allocation5 + $0x2960] ss:$28 sps:$4 sm:$0xff]   ;;  %v18123_v39 = vld [vmem:[#allocation5 + $0x2994] ss:$28 sps:$4 sm:$0xff]  }
 0x352   :  { %9222 = vmatpush1.bf16.msra.mxu0 %v18061_v2  ;;  %9714 = vmatpush1.bf16.msra.mxu1 %v18064_v41  ;;  %v18126_v2 = vld [vmem:[#allocation5 + $0x299c] ss:$28 sps:$4 sm:$0xff]   ;;  %v18121_v41 = vld [vmem:[#allocation5 + $0x2990] ss:$28 sps:$4 sm:$0xff]  }
 0x353   :  { %9223 = vmatprep.subr.bf16.mxu0 %v18069_v45  ;;  %9715 = vmatprep.subr.bf16.mxu1 %v18072_v50  ;;  %v18124_v45 = vld [vmem:[#allocation5 + $0x2998] ss:$28 sps:$4 sm:$0xff]   ;;  %v18129_v50 = vld [vmem:[#allocation5 + $0x29cc] ss:$28 sps:$4 sm:$0xff]  }
 0x356   :  { %9224 = vmatpush1.bf16.msra.mxu0 %v18067_v46  ;;  %9716 = vmatpush1.bf16.msra.mxu1 %v18070_v29  ;;  %v18132_v46 = vld [vmem:[#allocation5 + $0x29d4] ss:$28 sps:$4 sm:$0xff]   ;;  %v18127_v29 = vld [vmem:[#allocation5 + $0x29c8] ss:$28 sps:$4 sm:$0xff]  }
 0x357   :  { %9225 = vmatprep.subr.bf16.mxu0 %v18075_v48  ;;  %9717 = vmatprep.subr.bf16.mxu1 %v18078_v52  ;;  %v18130_v48 = vld [vmem:[#allocation5 + $0x29d0] ss:$28 sps:$4 sm:$0xff]  }
 0x358   :  { %v18136_v52 = vld [vmem:[#allocation5 + $0x14] ss:$28 sps:$4 sm:$0xff]  }
 0x35a   :  { %9226 = vmatpush1.bf16.msra.mxu0 %v18073_v53  ;;  %9718 = vmatpush1.bf16.msra.mxu1 %v18076_v54  ;;  %v18137_v53 = vld [vmem:[#allocation5 + $0x1d8] ss:$28 sps:$4 sm:$0xff]   ;;  %v18134_v54 = vld [vmem:[#allocation5 + $0x10] ss:$28 sps:$4 sm:$0xff]  }
 0x35b   :  { %9227 = vmatprep.subr.bf16.mxu0 %v18081_v56  ;;  %9719 = vmatprep.subr.bf16.mxu1 %v18084_v6  ;;  %v20045_v56 = vpack.c.bf16 %v20029_v3, %v20029_v3  ;;  %v18138_v6 = vld [vmem:[#allocation5 + $0x18] ss:$28 sps:$4 sm:$0xff]   ;;  %v18147_v3 = vld [vmem:[#allocation5 + $0x248] ss:$28 sps:$4 sm:$0xff]  }
 0x35e   :  { %9228 = vmatpush1.bf16.msra.mxu0 %v18079_v58  ;;  %9720 = vmatpush1.bf16.msra.mxu1 %v18082_v61  ;;  %v18141_v58 = vld [vmem:[#allocation5 + $0x4c] ss:$28 sps:$4 sm:$0xff]  }
 0x35f   :  { %9229 = vmatprep.subr.bf16.mxu0 %v18087_v62  ;;  %9721 = vmatprep.subr.bf16.mxu1 %v18090_v63  ;;  %v18142_v61 = vld [vmem:[#allocation5 + $0x210] ss:$28 sps:$4 sm:$0xff]   ;;  %v18139_v62 = vld [vmem:[#allocation5 + $0x48] ss:$28 sps:$4 sm:$0xff]  }
 0x360   :  { %v18143_v63 = vld [vmem:[#allocation5 + $0x50] ss:$28 sps:$4 sm:$0xff]  }
 0x362   :  { %9230 = vmatpush1.bf16.msra.mxu0 %v18085_v1  ;;  %9722 = vmatpush1.bf16.msra.mxu1 %v18088_v22  ;;  %v18146_v1 = vld [vmem:[#allocation5 + $0x84] ss:$28 sps:$4 sm:$0xff]  }
 0x363   :  { %9231 = vmatprep.subr.bf16.mxu0 %v18093_v12  ;;  %9723 = vmatprep.subr.bf16.mxu1 %v18096_v4  ;;  %v18144_v22 = vld [vmem:[#allocation5 + $0x80] ss:$28 sps:$4 sm:$0xff]   ;;  %v18148_v12 = vld [vmem:[#allocation5 + $0x88] ss:$28 sps:$4 sm:$0xff]  }
 0x364   :  { %v18151_v4 = vld [vmem:[#allocation5 + $0xbc] ss:$28 sps:$4 sm:$0xff]  }
 0x366   :  { %9232 = vmatpush1.bf16.msra.mxu0 %v18091_v5  ;;  %9724 = vmatpush1.bf16.msra.mxu1 %v18094_v42  ;;  %v18152_v5 = vld [vmem:[#allocation5 + $0x280] ss:$28 sps:$4 sm:$0xff]   ;;  %v18149_v42 = vld [vmem:[#allocation5 + $0xb8] ss:$28 sps:$4 sm:$0xff]  }
 0x367   :  { %9233 = vmatprep.subr.bf16.mxu0 %v18099_v8  ;;  %9725 = vmatprep.subr.bf16.mxu1 %v18102_v14  ;;  %v18153_v8 = vld [vmem:[#allocation5 + $0xc0] ss:$28 sps:$4 sm:$0xff]   ;;  %v18156_v14 = vld [vmem:[#allocation5 + $0xf4] ss:$28 sps:$4 sm:$0xff]  }
 0x36a   :  { %9234 = vmatpush1.bf16.msra.mxu0 %v18097_v11  ;;  %9726 = vmatpush1.bf16.msra.mxu1 %v18100_v49  ;;  %v18157_v11 = vld [vmem:[#allocation5 + $0x2b8] ss:$28 sps:$4 sm:$0xff]   ;;  %v18154_v49 = vld [vmem:[#allocation5 + $0xf0] ss:$28 sps:$4 sm:$0xff]  }
 0x36b   :  { %9235 = vmatprep.subr.bf16.mxu0 %v18105_v15  ;;  %9727 = vmatprep.subr.bf16.mxu1 %v18108_v17  ;;  %v18158_v15 = vld [vmem:[#allocation5 + $0xf8] ss:$28 sps:$4 sm:$0xff]   ;;  %v18162_v17 = vld [vmem:[#allocation5 + $0x2f0] ss:$28 sps:$4 sm:$0xff]  }
 0x36e   :  { %9236 = vmatpush1.bf16.msra.mxu0 %v18103_v19  ;;  %9728 = vmatpush1.bf16.msra.mxu1 %v18106_v25  ;;  %v18159_v19 = vld [vmem:[#allocation5 + $0x128] ss:$28 sps:$4 sm:$0xff]   ;;  %v18163_v25 = vld [vmem:[#allocation5 + $0x130] ss:$28 sps:$4 sm:$0xff]  }
 0x36f   :  { %9237 = vmatprep.subr.bf16.mxu0 %v18111_v23  ;;  %9729 = vmatprep.subr.bf16.mxu1 %v18114_v27  ;;  %v18166_v23 = vld [vmem:[#allocation5 + $0x164] ss:$28 sps:$4 sm:$0xff]  }
 0x370   :  { %v18167_v27 = vld [vmem:[#allocation5 + $0x328] ss:$28 sps:$4 sm:$0xff]  }
 0x372   :  { %9238 = vmatpush1.bf16.msra.mxu0 %v18109_v28  ;;  %9730 = vmatpush1.bf16.msra.mxu1 %v18112_v31  ;;  %v18164_v28 = vld [vmem:[#allocation5 + $0x160] ss:$28 sps:$4 sm:$0xff]   ;;  %v18168_v31 = vld [vmem:[#allocation5 + $0x168] ss:$28 sps:$4 sm:$0xff]  }
 0x373   :  { %9239 = vmatprep.subr.bf16.mxu0 %v18117_v33  ;;  %9731 = vmatprep.subr.bf16.mxu1 %v18120_v51  ;;  %v18171_v33 = vld [vmem:[#allocation5 + $0x19c] ss:$28 sps:$4 sm:$0xff]  }
 0x374   :  { %v18172_v51 = vld [vmem:[#allocation5 + $0x360] ss:$28 sps:$4 sm:$0xff]  }
 0x376   :  { %9240 = vmatpush1.bf16.msra.mxu0 %v18115_v35  ;;  %9732 = vmatpush1.bf16.msra.mxu1 %v18118_v26  ;;  %v18169_v35 = vld [vmem:[#allocation5 + $0x198] ss:$28 sps:$4 sm:$0xff]   ;;  %v18173_v26 = vld [vmem:[#allocation5 + $0x1a0] ss:$28 sps:$4 sm:$0xff]  }
 0x377   :  { %9241 = vmatprep.subr.bf16.mxu0 %v18123_v39  ;;  %9733 = vmatprep.subr.bf16.mxu1 %v18126_v2  ;;  %v18176_v39 = vld [vmem:[#allocation5 + $0x1d4] ss:$28 sps:$4 sm:$0xff]  }
 0x378   :  { %v18177_v2 = vld [vmem:[#allocation5 + $0x558] ss:$28 sps:$4 sm:$0xff]  }
 0x37a   :  { %9242 = vmatpush1.bf16.msra.mxu0 %v18121_v41  ;;  %9734 = vmatpush1.bf16.msra.mxu1 %v18124_v45  ;;  %v18174_v41 = vld [vmem:[#allocation5 + $0x1d0] ss:$28 sps:$4 sm:$0xff]   ;;  %v18178_v45 = vld [vmem:[#allocation5 + $0x398] ss:$28 sps:$4 sm:$0xff]  }
 0x37b   :  { %9243 = vmatprep.subr.bf16.mxu0 %v18129_v50  ;;  %9735 = vmatprep.subr.bf16.mxu1 %v18132_v46  ;;  %v18181_v50 = vld [vmem:[#allocation5 + $0x20c] ss:$28 sps:$4 sm:$0xff]  }
 0x37c   :  { %v18182_v46 = vld [vmem:[#allocation5 + $0x590] ss:$28 sps:$4 sm:$0xff]  }
 0x37e   :  { %9244 = vmatpush1.bf16.msra.mxu0 %v18127_v29  ;;  %9736 = vmatpush1.bf16.msra.mxu1 %v18130_v48  ;;  %v18179_v29 = vld [vmem:[#allocation5 + $0x208] ss:$28 sps:$4 sm:$0xff]   ;;  %v18183_v48 = vld [vmem:[#allocation5 + $0x3d0] ss:$28 sps:$4 sm:$0xff]  }
 0x37f   :  { %9746 = vmatprep.subr.bf16.mxu0 %v18136_v52  ;;  %16326 = vmatprep.subr.bf16.mxu1 %v18137_v53  ;;  %v18186_v52 = vld [vmem:[#allocation5 + $0x244] ss:$28 sps:$4 sm:$0xff]  }
 0x380   :  { %v18187_v53 = vld [vmem:[#allocation5 + $0x5c8] ss:$28 sps:$4 sm:$0xff]  }
 0x381   :  { %9246 = vmatmul.mubr.bf16.vlgmr.msra.gmra.mrb[0].mxu0 %v20045_v56  ;;  %9738 = vmatmul.mubr.bf16.vlgmr.msra.gmra.mrb[0].mxu1 %v20045_v56 }
 0x382   :  { %9747 = vmatpush1.bf16.msra.mxu0 %v18134_v54  ;;  %16327 = vmatpush3.bf16.msra.mxu1 %v18138_v6  ;;  %v18184_v54 = vld [vmem:[#allocation5 + $0x240] ss:$28 sps:$4 sm:$0xff]   ;;  %v18188_v6 = vld [vmem:[#allocation5 + $0x408] ss:$28 sps:$4 sm:$0xff]  }
 0x383   :  { %9748 = vmatprep.subr.bf16.mxu0 %v18141_v58  ;;  %16328 = vmatprep.subr.bf16.mxu1 %v18142_v61  ;;  %v18191_v58 = vld [vmem:[#allocation5 + $0x27c] ss:$28 sps:$4 sm:$0xff]  }
 0x384   :  { %10270 = vmatprep.mubr.bf16.mxu1 %v19851_v60  ;;  %9778 = vmatprep.mubr.bf16.mxu0 %v19851_v60  ;;  %v18161_v60 = vld [vmem:[#allocation5 + $0x12c] ss:$28 sps:$4 sm:$0xff]   ;;  %v18192_v61 = vld [vmem:[#allocation5 + $0x600] ss:$28 sps:$4 sm:$0xff]  }
 0x386   :  { %9749 = vmatpush1.bf16.msra.mxu0 %v18139_v62  ;;  %16329 = vmatpush3.bf16.msra.mxu1 %v18143_v63  ;;  %v18189_v62 = vld [vmem:[#allocation5 + $0x278] ss:$28 sps:$4 sm:$0xff]   ;;  %v18193_v63 = vld [vmem:[#allocation5 + $0x440] ss:$28 sps:$4 sm:$0xff]  }
 0x387   :  { %9750 = vmatprep.subr.bf16.mxu0 %v18146_v1  ;;  %16330 = vmatprep.subr.bf16.mxu1 %v18147_v3  ;;  %v18196_v1 = vld [vmem:[#allocation5 + $0x2b4] ss:$28 sps:$4 sm:$0xff]  }
 0x388   :  { %v18197_v3 = vld [vmem:[#allocation5 + $0x638] ss:$28 sps:$4 sm:$0xff]  }
 0x38a   :  { %9751 = vmatpush1.bf16.msra.mxu0 %v18144_v22  ;;  %16331 = vmatpush3.bf16.msra.mxu1 %v18148_v12  ;;  %v18194_v22 = vld [vmem:[#allocation5 + $0x2b0] ss:$28 sps:$4 sm:$0xff]   ;;  %v18198_v12 = vld [vmem:[#allocation5 + $0x478] ss:$28 sps:$4 sm:$0xff]  }
 0x38b   :  { %9752 = vmatprep.subr.bf16.mxu0 %v18151_v4  ;;  %16332 = vmatprep.subr.bf16.mxu1 %v18152_v5  ;;  %v18201_v4 = vld [vmem:[#allocation5 + $0x2ec] ss:$28 sps:$4 sm:$0xff]  }
 0x38c   :  { %v18202_v5 = vld [vmem:[#allocation5 + $0x670] ss:$28 sps:$4 sm:$0xff]  }
 0x38e   :  { %9753 = vmatpush1.bf16.msra.mxu0 %v18149_v42  ;;  %16333 = vmatpush3.bf16.msra.mxu1 %v18153_v8  ;;  %v18199_v42 = vld [vmem:[#allocation5 + $0x2e8] ss:$28 sps:$4 sm:$0xff]   ;;  %v18203_v8 = vld [vmem:[#allocation5 + $0x4b0] ss:$28 sps:$4 sm:$0xff]  }
 0x38f   :  { %9754 = vmatprep.subr.bf16.mxu0 %v18156_v14  ;;  %16334 = vmatprep.subr.bf16.mxu1 %v18157_v11  ;;  %v18206_v14 = vld [vmem:[#allocation5 + $0x324] ss:$28 sps:$4 sm:$0xff]  }
 0x390   :  { %v18207_v11 = vld [vmem:[#allocation5 + $0x6a8] ss:$28 sps:$4 sm:$0xff]  }
 0x392   :  { %9755 = vmatpush1.bf16.msra.mxu0 %v18154_v49  ;;  %16335 = vmatpush3.bf16.msra.mxu1 %v18158_v15  ;;  %v18204_v49 = vld [vmem:[#allocation5 + $0x320] ss:$28 sps:$4 sm:$0xff]   ;;  %v18208_v15 = vld [vmem:[#allocation5 + $0x4e8] ss:$28 sps:$4 sm:$0xff]  }
 0x393   :  { %9756 = vmatprep.subr.bf16.mxu0 %v18161_v60  ;;  %16336 = vmatprep.subr.bf16.mxu1 %v18162_v17  ;;  %v18211_v60 = vld [vmem:[#allocation5 + $0x35c] ss:$28 sps:$4 sm:$0xff]  }
 0x394   :  { %v18212_v17 = vld [vmem:[#allocation5 + $0x6e0] ss:$28 sps:$4 sm:$0xff]  }
 0x396   :  { %9757 = vmatpush1.bf16.msra.mxu0 %v18159_v19  ;;  %16337 = vmatpush3.bf16.msra.mxu1 %v18163_v25  ;;  %v18209_v19 = vld [vmem:[#allocation5 + $0x358] ss:$28 sps:$4 sm:$0xff]   ;;  %v18213_v25 = vld [vmem:[#allocation5 + $0x520] ss:$28 sps:$4 sm:$0xff]  }
 0x397   :  { %9758 = vmatprep.subr.bf16.mxu0 %v18166_v23  ;;  %16338 = vmatprep.subr.bf16.mxu1 %v18167_v27  ;;  %v18216_v23 = vld [vmem:[#allocation5 + $0x394] ss:$28 sps:$4 sm:$0xff]  }
 0x398   :  { %v18217_v27 = vld [vmem:[#allocation5 + $0x8d8] ss:$28 sps:$4 sm:$0xff]  }
 0x39a   :  { %9759 = vmatpush1.bf16.msra.mxu0 %v18164_v28  ;;  %16339 = vmatpush3.bf16.msra.mxu1 %v18168_v31  ;;  %v18214_v28 = vld [vmem:[#allocation5 + $0x390] ss:$28 sps:$4 sm:$0xff]   ;;  %v18218_v31 = vld [vmem:[#allocation5 + $0x718] ss:$28 sps:$4 sm:$0xff]  }
 0x39b   :  { %9760 = vmatprep.subr.bf16.mxu0 %v18171_v33  ;;  %16340 = vmatprep.subr.bf16.mxu1 %v18172_v51  ;;  %v18221_v33 = vld [vmem:[#allocation5 + $0x3cc] ss:$28 sps:$4 sm:$0xff]  }
 0x39c   :  { %v18222_v51 = vld [vmem:[#allocation5 + $0x910] ss:$28 sps:$4 sm:$0xff]  }
 0x39e   :  { %9761 = vmatpush1.bf16.msra.mxu0 %v18169_v35  ;;  %16341 = vmatpush3.bf16.msra.mxu1 %v18173_v26  ;;  %v18219_v35 = vld [vmem:[#allocation5 + $0x3c8] ss:$28 sps:$4 sm:$0xff]   ;;  %v18223_v26 = vld [vmem:[#allocation5 + $0x750] ss:$28 sps:$4 sm:$0xff]  }
 0x39f   :  { %9762 = vmatprep.subr.bf16.mxu0 %v18176_v39  ;;  %16348 = vmatprep.subr.bf16.mxu1 %v18177_v2  ;;  %v18226_v39 = vld [vmem:[#allocation5 + $0x404] ss:$28 sps:$4 sm:$0xff]  }
 0x3a0   :  { %v18227_v2 = vld [vmem:[#allocation5 + $0x948] ss:$28 sps:$4 sm:$0xff]  }
 0x3a1   :  { %10271 = vmatmul.mubr.bf16.vlgmr.msra.gmra.mrb[4].mxu1 %v19860_v16 }
 0x3a2   :  { %9763 = vmatpush1.bf16.msra.mxu0 %v18174_v41  ;;  %16349 = vmatpush3.bf16.msra.mxu1 %v18178_v45  ;;  %v18224_v41 = vld [vmem:[#allocation5 + $0x400] ss:$28 sps:$4 sm:$0xff]   ;;  %v18228_v45 = vld [vmem:[#allocation5 + $0x788] ss:$28 sps:$4 sm:$0xff]  }
 0x3a3   :  { %9764 = vmatprep.subr.bf16.mxu0 %v18181_v50  ;;  %16350 = vmatprep.subr.bf16.mxu1 %v18182_v46  ;;  %v18231_v50 = vld [vmem:[#allocation5 + $0x43c] ss:$28 sps:$4 sm:$0xff]  }
 0x3a4   :  { %10310 = vmatprep.mubr.bf16.mxu1 %v19862_v20  ;;  %v18229_v46 = vld [vmem:[#allocation5 + $0x438] ss:$28 sps:$4 sm:$0xff]  }
 0x3a6   :  { %9765 = vmatpush1.bf16.msra.mxu0 %v18179_v29  ;;  %16351 = vmatpush3.bf16.msra.mxu1 %v18183_v48  ;;  %v18233_v29 = vld [vmem:[#allocation5 + $0x7c0] ss:$28 sps:$4 sm:$0xff]   ;;  %v18236_v48 = vld [vmem:[#allocation5 + $0x474] ss:$28 sps:$4 sm:$0xff]  }
 0x3a7   :  { %9766 = vmatprep.subr.bf16.mxu0 %v18186_v52  ;;  %16352 = vmatprep.subr.bf16.mxu1 %v18187_v53  ;;  %v18237_v52 = vld [vmem:[#allocation5 + $0x9b8] ss:$28 sps:$4 sm:$0xff]   ;;  %v18234_v53 = vld [vmem:[#allocation5 + $0x470] ss:$28 sps:$4 sm:$0xff]  }
 0x3aa   :  { %9767 = vmatpush1.bf16.msra.mxu0 %v18184_v54  ;;  %16353 = vmatpush3.bf16.msra.mxu1 %v18188_v6  ;;  %v18238_v54 = vld [vmem:[#allocation5 + $0x7f8] ss:$28 sps:$4 sm:$0xff]   ;;  %v18242_v6 = vld [vmem:[#allocation5 + $0x9f0] ss:$28 sps:$4 sm:$0xff]  }
 0x3ab   :  { %9768 = vmatprep.subr.bf16.mxu0 %v18191_v58  ;;  %16354 = vmatprep.subr.bf16.mxu1 %v18192_v61  ;;  %v18239_v58 = vld [vmem:[#allocation5 + $0x4a8] ss:$28 sps:$4 sm:$0xff]   ;;  %v18243_v61 = vld [vmem:[#allocation5 + $0x830] ss:$28 sps:$4 sm:$0xff]  }
 0x3ae   :  { %9769 = vmatpush1.bf16.msra.mxu0 %v18189_v62  ;;  %16355 = vmatpush3.bf16.msra.mxu1 %v18193_v63  ;;  %v18246_v62 = vld [vmem:[#allocation5 + $0x4e4] ss:$28 sps:$4 sm:$0xff]  }
 0x3af   :  { %9770 = vmatprep.subr.bf16.mxu0 %v18196_v1  ;;  %16356 = vmatprep.subr.bf16.mxu1 %v18197_v3  ;;  %v18247_v63 = vld [vmem:[#allocation5 + $0xa28] ss:$28 sps:$4 sm:$0xff]   ;;  %v18244_v1 = vld [vmem:[#allocation5 + $0x4e0] ss:$28 sps:$4 sm:$0xff]  }
 0x3b0   :  { %v18248_v3 = vld [vmem:[#allocation5 + $0x868] ss:$28 sps:$4 sm:$0xff]  }
 0x3b2   :  { %9771 = vmatpush1.bf16.msra.mxu0 %v18194_v22  ;;  %16357 = vmatpush3.bf16.msra.mxu1 %v18198_v12  ;;  %v18251_v22 = vld [vmem:[#allocation5 + $0x51c] ss:$28 sps:$4 sm:$0xff]  }
 0x3b3   :  { %9772 = vmatprep.subr.bf16.mxu0 %v18201_v4  ;;  %16358 = vmatprep.subr.bf16.mxu1 %v18202_v5  ;;  %v18252_v12 = vld [vmem:[#allocation5 + $0xa60] ss:$28 sps:$4 sm:$0xff]   ;;  %v18249_v4 = vld [vmem:[#allocation5 + $0x518] ss:$28 sps:$4 sm:$0xff]  }
 0x3b4   :  { %v18253_v5 = vld [vmem:[#allocation5 + $0x8a0] ss:$28 sps:$4 sm:$0xff]  }
 0x3b6   :  { %9773 = vmatpush1.bf16.msra.mxu0 %v18199_v42  ;;  %16359 = vmatpush3.bf16.msra.mxu1 %v18203_v8  ;;  %v18256_v42 = vld [vmem:[#allocation5 + $0x554] ss:$28 sps:$4 sm:$0xff]  }
 0x3b7   :  { %9774 = vmatprep.subr.bf16.mxu0 %v18206_v14  ;;  %16360 = vmatprep.subr.bf16.mxu1 %v18207_v11  ;;  %v18257_v8 = vld [vmem:[#allocation5 + $0xc58] ss:$28 sps:$4 sm:$0xff]   ;;  %v18254_v14 = vld [vmem:[#allocation5 + $0x550] ss:$28 sps:$4 sm:$0xff]  }
 0x3b8   :  { %v18258_v11 = vld [vmem:[#allocation5 + $0xa98] ss:$28 sps:$4 sm:$0xff]  }
 0x3ba   :  { %9775 = vmatpush1.bf16.msra.mxu0 %v18204_v49  ;;  %16361 = vmatpush3.bf16.msra.mxu1 %v18208_v15  ;;  %v18261_v49 = vld [vmem:[#allocation5 + $0x58c] ss:$28 sps:$4 sm:$0xff]  }
 0x3bb   :  { %9776 = vmatprep.subr.bf16.mxu0 %v18211_v60  ;;  %16362 = vmatprep.subr.bf16.mxu1 %v18212_v17  ;;  %v18262_v15 = vld [vmem:[#allocation5 + $0xc90] ss:$28 sps:$4 sm:$0xff]   ;;  %v18259_v60 = vld [vmem:[#allocation5 + $0x588] ss:$28 sps:$4 sm:$0xff]  }
 0x3bc   :  { %v18263_v17 = vld [vmem:[#allocation5 + $0xad0] ss:$28 sps:$4 sm:$0xff]  }
 0x3be   :  { %9777 = vmatpush1.bf16.msra.mxu0 %v18209_v19  ;;  %16363 = vmatpush3.bf16.msra.mxu1 %v18213_v25  ;;  %v18266_v19 = vld [vmem:[#allocation5 + $0x5c4] ss:$28 sps:$4 sm:$0xff]  }
 0x3bf   :  { %9787 = vmatprep.subr.bf16.mxu0 %v18216_v23  ;;  %16370 = vmatprep.subr.bf16.mxu1 %v18217_v27  ;;  %v18267_v25 = vld [vmem:[#allocation5 + $0xcc8] ss:$28 sps:$4 sm:$0xff]   ;;  %v18264_v23 = vld [vmem:[#allocation5 + $0x5c0] ss:$28 sps:$4 sm:$0xff]  }
 0x3c0   :  { %v18268_v27 = vld [vmem:[#allocation5 + $0xb08] ss:$28 sps:$4 sm:$0xff]  }
 0x3c1   :  { %9779 = vmatmul.mubr.bf16.vlgmr.msra.gmra.mrb[4].mxu0 %v19860_v16  ;;  %10311 = vmatmul.mubr.bf16.vlgmr.msra.gmra.mrb[8].mxu1 %v19870_v24  ;;  %v18232_v16 = vld [vmem:[#allocation5 + $0x980] ss:$28 sps:$4 sm:$0xff]  }
 0x3c2   :  { %9788 = vmatpush1.bf16.msra.mxu0 %v18214_v28  ;;  %16371 = vmatpush3.bf16.msra.mxu1 %v18218_v31  ;;  %v18271_v28 = vld [vmem:[#allocation5 + $0x5fc] ss:$28 sps:$4 sm:$0xff]  }
 0x3c3   :  { %9789 = vmatprep.subr.bf16.mxu0 %v18221_v33  ;;  %16372 = vmatprep.subr.bf16.mxu1 %v18222_v51  ;;  %v18272_v31 = vld [vmem:[#allocation5 + $0xd00] ss:$28 sps:$4 sm:$0xff]   ;;  %v18269_v33 = vld [vmem:[#allocation5 + $0x5f8] ss:$28 sps:$4 sm:$0xff]  }
 0x3c4   :  { %10350 = vmatprep.mubr.bf16.mxu1 %v19882_v34  ;;  %9819 = vmatprep.mubr.bf16.mxu0 %v19862_v20  ;;  %v18241_v20 = vld [vmem:[#allocation5 + $0x4ac] ss:$28 sps:$4 sm:$0xff]   ;;  %v18273_v51 = vld [vmem:[#allocation5 + $0xb40] ss:$28 sps:$4 sm:$0xff]  }
 0x3c6   :  { %9790 = vmatpush1.bf16.msra.mxu0 %v18219_v35  ;;  %16373 = vmatpush3.bf16.msra.mxu1 %v18223_v26  ;;  %v18276_v35 = vld [vmem:[#allocation5 + $0x634] ss:$28 sps:$4 sm:$0xff]  }
 0x3c7   :  { %9791 = vmatprep.subr.bf16.mxu0 %v18226_v39  ;;  %16374 = vmatprep.subr.bf16.mxu1 %v18227_v2  ;;  %v18277_v26 = vld [vmem:[#allocation5 + $0xd38] ss:$28 sps:$4 sm:$0xff]   ;;  %v18274_v39 = vld [vmem:[#allocation5 + $0x630] ss:$28 sps:$4 sm:$0xff]  }
 0x3c8   :  { %v18278_v2 = vld [vmem:[#allocation5 + $0xb78] ss:$28 sps:$4 sm:$0xff]  }
 0x3ca   :  { %9792 = vmatpush1.bf16.msra.mxu0 %v18224_v41  ;;  %16375 = vmatpush3.bf16.msra.mxu1 %v18228_v45  ;;  %v18281_v41 = vld [vmem:[#allocation5 + $0x66c] ss:$28 sps:$4 sm:$0xff]  }
 0x3cb   :  { %9793 = vmatprep.subr.bf16.mxu0 %v18231_v50  ;;  %16376 = vmatprep.subr.bf16.mxu1 %v18232_v16  ;;  %v18282_v45 = vld [vmem:[#allocation5 + $0xd70] ss:$28 sps:$4 sm:$0xff]   ;;  %v18279_v50 = vld [vmem:[#allocation5 + $0x668] ss:$28 sps:$4 sm:$0xff]  }
 0x3cc   :  { %v18283_v16 = vld [vmem:[#allocation5 + $0xbb0] ss:$28 sps:$4 sm:$0xff]  }
 0x3ce   :  { %9794 = vmatpush1.bf16.msra.mxu0 %v18229_v46  ;;  %16377 = vmatpush3.bf16.msra.mxu1 %v18233_v29  ;;  %v18286_v46 = vld [vmem:[#allocation5 + $0x6a4] ss:$28 sps:$4 sm:$0xff]  }
 0x3cf   :  { %9795 = vmatprep.subr.bf16.mxu0 %v18236_v48  ;;  %16378 = vmatprep.subr.bf16.mxu1 %v18237_v52  ;;  %v18287_v29 = vld [vmem:[#allocation5 + $0xda8] ss:$28 sps:$4 sm:$0xff]   ;;  %v18284_v48 = vld [vmem:[#allocation5 + $0x6a0] ss:$28 sps:$4 sm:$0xff]  }
 0x3d0   :  { %v18288_v52 = vld [vmem:[#allocation5 + $0xbe8] ss:$28 sps:$4 sm:$0xff]  }
 0x3d2   :  { %9796 = vmatpush1.bf16.msra.mxu0 %v18234_v53  ;;  %16379 = vmatpush3.bf16.msra.mxu1 %v18238_v54  ;;  %v18291_v53 = vld [vmem:[#allocation5 + $0x6dc] ss:$28 sps:$4 sm:$0xff]  }
 0x3d3   :  { %9797 = vmatprep.subr.bf16.mxu0 %v18241_v20  ;;  %16380 = vmatprep.subr.bf16.mxu1 %v18242_v6  ;;  %v18292_v54 = vld [vmem:[#allocation5 + $0xde0] ss:$28 sps:$4 sm:$0xff]   ;;  %v18289_v20 = vld [vmem:[#allocation5 + $0x6d8] ss:$28 sps:$4 sm:$0xff]  }
 0x3d4   :  { %v18293_v6 = vld [vmem:[#allocation5 + $0xc20] ss:$28 sps:$4 sm:$0xff]  }
 0x3d6   :  { %9798 = vmatpush1.bf16.msra.mxu0 %v18239_v58  ;;  %16381 = vmatpush3.bf16.msra.mxu1 %v18243_v61  ;;  %v18296_v58 = vld [vmem:[#allocation5 + $0x714] ss:$28 sps:$4 sm:$0xff]  }
 0x3d7   :  { %9799 = vmatprep.subr.bf16.mxu0 %v18246_v62  ;;  %16382 = vmatprep.subr.bf16.mxu1 %v18247_v63  ;;  %v18297_v61 = vld [vmem:[#allocation5 + $0xfd8] ss:$28 sps:$4 sm:$0xff]   ;;  %v18294_v62 = vld [vmem:[#allocation5 + $0x710] ss:$28 sps:$4 sm:$0xff]  }
 0x3d8   :  { %v18298_v63 = vld [vmem:[#allocation5 + $0xe18] ss:$28 sps:$4 sm:$0xff]  }
 0x3da   :  { %9800 = vmatpush1.bf16.msra.mxu0 %v18244_v1  ;;  %16383 = vmatpush3.bf16.msra.mxu1 %v18248_v3  ;;  %v18301_v1 = vld [vmem:[#allocation5 + $0x74c] ss:$28 sps:$4 sm:$0xff]  }
 0x3db   :  { %9801 = vmatprep.subr.bf16.mxu0 %v18251_v22  ;;  %16384 = vmatprep.subr.bf16.mxu1 %v18252_v12  ;;  %v18302_v3 = vld [vmem:[#allocation5 + $0x1010] ss:$28 sps:$4 sm:$0xff]   ;;  %v18299_v22 = vld [vmem:[#allocation5 + $0x748] ss:$28 sps:$4 sm:$0xff]  }
 0x3dc   :  { %v18303_v12 = vld [vmem:[#allocation5 + $0xe50] ss:$28 sps:$4 sm:$0xff]  }
 0x3de   :  { %9802 = vmatpush1.bf16.msra.mxu0 %v18249_v4  ;;  %16385 = vmatpush3.bf16.msra.mxu1 %v18253_v5  ;;  %v18306_v4 = vld [vmem:[#allocation5 + $0x784] ss:$28 sps:$4 sm:$0xff]  }
 0x3df   :  { %9803 = vmatprep.subr.bf16.mxu0 %v18256_v42  ;;  %16392 = vmatprep.subr.bf16.mxu1 %v18257_v8  ;;  %v18307_v5 = vld [vmem:[#allocation5 + $0x1048] ss:$28 sps:$4 sm:$0xff]   ;;  %v18304_v42 = vld [vmem:[#allocation5 + $0x780] ss:$28 sps:$4 sm:$0xff]  }
 0x3e0   :  { %v18308_v8 = vld [vmem:[#allocation5 + $0xe88] ss:$28 sps:$4 sm:$0xff]  }
 0x3e1   :  { %10351 = vmatmul.mubr.bf16.vlgmr.msra.gmra.mrb[12].mxu1 %v19895_v38 }
 0x3e2   :  { %9804 = vmatpush1.bf16.msra.mxu0 %v18254_v14  ;;  %16393 = vmatpush3.bf16.msra.mxu1 %v18258_v11  ;;  %v18311_v14 = vld [vmem:[#allocation5 + $0x7bc] ss:$28 sps:$4 sm:$0xff]  }
 0x3e3   :  { %9805 = vmatprep.subr.bf16.mxu0 %v18261_v49  ;;  %16394 = vmatprep.subr.bf16.mxu1 %v18262_v15  ;;  %v18309_v11 = vld [vmem:[#allocation5 + $0x7b8] ss:$28 sps:$4 sm:$0xff]   ;;  %v18313_v49 = vld [vmem:[#allocation5 + $0xec0] ss:$28 sps:$4 sm:$0xff]  }
 0x3e4   :  { %10390 = vmatprep.mubr.bf16.mxu1 %v19897_v44  ;;  %v18316_v15 = vld [vmem:[#allocation5 + $0x7f4] ss:$28 sps:$4 sm:$0xff]  }
 0x3e6   :  { %9806 = vmatpush1.bf16.msra.mxu0 %v18259_v60  ;;  %16395 = vmatpush3.bf16.msra.mxu1 %v18263_v17  ;;  %v18317_v60 = vld [vmem:[#allocation5 + $0x10b8] ss:$28 sps:$4 sm:$0xff]   ;;  %v18314_v17 = vld [vmem:[#allocation5 + $0x7f0] ss:$28 sps:$4 sm:$0xff]  }
 0x3e7   :  { %9807 = vmatprep.subr.bf16.mxu0 %v18266_v19  ;;  %16396 = vmatprep.subr.bf16.mxu1 %v18267_v25  ;;  %v18318_v19 = vld [vmem:[#allocation5 + $0xef8] ss:$28 sps:$4 sm:$0xff]   ;;  %v18322_v25 = vld [vmem:[#allocation5 + $0x10f0] ss:$28 sps:$4 sm:$0xff]  }
 0x3ea   :  { %9808 = vmatpush1.bf16.msra.mxu0 %v18264_v23  ;;  %16397 = vmatpush3.bf16.msra.mxu1 %v18268_v27  ;;  %v18319_v23 = vld [vmem:[#allocation5 + $0x828] ss:$28 sps:$4 sm:$0xff]   ;;  %v18323_v27 = vld [vmem:[#allocation5 + $0xf30] ss:$28 sps:$4 sm:$0xff]  }
 0x3eb   :  { %9809 = vmatprep.subr.bf16.mxu0 %v18271_v28  ;;  %16398 = vmatprep.subr.bf16.mxu1 %v18272_v31  ;;  %v18326_v28 = vld [vmem:[#allocation5 + $0x864] ss:$28 sps:$4 sm:$0xff]  }
 0x3ec   :  { %v18327_v31 = vld [vmem:[#allocation5 + $0x1128] ss:$28 sps:$4 sm:$0xff]  }
 0x3ee   :  { %9810 = vmatpush1.bf16.msra.mxu0 %v18269_v33  ;;  %16399 = vmatpush3.bf16.msra.mxu1 %v18273_v51  ;;  %v18324_v33 = vld [vmem:[#allocation5 + $0x860] ss:$28 sps:$4 sm:$0xff]   ;;  %v18328_v51 = vld [vmem:[#allocation5 + $0xf68] ss:$28 sps:$4 sm:$0xff]  }
 0x3ef   :  { %9811 = vmatprep.subr.bf16.mxu0 %v18276_v35  ;;  %16400 = vmatprep.subr.bf16.mxu1 %v18277_v26  ;;  %v18331_v35 = vld [vmem:[#allocation5 + $0x89c] ss:$28 sps:$4 sm:$0xff]  }
 0x3f0   :  { %v18332_v26 = vld [vmem:[#allocation5 + $0x1160] ss:$28 sps:$4 sm:$0xff]  }
 0x3f2   :  { %9812 = vmatpush1.bf16.msra.mxu0 %v18274_v39  ;;  %16401 = vmatpush3.bf16.msra.mxu1 %v18278_v2  ;;  %v18329_v39 = vld [vmem:[#allocation5 + $0x898] ss:$28 sps:$4 sm:$0xff]   ;;  %v18333_v2 = vld [vmem:[#allocation5 + $0xfa0] ss:$28 sps:$4 sm:$0xff]  }
 0x3f3   :  { %9813 = vmatprep.subr.bf16.mxu0 %v18281_v41  ;;  %16402 = vmatprep.subr.bf16.mxu1 %v18282_v45  ;;  %v18336_v41 = vld [vmem:[#allocation5 + $0x8d4] ss:$28 sps:$4 sm:$0xff]  }
 0x3f4   :  { %v18337_v45 = vld [vmem:[#allocation5 + $0x1358] ss:$28 sps:$4 sm:$0xff]  }
 0x3f6   :  { %9814 = vmatpush1.bf16.msra.mxu0 %v18279_v50  ;;  %16403 = vmatpush3.bf16.msra.mxu1 %v18283_v16  ;;  %v18334_v50 = vld [vmem:[#allocation5 + $0x8d0] ss:$28 sps:$4 sm:$0xff]   ;;  %v18338_v16 = vld [vmem:[#allocation5 + $0x1198] ss:$28 sps:$4 sm:$0xff]  }
 0x3f7   :  { %9815 = vmatprep.subr.bf16.mxu0 %v18286_v46  ;;  %16404 = vmatprep.subr.bf16.mxu1 %v18287_v29  ;;  %v18341_v46 = vld [vmem:[#allocation5 + $0x90c] ss:$28 sps:$4 sm:$0xff]  }
 0x3f8   :  { %v18342_v29 = vld [vmem:[#allocation5 + $0x1390] ss:$28 sps:$4 sm:$0xff]  }
 0x3fa   :  { %9816 = vmatpush1.bf16.msra.mxu0 %v18284_v48  ;;  %16405 = vmatpush3.bf16.msra.mxu1 %v18288_v52  ;;  %v18339_v48 = vld [vmem:[#allocation5 + $0x908] ss:$28 sps:$4 sm:$0xff]   ;;  %v18343_v52 = vld [vmem:[#allocation5 + $0x11d0] ss:$28 sps:$4 sm:$0xff]  }
 0x3fb   :  { %9817 = vmatprep.subr.bf16.mxu0 %v18291_v53  ;;  %16406 = vmatprep.subr.bf16.mxu1 %v18292_v54  ;;  %v18346_v53 = vld [vmem:[#allocation5 + $0x944] ss:$28 sps:$4 sm:$0xff]  }
 0x3fc   :  { %v18347_v54 = vld [vmem:[#allocation5 + $0x13c8] ss:$28 sps:$4 sm:$0xff]  }
 0x3fe   :  { %9818 = vmatpush1.bf16.msra.mxu0 %v18289_v20  ;;  %16407 = vmatpush3.bf16.msra.mxu1 %v18293_v6  ;;  %v18344_v20 = vld [vmem:[#allocation5 + $0x940] ss:$28 sps:$4 sm:$0xff]   ;;  %v18348_v6 = vld [vmem:[#allocation5 + $0x1208] ss:$28 sps:$4 sm:$0xff]  }
 0x3ff   :  { %9828 = vmatprep.subr.bf16.mxu0 %v18296_v58  ;;  %16414 = vmatprep.subr.bf16.mxu1 %v18297_v61  ;;  %v18351_v58 = vld [vmem:[#allocation5 + $0x97c] ss:$28 sps:$4 sm:$0xff]  }
 0x400   :  { %v18352_v61 = vld [vmem:[#allocation5 + $0x1400] ss:$28 sps:$4 sm:$0xff]  }
 0x401   :  { %9820 = vmatmul.mubr.bf16.vlgmr.msra.gmra.mrb[4].mxu0 %v19870_v24  ;;  %10391 = vmatmul.mubr.bf16.vlgmr.msra.gmra.mrb[16].mxu1 %v19913_v55  ;;  %v18312_v24 = vld [vmem:[#allocation5 + $0x1080] ss:$28 sps:$4 sm:$0xff]  }
 0x402   :  { %9829 = vmatpush1.bf16.msra.mxu0 %v18294_v62  ;;  %16415 = vmatpush3.bf16.msra.mxu1 %v18298_v63  ;;  %v18349_v62 = vld [vmem:[#allocation5 + $0x978] ss:$28 sps:$4 sm:$0xff]   ;;  %v18353_v63 = vld [vmem:[#allocation5 + $0x1240] ss:$28 sps:$4 sm:$0xff]  }
 0x403   :  { %9830 = vmatprep.subr.bf16.mxu0 %v18301_v1  ;;  %16416 = vmatprep.subr.bf16.mxu1 %v18302_v3  ;;  %v18356_v1 = vld [vmem:[#allocation5 + $0x9b4] ss:$28 sps:$4 sm:$0xff]  }
 0x404   :  { %10430 = vmatprep.mubr.bf16.mxu1 %v19915_v59  ;;  %9860 = vmatprep.mubr.bf16.mxu0 %v19882_v34  ;;  %v18321_v34 = vld [vmem:[#allocation5 + $0x82c] ss:$28 sps:$4 sm:$0xff]   ;;  %v18357_v3 = vld [vmem:[#allocation5 + $0x1438] ss:$28 sps:$4 sm:$0xff]  }
 0x406   :  { %9831 = vmatpush1.bf16.msra.mxu0 %v18299_v22  ;;  %16417 = vmatpush3.bf16.msra.mxu1 %v18303_v12  ;;  %v18354_v22 = vld [vmem:[#allocation5 + $0x9b0] ss:$28 sps:$4 sm:$0xff]   ;;  %v18358_v12 = vld [vmem:[#allocation5 + $0x1278] ss:$28 sps:$4 sm:$0xff]  }
 0x407   :  { %9832 = vmatprep.subr.bf16.mxu0 %v18306_v4  ;;  %16418 = vmatprep.subr.bf16.mxu1 %v18307_v5  ;;  %v18361_v4 = vld [vmem:[#allocation5 + $0x9ec] ss:$28 sps:$4 sm:$0xff]  }
 0x408   :  { %v18362_v5 = vld [vmem:[#allocation5 + $0x1470] ss:$28 sps:$4 sm:$0xff]  }
 0x40a   :  { %9833 = vmatpush1.bf16.msra.mxu0 %v18304_v42  ;;  %16419 = vmatpush3.bf16.msra.mxu1 %v18308_v8  ;;  %v18359_v42 = vld [vmem:[#allocation5 + $0x9e8] ss:$28 sps:$4 sm:$0xff]   ;;  %v18363_v8 = vld [vmem:[#allocation5 + $0x12b0] ss:$28 sps:$4 sm:$0xff]  }
 0x40b   :  { %9834 = vmatprep.subr.bf16.mxu0 %v18311_v14  ;;  %16420 = vmatprep.subr.bf16.mxu1 %v18312_v24  ;;  %v18366_v14 = vld [vmem:[#allocation5 + $0xa24] ss:$28 sps:$4 sm:$0xff]  }
 0x40c   :  { %v18367_v24 = vld [vmem:[#allocation5 + $0x14a8] ss:$28 sps:$4 sm:$0xff]  }
 0x40e   :  { %9835 = vmatpush1.bf16.msra.mxu0 %v18309_v11  ;;  %16421 = vmatpush3.bf16.msra.mxu1 %v18313_v49  ;;  %v18364_v11 = vld [vmem:[#allocation5 + $0xa20] ss:$28 sps:$4 sm:$0xff]   ;;  %v18368_v49 = vld [vmem:[#allocation5 + $0x12e8] ss:$28 sps:$4 sm:$0xff]  }
 0x40f   :  { %9836 = vmatprep.subr.bf16.mxu0 %v18316_v15  ;;  %16422 = vmatprep.subr.bf16.mxu1 %v18317_v60  ;;  %v18371_v15 = vld [vmem:[#allocation5 + $0xa5c] ss:$28 sps:$4 sm:$0xff]  }
 0x410   :  { %v18372_v60 = vld [vmem:[#allocation5 + $0x14e0] ss:$28 sps:$4 sm:$0xff]  }
 0x412   :  { %9837 = vmatpush1.bf16.msra.mxu0 %v18314_v17  ;;  %16423 = vmatpush3.bf16.msra.mxu1 %v18318_v19  ;;  %v18369_v17 = vld [vmem:[#allocation5 + $0xa58] ss:$28 sps:$4 sm:$0xff]   ;;  %v18373_v19 = vld [vmem:[#allocation5 + $0x1320] ss:$28 sps:$4 sm:$0xff]  }
 0x413   :  { %9838 = vmatprep.subr.bf16.mxu0 %v18321_v34  ;;  %16424 = vmatprep.subr.bf16.mxu1 %v18322_v25  ;;  %v18376_v34 = vld [vmem:[#allocation5 + $0xa94] ss:$28 sps:$4 sm:$0xff]  }
 0x414   :  { %v18377_v25 = vld [vmem:[#allocation5 + $0x16d8] ss:$28 sps:$4 sm:$0xff]  }
 0x416   :  { %9839 = vmatpush1.bf16.msra.mxu0 %v18319_v23  ;;  %16425 = vmatpush3.bf16.msra.mxu1 %v18323_v27  ;;  %v18374_v23 = vld [vmem:[#allocation5 + $0xa90] ss:$28 sps:$4 sm:$0xff]   ;;  %v18378_v27 = vld [vmem:[#allocation5 + $0x1518] ss:$28 sps:$4 sm:$0xff]  }
 0x417   :  { %9840 = vmatprep.subr.bf16.mxu0 %v18326_v28  ;;  %16426 = vmatprep.subr.bf16.mxu1 %v18327_v31  ;;  %v18381_v28 = vld [vmem:[#allocation5 + $0xacc] ss:$28 sps:$4 sm:$0xff]  }
 0x418   :  { %v18382_v31 = vld [vmem:[#allocation5 + $0x1710] ss:$28 sps:$4 sm:$0xff]  }
 0x41a   :  { %9841 = vmatpush1.bf16.msra.mxu0 %v18324_v33  ;;  %16427 = vmatpush3.bf16.msra.mxu1 %v18328_v51  ;;  %v18379_v33 = vld [vmem:[#allocation5 + $0xac8] ss:$28 sps:$4 sm:$0xff]   ;;  %v18383_v51 = vld [vmem:[#allocation5 + $0x1550] ss:$28 sps:$4 sm:$0xff]  }
 0x41b   :  { %9842 = vmatprep.subr.bf16.mxu0 %v18331_v35  ;;  %16428 = vmatprep.subr.bf16.mxu1 %v18332_v26  ;;  %v18386_v35 = vld [vmem:[#allocation5 + $0xb04] ss:$28 sps:$4 sm:$0xff]  }
 0x41c   :  { %v18387_v26 = vld [vmem:[#allocation5 + $0x1748] ss:$28 sps:$4 sm:$0xff]  }
 0x41e   :  { %9843 = vmatpush1.bf16.msra.mxu0 %v18329_v39  ;;  %16429 = vmatpush3.bf16.msra.mxu1 %v18333_v2  ;;  %v18384_v39 = vld [vmem:[#allocation5 + $0xb00] ss:$28 sps:$4 sm:$0xff]   ;;  %v18388_v2 = vld [vmem:[#allocation5 + $0x1588] ss:$28 sps:$4 sm:$0xff]  }
 0x41f   :  { %9844 = vmatprep.subr.bf16.mxu0 %v18336_v41  ;;  %16436 = vmatprep.subr.bf16.mxu1 %v18337_v45  ;;  %v18391_v41 = vld [vmem:[#allocation5 + $0xb3c] ss:$28 sps:$4 sm:$0xff]  }
 0x420   :  { %v18389_v45 = vld [vmem:[#allocation5 + $0xb38] ss:$28 sps:$4 sm:$0xff]  }
 0x421   :  { %10431 = vmatmul.mubr.bf16.vlgmr.msra.gmra.mrb[20].mxu1 %v19930_v7 }
 0x422   :  { %9845 = vmatpush1.bf16.msra.mxu0 %v18334_v50  ;;  %16437 = vmatpush3.bf16.msra.mxu1 %v18338_v16  ;;  %v18393_v50 = vld [vmem:[#allocation5 + $0x15c0] ss:$28 sps:$4 sm:$0xff]   ;;  %v18396_v16 = vld [vmem:[#allocation5 + $0xb74] ss:$28 sps:$4 sm:$0xff]  }
 0x423   :  { %9846 = vmatprep.subr.bf16.mxu0 %v18341_v46  ;;  %16438 = vmatprep.subr.bf16.mxu1 %v18342_v29  ;;  %v18397_v46 = vld [vmem:[#allocation5 + $0x17b8] ss:$28 sps:$4 sm:$0xff]   ;;  %v18394_v29 = vld [vmem:[#allocation5 + $0xb70] ss:$28 sps:$4 sm:$0xff]  }
 0x424   :  { %10470 = vmatprep.mubr.bf16.mxu1 %v19932_v13 }
 0x426   :  { %9847 = vmatpush1.bf16.msra.mxu0 %v18339_v48  ;;  %16439 = vmatpush3.bf16.msra.mxu1 %v18343_v52  ;;  %v18398_v48 = vld [vmem:[#allocation5 + $0x15f8] ss:$28 sps:$4 sm:$0xff]   ;;  %v18402_v52 = vld [vmem:[#allocation5 + $0x17f0] ss:$28 sps:$4 sm:$0xff]  }
 0x427   :  { %9848 = vmatprep.subr.bf16.mxu0 %v18346_v53  ;;  %16440 = vmatprep.subr.bf16.mxu1 %v18347_v54  ;;  %v18399_v53 = vld [vmem:[#allocation5 + $0xba8] ss:$28 sps:$4 sm:$0xff]   ;;  %v18403_v54 = vld [vmem:[#allocation5 + $0x1630] ss:$28 sps:$4 sm:$0xff]  }
 0x42a   :  { %9849 = vmatpush1.bf16.msra.mxu0 %v18344_v20  ;;  %16441 = vmatpush3.bf16.msra.mxu1 %v18348_v6  ;;  %v18406_v20 = vld [vmem:[#allocation5 + $0xbe4] ss:$28 sps:$4 sm:$0xff]  }
 0x42b   :  { %9850 = vmatprep.subr.bf16.mxu0 %v18351_v58  ;;  %16442 = vmatprep.subr.bf16.mxu1 %v18352_v61  ;;  %v18407_v6 = vld [vmem:[#allocation5 + $0x1828] ss:$28 sps:$4 sm:$0xff]  }
 0x42e   :  { %9851 = vmatpush1.bf16.msra.mxu0 %v18349_v62  ;;  %16443 = vmatpush3.bf16.msra.mxu1 %v18353_v63 }
 0x42f   :  { %9852 = vmatprep.subr.bf16.mxu0 %v18356_v1  ;;  %16444 = vmatprep.subr.bf16.mxu1 %v18357_v3 }
 0x432   :  { %9853 = vmatpush1.bf16.msra.mxu0 %v18354_v22  ;;  %16445 = vmatpush3.bf16.msra.mxu1 %v18358_v12  ;;  %v18404_v22 = vld [vmem:[#allocation5 + $0xbe0] ss:$28 sps:$4 sm:$0xff]   ;;  %v18408_v12 = vld [vmem:[#allocation5 + $0x1668] ss:$28 sps:$4 sm:$0xff]  }
 0x433   :  { %9854 = vmatprep.subr.bf16.mxu0 %v18361_v4  ;;  %16446 = vmatprep.subr.bf16.mxu1 %v18362_v5 }
 0x436   :  { %9855 = vmatpush1.bf16.msra.mxu0 %v18359_v42  ;;  %16447 = vmatpush3.bf16.msra.mxu1 %v18363_v8  ;;  %v18411_v42 = vld [vmem:[#allocation5 + $0xc1c] ss:$28 sps:$4 sm:$0xff]  }
 0x437   :  { %9856 = vmatprep.subr.bf16.mxu0 %v18366_v14  ;;  %16448 = vmatprep.subr.bf16.mxu1 %v18367_v24  ;;  %v18412_v8 = vld [vmem:[#allocation5 + $0x1860] ss:$28 sps:$4 sm:$0xff]   ;;  %v18409_v14 = vld [vmem:[#allocation5 + $0xc18] ss:$28 sps:$4 sm:$0xff]  }
 0x438   :  { %v18413_v24 = vld [vmem:[#allocation5 + $0x16a0] ss:$28 sps:$4 sm:$0xff]  }
 0x43a   :  { %9857 = vmatpush1.bf16.msra.mxu0 %v18364_v11  ;;  %16449 = vmatpush3.bf16.msra.mxu1 %v18368_v49  ;;  %v18416_v11 = vld [vmem:[#allocation5 + $0xc54] ss:$28 sps:$4 sm:$0xff]  }
 0x43b   :  { %9858 = vmatprep.subr.bf16.mxu0 %v18371_v15  ;;  %16450 = vmatprep.subr.bf16.mxu1 %v18372_v60  ;;  %v18417_v49 = vld [vmem:[#allocation5 + $0x1a58] ss:$28 sps:$4 sm:$0xff]   ;;  %v18414_v15 = vld [vmem:[#allocation5 + $0xc50] ss:$28 sps:$4 sm:$0xff]  }
 0x43c   :  { %v18418_v60 = vld [vmem:[#allocation5 + $0x1898] ss:$28 sps:$4 sm:$0xff]  }
 0x43e   :  { %9859 = vmatpush1.bf16.msra.mxu0 %v18369_v17  ;;  %16451 = vmatpush3.bf16.msra.mxu1 %v18373_v19  ;;  %v18421_v17 = vld [vmem:[#allocation5 + $0xc8c] ss:$28 sps:$4 sm:$0xff]  }
 0x43f   :  { %9869 = vmatprep.subr.bf16.mxu0 %v18376_v34  ;;  %16458 = vmatprep.subr.bf16.mxu1 %v18377_v25  ;;  %v18422_v19 = vld [vmem:[#allocation5 + $0x1a90] ss:$28 sps:$4 sm:$0xff]   ;;  %v18419_v34 = vld [vmem:[#allocation5 + $0xc88] ss:$28 sps:$4 sm:$0xff]  }
 0x440   :  { %v18423_v25 = vld [vmem:[#allocation5 + $0x18d0] ss:$28 sps:$4 sm:$0xff]  }
 0x441   :  { %9861 = vmatmul.mubr.bf16.vlgmr.msra.gmra.mrb[4].mxu0 %v19895_v38  ;;  %10471 = vmatmul.mubr.bf16.vlgmr.msra.gmra.mrb[24].mxu1 %v19948_v30  ;;  %v18392_v38 = vld [vmem:[#allocation5 + $0x1780] ss:$28 sps:$4 sm:$0xff]  }
 0x442   :  { %9870 = vmatpush1.bf16.msra.mxu0 %v18374_v23  ;;  %16459 = vmatpush3.bf16.msra.mxu1 %v18378_v27  ;;  %v18426_v23 = vld [vmem:[#allocation5 + $0xcc4] ss:$28 sps:$4 sm:$0xff]  }
 0x443   :  { %9871 = vmatprep.subr.bf16.mxu0 %v18381_v28  ;;  %16460 = vmatprep.subr.bf16.mxu1 %v18382_v31  ;;  %v18427_v27 = vld [vmem:[#allocation5 + $0x1ac8] ss:$28 sps:$4 sm:$0xff]   ;;  %v18424_v28 = vld [vmem:[#allocation5 + $0xcc0] ss:$28 sps:$4 sm:$0xff]  }
 0x444   :  { %10510 = vmatprep.mubr.bf16.mxu1 %v19950_v37  ;;  %9901 = vmatprep.mubr.bf16.mxu0 %v19897_v44  ;;  %v18401_v44 = vld [vmem:[#allocation5 + $0xbac] ss:$28 sps:$4 sm:$0xff]  }
 0x445   :  { %v18428_v31 = vld [vmem:[#allocation5 + $0x1908] ss:$28 sps:$4 sm:$0xff]  }
 0x446   :  { %9872 = vmatpush1.bf16.msra.mxu0 %v18379_v33  ;;  %16461 = vmatpush3.bf16.msra.mxu1 %v18383_v51  ;;  %v18431_v33 = vld [vmem:[#allocation5 + $0xcfc] ss:$28 sps:$4 sm:$0xff]  }
 0x447   :  { %9873 = vmatprep.subr.bf16.mxu0 %v18386_v35  ;;  %16462 = vmatprep.subr.bf16.mxu1 %v18387_v26  ;;  %v18432_v51 = vld [vmem:[#allocation5 + $0x1b00] ss:$28 sps:$4 sm:$0xff]   ;;  %v18429_v35 = vld [vmem:[#allocation5 + $0xcf8] ss:$28 sps:$4 sm:$0xff]  }
 0x448   :  { %v18433_v26 = vld [vmem:[#allocation5 + $0x1940] ss:$28 sps:$4 sm:$0xff]  }
 0x44a   :  { %9874 = vmatpush1.bf16.msra.mxu0 %v18384_v39  ;;  %16463 = vmatpush3.bf16.msra.mxu1 %v18388_v2  ;;  %v18436_v39 = vld [vmem:[#allocation5 + $0xd34] ss:$28 sps:$4 sm:$0xff]  }
 0x44b   :  { %9875 = vmatprep.subr.bf16.mxu0 %v18391_v41  ;;  %16464 = vmatprep.subr.bf16.mxu1 %v18392_v38  ;;  %v18437_v2 = vld [vmem:[#allocation5 + $0x1b38] ss:$28 sps:$4 sm:$0xff]   ;;  %v18434_v41 = vld [vmem:[#allocation5 + $0xd30] ss:$28 sps:$4 sm:$0xff]  }
 0x44c   :  { %v18438_v38 = vld [vmem:[#allocation5 + $0x1978] ss:$28 sps:$4 sm:$0xff]  }
 0x44e   :  { %9876 = vmatpush1.bf16.msra.mxu0 %v18389_v45  ;;  %16465 = vmatpush3.bf16.msra.mxu1 %v18393_v50  ;;  %v18441_v45 = vld [vmem:[#allocation5 + $0xd6c] ss:$28 sps:$4 sm:$0xff]  }
 0x44f   :  { %9877 = vmatprep.subr.bf16.mxu0 %v18396_v16  ;;  %16466 = vmatprep.subr.bf16.mxu1 %v18397_v46  ;;  %v18442_v50 = vld [vmem:[#allocation5 + $0x1b70] ss:$28 sps:$4 sm:$0xff]   ;;  %v18439_v16 = vld [vmem:[#allocation5 + $0xd68] ss:$28 sps:$4 sm:$0xff]  }
 0x450   :  { %v18443_v46 = vld [vmem:[#allocation5 + $0x19b0] ss:$28 sps:$4 sm:$0xff]  }
 0x452   :  { %9878 = vmatpush1.bf16.msra.mxu0 %v18394_v29  ;;  %16467 = vmatpush3.bf16.msra.mxu1 %v18398_v48  ;;  %v18446_v29 = vld [vmem:[#allocation5 + $0xda4] ss:$28 sps:$4 sm:$0xff]  }
 0x453   :  { %9879 = vmatprep.subr.bf16.mxu0 %v18401_v44  ;;  %16468 = vmatprep.subr.bf16.mxu1 %v18402_v52  ;;  %v18447_v48 = vld [vmem:[#allocation5 + $0x1ba8] ss:$28 sps:$4 sm:$0xff]   ;;  %v18444_v44 = vld [vmem:[#allocation5 + $0xda0] ss:$28 sps:$4 sm:$0xff]  }
 0x454   :  { %v20069_v58 = vpop.f32.mrb[0].mxu0  ;;  %v20071_v61 = vpop.f32.mrb[0].mxu1  ;;  %v18448_v52 = vld [vmem:[#allocation5 + $0x19e8] ss:$28 sps:$4 sm:$0xff]  }
 0x455   :  { %v20073_v62 = vpop.f32.mrb[1].mxu0  ;;  %v20075_v63 = vpop.f32.mrb[1].mxu1 }
 0x456   :  { %v9251_v1 = vpop.f32.mrb[2].mxu0  ;;  %v9743_v3 = vpop.f32.mrb[2].mxu1  ;;  %9880 = vmatpush1.bf16.msra.mxu0 %v18399_v53  ;;  %16469 = vmatpush3.bf16.msra.mxu1 %v18403_v54  ;;  %v18451_v53 = vld [vmem:[#allocation5 + $0xddc] ss:$28 sps:$4 sm:$0xff]  }
 0x457   :  { %v9252_v4 = vpop.f32.mrb[3].mxu0  ;;  %v9744_v5 = vpop.f32.mrb[3].mxu1  ;;  %9881 = vmatprep.subr.bf16.mxu0 %v18406_v20  ;;  %16470 = vmatprep.subr.bf16.mxu1 %v18407_v6  ;;  %v18452_v54 = vld [vmem:[#allocation5 + $0x1be0] ss:$28 sps:$4 sm:$0xff]   ;;  %v18449_v20 = vld [vmem:[#allocation5 + $0xdd8] ss:$28 sps:$4 sm:$0xff]  }
 0x458   :  { %v18453_v6 = vld [vmem:[#allocation5 + $0x1a20] ss:$28 sps:$4 sm:$0xff]   ;;  %v18456_v1 = vld [vmem:[#allocation5 + $0xe14] ss:$28 sps:$4 sm:$0xff]   ;;  %v18461_v4 = vld [vmem:[#allocation5 + $0xe4c] ss:$28 sps:$4 sm:$0xff]  }
 0x459   :  { %v18457_v3 = vld [vmem:[#allocation5 + $0x1dd8] ss:$28 sps:$4 sm:$0xff]   ;;  %v18462_v5 = vld [vmem:[#allocation5 + $0x1e10] ss:$28 sps:$4 sm:$0xff]  }
 0x45a   :  { %9882 = vmatpush1.bf16.msra.mxu0 %v18404_v22  ;;  %16471 = vmatpush3.bf16.msra.mxu1 %v18408_v12  ;;  %v18454_v22 = vld [vmem:[#allocation5 + $0xe10] ss:$28 sps:$4 sm:$0xff]   ;;  %v18458_v12 = vld [vmem:[#allocation5 + $0x1c18] ss:$28 sps:$4 sm:$0xff]  }
 0x45b   :  { %9883 = vmatprep.subr.bf16.mxu0 %v18411_v42  ;;  %16472 = vmatprep.subr.bf16.mxu1 %v18412_v8  ;;  %v18459_v42 = vld [vmem:[#allocation5 + $0xe48] ss:$28 sps:$4 sm:$0xff]   ;;  %v18463_v8 = vld [vmem:[#allocation5 + $0x1c50] ss:$28 sps:$4 sm:$0xff]  }
 0x45e   :  { %9884 = vmatpush1.bf16.msra.mxu0 %v18409_v14  ;;  %16473 = vmatpush3.bf16.msra.mxu1 %v18413_v24  ;;  %v18466_v14 = vld [vmem:[#allocation5 + $0xe84] ss:$28 sps:$4 sm:$0xff]  }
 0x45f   :  { %9885 = vmatprep.subr.bf16.mxu0 %v18416_v11  ;;  %16480 = vmatprep.subr.bf16.mxu1 %v18417_v49  ;;  %v18467_v24 = vld [vmem:[#allocation5 + $0x1e48] ss:$28 sps:$4 sm:$0xff]   ;;  %v18464_v11 = vld [vmem:[#allocation5 + $0xe80] ss:$28 sps:$4 sm:$0xff]  }
 0x460   :  { %v18468_v49 = vld [vmem:[#allocation5 + $0x1c88] ss:$28 sps:$4 sm:$0xff]  }
 0x461   :  { %10511 = vmatmul.mubr.bf16.vlgmr.msra.gmra.mrb[28].mxu1 %v19965_v57 }
 0x462   :  { %9886 = vmatpush1.bf16.msra.mxu0 %v18414_v15  ;;  %16481 = vmatpush3.bf16.msra.mxu1 %v18418_v60  ;;  %v18471_v15 = vld [vmem:[#allocation5 + $0xebc] ss:$28 sps:$4 sm:$0xff]  }
 0x463   :  { %9887 = vmatprep.subr.bf16.mxu0 %v18421_v17  ;;  %16482 = vmatprep.subr.bf16.mxu1 %v18422_v19  ;;  %v18469_v60 = vld [vmem:[#allocation5 + $0xeb8] ss:$28 sps:$4 sm:$0xff]   ;;  %v18473_v17 = vld [vmem:[#allocation5 + $0x1cc0] ss:$28 sps:$4 sm:$0xff]  }
 0x464   :  { %10550 = vmatprep.mubr.bf16.mxu1 %v19967_v32  ;;  %v18476_v19 = vld [vmem:[#allocation5 + $0xef4] ss:$28 sps:$4 sm:$0xff]  }
 0x466   :  { %9888 = vmatpush1.bf16.msra.mxu0 %v18419_v34  ;;  %16483 = vmatpush3.bf16.msra.mxu1 %v18423_v25  ;;  %v18477_v34 = vld [vmem:[#allocation5 + $0x1eb8] ss:$28 sps:$4 sm:$0xff]   ;;  %v18474_v25 = vld [vmem:[#allocation5 + $0xef0] ss:$28 sps:$4 sm:$0xff]  }
 0x467   :  { %9889 = vmatprep.subr.bf16.mxu0 %v18426_v23  ;;  %16484 = vmatprep.subr.bf16.mxu1 %v18427_v27  ;;  %v18481_v23 = vld [vmem:[#allocation5 + $0xf2c] ss:$28 sps:$4 sm:$0xff]  }
 0x468   :  { %v18482_v27 = vld [vmem:[#allocation5 + $0x1ef0] ss:$28 sps:$4 sm:$0xff]  }
 0x46a   :  { %9890 = vmatpush1.bf16.msra.mxu0 %v18424_v28  ;;  %16485 = vmatpush3.bf16.msra.mxu1 %v18428_v31  ;;  %v18479_v28 = vld [vmem:[#allocation5 + $0xf28] ss:$28 sps:$4 sm:$0xff]   ;;  %v18483_v31 = vld [vmem:[#allocation5 + $0x1d30] ss:$28 sps:$4 sm:$0xff]  }
 0x46b   :  { %9891 = vmatprep.subr.bf16.mxu0 %v18431_v33  ;;  %16486 = vmatprep.subr.bf16.mxu1 %v18432_v51  ;;  %v18486_v33 = vld [vmem:[#allocation5 + $0xf64] ss:$28 sps:$4 sm:$0xff]  }
 0x46c   :  { %v18487_v51 = vld [vmem:[#allocation5 + $0x1f28] ss:$28 sps:$4 sm:$0xff]  }
 0x46e   :  { %9892 = vmatpush1.bf16.msra.mxu0 %v18429_v35  ;;  %16487 = vmatpush3.bf16.msra.mxu1 %v18433_v26  ;;  %v18484_v35 = vld [vmem:[#allocation5 + $0xf60] ss:$28 sps:$4 sm:$0xff]   ;;  %v18488_v26 = vld [vmem:[#allocation5 + $0x1d68] ss:$28 sps:$4 sm:$0xff]  }
 0x46f   :  { %9893 = vmatprep.subr.bf16.mxu0 %v18436_v39  ;;  %16488 = vmatprep.subr.bf16.mxu1 %v18437_v2  ;;  %v18491_v39 = vld [vmem:[#allocation5 + $0xf9c] ss:$28 sps:$4 sm:$0xff]  }
 0x470   :  { %v18492_v2 = vld [vmem:[#allocation5 + $0x1f60] ss:$28 sps:$4 sm:$0xff]  }
 0x472   :  { %9894 = vmatpush1.bf16.msra.mxu0 %v18434_v41  ;;  %16489 = vmatpush3.bf16.msra.mxu1 %v18438_v38  ;;  %v18489_v41 = vld [vmem:[#allocation5 + $0xf98] ss:$28 sps:$4 sm:$0xff]   ;;  %v18493_v38 = vld [vmem:[#allocation5 + $0x1da0] ss:$28 sps:$4 sm:$0xff]  }
 0x473   :  { %9895 = vmatprep.subr.bf16.mxu0 %v18441_v45  ;;  %16490 = vmatprep.subr.bf16.mxu1 %v18442_v50  ;;  %v18496_v45 = vld [vmem:[#allocation5 + $0xfd4] ss:$28 sps:$4 sm:$0xff]  }
 0x474   :  { %v18497_v50 = vld [vmem:[#allocation5 + $0x2158] ss:$28 sps:$4 sm:$0xff]  }
 0x476   :  { %9896 = vmatpush1.bf16.msra.mxu0 %v18439_v16  ;;  %16491 = vmatpush3.bf16.msra.mxu1 %v18443_v46  ;;  %v18494_v16 = vld [vmem:[#allocation5 + $0xfd0] ss:$28 sps:$4 sm:$0xff]   ;;  %v18498_v46 = vld [vmem:[#allocation5 + $0x1f98] ss:$28 sps:$4 sm:$0xff]  }
 0x477   :  { %9897 = vmatprep.subr.bf16.mxu0 %v18446_v29  ;;  %16492 = vmatprep.subr.bf16.mxu1 %v18447_v48  ;;  %v18501_v29 = vld [vmem:[#allocation5 + $0x100c] ss:$28 sps:$4 sm:$0xff]  }
 0x478   :  { %v18502_v48 = vld [vmem:[#allocation5 + $0x2190] ss:$28 sps:$4 sm:$0xff]  }
 0x47a   :  { %9898 = vmatpush1.bf16.msra.mxu0 %v18444_v44  ;;  %16493 = vmatpush3.bf16.msra.mxu1 %v18448_v52  ;;  %v18499_v44 = vld [vmem:[#allocation5 + $0x1008] ss:$28 sps:$4 sm:$0xff]   ;;  %v18503_v52 = vld [vmem:[#allocation5 + $0x1fd0] ss:$28 sps:$4 sm:$0xff]  }
 0x47b   :  { %9899 = vmatprep.subr.bf16.mxu0 %v18451_v53  ;;  %16494 = vmatprep.subr.bf16.mxu1 %v18452_v54  ;;  %v18506_v53 = vld [vmem:[#allocation5 + $0x1044] ss:$28 sps:$4 sm:$0xff]  }
 0x47c   :  { %v18507_v54 = vld [vmem:[#allocation5 + $0x21c8] ss:$28 sps:$4 sm:$0xff]  }
 0x47e   :  { %9900 = vmatpush1.bf16.msra.mxu0 %v18449_v20  ;;  %16495 = vmatpush3.bf16.msra.mxu1 %v18453_v6  ;;  %v18504_v20 = vld [vmem:[#allocation5 + $0x1040] ss:$28 sps:$4 sm:$0xff]   ;;  %v18508_v6 = vld [vmem:[#allocation5 + $0x2008] ss:$28 sps:$4 sm:$0xff]  }
 0x47f   :  { %9910 = vmatprep.subr.bf16.mxu0 %v18456_v1  ;;  %16502 = vmatprep.subr.bf16.mxu1 %v18457_v3  ;;  %v18511_v1 = vld [vmem:[#allocation5 + $0x107c] ss:$28 sps:$4 sm:$0xff]  }
 0x480   :  { %v18512_v3 = vld [vmem:[#allocation5 + $0x2200] ss:$28 sps:$4 sm:$0xff]  }
 0x481   :  { %9902 = vmatmul.mubr.bf16.vlgmr.msra.gmra.mrb[4].mxu0 %v19913_v55  ;;  %10551 = vmatmul.mubr.bf16.vlgmr.msra.gmra.mrb[32].mxu1 %v19983_v21  ;;  %v18472_v55 = vld [vmem:[#allocation5 + $0x1e80] ss:$28 sps:$4 sm:$0xff]  }
 0x482   :  { %9911 = vmatpush1.bf16.msra.mxu0 %v18454_v22  ;;  %16503 = vmatpush3.bf16.msra.mxu1 %v18458_v12  ;;  %v18509_v22 = vld [vmem:[#allocation5 + $0x1078] ss:$28 sps:$4 sm:$0xff]   ;;  %v18513_v12 = vld [vmem:[#allocation5 + $0x2040] ss:$28 sps:$4 sm:$0xff]  }
 0x483   :  { %9912 = vmatprep.subr.bf16.mxu0 %v18461_v4  ;;  %16504 = vmatprep.subr.bf16.mxu1 %v18462_v5  ;;  %v18516_v4 = vld [vmem:[#allocation5 + $0x10b4] ss:$28 sps:$4 sm:$0xff]  }
 0x484   :  { %10590 = vmatprep.mubr.bf16.mxu1 %v19985_v9  ;;  %9942 = vmatprep.mubr.bf16.mxu0 %v19915_v59  ;;  %v18478_v59 = vld [vmem:[#allocation5 + $0x1cf8] ss:$28 sps:$4 sm:$0xff]  }
 0x485   :  { %v18517_v5 = vld [vmem:[#allocation5 + $0x2238] ss:$28 sps:$4 sm:$0xff]  }
 0x486   :  { %9913 = vmatpush1.bf16.msra.mxu0 %v18459_v42  ;;  %16505 = vmatpush3.bf16.msra.mxu1 %v18463_v8  ;;  %v18514_v42 = vld [vmem:[#allocation5 + $0x10b0] ss:$28 sps:$4 sm:$0xff]   ;;  %v18518_v8 = vld [vmem:[#allocation5 + $0x2078] ss:$28 sps:$4 sm:$0xff]  }
 0x487   :  { %9914 = vmatprep.subr.bf16.mxu0 %v18466_v14  ;;  %16506 = vmatprep.subr.bf16.mxu1 %v18467_v24  ;;  %v18521_v14 = vld [vmem:[#allocation5 + $0x10ec] ss:$28 sps:$4 sm:$0xff]  }
 0x488   :  { %v18522_v24 = vld [vmem:[#allocation5 + $0x2270] ss:$28 sps:$4 sm:$0xff]  }
 0x48a   :  { %9915 = vmatpush1.bf16.msra.mxu0 %v18464_v11  ;;  %16507 = vmatpush3.bf16.msra.mxu1 %v18468_v49  ;;  %v18519_v11 = vld [vmem:[#allocation5 + $0x10e8] ss:$28 sps:$4 sm:$0xff]   ;;  %v18523_v49 = vld [vmem:[#allocation5 + $0x20b0] ss:$28 sps:$4 sm:$0xff]  }
 0x48b   :  { %9916 = vmatprep.subr.bf16.mxu0 %v18471_v15  ;;  %16508 = vmatprep.subr.bf16.mxu1 %v18472_v55  ;;  %v18526_v15 = vld [vmem:[#allocation5 + $0x1124] ss:$28 sps:$4 sm:$0xff]  }
 0x48c   :  { %v18527_v55 = vld [vmem:[#allocation5 + $0x22a8] ss:$28 sps:$4 sm:$0xff]  }
 0x48e   :  { %9917 = vmatpush1.bf16.msra.mxu0 %v18469_v60  ;;  %16509 = vmatpush3.bf16.msra.mxu1 %v18473_v17  ;;  %v18524_v60 = vld [vmem:[#allocation5 + $0x1120] ss:$28 sps:$4 sm:$0xff]   ;;  %v18528_v17 = vld [vmem:[#allocation5 + $0x20e8] ss:$28 sps:$4 sm:$0xff]  }
 0x48f   :  { %9918 = vmatprep.subr.bf16.mxu0 %v18476_v19  ;;  %16510 = vmatprep.subr.bf16.mxu1 %v18477_v34  ;;  %v18531_v19 = vld [vmem:[#allocation5 + $0x115c] ss:$28 sps:$4 sm:$0xff]  }
 0x490   :  { %v18532_v34 = vld [vmem:[#allocation5 + $0x22e0] ss:$28 sps:$4 sm:$0xff]  }
 0x492   :  { %9919 = vmatpush1.bf16.msra.mxu0 %v18474_v25  ;;  %16511 = vmatpush3.bf16.msra.mxu1 %v18478_v59  ;;  %v18529_v25 = vld [vmem:[#allocation5 + $0x1158] ss:$28 sps:$4 sm:$0xff]   ;;  %v18533_v59 = vld [vmem:[#allocation5 + $0x2120] ss:$28 sps:$4 sm:$0xff]  }
 0x493   :  { %9920 = vmatprep.subr.bf16.mxu0 %v18481_v23  ;;  %16512 = vmatprep.subr.bf16.mxu1 %v18482_v27  ;;  %v18536_v23 = vld [vmem:[#allocation5 + $0x1194] ss:$28 sps:$4 sm:$0xff]  }
 0x494   :  { %v18537_v27 = vld [vmem:[#allocation5 + $0x24d8] ss:$28 sps:$4 sm:$0xff]  }
 0x496   :  { %9921 = vmatpush1.bf16.msra.mxu0 %v18479_v28  ;;  %16513 = vmatpush3.bf16.msra.mxu1 %v18483_v31  ;;  %v18534_v28 = vld [vmem:[#allocation5 + $0x1190] ss:$28 sps:$4 sm:$0xff]   ;;  %v18538_v31 = vld [vmem:[#allocation5 + $0x2318] ss:$28 sps:$4 sm:$0xff]  }
 0x497   :  { %9922 = vmatprep.subr.bf16.mxu0 %v18486_v33  ;;  %16514 = vmatprep.subr.bf16.mxu1 %v18487_v51  ;;  %v18541_v33 = vld [vmem:[#allocation5 + $0x11cc] ss:$28 sps:$4 sm:$0xff]  }
 0x498   :  { %v18542_v51 = vld [vmem:[#allocation5 + $0x2510] ss:$28 sps:$4 sm:$0xff]  }
 0x49a   :  { %9923 = vmatpush1.bf16.msra.mxu0 %v18484_v35  ;;  %16515 = vmatpush3.bf16.msra.mxu1 %v18488_v26  ;;  %v18539_v35 = vld [vmem:[#allocation5 + $0x11c8] ss:$28 sps:$4 sm:$0xff]   ;;  %v18543_v26 = vld [vmem:[#allocation5 + $0x2350] ss:$28 sps:$4 sm:$0xff]  }
 0x49b   :  { %9924 = vmatprep.subr.bf16.mxu0 %v18491_v39  ;;  %16516 = vmatprep.subr.bf16.mxu1 %v18492_v2  ;;  %v18546_v39 = vld [vmem:[#allocation5 + $0x1204] ss:$28 sps:$4 sm:$0xff]  }
 0x49c   :  { %v18547_v2 = vld [vmem:[#allocation5 + $0x2548] ss:$28 sps:$4 sm:$0xff]  }
 0x49e   :  { %9925 = vmatpush1.bf16.msra.mxu0 %v18489_v41  ;;  %16517 = vmatpush3.bf16.msra.mxu1 %v18493_v38  ;;  %v18544_v41 = vld [vmem:[#allocation5 + $0x1200] ss:$28 sps:$4 sm:$0xff]   ;;  %v18548_v38 = vld [vmem:[#allocation5 + $0x2388] ss:$28 sps:$4 sm:$0xff]  }
 0x49f   :  { %9926 = vmatprep.subr.bf16.mxu0 %v18496_v45  ;;  %16524 = vmatprep.subr.bf16.mxu1 %v18497_v50  ;;  %v18552_v45 = vld [vmem:[#allocation5 + $0x2580] ss:$28 sps:$4 sm:$0xff]   ;;  %v18549_v50 = vld [vmem:[#allocation5 + $0x1238] ss:$28 sps:$4 sm:$0xff]  }
 0x4a1   :  { %10591 = vmatmul.mubr.bf16.vlgmr.msra.gmra.mrb[36].mxu1 %v20000_v47 }
 0x4a2   :  { %9927 = vmatpush1.bf16.msra.mxu0 %v18494_v16  ;;  %16525 = vmatpush3.bf16.msra.mxu1 %v18498_v46  ;;  %v18553_v16 = vld [vmem:[#allocation5 + $0x23c0] ss:$28 sps:$4 sm:$0xff]   ;;  %v18556_v46 = vld [vmem:[#allocation5 + $0x1274] ss:$28 sps:$4 sm:$0xff]  }
 0x4a3   :  { %9928 = vmatprep.subr.bf16.mxu0 %v18501_v29  ;;  %16526 = vmatprep.subr.bf16.mxu1 %v18502_v48  ;;  %v18557_v29 = vld [vmem:[#allocation5 + $0x25b8] ss:$28 sps:$4 sm:$0xff]   ;;  %v18554_v48 = vld [vmem:[#allocation5 + $0x1270] ss:$28 sps:$4 sm:$0xff]  }
 0x4a4   :  { %10630 = vmatprep.mubr.bf16.mxu1 %v20002_v0 }
 0x4a6   :  { %9929 = vmatpush1.bf16.msra.mxu0 %v18499_v44  ;;  %16527 = vmatpush3.bf16.msra.mxu1 %v18503_v52  ;;  %v18561_v44 = vld [vmem:[#allocation5 + $0x12ac] ss:$28 sps:$4 sm:$0xff]  }
 0x4a7   :  { %9930 = vmatprep.subr.bf16.mxu0 %v18506_v53  ;;  %16528 = vmatprep.subr.bf16.mxu1 %v18507_v54  ;;  %v18562_v52 = vld [vmem:[#allocation5 + $0x25f0] ss:$28 sps:$4 sm:$0xff]   ;;  %v18559_v53 = vld [vmem:[#allocation5 + $0x12a8] ss:$28 sps:$4 sm:$0xff]  }
 0x4a8   :  { %v18563_v54 = vld [vmem:[#allocation5 + $0x2430] ss:$28 sps:$4 sm:$0xff]  }
 0x4aa   :  { %9931 = vmatpush1.bf16.msra.mxu0 %v18504_v20  ;;  %16529 = vmatpush3.bf16.msra.mxu1 %v18508_v6  ;;  %v18566_v20 = vld [vmem:[#allocation5 + $0x12e4] ss:$28 sps:$4 sm:$0xff]  }
 0x4ab   :  { %9932 = vmatprep.subr.bf16.mxu0 %v18511_v1  ;;  %16530 = vmatprep.subr.bf16.mxu1 %v18512_v3  ;;  %v18567_v6 = vld [vmem:[#allocation5 + $0x2628] ss:$28 sps:$4 sm:$0xff]   ;;  %v18564_v1 = vld [vmem:[#allocation5 + $0x12e0] ss:$28 sps:$4 sm:$0xff]  }
 0x4ac   :  { %v18568_v3 = vld [vmem:[#allocation5 + $0x2468] ss:$28 sps:$4 sm:$0xff]  }
 0x4ae   :  { %9933 = vmatpush1.bf16.msra.mxu0 %v18509_v22  ;;  %16531 = vmatpush3.bf16.msra.mxu1 %v18513_v12  ;;  %v18571_v22 = vld [vmem:[#allocation5 + $0x131c] ss:$28 sps:$4 sm:$0xff]  }
 0x4af   :  { %9934 = vmatprep.subr.bf16.mxu0 %v18516_v4  ;;  %16532 = vmatprep.subr.bf16.mxu1 %v18517_v5  ;;  %v18572_v12 = vld [vmem:[#allocation5 + $0x2660] ss:$28 sps:$4 sm:$0xff]   ;;  %v18569_v4 = vld [vmem:[#allocation5 + $0x1318] ss:$28 sps:$4 sm:$0xff]  }
 0x4b0   :  { %v18573_v5 = vld [vmem:[#allocation5 + $0x24a0] ss:$28 sps:$4 sm:$0xff]  }
 0x4b2   :  { %9935 = vmatpush1.bf16.msra.mxu0 %v18514_v42  ;;  %16533 = vmatpush3.bf16.msra.mxu1 %v18518_v8  ;;  %v18576_v42 = vld [vmem:[#allocation5 + $0x1354] ss:$28 sps:$4 sm:$0xff]  }
 0x4b3   :  { %9936 = vmatprep.subr.bf16.mxu0 %v18521_v14  ;;  %16534 = vmatprep.subr.bf16.mxu1 %v18522_v24  ;;  %v18577_v8 = vld [vmem:[#allocation5 + $0x2858] ss:$28 sps:$4 sm:$0xff]   ;;  %v18574_v14 = vld [vmem:[#allocation5 + $0x1350] ss:$28 sps:$4 sm:$0xff]  }
 0x4b4   :  { %v18578_v24 = vld [vmem:[#allocation5 + $0x2698] ss:$28 sps:$4 sm:$0xff]  }
 0x4b6   :  { %9937 = vmatpush1.bf16.msra.mxu0 %v18519_v11  ;;  %16535 = vmatpush3.bf16.msra.mxu1 %v18523_v49  ;;  %v18581_v11 = vld [vmem:[#allocation5 + $0x138c] ss:$28 sps:$4 sm:$0xff]  }
 0x4b7   :  { %9938 = vmatprep.subr.bf16.mxu0 %v18526_v15  ;;  %16536 = vmatprep.subr.bf16.mxu1 %v18527_v55  ;;  %v18582_v49 = vld [vmem:[#allocation5 + $0x2890] ss:$28 sps:$4 sm:$0xff]   ;;  %v18579_v15 = vld [vmem:[#allocation5 + $0x1388] ss:$28 sps:$4 sm:$0xff]  }
 0x4b8   :  { %v18583_v55 = vld [vmem:[#allocation5 + $0x26d0] ss:$28 sps:$4 sm:$0xff]  }
 0x4ba   :  { %9939 = vmatpush1.bf16.msra.mxu0 %v18524_v60  ;;  %16537 = vmatpush3.bf16.msra.mxu1 %v18528_v17  ;;  %v18586_v60 = vld [vmem:[#allocation5 + $0x13c4] ss:$28 sps:$4 sm:$0xff]  }
 0x4bb   :  { %9940 = vmatprep.subr.bf16.mxu0 %v18531_v19  ;;  %16538 = vmatprep.subr.bf16.mxu1 %v18532_v34  ;;  %v18587_v17 = vld [vmem:[#allocation5 + $0x28c8] ss:$28 sps:$4 sm:$0xff]   ;;  %v18584_v19 = vld [vmem:[#allocation5 + $0x13c0] ss:$28 sps:$4 sm:$0xff]  }
 0x4bc   :  { %v18588_v34 = vld [vmem:[#allocation5 + $0x2708] ss:$28 sps:$4 sm:$0xff]  }
 0x4be   :  { %9941 = vmatpush1.bf16.msra.mxu0 %v18529_v25  ;;  %16539 = vmatpush3.bf16.msra.mxu1 %v18533_v59  ;;  %v18591_v25 = vld [vmem:[#allocation5 + $0x13fc] ss:$28 sps:$4 sm:$0xff]  }
 0x4bf   :  { %9951 = vmatprep.subr.bf16.mxu0 %v18536_v23  ;;  %16546 = vmatprep.subr.bf16.mxu1 %v18537_v27  ;;  %v18592_v59 = vld [vmem:[#allocation5 + $0x2900] ss:$28 sps:$4 sm:$0xff]   ;;  %v18589_v23 = vld [vmem:[#allocation5 + $0x13f8] ss:$28 sps:$4 sm:$0xff]  }
 0x4c0   :  { %v18593_v27 = vld [vmem:[#allocation5 + $0x2740] ss:$28 sps:$4 sm:$0xff]  }
 0x4c1   :  { %9943 = vmatmul.mubr.bf16.vlgmr.msra.gmra.mrb[4].mxu0 %v19930_v7  ;;  %10631 = vmatmul.mubr.bf16.vlgmr.msra.gmra.mrb[40].mxu1 %v20018_v36  ;;  %v18551_v7 = vld [vmem:[#allocation5 + $0x123c] ss:$28 sps:$4 sm:$0xff]  }
 0x4c2   :  { %9952 = vmatpush1.bf16.msra.mxu0 %v18534_v28  ;;  %16547 = vmatpush3.bf16.msra.mxu1 %v18538_v31  ;;  %v18596_v28 = vld [vmem:[#allocation5 + $0x1434] ss:$28 sps:$4 sm:$0xff]  }
 0x4c3   :  { %9953 = vmatprep.subr.bf16.mxu0 %v18541_v33  ;;  %16548 = vmatprep.subr.bf16.mxu1 %v18542_v51  ;;  %v18597_v31 = vld [vmem:[#allocation5 + $0x2938] ss:$28 sps:$4 sm:$0xff]   ;;  %v18594_v33 = vld [vmem:[#allocation5 + $0x1430] ss:$28 sps:$4 sm:$0xff]  }
 0x4c4   :  { %10670 = vmatprep.mubr.bf16.mxu1 %v20020_v40  ;;  %9983 = vmatprep.mubr.bf16.mxu0 %v19932_v13  ;;  %v18558_v13 = vld [vmem:[#allocation5 + $0x23f8] ss:$28 sps:$4 sm:$0xff]  }
 0x4c5   :  { %v18598_v51 = vld [vmem:[#allocation5 + $0x2778] ss:$28 sps:$4 sm:$0xff]  }
 0x4c6   :  { %9954 = vmatpush1.bf16.msra.mxu0 %v18539_v35  ;;  %16549 = vmatpush3.bf16.msra.mxu1 %v18543_v26  ;;  %v18601_v35 = vld [vmem:[#allocation5 + $0x146c] ss:$28 sps:$4 sm:$0xff]  }
 0x4c7   :  { %9955 = vmatprep.subr.bf16.mxu0 %v18546_v39  ;;  %16550 = vmatprep.subr.bf16.mxu1 %v18547_v2  ;;  %v18602_v26 = vld [vmem:[#allocation5 + $0x2970] ss:$28 sps:$4 sm:$0xff]   ;;  %v1821_v39 = vsub.s32 1, %v19845_v43  ;;  %v20092_v2 = vld [vmem:[#allocation7] sm:$0xff] }
 0x4ca   :  { %9956 = vmatpush1.bf16.msra.mxu0 %v18544_v41  ;;  %16551 = vmatpush3.bf16.msra.mxu1 %v18548_v38  ;;  %v18599_v41 = vld [vmem:[#allocation5 + $0x1468] ss:$28 sps:$4 sm:$0xff]   ;;  %v18603_v38 = vld [vmem:[#allocation5 + $0x27b0] ss:$28 sps:$4 sm:$0xff]  }
 0x4cb   :  { %9957 = vmatprep.subr.bf16.mxu0 %v18551_v7  ;;  %16552 = vmatprep.subr.bf16.mxu1 %v18552_v45  ;;  %v18606_v7 = vld [vmem:[#allocation5 + $0x14a4] ss:$28 sps:$4 sm:$0xff]  }
 0x4cc   :  { %v18607_v45 = vld [vmem:[#allocation5 + $0x29a8] ss:$28 sps:$4 sm:$0xff]  }
 0x4ce   :  { %9958 = vmatpush1.bf16.msra.mxu0 %v18549_v50  ;;  %16553 = vmatpush3.bf16.msra.mxu1 %v18553_v16  ;;  %v1822_v50 = vrot.slane %v20092_v2, %v1821_v39  ;;  %v18604_v16 = vld [vmem:[#allocation5 + $0x14a0] ss:$28 sps:$4 sm:$0xff]  }
 0x4cf   :  { %9959 = vmatprep.subr.bf16.mxu0 %v18556_v46  ;;  %16554 = vmatprep.subr.bf16.mxu1 %v18557_v29  ;;  %v18608_v46 = vld [vmem:[#allocation5 + $0x27e8] ss:$28 sps:$4 sm:$0xff]   ;;  %v18611_v29 = vld [vmem:[#allocation5 + $0x14dc] ss:$28 sps:$4 sm:$0xff]  }
 0x4d2   :  { %9960 = vmatpush1.bf16.msra.mxu0 %v18554_v48  ;;  %16555 = vmatpush3.bf16.msra.mxu1 %v18558_v13  ;;  %v18612_v48 = vld [vmem:[#allocation5 + $0x29e0] ss:$28 sps:$4 sm:$0xff]   ;;  %v16781_v13 = vadd.f32 %v20073_v62, %v1822_v50  ;;  %v18620_v62 = vld [vmem:[#allocation5 + $0x1548] ss:$28 sps:$4 sm:$0xff]  }
 0x4d3   :  { %9961 = vmatprep.subr.bf16.mxu0 %v18561_v44  ;;  %16556 = vmatprep.subr.bf16.mxu1 %v18562_v52  ;;  %v18609_v44 = vld [vmem:[#allocation5 + $0x14d8] ss:$28 sps:$4 sm:$0xff]   ;;  %v18613_v52 = vld [vmem:[#allocation5 + $0x2820] ss:$28 sps:$4 sm:$0xff]  }
 0x4d4   :  { %v18673_v50 = vld [vmem:[#allocation8 + $0x1fc] ss:$28 sps:$4 sm:$0xff]  }
 0x4d6   :  { %9962 = vmatpush1.bf16.msra.mxu0 %v18559_v53  ;;  %16557 = vmatpush3.bf16.msra.mxu1 %v18563_v54  ;;  %v18616_v53 = vld [vmem:[#allocation5 + $0x1514] ss:$28 sps:$4 sm:$0xff]   ;;  %v18619_v54 = vld [vmem:[#allocation8 + $0x4] ss:$28 sps:$4 sm:$0xff]  }
 0x4d7   :  { %9963 = vmatprep.subr.bf16.mxu0 %v18566_v20  ;;  %16558 = vmatprep.subr.bf16.mxu1 %v18567_v6  ;;  %v10719_v20 = vmax.f32 %v16781_v13, 0.0  ;;  %v18614_v6 = vld [vmem:[#allocation5 + $0x1510] ss:$28 sps:$4 sm:$0xff]   ;;  %v18674_v13 = vld [vmem:[#allocation5 + $0x1740] ss:$28 sps:$4 sm:$0xff]  }
 0x4da   :  { %9964 = vmatpush1.bf16.msra.mxu0 %v18564_v1  ;;  %16559 = vmatpush3.bf16.msra.mxu1 %v18568_v3  ;;  %v18617_v1 = vld [vmem:[#allocation8] ss:$28 sps:$4 sm:$0xff]  }
 0x4db   :  { %9965 = vmatprep.subr.bf16.mxu0 %v18571_v22  ;;  %16560 = vmatprep.subr.bf16.mxu1 %v18572_v12  ;;  %v18622_v3 = vld [vmem:[#allocation5 + $0x154c] ss:$28 sps:$4 sm:$0xff]   ;;  %v18625_v22 = vld [vmem:[#allocation8 + $0x3c] ss:$28 sps:$4 sm:$0xff]   ;;  %v20098_v12 = vpack.c.bf16 %v10719_v20, %v10719_v20 }
 0x4dc   :  { %v18683_v20 = vld [vmem:[#allocation8 + $0x268] ss:$28 sps:$4 sm:$0xff]  }
 0x4de   :  { %9966 = vmatpush1.bf16.msra.mxu0 %v18569_v4  ;;  %16561 = vmatpush3.bf16.msra.mxu1 %v18573_v5  ;;  %v18623_v4 = vld [vmem:[#allocation8 + $0x38] ss:$28 sps:$4 sm:$0xff]  }
 0x4df   :  { %9967 = vmatprep.subr.bf16.mxu0 %v18576_v42  ;;  %16568 = vmatprep.subr.bf16.mxu1 %v18577_v8  ;;  %v18628_v5 = vld [vmem:[#allocation5 + $0x1584] ss:$28 sps:$4 sm:$0xff]   ;;  %v18631_v42 = vld [vmem:[#allocation8 + $0x74] ss:$28 sps:$4 sm:$0xff]  }
 0x4e0   :  { %v18626_v8 = vld [vmem:[#allocation5 + $0x1580] ss:$28 sps:$4 sm:$0xff]  }
 0x4e1   :  { %10671 = vmatmul.mubr.bf16.vlgmr.msra.gmra.mrb[44].mxu1 %v20035_v10 }
 0x4e2   :  { %9968 = vmatpush1.bf16.msra.mxu0 %v18574_v14  ;;  %16569 = vmatpush3.bf16.msra.mxu1 %v18578_v24  ;;  %v18629_v14 = vld [vmem:[#allocation8 + $0x70] ss:$28 sps:$4 sm:$0xff]  }
 0x4e3   :  { %9969 = vmatprep.subr.bf16.mxu0 %v18581_v11  ;;  %16570 = vmatprep.subr.bf16.mxu1 %v18582_v49  ;;  %v18634_v24 = vld [vmem:[#allocation5 + $0x15bc] ss:$28 sps:$4 sm:$0xff]   ;;  %v18635_v49 = vld [vmem:[#allocation8 + $0xa8] ss:$28 sps:$4 sm:$0xff]  }
 0x4e4   :  { %10710 = vmatprep.mubr.bf16.mxu1 %v20037_v18  ;;  %v18632_v11 = vld [vmem:[#allocation5 + $0x15b8] ss:$28 sps:$4 sm:$0xff]  }
 0x4e6   :  { %9970 = vmatpush1.bf16.msra.mxu0 %v18579_v15  ;;  %16571 = vmatpush3.bf16.msra.mxu1 %v18583_v55  ;;  %v18640_v15 = vld [vmem:[#allocation5 + $0x15f4] ss:$28 sps:$4 sm:$0xff]   ;;  %v18643_v55 = vld [vmem:[#allocation8 + $0xe4] ss:$28 sps:$4 sm:$0xff]  }
 0x4e7   :  { %9971 = vmatprep.subr.bf16.mxu0 %v18586_v60  ;;  %16572 = vmatprep.subr.bf16.mxu1 %v18587_v17  ;;  %v18638_v60 = vld [vmem:[#allocation5 + $0x15f0] ss:$28 sps:$4 sm:$0xff]  }
 0x4e8   :  { %v18646_v17 = vld [vmem:[#allocation5 + $0x162c] ss:$28 sps:$4 sm:$0xff]  }
 0x4ea   :  { %9972 = vmatpush1.bf16.msra.mxu0 %v18584_v19  ;;  %16573 = vmatpush3.bf16.msra.mxu1 %v18588_v34  ;;  %v18649_v19 = vld [vmem:[#allocation8 + $0x11c] ss:$28 sps:$4 sm:$0xff]  }
 0x4eb   :  { %9973 = vmatprep.subr.bf16.mxu0 %v18591_v25  ;;  %16574 = vmatprep.subr.bf16.mxu1 %v18592_v59  ;;  %v18644_v34 = vld [vmem:[#allocation5 + $0x1628] ss:$28 sps:$4 sm:$0xff]   ;;  %v18647_v25 = vld [vmem:[#allocation8 + $0x118] ss:$28 sps:$4 sm:$0xff]  }
 0x4ec   :  { %v18652_v59 = vld [vmem:[#allocation5 + $0x1664] ss:$28 sps:$4 sm:$0xff]  }
 0x4ee   :  { %9974 = vmatpush1.bf16.msra.mxu0 %v18589_v23  ;;  %16575 = vmatpush3.bf16.msra.mxu1 %v18593_v27  ;;  %v18655_v23 = vld [vmem:[#allocation8 + $0x154] ss:$28 sps:$4 sm:$0xff]  }
 0x4ef   :  { %9975 = vmatprep.subr.bf16.mxu0 %v18596_v28  ;;  %16576 = vmatprep.subr.bf16.mxu1 %v18597_v31  ;;  %v18650_v27 = vld [vmem:[#allocation5 + $0x1660] ss:$28 sps:$4 sm:$0xff]   ;;  %v18653_v28 = vld [vmem:[#allocation8 + $0x150] ss:$28 sps:$4 sm:$0xff]  }
 0x4f0   :  { %v18658_v31 = vld [vmem:[#allocation5 + $0x169c] ss:$28 sps:$4 sm:$0xff]  }
 0x4f2   :  { %9976 = vmatpush1.bf16.msra.mxu0 %v18594_v33  ;;  %16577 = vmatpush3.bf16.msra.mxu1 %v18598_v51  ;;  %v18661_v33 = vld [vmem:[#allocation8 + $0x18c] ss:$28 sps:$4 sm:$0xff]  }
 0x4f3   :  { %9977 = vmatprep.subr.bf16.mxu0 %v18601_v35  ;;  %16578 = vmatprep.subr.bf16.mxu1 %v18602_v26  ;;  %v18656_v51 = vld [vmem:[#allocation5 + $0x1698] ss:$28 sps:$4 sm:$0xff]   ;;  %v18659_v35 = vld [vmem:[#allocation8 + $0x188] ss:$28 sps:$4 sm:$0xff]  }
 0x4f4   :  { %v18664_v26 = vld [vmem:[#allocation5 + $0x16d4] ss:$28 sps:$4 sm:$0xff]  }
 0x4f6   :  { %9978 = vmatpush1.bf16.msra.mxu0 %v18599_v41  ;;  %16579 = vmatpush3.bf16.msra.mxu1 %v18603_v38  ;;  %v18667_v41 = vld [vmem:[#allocation8 + $0x1c4] ss:$28 sps:$4 sm:$0xff]  }
 0x4f7   :  { %9979 = vmatprep.subr.bf16.mxu0 %v18606_v7  ;;  %16580 = vmatprep.subr.bf16.mxu1 %v18607_v45  ;;  %v18662_v38 = vld [vmem:[#allocation5 + $0x16d0] ss:$28 sps:$4 sm:$0xff]   ;;  %v18665_v7 = vld [vmem:[#allocation8 + $0x1c0] ss:$28 sps:$4 sm:$0xff]  }
 0x4f8   :  { %v18670_v45 = vld [vmem:[#allocation5 + $0x170c] ss:$28 sps:$4 sm:$0xff]  }
 0x4fa   :  { %9980 = vmatpush1.bf16.msra.mxu0 %v18604_v16  ;;  %16581 = vmatpush3.bf16.msra.mxu1 %v18608_v46  ;;  %v18668_v16 = vld [vmem:[#allocation5 + $0x1708] ss:$28 sps:$4 sm:$0xff]   ;;  %v18671_v46 = vld [vmem:[#allocation8 + $0x1f8] ss:$28 sps:$4 sm:$0xff]  }
 0x4fb   :  { %9981 = vmatprep.subr.bf16.mxu0 %v18611_v29  ;;  %16582 = vmatprep.subr.bf16.mxu1 %v18612_v48  ;;  %v18676_v29 = vld [vmem:[#allocation5 + $0x1744] ss:$28 sps:$4 sm:$0xff]   ;;  %v18679_v48 = vld [vmem:[#allocation8 + $0x234] ss:$28 sps:$4 sm:$0xff]  }
 0x4fe   :  { %9982 = vmatpush1.bf16.msra.mxu0 %v18609_v44  ;;  %16583 = vmatpush3.bf16.msra.mxu1 %v18613_v52  ;;  %v18677_v44 = vld [vmem:[#allocation8 + $0x230] ss:$28 sps:$4 sm:$0xff]  }
 0x4ff   :  { %9992 = vmatprep.subr.bf16.mxu0 %v18616_v53  ;;  %13233 = vmatprep.subr.bf16.mxu1 %v18619_v54  ;;  %v18682_v52 = vld [vmem:[#allocation5 + $0x177c] ss:$28 sps:$4 sm:$0xff]   ;;  %v18685_v53 = vld [vmem:[#allocation8 + $0x26c] ss:$28 sps:$4 sm:$0xff]  }
 0x500   :  { %v18680_v54 = vld [vmem:[#allocation5 + $0x1778] ss:$28 sps:$4 sm:$0xff]  }
 0x501   :  { %10711 = vmatmul.mubr.bf16.vlgmr.msra.gmra.mrb[48].mxu1 %v20045_v56  ;;  %9984 = vmatmul.mubr.bf16.vlgmr.msra.gmra.mrb[4].mxu0 %v19948_v30  ;;  %v18637_v30 = vld [vmem:[#allocation8 + $0xac] ss:$28 sps:$4 sm:$0xff]  }
 0x502   :  { %9993 = vmatpush1.bf16.msra.mxu0 %v18614_v6  ;;  %13234 = vmatpush1.bf16.msra.mxu1 %v18617_v1  ;;  %v18688_v6 = vld [vmem:[#allocation5 + $0x17b4] ss:$28 sps:$4 sm:$0xff]   ;;  %v18691_v1 = vld [vmem:[#allocation8 + $0x2a4] ss:$28 sps:$4 sm:$0xff]  }
 0x503   :  { %13265 = vmatprep.mubr.bf16.mxu1 %v20098_v12  ;;  %9994 = vmatprep.subr.bf16.mxu0 %v18622_v3  ;;  %v18686_v3 = vld [vmem:[#allocation5 + $0x17b0] ss:$28 sps:$4 sm:$0xff]  }
 0x504   :  { %13235 = vmatprep.subr.bf16.mxu1 %v18625_v22  ;;  %10024 = vmatprep.mubr.bf16.mxu0 %v19950_v37  ;;  %v18641_v37 = vld [vmem:[#allocation8 + $0xe0] ss:$28 sps:$4 sm:$0xff]  }
 0x505   :  { %v18689_v22 = vld [vmem:[#allocation8 + $0x2a0] ss:$28 sps:$4 sm:$0xff]  }
 0x506   :  { %9995 = vmatpush1.bf16.msra.mxu0 %v18620_v62  ;;  %13236 = vmatpush1.bf16.msra.mxu1 %v18623_v4  ;;  %v1817_v62 = vsub.s32 0, %v19845_v43  ;;  %v18694_v4 = vld [vmem:[#allocation5 + $0x17ec] ss:$28 sps:$4 sm:$0xff]  }
 0x507   :  { %9996 = vmatprep.subr.bf16.mxu0 %v18628_v5  ;;  %13237 = vmatprep.subr.bf16.mxu1 %v18631_v42  ;;  %v18697_v5 = vld [vmem:[#allocation8 + $0x2dc] ss:$28 sps:$4 sm:$0xff]   ;;  %v1829_v42 = vsub.s32 3, %v19845_v43 }
 0x50a   :  { %9997 = vmatpush1.bf16.msra.mxu0 %v18626_v8  ;;  %13238 = vmatpush1.bf16.msra.mxu1 %v18629_v14  ;;  %v18692_v8 = vld [vmem:[#allocation5 + $0x17e8] ss:$28 sps:$4 sm:$0xff]   ;;  %v18695_v14 = vld [vmem:[#allocation8 + $0x2d8] ss:$28 sps:$4 sm:$0xff]  }
 0x50b   :  { %9998 = vmatprep.subr.bf16.mxu0 %v18634_v24  ;;  %13239 = vmatprep.subr.bf16.mxu1 %v18637_v30  ;;  %v1818_v24 = vrot.slane %v20092_v2, %v1817_v62  ;;  %v18700_v30 = vld [vmem:[#allocation5 + $0x1824] ss:$28 sps:$4 sm:$0xff]  }
 0x50e   :  { %9999 = vmatpush1.bf16.msra.mxu0 %v18632_v11  ;;  %13240 = vmatpush1.bf16.msra.mxu1 %v18635_v49  ;;  %v18703_v11 = vld [vmem:[#allocation8 + $0x314] ss:$28 sps:$4 sm:$0xff]   ;;  %v1830_v49 = vrot.slane %v20092_v2, %v1829_v42 }
 0x50f   :  { %10000 = vmatprep.subr.bf16.mxu0 %v18640_v15  ;;  %13241 = vmatprep.subr.bf16.mxu1 %v18643_v55  ;;  %v18698_v15 = vld [vmem:[#allocation5 + $0x1820] ss:$28 sps:$4 sm:$0xff]   ;;  %v18701_v55 = vld [vmem:[#allocation8 + $0x310] ss:$28 sps:$4 sm:$0xff]  }
 0x512   :  { %10001 = vmatpush1.bf16.msra.mxu0 %v18638_v60  ;;  %13242 = vmatpush1.bf16.msra.mxu1 %v18641_v37  ;;  %v16780_v60 = vadd.f32 %v20069_v58, %v1818_v24  ;;  %v18706_v37 = vld [vmem:[#allocation5 + $0x185c] ss:$28 sps:$4 sm:$0xff]   ;;  %v18713_v58 = vld [vmem:[#allocation8 + $0x380] ss:$28 sps:$4 sm:$0xff]   ;;  %v18760_v24 = vld [vmem:[#allocation5 + $0x1a54] ss:$28 sps:$4 sm:$0xff]  }
 0x513   :  { %10002 = vmatprep.subr.bf16.mxu0 %v18646_v17  ;;  %13243 = vmatprep.subr.bf16.mxu1 %v18649_v19  ;;  %v18709_v17 = vld [vmem:[#allocation8 + $0x34c] ss:$28 sps:$4 sm:$0xff]   ;;  %v16783_v19 = vadd.f32 %v20075_v63, %v1830_v49  ;;  %v18721_v63 = vld [vmem:[#allocation8 + $0x3bc] ss:$28 sps:$4 sm:$0xff]  }
 0x514   :  { %v18761_v49 = vld [vmem:[#allocation8 + $0x540] ss:$28 sps:$4 sm:$0xff]  }
 0x516   :  { %10003 = vmatpush1.bf16.msra.mxu0 %v18644_v34  ;;  %13244 = vmatpush1.bf16.msra.mxu1 %v18647_v25  ;;  %v18704_v34 = vld [vmem:[#allocation5 + $0x1858] ss:$28 sps:$4 sm:$0xff]   ;;  %v18707_v25 = vld [vmem:[#allocation8 + $0x348] ss:$28 sps:$4 sm:$0xff]  }
 0x517   :  { %10004 = vmatprep.subr.bf16.mxu0 %v18652_v59  ;;  %13245 = vmatprep.subr.bf16.mxu1 %v18655_v23  ;;  %v10718_v59 = vmax.f32 %v16780_v60, 0.0  ;;  %v18712_v23 = vld [vmem:[#allocation5 + $0x1894] ss:$28 sps:$4 sm:$0xff]   ;;  %v18764_v60 = vld [vmem:[#allocation5 + $0x1a88] ss:$28 sps:$4 sm:$0xff]  }
 0x51a   :  { %10005 = vmatpush1.bf16.msra.mxu0 %v18650_v27  ;;  %13246 = vmatpush1.bf16.msra.mxu1 %v18653_v28  ;;  %v18715_v27 = vld [vmem:[#allocation8 + $0x384] ss:$28 sps:$4 sm:$0xff]   ;;  %v10721_v28 = vmax.f32 %v16783_v19, 0.0  ;;  %v18775_v19 = vld [vmem:[#allocation8 + $0x5b4] ss:$28 sps:$4 sm:$0xff]  }
 0x51b   :  { %10006 = vmatprep.subr.bf16.mxu0 %v18658_v31  ;;  %13247 = vmatprep.subr.bf16.mxu1 %v18661_v33  ;;  %v18710_v31 = vld [vmem:[#allocation5 + $0x1890] ss:$28 sps:$4 sm:$0xff]   ;;  %v20114_v33 = vpack.c.bf16 %v10718_v59, %v10718_v59  ;;  %v18778_v59 = vld [vmem:[#allocation5 + $0x1afc] ss:$28 sps:$4 sm:$0xff]  }
 0x51e   :  { %10007 = vmatpush1.bf16.msra.mxu0 %v18656_v51  ;;  %13248 = vmatpush1.bf16.msra.mxu1 %v18659_v35  ;;  %v18718_v51 = vld [vmem:[#allocation5 + $0x18cc] ss:$28 sps:$4 sm:$0xff]   ;;  %v20116_v35 = vpack.c.bf16 %v10721_v28, %v10721_v28 }
 0x51f   :  { %10008 = vmatprep.subr.bf16.mxu0 %v18664_v26  ;;  %13249 = vmatprep.subr.bf16.mxu1 %v18667_v41  ;;  %v18716_v26 = vld [vmem:[#allocation5 + $0x18c8] ss:$28 sps:$4 sm:$0xff]   ;;  %v18719_v41 = vld [vmem:[#allocation8 + $0x3b8] ss:$28 sps:$4 sm:$0xff]   ;;  %v18779_v28 = vld [vmem:[#allocation8 + $0x5e8] ss:$28 sps:$4 sm:$0xff]  }
 0x522   :  { %10009 = vmatpush1.bf16.msra.mxu0 %v18662_v38  ;;  %13250 = vmatpush1.bf16.msra.mxu1 %v18665_v7  ;;  %v18724_v38 = vld [vmem:[#allocation5 + $0x1904] ss:$28 sps:$4 sm:$0xff]   ;;  %v18727_v7 = vld [vmem:[#allocation8 + $0x3f4] ss:$28 sps:$4 sm:$0xff]  }
 0x523   :  { %10010 = vmatprep.subr.bf16.mxu0 %v18670_v45  ;;  %13251 = vmatprep.subr.bf16.mxu1 %v18673_v50  ;;  %v18722_v45 = vld [vmem:[#allocation5 + $0x1900] ss:$28 sps:$4 sm:$0xff]   ;;  %v18725_v50 = vld [vmem:[#allocation8 + $0x3f0] ss:$28 sps:$4 sm:$0xff]  }
 0x526   :  { %10011 = vmatpush1.bf16.msra.mxu0 %v18668_v16  ;;  %13252 = vmatpush1.bf16.msra.mxu1 %v18671_v46  ;;  %v18730_v16 = vld [vmem:[#allocation5 + $0x193c] ss:$28 sps:$4 sm:$0xff]  }
 0x527   :  { %10012 = vmatprep.subr.bf16.mxu0 %v18676_v29  ;;  %13253 = vmatprep.subr.bf16.mxu1 %v18679_v48  ;;  %v18728_v46 = vld [vmem:[#allocation5 + $0x1938] ss:$28 sps:$4 sm:$0xff]   ;;  %v18731_v29 = vld [vmem:[#allocation8 + $0x428] ss:$28 sps:$4 sm:$0xff]  }
 0x528   :  { %v18736_v48 = vld [vmem:[#allocation5 + $0x1974] ss:$28 sps:$4 sm:$0xff]  }
 0x52a   :  { %10013 = vmatpush1.bf16.msra.mxu0 %v18674_v13  ;;  %13254 = vmatpush1.bf16.msra.mxu1 %v18677_v44  ;;  %v18739_v13 = vld [vmem:[#allocation8 + $0x464] ss:$28 sps:$4 sm:$0xff]  }
 0x52b   :  { %10014 = vmatprep.subr.bf16.mxu0 %v18682_v52  ;;  %13255 = vmatprep.subr.bf16.mxu1 %v18685_v53  ;;  %v18734_v44 = vld [vmem:[#allocation5 + $0x1970] ss:$28 sps:$4 sm:$0xff]   ;;  %v18745_v53 = vld [vmem:[#allocation8 + $0x49c] ss:$28 sps:$4 sm:$0xff]  }
 0x52c   :  { %v18742_v52 = vld [vmem:[#allocation5 + $0x19ac] ss:$28 sps:$4 sm:$0xff]  }
 0x52e   :  { %10015 = vmatpush1.bf16.msra.mxu0 %v18680_v54  ;;  %13256 = vmatpush1.bf16.msra.mxu1 %v18683_v20  ;;  %v18740_v54 = vld [vmem:[#allocation5 + $0x19a8] ss:$28 sps:$4 sm:$0xff]   ;;  %v18743_v20 = vld [vmem:[#allocation8 + $0x498] ss:$28 sps:$4 sm:$0xff]  }
 0x52f   :  { %10016 = vmatprep.subr.bf16.mxu0 %v18688_v6  ;;  %13257 = vmatprep.subr.bf16.mxu1 %v18691_v1  ;;  %v18748_v6 = vld [vmem:[#allocation5 + $0x19e4] ss:$28 sps:$4 sm:$0xff]   ;;  %v18751_v1 = vld [vmem:[#allocation8 + $0x4d4] ss:$28 sps:$4 sm:$0xff]  }
 0x532   :  { %10017 = vmatpush1.bf16.msra.mxu0 %v18686_v3  ;;  %13258 = vmatpush1.bf16.msra.mxu1 %v18689_v22  ;;  %v18746_v3 = vld [vmem:[#allocation5 + $0x19e0] ss:$28 sps:$4 sm:$0xff]   ;;  %v18749_v22 = vld [vmem:[#allocation8 + $0x4d0] ss:$28 sps:$4 sm:$0xff]  }
 0x533   :  { %10018 = vmatprep.subr.bf16.mxu0 %v18694_v4  ;;  %13259 = vmatprep.subr.bf16.mxu1 %v18697_v5  ;;  %v18754_v4 = vld [vmem:[#allocation5 + $0x1a1c] ss:$28 sps:$4 sm:$0xff]   ;;  %v18757_v5 = vld [vmem:[#allocation8 + $0x50c] ss:$28 sps:$4 sm:$0xff]  }
 0x536   :  { %10019 = vmatpush1.bf16.msra.mxu0 %v18692_v8  ;;  %13260 = vmatpush1.bf16.msra.mxu1 %v18695_v14  ;;  %v18752_v8 = vld [vmem:[#allocation5 + $0x1a18] ss:$28 sps:$4 sm:$0xff]   ;;  %v18755_v14 = vld [vmem:[#allocation8 + $0x508] ss:$28 sps:$4 sm:$0xff]  }
 0x537   :  { %10020 = vmatprep.subr.bf16.mxu0 %v18700_v30  ;;  %13261 = vmatprep.subr.bf16.mxu1 %v18703_v11  ;;  %v18763_v30 = vld [vmem:[#allocation8 + $0x544] ss:$28 sps:$4 sm:$0xff]  }
 0x538   :  { %v18758_v11 = vld [vmem:[#allocation5 + $0x1a50] ss:$28 sps:$4 sm:$0xff]  }
 0x53a   :  { %10021 = vmatpush1.bf16.msra.mxu0 %v18698_v15  ;;  %13262 = vmatpush1.bf16.msra.mxu1 %v18701_v55  ;;  %v18766_v15 = vld [vmem:[#allocation5 + $0x1a8c] ss:$28 sps:$4 sm:$0xff]   ;;  %v18769_v55 = vld [vmem:[#allocation8 + $0x57c] ss:$28 sps:$4 sm:$0xff]  }
 0x53b   :  { %10022 = vmatprep.subr.bf16.mxu0 %v18706_v37  ;;  %13263 = vmatprep.subr.bf16.mxu1 %v18709_v17  ;;  %v18767_v37 = vld [vmem:[#allocation8 + $0x578] ss:$28 sps:$4 sm:$0xff]  }
 0x53c   :  { %v18772_v17 = vld [vmem:[#allocation5 + $0x1ac4] ss:$28 sps:$4 sm:$0xff]  }
 0x53e   :  { %10023 = vmatpush1.bf16.msra.mxu0 %v18704_v34  ;;  %13264 = vmatpush1.bf16.msra.mxu1 %v18707_v25  ;;  %v18770_v34 = vld [vmem:[#allocation5 + $0x1ac0] ss:$28 sps:$4 sm:$0xff]   ;;  %v18773_v25 = vld [vmem:[#allocation8 + $0x5b0] ss:$28 sps:$4 sm:$0xff]  }
 0x53f   :  { %10033 = vmatprep.subr.bf16.mxu0 %v18712_v23  ;;  %13274 = vmatprep.subr.bf16.mxu1 %v18715_v27  ;;  %v18781_v23 = vld [vmem:[#allocation8 + $0x5ec] ss:$28 sps:$4 sm:$0xff]  }
 0x540   :  { %v18776_v27 = vld [vmem:[#allocation5 + $0x1af8] ss:$28 sps:$4 sm:$0xff]  }
 0x541   :  { %13266 = vmatmul.mubr.bf16.vlgmr.msra.gmra.mrb[52].mxu1 %v20114_v33  ;;  %10025 = vmatmul.mubr.bf16.vlgmr.msra.gmra.mrb[4].mxu0 %v19965_v57  ;;  %v18733_v57 = vld [vmem:[#allocation8 + $0x42c] ss:$28 sps:$4 sm:$0xff]  }
 0x542   :  { %10034 = vmatpush1.bf16.msra.mxu0 %v18710_v31  ;;  %13275 = vmatpush1.bf16.msra.mxu1 %v18713_v58  ;;  %v18784_v31 = vld [vmem:[#allocation5 + $0x1b34] ss:$28 sps:$4 sm:$0xff]   ;;  %v18787_v58 = vld [vmem:[#allocation8 + $0x624] ss:$28 sps:$4 sm:$0xff]  }
 0x543   :  { %13306 = vmatprep.mubr.bf16.mxu1 %v20116_v35  ;;  %10035 = vmatprep.subr.bf16.mxu0 %v18718_v51  ;;  %v18782_v51 = vld [vmem:[#allocation5 + $0x1b30] ss:$28 sps:$4 sm:$0xff]  }
 0x544   :  { %13276 = vmatprep.subr.bf16.mxu1 %v18721_v63  ;;  %10065 = vmatprep.mubr.bf16.mxu0 %v19967_v32  ;;  %v18737_v32 = vld [vmem:[#allocation8 + $0x460] ss:$28 sps:$4 sm:$0xff]  }
 0x545   :  { %v18785_v63 = vld [vmem:[#allocation8 + $0x620] ss:$28 sps:$4 sm:$0xff]  }
 0x546   :  { %10036 = vmatpush1.bf16.msra.mxu0 %v18716_v26  ;;  %13277 = vmatpush1.bf16.msra.mxu1 %v18719_v41  ;;  %v1825_v26 = vsub.s32 2, %v19845_v43  ;;  %v18790_v41 = vld [vmem:[#allocation5 + $0x1b6c] ss:$28 sps:$4 sm:$0xff]  }
 0x547   :  { %10037 = vmatprep.subr.bf16.mxu0 %v18724_v38  ;;  %13278 = vmatprep.subr.bf16.mxu1 %v18727_v7  ;;  %v18793_v38 = vld [vmem:[#allocation8 + $0x65c] ss:$28 sps:$4 sm:$0xff]  }
 0x548   :  { %v18788_v7 = vld [vmem:[#allocation5 + $0x1b68] ss:$28 sps:$4 sm:$0xff]  }
 0x54a   :  { %10038 = vmatpush1.bf16.msra.mxu0 %v18722_v45  ;;  %13279 = vmatpush1.bf16.msra.mxu1 %v18725_v50  ;;  %v18791_v45 = vld [vmem:[#allocation8 + $0x658] ss:$28 sps:$4 sm:$0xff]   ;;  %v1826_v50 = vrot.slane %v20092_v2, %v1825_v26 }
 0x54b   :  { %10039 = vmatprep.subr.bf16.mxu0 %v18730_v16  ;;  %13280 = vmatprep.subr.bf16.mxu1 %v18733_v57  ;;  %v18796_v16 = vld [vmem:[#allocation5 + $0x1ba4] ss:$28 sps:$4 sm:$0xff]   ;;  %v18799_v57 = vld [vmem:[#allocation8 + $0x694] ss:$28 sps:$4 sm:$0xff]  }
 0x54e   :  { %10040 = vmatpush1.bf16.msra.mxu0 %v18728_v46  ;;  %13281 = vmatpush1.bf16.msra.mxu1 %v18731_v29  ;;  %v18794_v46 = vld [vmem:[#allocation5 + $0x1ba0] ss:$28 sps:$4 sm:$0xff]   ;;  %v18797_v29 = vld [vmem:[#allocation8 + $0x690] ss:$28 sps:$4 sm:$0xff]  }
 0x54f   :  { %10041 = vmatprep.subr.bf16.mxu0 %v18736_v48  ;;  %13282 = vmatprep.subr.bf16.mxu1 %v18739_v13  ;;  %v16782_v48 = vadd.f32 %v20071_v61, %v1826_v50  ;;  %v18802_v13 = vld [vmem:[#allocation5 + $0x1bdc] ss:$28 sps:$4 sm:$0xff]  }
 0x552   :  { %10042 = vmatpush1.bf16.msra.mxu0 %v18734_v44  ;;  %13283 = vmatpush1.bf16.msra.mxu1 %v18737_v32  ;;  %v18805_v44 = vld [vmem:[#allocation8 + $0x6cc] ss:$28 sps:$4 sm:$0xff]   ;;  %v16342_v32 = vpop.f32.mrb[4].mxu1 }
 0x553   :  { %10043 = vmatprep.subr.bf16.mxu0 %v18742_v52  ;;  %13284 = vmatprep.subr.bf16.mxu1 %v18745_v53  ;;  %v18800_v52 = vld [vmem:[#allocation5 + $0x1bd8] ss:$28 sps:$4 sm:$0xff]   ;;  %v18803_v53 = vld [vmem:[#allocation8 + $0x6c8] ss:$28 sps:$4 sm:$0xff]  }
 0x556   :  { %10044 = vmatpush1.bf16.msra.mxu0 %v18740_v54  ;;  %13285 = vmatpush1.bf16.msra.mxu1 %v18743_v20  ;;  %v1841_v54 = vsub.s32 6, %v19845_v43  ;;  %v16343_v20 = vpop.f32.mrb[5].mxu1 }
 0x557   :  { %10045 = vmatprep.subr.bf16.mxu0 %v18748_v6  ;;  %13286 = vmatprep.subr.bf16.mxu1 %v18751_v1  ;;  %v10720_v6 = vmax.f32 %v16782_v48, 0.0  ;;  %v18808_v1 = vld [vmem:[#allocation5 + $0x1c14] ss:$28 sps:$4 sm:$0xff]  }
 0x558   :  { %v1842_v61 = vrot.slane %v20092_v2, %v1841_v54  ;;  %v18818_v48 = vld [vmem:[#allocation5 + $0x1cf0] ss:$28 sps:$4 sm:$0xff]  }
 0x55a   :  { %10046 = vmatpush1.bf16.msra.mxu0 %v18746_v3  ;;  %13287 = vmatpush1.bf16.msra.mxu1 %v18749_v22  ;;  %v16344_v3 = vadd.f32 %v16343_v20, %v16342_v32  ;;  %v16345_v22 = vpop.f32.mrb[6].mxu1 }
 0x55b   :  { %10047 = vmatprep.subr.bf16.mxu0 %v18754_v4  ;;  %13288 = vmatprep.subr.bf16.mxu1 %v18757_v5  ;;  %v16346_v4 = vpop.f32.mrb[7].mxu1  ;;  %v18826_v22 = vld [vmem:[#allocation5 + $0x1d64] ss:$28 sps:$4 sm:$0xff]  }
 0x55c   :  { %v16364_v5 = vpop.f32.mrb[8].mxu1 }
 0x55e   :  { %10048 = vmatpush1.bf16.msra.mxu0 %v18752_v8  ;;  %13289 = vmatpush1.bf16.msra.mxu1 %v18755_v14  ;;  %v18806_v8 = vld [vmem:[#allocation5 + $0x1c10] ss:$28 sps:$4 sm:$0xff]   ;;  %v10273_v14 = vadd.f32 %v16344_v3, %v1842_v61 }
 0x55f   :  { %10049 = vmatprep.subr.bf16.mxu0 %v18760_v24  ;;  %13290 = vmatprep.subr.bf16.mxu1 %v18763_v30  ;;  %v16365_v24 = vpop.f32.mrb[9].mxu1  ;;  %v20131_v30 = vpack.c.bf16 %v10720_v6, %v10720_v6 }
 0x562   :  { %10050 = vmatpush1.bf16.msra.mxu0 %v18758_v11  ;;  %13291 = vmatpush1.bf16.msra.mxu1 %v18761_v49  ;;  %v18811_v11 = vld [vmem:[#allocation5 + $0x1c4c] ss:$28 sps:$4 sm:$0xff]   ;;  %v16366_v49 = vadd.f32 %v16365_v24, %v16364_v5  ;;  %v18824_v24 = vld [vmem:[#allocation5 + $0x1d60] ss:$28 sps:$4 sm:$0xff]  }
 0x563   :  { %10051 = vmatprep.subr.bf16.mxu0 %v18766_v15  ;;  %13292 = vmatprep.subr.bf16.mxu1 %v18769_v55  ;;  %v16367_v15 = vpop.f32.mrb[10].mxu1 }
 0x564   :  { %v16368_v55 = vpop.f32.mrb[11].mxu1 }
 0x565   :  { %v16386_v2 = vpop.f32.mrb[12].mxu1 }
 0x566   :  { %10052 = vmatpush1.bf16.msra.mxu0 %v18764_v60  ;;  %13293 = vmatpush1.bf16.msra.mxu1 %v18767_v37  ;;  %v10313_v60 = vadd.f32 %v16366_v49, %v10273_v14  ;;  %v18809_v37 = vld [vmem:[#allocation5 + $0x1c48] ss:$28 sps:$4 sm:$0xff]   ;;  %v18829_v49 = vld [vmem:[#allocation5 + $0x1d9c] ss:$28 sps:$4 sm:$0xff]  }
 0x567   :  { %10053 = vmatprep.subr.bf16.mxu0 %v18772_v17  ;;  %13294 = vmatprep.subr.bf16.mxu1 %v18775_v19  ;;  %v16387_v17 = vpop.f32.mrb[13].mxu1  ;;  %v18814_v19 = vld [vmem:[#allocation5 + $0x1c84] ss:$28 sps:$4 sm:$0xff]  }
 0x56a   :  { %10054 = vmatpush1.bf16.msra.mxu0 %v18770_v34  ;;  %13295 = vmatpush1.bf16.msra.mxu1 %v18773_v25  ;;  %v16388_v34 = vadd.f32 %v16387_v17, %v16386_v2  ;;  %v16389_v25 = vpop.f32.mrb[14].mxu1  ;;  %v18827_v17 = vld [vmem:[#allocation5 + $0x1d98] ss:$28 sps:$4 sm:$0xff]  }
 0x56b   :  { %10055 = vmatprep.subr.bf16.mxu0 %v18778_v59  ;;  %13296 = vmatprep.subr.bf16.mxu1 %v18781_v23  ;;  %v16390_v59 = vpop.f32.mrb[15].mxu1 }
 0x56c   :  { %v10353_v23 = vadd.f32 %v16388_v34, %v10313_v60  ;;  %v18832_v34 = vld [vmem:[#allocation5 + $0x1dd4] ss:$28 sps:$4 sm:$0xff]  }
 0x56e   :  { %10056 = vmatpush1.bf16.msra.mxu0 %v18776_v27  ;;  %13297 = vmatpush1.bf16.msra.mxu1 %v18779_v28  ;;  %v16408_v27 = vpop.f32.mrb[16].mxu1  ;;  %v18812_v28 = vld [vmem:[#allocation5 + $0x1c80] ss:$28 sps:$4 sm:$0xff]  }
 0x56f   :  { %10057 = vmatprep.subr.bf16.mxu0 %v18784_v31  ;;  %13298 = vmatprep.subr.bf16.mxu1 %v18787_v58  ;;  %v16409_v31 = vpop.f32.mrb[17].mxu1  ;;  %v18817_v58 = vld [vmem:[#allocation5 + $0x1cbc] ss:$28 sps:$4 sm:$0xff]  }
 0x572   :  { %10058 = vmatpush1.bf16.msra.mxu0 %v18782_v51  ;;  %13299 = vmatpush1.bf16.msra.mxu1 %v18785_v63  ;;  %v16411_v51 = vpop.f32.mrb[18].mxu1 }
 0x573   :  { %10059 = vmatprep.subr.bf16.mxu0 %v18790_v41  ;;  %13300 = vmatprep.subr.bf16.mxu1 %v18793_v38  ;;  %v16412_v63 = vpop.f32.mrb[19].mxu1 }
 0x574   :  { %v16430_v38 = vpop.f32.mrb[20].mxu1 }
 0x576   :  { %10060 = vmatpush1.bf16.msra.mxu0 %v18788_v7  ;;  %13301 = vmatpush1.bf16.msra.mxu1 %v18791_v45  ;;  %v16431_v7 = vpop.f32.mrb[21].mxu1  ;;  %v18820_v45 = vld [vmem:[#allocation5 + $0x1cf4] ss:$28 sps:$4 sm:$0xff]  }
 0x577   :  { %10061 = vmatprep.subr.bf16.mxu0 %v18796_v16  ;;  %13302 = vmatprep.subr.bf16.mxu1 %v18799_v57  ;;  %v16432_v50 = vadd.f32 %v16431_v7, %v16430_v38  ;;  %v16433_v16 = vpop.f32.mrb[22].mxu1  ;;  %v18838_v7 = vld [vmem:[#allocation5 + $0x1e44] ss:$28 sps:$4 sm:$0xff]  }
 0x578   :  { %v16434_v57 = vpop.f32.mrb[23].mxu1  ;;  %v18839_v16 = vld [vmem:[#allocation5 + $0x1e78] ss:$28 sps:$4 sm:$0xff]  }
 0x579   :  { %v18844_v57 = vld [vmem:[#allocation5 + $0x1eb4] ss:$28 sps:$4 sm:$0xff]  }
 0x57a   :  { %10062 = vmatpush1.bf16.msra.mxu0 %v18794_v46  ;;  %13303 = vmatpush1.bf16.msra.mxu1 %v18797_v29  ;;  %v16452_v29 = vpop.f32.mrb[24].mxu1 }
 0x57b   :  { %10063 = vmatprep.subr.bf16.mxu0 %v18802_v13  ;;  %13304 = vmatprep.subr.bf16.mxu1 %v18805_v44  ;;  %v16453_v13 = vpop.f32.mrb[25].mxu1  ;;  %v18823_v44 = vld [vmem:[#allocation5 + $0x1d2c] ss:$28 sps:$4 sm:$0xff]  }
 0x57c   :  { %v16454_v32 = vadd.f32 %v16453_v13, %v16452_v29  ;;  %v18847_v29 = vld [vmem:[#allocation5 + $0x1eec] ss:$28 sps:$4 sm:$0xff]   ;;  %v18850_v13 = vld [vmem:[#allocation5 + $0x1f24] ss:$28 sps:$4 sm:$0xff]  }
 0x57e   :  { %10064 = vmatpush1.bf16.msra.mxu0 %v18800_v52  ;;  %13305 = vmatpush1.bf16.msra.mxu1 %v18803_v53  ;;  %v16455_v52 = vpop.f32.mrb[26].mxu1 }
 0x57f   :  { %10074 = vmatprep.subr.bf16.mxu0 %v18808_v1  ;;  %v16456_v53 = vpop.f32.mrb[27].mxu1  ;;  %v18821_v1 = vld [vmem:[#allocation5 + $0x1d28] ss:$28 sps:$4 sm:$0xff]   ;;  %v18848_v52 = vld [vmem:[#allocation5 + $0x1f20] ss:$28 sps:$4 sm:$0xff]  }
 0x580   :  { %v16474_v6 = vpop.f32.mrb[28].mxu1 }
 0x581   :  { %13307 = vmatmul.mubr.bf16.vlgmr.msra.gmra.mrb[52].mxu1 %v20131_v30  ;;  %10066 = vmatmul.mubr.bf16.vlgmr.msra.gmra.mrb[4].mxu0 %v19983_v21  ;;  %v16410_v21 = vadd.f32 %v16409_v31, %v16408_v27  ;;  %v16475_v3 = vpop.f32.mrb[29].mxu1  ;;  %v18830_v31 = vld [vmem:[#allocation5 + $0x1dd0] ss:$28 sps:$4 sm:$0xff]  }
 0x582   :  { %10075 = vmatpush1.bf16.msra.mxu0 %v18806_v8  ;;  %10106 = vmatprep.mubr.bf16.mxu0 %v19985_v9  ;;  %v18815_v9 = vld [vmem:[#allocation5 + $0x1cb8] ss:$28 sps:$4 sm:$0xff]   ;;  %v16476_v61 = vadd.f32 %v16475_v3, %v16474_v6  ;;  %v16477_v4 = vpop.f32.mrb[30].mxu1 }
 0x583   :  { %10076 = vmatprep.subr.bf16.mxu0 %v18811_v11  ;;  %v10393_v41 = vadd.f32 %v16410_v21, %v10353_v23  ;;  %v16478_v5 = vpop.f32.mrb[31].mxu1  ;;  %v18835_v21 = vld [vmem:[#allocation5 + $0x1e0c] ss:$28 sps:$4 sm:$0xff]   ;;  %v18853_v6 = vld [vmem:[#allocation5 + $0x1f5c] ss:$28 sps:$4 sm:$0xff]  }
 0x584   :  { %v16496_v14 = vpop.f32.mrb[32].mxu1  ;;  %v18854_v4 = vld [vmem:[#allocation5 + $0x1f90] ss:$28 sps:$4 sm:$0xff]  }
 0x585   :  { %v10433_v46 = vadd.f32 %v16432_v50, %v10393_v41  ;;  %v16497_v11 = vpop.f32.mrb[33].mxu1  ;;  %v18841_v50 = vld [vmem:[#allocation5 + $0x1e7c] ss:$28 sps:$4 sm:$0xff]   ;;  %v18859_v5 = vld [vmem:[#allocation5 + $0x1fcc] ss:$28 sps:$4 sm:$0xff]  }
 0x586   :  { %10077 = vmatpush1.bf16.msra.mxu0 %v18809_v37  ;;  %v16498_v15 = vadd.f32 %v16497_v11, %v16496_v14  ;;  %v16499_v55 = vpop.f32.mrb[34].mxu1  ;;  %v18862_v14 = vld [vmem:[#allocation5 + $0x2004] ss:$28 sps:$4 sm:$0xff]   ;;  %v18865_v11 = vld [vmem:[#allocation5 + $0x203c] ss:$28 sps:$4 sm:$0xff]  }
 0x587   :  { %10078 = vmatprep.subr.bf16.mxu0 %v18814_v19  ;;  %v10473_v20 = vadd.f32 %v16454_v32, %v10433_v46  ;;  %v16500_v60 = vpop.f32.mrb[35].mxu1  ;;  %v18842_v46 = vld [vmem:[#allocation5 + $0x1eb0] ss:$28 sps:$4 sm:$0xff]  }
 0x588   :  { %v16518_v37 = vpop.f32.mrb[36].mxu1  ;;  %v18866_v55 = vld [vmem:[#allocation5 + $0x2070] ss:$28 sps:$4 sm:$0xff]  }
 0x589   :  { %v10513_v8 = vadd.f32 %v16476_v61, %v10473_v20  ;;  %v16519_v19 = vpop.f32.mrb[37].mxu1  ;;  %v18856_v61 = vld [vmem:[#allocation5 + $0x1f94] ss:$28 sps:$4 sm:$0xff]   ;;  %v18871_v60 = vld [vmem:[#allocation5 + $0x20ac] ss:$28 sps:$4 sm:$0xff]  }
 0x58a   :  { %10079 = vmatpush1.bf16.msra.mxu0 %v18812_v28  ;;  %v16520_v25 = vadd.f32 %v16519_v19, %v16518_v37  ;;  %v16521_v59 = vpop.f32.mrb[38].mxu1 }
 0x58b   :  { %10080 = vmatprep.subr.bf16.mxu0 %v18817_v58  ;;  %v10553_v2 = vadd.f32 %v16498_v15, %v10513_v8  ;;  %v16522_v23 = vpop.f32.mrb[39].mxu1  ;;  %v18857_v8 = vld [vmem:[#allocation5 + $0x1fc8] ss:$28 sps:$4 sm:$0xff]   ;;  %v18868_v15 = vld [vmem:[#allocation5 + $0x2074] ss:$28 sps:$4 sm:$0xff]  }
 0x58d   :  { %v10593_v27 = vadd.f32 %v16520_v25, %v10553_v2  ;;  %v18874_v2 = vld [vmem:[#allocation5 + $0x20e4] ss:$28 sps:$4 sm:$0xff]   ;;  %v18877_v25 = vld [vmem:[#allocation5 + $0x211c] ss:$28 sps:$4 sm:$0xff]  }
 0x58e   :  { %10081 = vmatpush1.bf16.msra.mxu0 %v18815_v9  ;;  %v18833_v9 = vld [vmem:[#allocation5 + $0x1e08] ss:$28 sps:$4 sm:$0xff]  }
 0x58f   :  { %10082 = vmatprep.subr.bf16.mxu0 %v18820_v45  ;;  %v18836_v45 = vld [vmem:[#allocation5 + $0x1e40] ss:$28 sps:$4 sm:$0xff]  }
 0x592   :  { %10083 = vmatpush1.bf16.msra.mxu0 %v18818_v48  ;;  %v18845_v48 = vld [vmem:[#allocation5 + $0x1ee8] ss:$28 sps:$4 sm:$0xff]  }
 0x593   :  { %10084 = vmatprep.subr.bf16.mxu0 %v18823_v44 }
 0x594   :  { %v16540_v28 = vpop.f32.mrb[40].mxu1 }
 0x595   :  { %v16541_v58 = vpop.f32.mrb[41].mxu1 }
 0x596   :  { %10085 = vmatpush1.bf16.msra.mxu0 %v18821_v1  ;;  %v16542_v51 = vadd.f32 %v16541_v58, %v16540_v28  ;;  %v16543_v63 = vpop.f32.mrb[42].mxu1  ;;  %v18880_v28 = vld [vmem:[#allocation5 + $0x2154] ss:$28 sps:$4 sm:$0xff]   ;;  %v18883_v58 = vld [vmem:[#allocation5 + $0x218c] ss:$28 sps:$4 sm:$0xff]  }
 0x597   :  { %10086 = vmatprep.subr.bf16.mxu0 %v18826_v22  ;;  %v16544_v41 = vpop.f32.mrb[43].mxu1  ;;  %v18851_v22 = vld [vmem:[#allocation5 + $0x1f58] ss:$28 sps:$4 sm:$0xff]   ;;  %v18884_v63 = vld [vmem:[#allocation5 + $0x21c0] ss:$28 sps:$4 sm:$0xff]  }
 0x598   :  { %v10633_v38 = vadd.f32 %v16542_v51, %v10593_v27  ;;  %v18875_v27 = vld [vmem:[#allocation5 + $0x2118] ss:$28 sps:$4 sm:$0xff]   ;;  %v18886_v51 = vld [vmem:[#allocation5 + $0x21c4] ss:$28 sps:$4 sm:$0xff]  }
 0x599   :  { %v18889_v41 = vld [vmem:[#allocation5 + $0x21fc] ss:$28 sps:$4 sm:$0xff]  }
 0x59a   :  { %10087 = vmatpush1.bf16.msra.mxu0 %v18824_v24  ;;  %v18860_v24 = vld [vmem:[#allocation5 + $0x2000] ss:$28 sps:$4 sm:$0xff]  }
 0x59b   :  { %10088 = vmatprep.subr.bf16.mxu0 %v18829_v49  ;;  %v18863_v49 = vld [vmem:[#allocation5 + $0x2038] ss:$28 sps:$4 sm:$0xff]  }
 0x59e   :  { %10089 = vmatpush1.bf16.msra.mxu0 %v18827_v17  ;;  %v18872_v17 = vld [vmem:[#allocation5 + $0x20e0] ss:$28 sps:$4 sm:$0xff]  }
 0x59f   :  { %10090 = vmatprep.subr.bf16.mxu0 %v18832_v34 }
 0x5a2   :  { %10091 = vmatpush1.bf16.msra.mxu0 %v18830_v31  ;;  %v18878_v31 = vld [vmem:[#allocation5 + $0x2150] ss:$28 sps:$4 sm:$0xff]  }
 0x5a3   :  { %10092 = vmatprep.subr.bf16.mxu0 %v18835_v21  ;;  %v18881_v21 = vld [vmem:[#allocation5 + $0x2188] ss:$28 sps:$4 sm:$0xff]  }
 0x5a6   :  { %10093 = vmatpush1.bf16.msra.mxu0 %v18833_v9  ;;  %v18892_v9 = vld [vmem:[#allocation5 + $0x2234] ss:$28 sps:$4 sm:$0xff]  }
 0x5a7   :  { %10094 = vmatprep.subr.bf16.mxu0 %v18838_v7  ;;  %v18890_v7 = vld [vmem:[#allocation5 + $0x2230] ss:$28 sps:$4 sm:$0xff]  }
 0x5aa   :  { %10095 = vmatpush1.bf16.msra.mxu0 %v18836_v45  ;;  %v18895_v45 = vld [vmem:[#allocation5 + $0x226c] ss:$28 sps:$4 sm:$0xff]  }
 0x5ab   :  { %10096 = vmatprep.subr.bf16.mxu0 %v18841_v50  ;;  %v18893_v50 = vld [vmem:[#allocation5 + $0x2268] ss:$28 sps:$4 sm:$0xff]  }
 0x5ae   :  { %10097 = vmatpush1.bf16.msra.mxu0 %v18839_v16  ;;  %v18898_v16 = vld [vmem:[#allocation5 + $0x22a4] ss:$28 sps:$4 sm:$0xff]  }
 0x5af   :  { %10098 = vmatprep.subr.bf16.mxu0 %v18844_v57  ;;  %v18896_v57 = vld [vmem:[#allocation5 + $0x22a0] ss:$28 sps:$4 sm:$0xff]  }
 0x5b2   :  { %10099 = vmatpush1.bf16.msra.mxu0 %v18842_v46  ;;  %v18901_v46 = vld [vmem:[#allocation5 + $0x22dc] ss:$28 sps:$4 sm:$0xff]  }
 0x5b3   :  { %10100 = vmatprep.subr.bf16.mxu0 %v18847_v29  ;;  %v18899_v29 = vld [vmem:[#allocation5 + $0x22d8] ss:$28 sps:$4 sm:$0xff]  }
 0x5b4   :  { %v16562_v44 = vpop.f32.mrb[44].mxu1 }
 0x5b5   :  { %v16563_v32 = vpop.f32.mrb[45].mxu1 }
 0x5b6   :  { %10101 = vmatpush1.bf16.msra.mxu0 %v18845_v48  ;;  %v16564_v53 = vadd.f32 %v16563_v32, %v16562_v44  ;;  %v16565_v20 = vpop.f32.mrb[46].mxu1  ;;  %v18904_v48 = vld [vmem:[#allocation5 + $0x2314] ss:$28 sps:$4 sm:$0xff]   ;;  %v18907_v44 = vld [vmem:[#allocation5 + $0x234c] ss:$28 sps:$4 sm:$0xff]  }
 0x5b7   :  { %10102 = vmatprep.subr.bf16.mxu0 %v18850_v13  ;;  %v16566_v1 = vpop.f32.mrb[47].mxu1  ;;  %v18902_v13 = vld [vmem:[#allocation5 + $0x2310] ss:$28 sps:$4 sm:$0xff]   ;;  %v18905_v32 = vld [vmem:[#allocation5 + $0x2348] ss:$28 sps:$4 sm:$0xff]  }
 0x5b8   :  { %v10673_v3 = vadd.f32 %v16564_v53, %v10633_v38  ;;  %v18887_v38 = vld [vmem:[#allocation5 + $0x21f8] ss:$28 sps:$4 sm:$0xff]   ;;  %v18908_v53 = vld [vmem:[#allocation5 + $0x2380] ss:$28 sps:$4 sm:$0xff]  }
 0x5b9   :  { %v18913_v20 = vld [vmem:[#allocation5 + $0x23bc] ss:$28 sps:$4 sm:$0xff]   ;;  %v18916_v1 = vld [vmem:[#allocation5 + $0x23f4] ss:$28 sps:$4 sm:$0xff]  }
 0x5ba   :  { %10103 = vmatpush1.bf16.msra.mxu0 %v18848_v52  ;;  %v18910_v52 = vld [vmem:[#allocation5 + $0x2384] ss:$28 sps:$4 sm:$0xff]  }
 0x5bb   :  { %10104 = vmatprep.subr.bf16.mxu0 %v18853_v6  ;;  %v18911_v6 = vld [vmem:[#allocation5 + $0x23b8] ss:$28 sps:$4 sm:$0xff]  }
 0x5be   :  { %10105 = vmatpush1.bf16.msra.mxu0 %v18851_v22  ;;  %v18919_v22 = vld [vmem:[#allocation5 + $0x242c] ss:$28 sps:$4 sm:$0xff]  }
 0x5bf   :  { %10115 = vmatprep.subr.bf16.mxu0 %v18856_v61  ;;  %v18922_v61 = vld [vmem:[#allocation5 + $0x2464] ss:$28 sps:$4 sm:$0xff]  }
 0x5c1   :  { %10107 = vmatmul.mubr.bf16.vlgmr.msra.gmra.mrb[4].mxu0 %v20000_v47  ;;  %v18869_v47 = vld [vmem:[#allocation5 + $0x20a8] ss:$28 sps:$4 sm:$0xff]  }
 0x5c2   :  { %10116 = vmatpush1.bf16.msra.mxu0 %v18854_v4  ;;  %10147 = vmatprep.mubr.bf16.mxu0 %v20002_v0  ;;  %v18925_v4 = vld [vmem:[#allocation5 + $0x249c] ss:$28 sps:$4 sm:$0xff]  }
 0x5c3   :  { %10117 = vmatprep.subr.bf16.mxu0 %v18859_v5  ;;  %v18923_v5 = vld [vmem:[#allocation5 + $0x2498] ss:$28 sps:$4 sm:$0xff]  }
 0x5c6   :  { %10118 = vmatpush1.bf16.msra.mxu0 %v18857_v8  ;;  %v18928_v8 = vld [vmem:[#allocation5 + $0x24d4] ss:$28 sps:$4 sm:$0xff]  }
 0x5c7   :  { %10119 = vmatprep.subr.bf16.mxu0 %v18862_v14  ;;  %v18926_v14 = vld [vmem:[#allocation5 + $0x24d0] ss:$28 sps:$4 sm:$0xff]  }
 0x5ca   :  { %10120 = vmatpush1.bf16.msra.mxu0 %v18860_v24  ;;  %v18931_v24 = vld [vmem:[#allocation5 + $0x250c] ss:$28 sps:$4 sm:$0xff]  }
 0x5cb   :  { %10121 = vmatprep.subr.bf16.mxu0 %v18865_v11  ;;  %v18929_v11 = vld [vmem:[#allocation5 + $0x2508] ss:$28 sps:$4 sm:$0xff]  }
 0x5ce   :  { %10122 = vmatpush1.bf16.msra.mxu0 %v18863_v49  ;;  %v18934_v49 = vld [vmem:[#allocation5 + $0x2544] ss:$28 sps:$4 sm:$0xff]  }
 0x5cf   :  { %10123 = vmatprep.subr.bf16.mxu0 %v18868_v15  ;;  %v18932_v15 = vld [vmem:[#allocation5 + $0x2540] ss:$28 sps:$4 sm:$0xff]  }
 0x5d2   :  { %10124 = vmatpush1.bf16.msra.mxu0 %v18866_v55  ;;  %v18937_v55 = vld [vmem:[#allocation5 + $0x257c] ss:$28 sps:$4 sm:$0xff]  }
 0x5d3   :  { %10125 = vmatprep.subr.bf16.mxu0 %v18871_v60  ;;  %v18935_v60 = vld [vmem:[#allocation5 + $0x2578] ss:$28 sps:$4 sm:$0xff]  }
 0x5d4   :  { %v16584_v37 = vpop.f32.mrb[48].mxu1 }
 0x5d5   :  { %v16585_v0 = vpop.f32.mrb[49].mxu1 }
 0x5d6   :  { %10126 = vmatpush1.bf16.msra.mxu0 %v18869_v47  ;;  %v16586_v19 = vadd.f32 %v16585_v0, %v16584_v37  ;;  %v16587_v34 = vpop.f32.mrb[50].mxu1  ;;  %v18940_v47 = vld [vmem:[#allocation5 + $0x25b4] ss:$28 sps:$4 sm:$0xff]   ;;  %v18943_v37 = vld [vmem:[#allocation5 + $0x25ec] ss:$28 sps:$4 sm:$0xff]  }
 0x5d7   :  { %10127 = vmatprep.subr.bf16.mxu0 %v18874_v2  ;;  %v16588_v59 = vpop.f32.mrb[51].mxu1  ;;  %v18938_v2 = vld [vmem:[#allocation5 + $0x25b0] ss:$28 sps:$4 sm:$0xff]   ;;  %v18941_v0 = vld [vmem:[#allocation5 + $0x25e8] ss:$28 sps:$4 sm:$0xff]  }
 0x5d8   :  { %v20138_v23 = vadd.f32 %v16586_v19, %v10673_v3  ;;  %v18914_v3 = vld [vmem:[#allocation5 + $0x23f0] ss:$28 sps:$4 sm:$0xff]   ;;  %v18944_v19 = vld [vmem:[#allocation5 + $0x2620] ss:$28 sps:$4 sm:$0xff]  }
 0x5d9   :  { %v18949_v34 = vld [vmem:[#allocation5 + $0x265c] ss:$28 sps:$4 sm:$0xff]   ;;  %v18952_v59 = vld [vmem:[#allocation5 + $0x2694] ss:$28 sps:$4 sm:$0xff]  }
 0x5da   :  { %10128 = vmatpush1.bf16.msra.mxu0 %v18872_v17  ;;  %v18946_v17 = vld [vmem:[#allocation5 + $0x2624] ss:$28 sps:$4 sm:$0xff]  }
 0x5db   :  { %10129 = vmatprep.subr.bf16.mxu0 %v18877_v25  ;;  %v18947_v25 = vld [vmem:[#allocation5 + $0x2658] ss:$28 sps:$4 sm:$0xff]  }
 0x5de   :  { %10130 = vmatpush1.bf16.msra.mxu0 %v18875_v27  ;;  %v18950_v27 = vld [vmem:[#allocation5 + $0x2690] ss:$28 sps:$4 sm:$0xff]  }
 0x5df   :  { %10131 = vmatprep.subr.bf16.mxu0 %v18880_v28  ;;  %v18955_v28 = vld [vmem:[#allocation5 + $0x26cc] ss:$28 sps:$4 sm:$0xff]  }
 0x5e2   :  { %10132 = vmatpush1.bf16.msra.mxu0 %v18878_v31  ;;  %v18953_v31 = vld [vmem:[#allocation5 + $0x26c8] ss:$28 sps:$4 sm:$0xff]  }
 0x5e3   :  { %10133 = vmatprep.subr.bf16.mxu0 %v18883_v58  ;;  %v18958_v58 = vld [vmem:[#allocation5 + $0x2704] ss:$28 sps:$4 sm:$0xff]  }
 0x5e6   :  { %10134 = vmatpush1.bf16.msra.mxu0 %v18881_v21  ;;  %v18956_v21 = vld [vmem:[#allocation5 + $0x2700] ss:$28 sps:$4 sm:$0xff]  }
 0x5e7   :  { %10135 = vmatprep.subr.bf16.mxu0 %v18886_v51  ;;  %v18961_v51 = vld [vmem:[#allocation5 + $0x273c] ss:$28 sps:$4 sm:$0xff]  }
 0x5ea   :  { %10136 = vmatpush1.bf16.msra.mxu0 %v18884_v63  ;;  %v18959_v63 = vld [vmem:[#allocation5 + $0x2738] ss:$28 sps:$4 sm:$0xff]  }
 0x5eb   :  { %10137 = vmatprep.subr.bf16.mxu0 %v18889_v41  ;;  %v18964_v41 = vld [vmem:[#allocation5 + $0x2774] ss:$28 sps:$4 sm:$0xff]  }
 0x5ee   :  { %10138 = vmatpush1.bf16.msra.mxu0 %v18887_v38  ;;  %v18962_v38 = vld [vmem:[#allocation5 + $0x2770] ss:$28 sps:$4 sm:$0xff]  }
 0x5ef   :  { %10139 = vmatprep.subr.bf16.mxu0 %v18892_v9  ;;  %v18967_v9 = vld [vmem:[#allocation5 + $0x27ac] ss:$28 sps:$4 sm:$0xff]  }
 0x5f2   :  { %10140 = vmatpush1.bf16.msra.mxu0 %v18890_v7  ;;  %v18970_v7 = vld [vmem:[#allocation5 + $0x27e4] ss:$28 sps:$4 sm:$0xff]  }
 0x5f3   :  { %10141 = vmatprep.subr.bf16.mxu0 %v18895_v45  ;;  %v18973_v45 = vld [vmem:[#allocation5 + $0x281c] ss:$28 sps:$4 sm:$0xff]  }
 0x5f6   :  { %10142 = vmatpush1.bf16.msra.mxu0 %v18893_v50  ;;  %v18971_v50 = vld [vmem:[#allocation5 + $0x2818] ss:$28 sps:$4 sm:$0xff]  }
 0x5f7   :  { %10143 = vmatprep.subr.bf16.mxu0 %v18898_v16  ;;  %v18976_v16 = vld [vmem:[#allocation5 + $0x2854] ss:$28 sps:$4 sm:$0xff]  }
 0x5fa   :  { %10144 = vmatpush1.bf16.msra.mxu0 %v18896_v57  ;;  %v18974_v57 = vld [vmem:[#allocation5 + $0x2850] ss:$28 sps:$4 sm:$0xff]  }
 0x5fb   :  { %10145 = vmatprep.subr.bf16.mxu0 %v18901_v46  ;;  %v18979_v46 = vld [vmem:[#allocation5 + $0x288c] ss:$28 sps:$4 sm:$0xff]  }
 0x5fe   :  { %10146 = vmatpush1.bf16.msra.mxu0 %v18899_v29  ;;  %v18977_v29 = vld [vmem:[#allocation5 + $0x2888] ss:$28 sps:$4 sm:$0xff]  }
 0x5ff   :  { %10156 = vmatprep.subr.bf16.mxu0 %v18904_v48  ;;  %v18982_v48 = vld [vmem:[#allocation5 + $0x28c4] ss:$28 sps:$4 sm:$0xff]  }
 0x601   :  { %10148 = vmatmul.mubr.bf16.vlgmr.msra.gmra.mrb[4].mxu0 %v20018_v36  ;;  %v18917_v36 = vld [vmem:[#allocation5 + $0x2428] ss:$28 sps:$4 sm:$0xff]  }
 0x602   :  { %10157 = vmatpush1.bf16.msra.mxu0 %v18902_v13  ;;  %10188 = vmatprep.mubr.bf16.mxu0 %v20020_v40  ;;  %v18920_v40 = vld [vmem:[#allocation5 + $0x2460] ss:$28 sps:$4 sm:$0xff]  }
 0x603   :  { %10158 = vmatprep.subr.bf16.mxu0 %v18907_v44  ;;  %v18980_v13 = vld [vmem:[#allocation5 + $0x28c0] ss:$28 sps:$4 sm:$0xff]  }
 0x604   :  { %v18985_v44 = vld [vmem:[#allocation5 + $0x28fc] ss:$28 sps:$4 sm:$0xff]  }
 0x606   :  { %10159 = vmatpush1.bf16.msra.mxu0 %v18905_v32  ;;  %v18983_v32 = vld [vmem:[#allocation5 + $0x28f8] ss:$28 sps:$4 sm:$0xff]  }
 0x607   :  { %10160 = vmatprep.subr.bf16.mxu0 %v18910_v52  ;;  %v18988_v52 = vld [vmem:[#allocation5 + $0x2934] ss:$28 sps:$4 sm:$0xff]  }
 0x60a   :  { %10161 = vmatpush1.bf16.msra.mxu0 %v18908_v53  ;;  %v18986_v53 = vld [vmem:[#allocation5 + $0x2930] ss:$28 sps:$4 sm:$0xff]  }
 0x60b   :  { %10162 = vmatprep.subr.bf16.mxu0 %v18913_v20  ;;  %v18991_v20 = vld [vmem:[#allocation5 + $0x296c] ss:$28 sps:$4 sm:$0xff]  }
 0x60e   :  { %10163 = vmatpush1.bf16.msra.mxu0 %v18911_v6  ;;  %v18989_v6 = vld [vmem:[#allocation5 + $0x2968] ss:$28 sps:$4 sm:$0xff]  }
 0x60f   :  { %10164 = vmatprep.subr.bf16.mxu0 %v18916_v1  ;;  %v18994_v1 = vld [vmem:[#allocation5 + $0x29a4] ss:$28 sps:$4 sm:$0xff]  }
 0x612   :  { %10165 = vmatpush1.bf16.msra.mxu0 %v18914_v3  ;;  %v18992_v3 = vld [vmem:[#allocation5 + $0x29a0] ss:$28 sps:$4 sm:$0xff]  }
 0x613   :  { %10166 = vmatprep.subr.bf16.mxu0 %v18919_v22  ;;  %v18997_v22 = vld [vmem:[#allocation5 + $0x29dc] ss:$28 sps:$4 sm:$0xff]  }
 0x616   :  { %10167 = vmatpush1.bf16.msra.mxu0 %v18917_v36  ;;  %v18995_v36 = vld [vmem:[#allocation5 + $0x29d8] ss:$28 sps:$4 sm:$0xff]  }
 0x617   :  { %10168 = vmatprep.subr.bf16.mxu0 %v18922_v61  ;;  %v19000_v61 = vld [vmem:[#allocation8 + $0x14] ss:$28 sps:$4 sm:$0xff]  }
 0x61a   :  { %10169 = vmatpush1.bf16.msra.mxu0 %v18920_v40  ;;  %v18998_v40 = vld [vmem:[#allocation8 + $0x10] ss:$28 sps:$4 sm:$0xff]  }
 0x61b   :  { %10170 = vmatprep.subr.bf16.mxu0 %v18925_v4  ;;  %v19003_v4 = vld [vmem:[#allocation8 + $0x4c] ss:$28 sps:$4 sm:$0xff]  }
 0x61e   :  { %10171 = vmatpush1.bf16.msra.mxu0 %v18923_v5  ;;  %v19094_v5 = vld [vmem:[#allocation8 + $0x700] ss:$28 sps:$4 sm:$0xff]  }
 0x61f   :  { %10172 = vmatprep.subr.bf16.mxu0 %v18928_v8  ;;  %v19096_v8 = vld [vmem:[#allocation8 + $0x704] ss:$28 sps:$4 sm:$0xff]  }
 0x620   :  { %13315 = vmatprep.subr.bf16.mxu1 %v19096_v8  ;;  %v19040_v8 = vld [vmem:[#allocation8 + $0x320] ss:$28 sps:$4 sm:$0xff]  }
 0x621   :  { %13316 = vmatpush1.bf16.msra.mxu1 %v19094_v5  ;;  %v19172_v5 = vld [vmem:[#allocation8 + $0x9d8] ss:$28 sps:$4 sm:$0xff]  }
 0x622   :  { %10173 = vmatpush1.bf16.msra.mxu0 %v18926_v14  ;;  %v19001_v14 = vld [vmem:[#allocation8 + $0x48] ss:$28 sps:$4 sm:$0xff]  }
 0x623   :  { %10174 = vmatprep.subr.bf16.mxu0 %v18931_v24  ;;  %v19102_v24 = vld [vmem:[#allocation8 + $0x73c] ss:$28 sps:$4 sm:$0xff]  }
 0x624   :  { %13317 = vmatprep.subr.bf16.mxu1 %v19102_v24  ;;  %v19043_v24 = vld [vmem:[#allocation8 + $0x358] ss:$28 sps:$4 sm:$0xff]  }
 0x626   :  { %10175 = vmatpush1.bf16.msra.mxu0 %v18929_v11  ;;  %v19006_v11 = vld [vmem:[#allocation8 + $0x84] ss:$28 sps:$4 sm:$0xff]  }
 0x627   :  { %10176 = vmatprep.subr.bf16.mxu0 %v18934_v49  ;;  %v19100_v49 = vld [vmem:[#allocation8 + $0x738] ss:$28 sps:$4 sm:$0xff]  }
 0x628   :  { %13318 = vmatpush1.bf16.msra.mxu1 %v19100_v49  ;;  %v19046_v49 = vld [vmem:[#allocation8 + $0x390] ss:$28 sps:$4 sm:$0xff]  }
 0x62a   :  { %10177 = vmatpush1.bf16.msra.mxu0 %v18932_v15  ;;  %v19004_v15 = vld [vmem:[#allocation8 + $0x80] ss:$28 sps:$4 sm:$0xff]  }
 0x62b   :  { %10178 = vmatprep.subr.bf16.mxu0 %v18937_v55  ;;  %v19108_v55 = vld [vmem:[#allocation8 + $0x774] ss:$28 sps:$4 sm:$0xff]  }
 0x62c   :  { %13319 = vmatprep.subr.bf16.mxu1 %v19108_v55  ;;  %v19049_v55 = vld [vmem:[#allocation8 + $0x3c8] ss:$28 sps:$4 sm:$0xff]  }
 0x62e   :  { %10179 = vmatpush1.bf16.msra.mxu0 %v18935_v60  ;;  %v19009_v60 = vld [vmem:[#allocation8 + $0xbc] ss:$28 sps:$4 sm:$0xff]  }
 0x62f   :  { %10180 = vmatprep.subr.bf16.mxu0 %v18940_v47  ;;  %v19007_v47 = vld [vmem:[#allocation8 + $0xb8] ss:$28 sps:$4 sm:$0xff]  }
 0x632   :  { %10181 = vmatpush1.bf16.msra.mxu0 %v18938_v2  ;;  %v19114_v2 = vld [vmem:[#allocation8 + $0x7ac] ss:$28 sps:$4 sm:$0xff]  }
 0x633   :  { %10182 = vmatprep.subr.bf16.mxu0 %v18943_v37  ;;  %v19012_v37 = vld [vmem:[#allocation8 + $0xf4] ss:$28 sps:$4 sm:$0xff]  }
 0x636   :  { %10183 = vmatpush1.bf16.msra.mxu0 %v18941_v0  ;;  %v19112_v0 = vld [vmem:[#allocation8 + $0x7a8] ss:$28 sps:$4 sm:$0xff]  }
 0x637   :  { %10184 = vmatprep.subr.bf16.mxu0 %v18946_v17  ;;  %v19010_v17 = vld [vmem:[#allocation8 + $0xf0] ss:$28 sps:$4 sm:$0xff]  }
 0x63a   :  { %10185 = vmatpush1.bf16.msra.mxu0 %v18944_v19  ;;  %v19120_v19 = vld [vmem:[#allocation8 + $0x7e4] ss:$28 sps:$4 sm:$0xff]  }
 0x63b   :  { %10186 = vmatprep.subr.bf16.mxu0 %v18949_v34  ;;  %v19015_v34 = vld [vmem:[#allocation8 + $0x12c] ss:$28 sps:$4 sm:$0xff]  }
 0x63e   :  { %10187 = vmatpush1.bf16.msra.mxu0 %v18947_v25  ;;  %v19118_v25 = vld [vmem:[#allocation8 + $0x7e0] ss:$28 sps:$4 sm:$0xff]  }
 0x63f   :  { %10197 = vmatprep.subr.bf16.mxu0 %v18952_v59  ;;  %v19013_v59 = vld [vmem:[#allocation8 + $0x128] ss:$28 sps:$4 sm:$0xff]  }
 0x641   :  { %10189 = vmatmul.mubr.bf16.vlgmr.msra.gmra.mrb[4].mxu0 %v20035_v10  ;;  %v18965_v10 = vld [vmem:[#allocation5 + $0x27a8] ss:$28 sps:$4 sm:$0xff]  }
 0x642   :  { %10198 = vmatpush1.bf16.msra.mxu0 %v18950_v27  ;;  %10229 = vmatprep.mubr.bf16.mxu0 %v20037_v18  ;;  %v18968_v18 = vld [vmem:[#allocation5 + $0x27e0] ss:$28 sps:$4 sm:$0xff]  }
 0x643   :  { %10199 = vmatprep.subr.bf16.mxu0 %v18955_v28  ;;  %v19126_v27 = vld [vmem:[#allocation8 + $0x81c] ss:$28 sps:$4 sm:$0xff]   ;;  %v19018_v28 = vld [vmem:[#allocation8 + $0x164] ss:$28 sps:$4 sm:$0xff]  }
 0x646   :  { %10200 = vmatpush1.bf16.msra.mxu0 %v18953_v31  ;;  %v19124_v31 = vld [vmem:[#allocation8 + $0x818] ss:$28 sps:$4 sm:$0xff]  }
 0x647   :  { %10201 = vmatprep.subr.bf16.mxu0 %v18958_v58  ;;  %v19016_v58 = vld [vmem:[#allocation8 + $0x160] ss:$28 sps:$4 sm:$0xff]  }
 0x64a   :  { %10202 = vmatpush1.bf16.msra.mxu0 %v18956_v21  ;;  %v19132_v21 = vld [vmem:[#allocation8 + $0x854] ss:$28 sps:$4 sm:$0xff]  }
 0x64b   :  { %10203 = vmatprep.subr.bf16.mxu0 %v18961_v51  ;;  %v19021_v51 = vld [vmem:[#allocation8 + $0x19c] ss:$28 sps:$4 sm:$0xff]  }
 0x64e   :  { %10204 = vmatpush1.bf16.msra.mxu0 %v18959_v63  ;;  %v19130_v63 = vld [vmem:[#allocation8 + $0x850] ss:$28 sps:$4 sm:$0xff]  }
 0x64f   :  { %10205 = vmatprep.subr.bf16.mxu0 %v18964_v41  ;;  %v19019_v41 = vld [vmem:[#allocation8 + $0x198] ss:$28 sps:$4 sm:$0xff]  }
 0x652   :  { %10206 = vmatpush1.bf16.msra.mxu0 %v18962_v38  ;;  %v19138_v38 = vld [vmem:[#allocation8 + $0x88c] ss:$28 sps:$4 sm:$0xff]  }
 0x653   :  { %10207 = vmatprep.subr.bf16.mxu0 %v18967_v9  ;;  %v19024_v9 = vld [vmem:[#allocation8 + $0x1d4] ss:$28 sps:$4 sm:$0xff]  }
 0x656   :  { %10208 = vmatpush1.bf16.msra.mxu0 %v18965_v10  ;;  %v19136_v10 = vld [vmem:[#allocation8 + $0x888] ss:$28 sps:$4 sm:$0xff]  }
 0x657   :  { %10209 = vmatprep.subr.bf16.mxu0 %v18970_v7  ;;  %v19022_v7 = vld [vmem:[#allocation8 + $0x1d0] ss:$28 sps:$4 sm:$0xff]  }
 0x65a   :  { %10210 = vmatpush1.bf16.msra.mxu0 %v18968_v18  ;;  %v19144_v18 = vld [vmem:[#allocation8 + $0x8c4] ss:$28 sps:$4 sm:$0xff]  }
 0x65b   :  { %10211 = vmatprep.subr.bf16.mxu0 %v18973_v45  ;;  %v19027_v45 = vld [vmem:[#allocation8 + $0x20c] ss:$28 sps:$4 sm:$0xff]  }
 0x65e   :  { %10212 = vmatpush1.bf16.msra.mxu0 %v18971_v50  ;;  %v19142_v50 = vld [vmem:[#allocation8 + $0x8c0] ss:$28 sps:$4 sm:$0xff]  }
 0x65f   :  { %10213 = vmatprep.subr.bf16.mxu0 %v18976_v16  ;;  %v19025_v16 = vld [vmem:[#allocation8 + $0x208] ss:$28 sps:$4 sm:$0xff]  }
 0x662   :  { %10214 = vmatpush1.bf16.msra.mxu0 %v18974_v57  ;;  %v19150_v57 = vld [vmem:[#allocation8 + $0x8fc] ss:$28 sps:$4 sm:$0xff]  }
 0x663   :  { %10215 = vmatprep.subr.bf16.mxu0 %v18979_v46  ;;  %v19030_v46 = vld [vmem:[#allocation8 + $0x244] ss:$28 sps:$4 sm:$0xff]  }
 0x666   :  { %10216 = vmatpush1.bf16.msra.mxu0 %v18977_v29  ;;  %v19148_v29 = vld [vmem:[#allocation8 + $0x8f8] ss:$28 sps:$4 sm:$0xff]  }
 0x667   :  { %10217 = vmatprep.subr.bf16.mxu0 %v18982_v48  ;;  %v19028_v48 = vld [vmem:[#allocation8 + $0x240] ss:$28 sps:$4 sm:$0xff]  }
 0x66a   :  { %10218 = vmatpush1.bf16.msra.mxu0 %v18980_v13  ;;  %v19156_v13 = vld [vmem:[#allocation8 + $0x934] ss:$28 sps:$4 sm:$0xff]  }
 0x66b   :  { %10219 = vmatprep.subr.bf16.mxu0 %v18985_v44  ;;  %v19033_v44 = vld [vmem:[#allocation8 + $0x27c] ss:$28 sps:$4 sm:$0xff]  }
 0x66e   :  { %10220 = vmatpush1.bf16.msra.mxu0 %v18983_v32  ;;  %v19154_v32 = vld [vmem:[#allocation8 + $0x930] ss:$28 sps:$4 sm:$0xff]  }
 0x66f   :  { %10221 = vmatprep.subr.bf16.mxu0 %v18988_v52  ;;  %v19031_v52 = vld [vmem:[#allocation8 + $0x278] ss:$28 sps:$4 sm:$0xff]  }
 0x672   :  { %10222 = vmatpush1.bf16.msra.mxu0 %v18986_v53  ;;  %v19162_v53 = vld [vmem:[#allocation8 + $0x96c] ss:$28 sps:$4 sm:$0xff]  }
 0x673   :  { %10223 = vmatprep.subr.bf16.mxu0 %v18991_v20  ;;  %v19036_v20 = vld [vmem:[#allocation8 + $0x2b4] ss:$28 sps:$4 sm:$0xff]  }
 0x676   :  { %10224 = vmatpush1.bf16.msra.mxu0 %v18989_v6  ;;  %v19160_v6 = vld [vmem:[#allocation8 + $0x968] ss:$28 sps:$4 sm:$0xff]  }
 0x677   :  { %10225 = vmatprep.subr.bf16.mxu0 %v18994_v1  ;;  %v19034_v1 = vld [vmem:[#allocation8 + $0x2b0] ss:$28 sps:$4 sm:$0xff]  }
 0x67a   :  { %10226 = vmatpush1.bf16.msra.mxu0 %v18992_v3  ;;  %v19168_v3 = vld [vmem:[#allocation8 + $0x9a4] ss:$28 sps:$4 sm:$0xff]  }
 0x67b   :  { %10227 = vmatprep.subr.bf16.mxu0 %v18997_v22  ;;  %v19039_v22 = vld [vmem:[#allocation8 + $0x2ec] ss:$28 sps:$4 sm:$0xff]  }
 0x67e   :  { %10228 = vmatpush1.bf16.msra.mxu0 %v18995_v36  ;;  %v19166_v36 = vld [vmem:[#allocation8 + $0x9a0] ss:$28 sps:$4 sm:$0xff]  }
 0x67f   :  { %13561 = vmatprep.subr.bf16.mxu0 %v19000_v61  ;;  %v19037_v61 = vld [vmem:[#allocation8 + $0x2e8] ss:$28 sps:$4 sm:$0xff]  }
 0x681   :  { %10230 = vmatmul.mubr.bf16.vlgmr.msra.gmra.mrb[4].mxu0 %v20045_v56  ;;  %v19106_v56 = vld [vmem:[#allocation8 + $0x770] ss:$28 sps:$4 sm:$0xff]  }
 0x682   :  { %13562 = vmatpush1.bf16.msra.mxu0 %v18998_v40  ;;  %13593 = vmatprep.mubr.bf16.mxu0 %v20098_v12  ;;  %v19174_v40 = vld [vmem:[#allocation8 + $0x9dc] ss:$28 sps:$4 sm:$0xff]  }
 0x683   :  { %13563 = vmatprep.subr.bf16.mxu0 %v19003_v4  ;;  %13320 = vmatpush1.bf16.msra.mxu1 %v19106_v56  ;;  %v19042_v4 = vld [vmem:[#allocation8 + $0x324] ss:$28 sps:$4 sm:$0xff]  }
 0x684   :  { %13321 = vmatprep.subr.bf16.mxu1 %v19114_v2  ;;  %v19052_v56 = vld [vmem:[#allocation8 + $0x400] ss:$28 sps:$4 sm:$0xff]   ;;  %v19055_v2 = vld [vmem:[#allocation8 + $0x438] ss:$28 sps:$4 sm:$0xff]  }
 0x686   :  { %13564 = vmatpush1.bf16.msra.mxu0 %v19001_v14  ;;  %v19045_v14 = vld [vmem:[#allocation8 + $0x35c] ss:$28 sps:$4 sm:$0xff]  }
 0x687   :  { %13565 = vmatprep.subr.bf16.mxu0 %v19006_v11  ;;  %13322 = vmatpush1.bf16.msra.mxu1 %v19112_v0  ;;  %v19048_v11 = vld [vmem:[#allocation8 + $0x394] ss:$28 sps:$4 sm:$0xff]  }
 0x688   :  { %13323 = vmatprep.subr.bf16.mxu1 %v19120_v19  ;;  %v19058_v0 = vld [vmem:[#allocation8 + $0x470] ss:$28 sps:$4 sm:$0xff]   ;;  %v19061_v19 = vld [vmem:[#allocation8 + $0x4a8] ss:$28 sps:$4 sm:$0xff]  }
 0x68a   :  { %13566 = vmatpush1.bf16.msra.mxu0 %v19004_v15  ;;  %v19051_v15 = vld [vmem:[#allocation8 + $0x3cc] ss:$28 sps:$4 sm:$0xff]  }
 0x68b   :  { %13567 = vmatprep.subr.bf16.mxu0 %v19009_v60  ;;  %13324 = vmatpush1.bf16.msra.mxu1 %v19118_v25  ;;  %v19054_v60 = vld [vmem:[#allocation8 + $0x404] ss:$28 sps:$4 sm:$0xff]   ;;  %v19180_v25 = vld [vmem:[#allocation8 + $0xa14] ss:$28 sps:$4 sm:$0xff]  }
 0x68c   :  { %13325 = vmatprep.subr.bf16.mxu1 %v19126_v27  ;;  %v19064_v27 = vld [vmem:[#allocation8 + $0x4e0] ss:$28 sps:$4 sm:$0xff]  }
 0x68e   :  { %13568 = vmatpush1.bf16.msra.mxu0 %v19007_v47  ;;  %v19057_v47 = vld [vmem:[#allocation8 + $0x43c] ss:$28 sps:$4 sm:$0xff]  }
 0x68f   :  { %13569 = vmatprep.subr.bf16.mxu0 %v19012_v37  ;;  %13326 = vmatpush1.bf16.msra.mxu1 %v19124_v31  ;;  %v19060_v37 = vld [vmem:[#allocation8 + $0x474] ss:$28 sps:$4 sm:$0xff]   ;;  %v19186_v31 = vld [vmem:[#allocation8 + $0xa4c] ss:$28 sps:$4 sm:$0xff]  }
 0x690   :  { %13327 = vmatprep.subr.bf16.mxu1 %v19132_v21  ;;  %v19067_v21 = vld [vmem:[#allocation8 + $0x518] ss:$28 sps:$4 sm:$0xff]  }
 0x692   :  { %13570 = vmatpush1.bf16.msra.mxu0 %v19010_v17  ;;  %v19063_v17 = vld [vmem:[#allocation8 + $0x4ac] ss:$28 sps:$4 sm:$0xff]  }
 0x693   :  { %13571 = vmatprep.subr.bf16.mxu0 %v19015_v34  ;;  %13328 = vmatpush1.bf16.msra.mxu1 %v19130_v63  ;;  %v19066_v34 = vld [vmem:[#allocation8 + $0x4e4] ss:$28 sps:$4 sm:$0xff]  }
 0x694   :  { %13329 = vmatprep.subr.bf16.mxu1 %v19138_v38  ;;  %v19192_v63 = vld [vmem:[#allocation8 + $0xa84] ss:$28 sps:$4 sm:$0xff]   ;;  %v19075_v38 = vld [vmem:[#allocation8 + $0x58c] ss:$28 sps:$4 sm:$0xff]  }
 0x696   :  { %13572 = vmatpush1.bf16.msra.mxu0 %v19013_v59  ;;  %v19178_v59 = vld [vmem:[#allocation8 + $0xa10] ss:$28 sps:$4 sm:$0xff]  }
 0x697   :  { %13573 = vmatprep.subr.bf16.mxu0 %v19018_v28  ;;  %13330 = vmatpush1.bf16.msra.mxu1 %v19136_v10  ;;  %v19069_v28 = vld [vmem:[#allocation8 + $0x51c] ss:$28 sps:$4 sm:$0xff]   ;;  %v19078_v10 = vld [vmem:[#allocation8 + $0x5c4] ss:$28 sps:$4 sm:$0xff]  }
 0x698   :  { %13331 = vmatprep.subr.bf16.mxu1 %v19144_v18  ;;  %v19081_v18 = vld [vmem:[#allocation8 + $0x5fc] ss:$28 sps:$4 sm:$0xff]  }
 0x69a   :  { %13574 = vmatpush1.bf16.msra.mxu0 %v19016_v58  ;;  %v19184_v58 = vld [vmem:[#allocation8 + $0xa48] ss:$28 sps:$4 sm:$0xff]  }
 0x69b   :  { %13575 = vmatprep.subr.bf16.mxu0 %v19021_v51  ;;  %13332 = vmatpush1.bf16.msra.mxu1 %v19142_v50  ;;  %v19072_v51 = vld [vmem:[#allocation8 + $0x554] ss:$28 sps:$4 sm:$0xff]  }
 0x69c   :  { %13333 = vmatprep.subr.bf16.mxu1 %v19150_v57  ;;  %v19084_v50 = vld [vmem:[#allocation8 + $0x634] ss:$28 sps:$4 sm:$0xff]   ;;  %v19087_v57 = vld [vmem:[#allocation8 + $0x66c] ss:$28 sps:$4 sm:$0xff]  }
 0x69e   :  { %13576 = vmatpush1.bf16.msra.mxu0 %v19019_v41  ;;  %v19070_v41 = vld [vmem:[#allocation8 + $0x550] ss:$28 sps:$4 sm:$0xff]  }
 0x69f   :  { %13577 = vmatprep.subr.bf16.mxu0 %v19024_v9  ;;  %13334 = vmatpush1.bf16.msra.mxu1 %v19148_v29  ;;  %v19073_v9 = vld [vmem:[#allocation8 + $0x588] ss:$28 sps:$4 sm:$0xff]  }
 0x6a0   :  { %13335 = vmatprep.subr.bf16.mxu1 %v19156_v13  ;;  %v19090_v29 = vld [vmem:[#allocation8 + $0x6a4] ss:$28 sps:$4 sm:$0xff]   ;;  %v19093_v13 = vld [vmem:[#allocation8 + $0x6dc] ss:$28 sps:$4 sm:$0xff]  }
 0x6a2   :  { %13578 = vmatpush1.bf16.msra.mxu0 %v19022_v7  ;;  %v19076_v7 = vld [vmem:[#allocation8 + $0x5c0] ss:$28 sps:$4 sm:$0xff]  }
 0x6a3   :  { %13579 = vmatprep.subr.bf16.mxu0 %v19027_v45  ;;  %13336 = vmatpush1.bf16.msra.mxu1 %v19154_v32  ;;  %v19079_v45 = vld [vmem:[#allocation8 + $0x5f8] ss:$28 sps:$4 sm:$0xff]  }
 0x6a4   :  { %13337 = vmatprep.subr.bf16.mxu1 %v19162_v53  ;;  %v19099_v32 = vld [vmem:[#allocation8 + $0x714] ss:$28 sps:$4 sm:$0xff]   ;;  %v19105_v53 = vld [vmem:[#allocation8 + $0x74c] ss:$28 sps:$4 sm:$0xff]  }
 0x6a6   :  { %13580 = vmatpush1.bf16.msra.mxu0 %v19025_v16  ;;  %v19082_v16 = vld [vmem:[#allocation8 + $0x630] ss:$28 sps:$4 sm:$0xff]  }
 0x6a7   :  { %13581 = vmatprep.subr.bf16.mxu0 %v19030_v46  ;;  %13338 = vmatpush1.bf16.msra.mxu1 %v19160_v6  ;;  %v19085_v46 = vld [vmem:[#allocation8 + $0x668] ss:$28 sps:$4 sm:$0xff]  }
 0x6a8   :  { %13339 = vmatprep.subr.bf16.mxu1 %v19168_v3  ;;  %v19111_v6 = vld [vmem:[#allocation8 + $0x784] ss:$28 sps:$4 sm:$0xff]   ;;  %v19117_v3 = vld [vmem:[#allocation8 + $0x7bc] ss:$28 sps:$4 sm:$0xff]  }
 0x6aa   :  { %13582 = vmatpush1.bf16.msra.mxu0 %v19028_v48  ;;  %v19088_v48 = vld [vmem:[#allocation8 + $0x6a0] ss:$28 sps:$4 sm:$0xff]  }
 0x6ab   :  { %13583 = vmatprep.subr.bf16.mxu0 %v19033_v44  ;;  %13340 = vmatpush1.bf16.msra.mxu1 %v19166_v36  ;;  %v19091_v44 = vld [vmem:[#allocation8 + $0x6d8] ss:$28 sps:$4 sm:$0xff]  }
 0x6ac   :  { %13341 = vmatprep.subr.bf16.mxu1 %v19174_v40  ;;  %v19123_v36 = vld [vmem:[#allocation8 + $0x7f4] ss:$28 sps:$4 sm:$0xff]   ;;  %v19129_v40 = vld [vmem:[#allocation8 + $0x82c] ss:$28 sps:$4 sm:$0xff]  }
 0x6ae   :  { %13584 = vmatpush1.bf16.msra.mxu0 %v19031_v52  ;;  %v19097_v52 = vld [vmem:[#allocation8 + $0x710] ss:$28 sps:$4 sm:$0xff]  }
 0x6af   :  { %13585 = vmatprep.subr.bf16.mxu0 %v19036_v20  ;;  %13342 = vmatpush1.bf16.msra.mxu1 %v19172_v5  ;;  %v19103_v20 = vld [vmem:[#allocation8 + $0x748] ss:$28 sps:$4 sm:$0xff]  }
 0x6b0   :  { %13343 = vmatprep.subr.bf16.mxu1 %v19180_v25  ;;  %v19135_v5 = vld [vmem:[#allocation8 + $0x864] ss:$28 sps:$4 sm:$0xff]  }
 0x6b1   :  { %v19181_v25 = vld [vmem:[#allocation8 + $0xa20] ss:$28 sps:$4 sm:$0xff]  }
 0x6b2   :  { %13586 = vmatpush1.bf16.msra.mxu0 %v19034_v1  ;;  %v19109_v1 = vld [vmem:[#allocation8 + $0x780] ss:$28 sps:$4 sm:$0xff]  }
 0x6b3   :  { %13587 = vmatprep.subr.bf16.mxu0 %v19039_v22  ;;  %13344 = vmatpush1.bf16.msra.mxu1 %v19178_v59  ;;  %v19115_v22 = vld [vmem:[#allocation8 + $0x7b8] ss:$28 sps:$4 sm:$0xff]  }
 0x6b4   :  { %13345 = vmatprep.subr.bf16.mxu1 %v19186_v31  ;;  %v19189_v59 = vld [vmem:[#allocation8 + $0xa5c] ss:$28 sps:$4 sm:$0xff]   ;;  %v1833_v31 = vsub.s32 4, %v19845_v43 }
 0x6b6   :  { %13588 = vmatpush1.bf16.msra.mxu0 %v19037_v61  ;;  %v19121_v61 = vld [vmem:[#allocation8 + $0x7f0] ss:$28 sps:$4 sm:$0xff]  }
 0x6b7   :  { %13589 = vmatprep.subr.bf16.mxu0 %v19042_v4  ;;  %13346 = vmatpush1.bf16.msra.mxu1 %v19184_v58  ;;  %v19127_v4 = vld [vmem:[#allocation8 + $0x828] ss:$28 sps:$4 sm:$0xff]   ;;  %v1837_v58 = vsub.s32 5, %v19845_v43 }
 0x6b8   :  { %13356 = vmatprep.subr.bf16.mxu1 %v19192_v63 }
 0x6ba   :  { %13590 = vmatpush1.bf16.msra.mxu0 %v19040_v8  ;;  %v19133_v8 = vld [vmem:[#allocation8 + $0x860] ss:$28 sps:$4 sm:$0xff]  }
 0x6bb   :  { %13591 = vmatprep.subr.bf16.mxu0 %v19045_v14  ;;  %v19141_v14 = vld [vmem:[#allocation8 + $0x89c] ss:$28 sps:$4 sm:$0xff]  }
 0x6be   :  { %13592 = vmatpush1.bf16.msra.mxu0 %v19043_v24  ;;  %v19139_v24 = vld [vmem:[#allocation8 + $0x898] ss:$28 sps:$4 sm:$0xff]  }
 0x6bf   :  { %13602 = vmatprep.subr.bf16.mxu0 %v19048_v11  ;;  %v19147_v11 = vld [vmem:[#allocation8 + $0x8d4] ss:$28 sps:$4 sm:$0xff]  }
 0x6c1   :  { %13594 = vmatmul.mubr.bf16.vlgmr.msra.gmra.mrb[8].mxu0 %v20114_v33 }
 0x6c2   :  { %13603 = vmatpush1.bf16.msra.mxu0 %v19046_v49  ;;  %13634 = vmatprep.mubr.bf16.mxu0 %v20116_v35  ;;  %v19145_v49 = vld [vmem:[#allocation8 + $0x8d0] ss:$28 sps:$4 sm:$0xff]  }
 0x6c3   :  { %13604 = vmatprep.subr.bf16.mxu0 %v19051_v15  ;;  %v19153_v15 = vld [vmem:[#allocation8 + $0x90c] ss:$28 sps:$4 sm:$0xff]  }
 0x6c6   :  { %13605 = vmatpush1.bf16.msra.mxu0 %v19049_v55  ;;  %v19151_v55 = vld [vmem:[#allocation8 + $0x908] ss:$28 sps:$4 sm:$0xff]  }
 0x6c7   :  { %13606 = vmatprep.subr.bf16.mxu0 %v19054_v60  ;;  %v19159_v60 = vld [vmem:[#allocation8 + $0x944] ss:$28 sps:$4 sm:$0xff]  }
 0x6ca   :  { %13607 = vmatpush1.bf16.msra.mxu0 %v19052_v56  ;;  %v19157_v56 = vld [vmem:[#allocation8 + $0x940] ss:$28 sps:$4 sm:$0xff]  }
 0x6cb   :  { %13608 = vmatprep.subr.bf16.mxu0 %v19057_v47  ;;  %v19165_v47 = vld [vmem:[#allocation8 + $0x97c] ss:$28 sps:$4 sm:$0xff]  }
 0x6ce   :  { %13609 = vmatpush1.bf16.msra.mxu0 %v19055_v2  ;;  %v19163_v2 = vld [vmem:[#allocation8 + $0x978] ss:$28 sps:$4 sm:$0xff]  }
 0x6cf   :  { %13610 = vmatprep.subr.bf16.mxu0 %v19060_v37  ;;  %v19171_v37 = vld [vmem:[#allocation8 + $0x9b4] ss:$28 sps:$4 sm:$0xff]  }
 0x6d2   :  { %13611 = vmatpush1.bf16.msra.mxu0 %v19058_v0  ;;  %v19169_v0 = vld [vmem:[#allocation8 + $0x9b0] ss:$28 sps:$4 sm:$0xff]  }
 0x6d3   :  { %13612 = vmatprep.subr.bf16.mxu0 %v19063_v17  ;;  %v19177_v17 = vld [vmem:[#allocation8 + $0x9ec] ss:$28 sps:$4 sm:$0xff]  }
 0x6d6   :  { %13613 = vmatpush1.bf16.msra.mxu0 %v19061_v19  ;;  %v19175_v19 = vld [vmem:[#allocation8 + $0x9e8] ss:$28 sps:$4 sm:$0xff]  }
 0x6d7   :  { %13614 = vmatprep.subr.bf16.mxu0 %v19066_v34  ;;  %v19183_v34 = vld [vmem:[#allocation8 + $0xa24] ss:$28 sps:$4 sm:$0xff]  }
 0x6da   :  { %13615 = vmatpush1.bf16.msra.mxu0 %v19064_v27  ;;  %v19187_v27 = vld [vmem:[#allocation8 + $0xa58] ss:$28 sps:$4 sm:$0xff]  }
 0x6db   :  { %13616 = vmatprep.subr.bf16.mxu0 %v19069_v28  ;;  %v19195_v28 = vld [vmem:[#allocation8 + $0xa94] ss:$28 sps:$4 sm:$0xff]  }
 0x6de   :  { %13617 = vmatpush1.bf16.msra.mxu0 %v19067_v21  ;;  %v19518_v21 = vld [vmem:[#allocation7] sm:$0xff] }
 0x6df   :  { %13618 = vmatprep.subr.bf16.mxu0 %v19072_v51  ;;  %v1834_v51 = vrot.slane %v19518_v21, %v1833_v31  ;;  %v1838_v63 = vrot.slane %v19518_v21, %v1837_v58  ;;  %v19249_v21 = vld [vmem:[#allocation8 + $0xb4] ss:$28 sps:$4 sm:$0xff]  }
 0x6e2   :  { %13619 = vmatpush1.bf16.msra.mxu0 %v19070_v41 }
 0x6e3   :  { %13620 = vmatprep.subr.bf16.mxu0 %v19075_v38 }
 0x6e6   :  { %13621 = vmatpush1.bf16.msra.mxu0 %v19073_v9 }
 0x6e7   :  { %13622 = vmatprep.subr.bf16.mxu0 %v19078_v10 }
 0x6ea   :  { %13623 = vmatpush1.bf16.msra.mxu0 %v19076_v7 }
 0x6eb   :  { %13624 = vmatprep.subr.bf16.mxu0 %v19081_v18 }
 0x6ee   :  { %13625 = vmatpush1.bf16.msra.mxu0 %v19079_v45 }
 0x6ef   :  { %13626 = vmatprep.subr.bf16.mxu0 %v19084_v50 }
 0x6f2   :  { %13627 = vmatpush1.bf16.msra.mxu0 %v19082_v16 }
 0x6f3   :  { %13628 = vmatprep.subr.bf16.mxu0 %v19087_v57  ;;  %v19190_v57 = vld [vmem:[#allocation8 + $0xa80] ss:$28 sps:$4 sm:$0xff]  }
 0x6f6   :  { %13629 = vmatpush1.bf16.msra.mxu0 %v19085_v46  ;;  %v19193_v46 = vld [vmem:[#allocation8 + $0xa90] ss:$28 sps:$4 sm:$0xff]  }
 0x6f7   :  { %13630 = vmatprep.subr.bf16.mxu0 %v19090_v29 }
 0x6fa   :  { %13631 = vmatpush1.bf16.msra.mxu0 %v19088_v48  ;;  %v19198_v48 = vld [vmem:[#allocation8 + $0xabc] ss:$28 sps:$4 sm:$0xff]  }
 0x6fb   :  { %13632 = vmatprep.subr.bf16.mxu0 %v19093_v13  ;;  %v19201_v13 = vld [vmem:[#allocation8 + $0xacc] ss:$28 sps:$4 sm:$0xff]  }
 0x6fe   :  { %13633 = vmatpush1.bf16.msra.mxu0 %v19091_v44  ;;  %v19196_v44 = vld [vmem:[#allocation8 + $0xab8] ss:$28 sps:$4 sm:$0xff]  }
 0x6ff   :  { %13643 = vmatprep.subr.bf16.mxu0 %v19099_v32  ;;  %v19199_v32 = vld [vmem:[#allocation8 + $0xac8] ss:$28 sps:$4 sm:$0xff]  }
 0x701   :  { %13635 = vmatmul.mubr.bf16.vlgmr.msra.gmra.mrb[8].mxu0 %v20131_v30 }
 0x702   :  { %13644 = vmatpush1.bf16.msra.mxu0 %v19097_v52  ;;  %v19204_v52 = vld [vmem:[#allocation8 + $0xaf4] ss:$28 sps:$4 sm:$0xff]  }
 0x703   :  { %13645 = vmatprep.subr.bf16.mxu0 %v19105_v53  ;;  %v19207_v53 = vld [vmem:[#allocation8 + $0xb04] ss:$28 sps:$4 sm:$0xff]  }
 0x706   :  { %13646 = vmatpush1.bf16.msra.mxu0 %v19103_v20  ;;  %v19717_v20 = vmov 0  }
 0x707   :  { %13647 = vmatprep.subr.bf16.mxu0 %v19111_v6  ;;  %v19202_v6 = vld [vmem:[#allocation8 + $0xaf0] ss:$28 sps:$4 sm:$0xff]  }
 0x70a   :  { %13648 = vmatpush1.bf16.msra.mxu0 %v19109_v1  ;;  %v19205_v1 = vld [vmem:[#allocation8 + $0xb00] ss:$28 sps:$4 sm:$0xff]  }
 0x70b   :  { %13649 = vmatprep.subr.bf16.mxu0 %v19117_v3  ;;  %v19210_v3 = vld [vmem:[#allocation8 + $0xb2c] ss:$28 sps:$4 sm:$0xff]  }
 0x70e   :  { %13650 = vmatpush1.bf16.msra.mxu0 %v19115_v22  ;;  %v19213_v22 = vld [vmem:[#allocation8 + $0xb3c] ss:$28 sps:$4 sm:$0xff]  }
 0x70f   :  { %13651 = vmatprep.subr.bf16.mxu0 %v19123_v36  ;;  %v19208_v36 = vld [vmem:[#allocation8 + $0xb28] ss:$28 sps:$4 sm:$0xff]  }
 0x712   :  { %13652 = vmatpush1.bf16.msra.mxu0 %v19121_v61  ;;  %v19211_v61 = vld [vmem:[#allocation8 + $0xb38] ss:$28 sps:$4 sm:$0xff]  }
 0x713   :  { %13653 = vmatprep.subr.bf16.mxu0 %v19129_v40  ;;  %v19216_v40 = vld [vmem:[#allocation8 + $0xb64] ss:$28 sps:$4 sm:$0xff]  }
 0x716   :  { %13654 = vmatpush1.bf16.msra.mxu0 %v19127_v4  ;;  %v19219_v4 = vld [vmem:[#allocation8 + $0xb74] ss:$28 sps:$4 sm:$0xff]  }
 0x717   :  { %13655 = vmatprep.subr.bf16.mxu0 %v19135_v5  ;;  %v19214_v5 = vld [vmem:[#allocation8 + $0xb60] ss:$28 sps:$4 sm:$0xff]  }
 0x71a   :  { %13656 = vmatpush1.bf16.msra.mxu0 %v19133_v8  ;;  %v19217_v8 = vld [vmem:[#allocation8 + $0xb70] ss:$28 sps:$4 sm:$0xff]  }
 0x71b   :  { %13657 = vmatprep.subr.bf16.mxu0 %v19141_v14  ;;  %v19222_v14 = vld [vmem:[#allocation8 + $0xb9c] ss:$28 sps:$4 sm:$0xff]  }
 0x71e   :  { %13658 = vmatpush1.bf16.msra.mxu0 %v19139_v24  ;;  %v19225_v24 = vld [vmem:[#allocation8 + $0xbac] ss:$28 sps:$4 sm:$0xff]  }
 0x71f   :  { %13659 = vmatprep.subr.bf16.mxu0 %v19147_v11  ;;  %v19220_v11 = vld [vmem:[#allocation8 + $0xb98] ss:$28 sps:$4 sm:$0xff]  }
 0x722   :  { %13660 = vmatpush1.bf16.msra.mxu0 %v19145_v49  ;;  %v19223_v49 = vld [vmem:[#allocation8 + $0xba8] ss:$28 sps:$4 sm:$0xff]  }
 0x723   :  { %13661 = vmatprep.subr.bf16.mxu0 %v19153_v15  ;;  %v19228_v15 = vld [vmem:[#allocation8 + $0xbd4] ss:$28 sps:$4 sm:$0xff]  }
 0x726   :  { %13662 = vmatpush1.bf16.msra.mxu0 %v19151_v55  ;;  %v19231_v55 = vld [vmem:[#allocation8 + $0xbe4] ss:$28 sps:$4 sm:$0xff]  }
 0x727   :  { %13663 = vmatprep.subr.bf16.mxu0 %v19159_v60  ;;  %v19226_v60 = vld [vmem:[#allocation8 + $0xbd0] ss:$28 sps:$4 sm:$0xff]  }
 0x72a   :  { %13664 = vmatpush1.bf16.msra.mxu0 %v19157_v56  ;;  %v19229_v56 = vld [vmem:[#allocation8 + $0xbe0] ss:$28 sps:$4 sm:$0xff]  }
 0x72b   :  { %13665 = vmatprep.subr.bf16.mxu0 %v19165_v47  ;;  %v19234_v47 = vld [vmem:[#allocation8 + $0xc0c] ss:$28 sps:$4 sm:$0xff]  }
 0x72e   :  { %13666 = vmatpush1.bf16.msra.mxu0 %v19163_v2  ;;  %v19237_v2 = vld [vmem:[#allocation8 + $0xc1c] ss:$28 sps:$4 sm:$0xff]  }
 0x72f   :  { %13667 = vmatprep.subr.bf16.mxu0 %v19171_v37  ;;  %v19232_v37 = vld [vmem:[#allocation8 + $0xc08] ss:$28 sps:$4 sm:$0xff]  }
 0x732   :  { %13668 = vmatpush1.bf16.msra.mxu0 %v19169_v0  ;;  %v19235_v0 = vld [vmem:[#allocation8 + $0xc18] ss:$28 sps:$4 sm:$0xff]  }
 0x733   :  { %13669 = vmatprep.subr.bf16.mxu0 %v19177_v17  ;;  %v10724_v17 = vmax.f32 %v20138_v23, 0.0  ;;  %v19246_v23 = vld [vmem:[#allocation8 + $0x7c] ss:$28 sps:$4 sm:$0xff]  }
 0x736   :  { %13670 = vmatpush1.bf16.msra.mxu0 %v19175_v19  ;;  %v19240_v19 = vld [vmem:[#allocation8 + $0xc] ss:$28 sps:$4 sm:$0xff]  }
 0x737   :  { %13671 = vmatprep.subr.bf16.mxu0 %v19183_v34  ;;  %v19238_v34 = vld [vmem:[#allocation8 + $0x8] ss:$28 sps:$4 sm:$0xff]  }
 0x73a   :  { %13672 = vmatpush1.bf16.msra.mxu0 %v19181_v25  ;;  %v20166_v25 = vpack.c.bf16 %v10724_v17, %v10724_v17  ;;  %v19307_v17 = vld [vmem:[#allocation8 + $0x510] ss:$28 sps:$4 sm:$0xff]  }
 0x73b   :  { %13673 = vmatprep.subr.bf16.mxu0 %v19189_v59  ;;  %v19243_v59 = vld [vmem:[#allocation8 + $0x44] ss:$28 sps:$4 sm:$0xff]  }
 0x73e   :  { %13674 = vmatpush1.bf16.msra.mxu0 %v19187_v27  ;;  %v19241_v27 = vld [vmem:[#allocation8 + $0x40] ss:$28 sps:$4 sm:$0xff]  }
 0x73f   :  { %13684 = vmatprep.subr.bf16.mxu0 %v19195_v28  ;;  %v19244_v28 = vld [vmem:[#allocation8 + $0x78] ss:$28 sps:$4 sm:$0xff]  }
 0x754   :  { %v10231_v41 = vpop.f32.mrb[4].mxu0 }
 0x755   :  { %v16784_v38 = vadd.f32 %v10231_v41, %v1834_v51  ;;  %v10233_v9 = vpop.f32.mrb[5].mxu0  ;;  %v19247_v51 = vld [vmem:[#allocation8 + $0xb0] ss:$28 sps:$4 sm:$0xff]   ;;  %v19250_v41 = vld [vmem:[#allocation8 + $0xe8] ss:$28 sps:$4 sm:$0xff]  }
 0x756   :  { %v16785_v10 = vadd.f32 %v10233_v9, %v1838_v63  ;;  %v10235_v7 = vpop.f32.mrb[6].mxu0  ;;  %v19252_v63 = vld [vmem:[#allocation8 + $0xec] ss:$28 sps:$4 sm:$0xff]   ;;  %v19253_v9 = vld [vmem:[#allocation8 + $0x120] ss:$28 sps:$4 sm:$0xff]  }
 0x757   :  { %v10722_v18 = vmax.f32 %v16784_v38, 0.0  ;;  %v10236_v45 = vpop.f32.mrb[7].mxu0  ;;  %v19255_v38 = vld [vmem:[#allocation8 + $0x124] ss:$28 sps:$4 sm:$0xff]   ;;  %v19256_v7 = vld [vmem:[#allocation8 + $0x158] ss:$28 sps:$4 sm:$0xff]  }
 0x758   :  { %v10723_v50 = vmax.f32 %v16785_v10, 0.0  ;;  %v19258_v10 = vld [vmem:[#allocation8 + $0x15c] ss:$28 sps:$4 sm:$0xff]   ;;  %v19259_v45 = vld [vmem:[#allocation8 + $0x190] ss:$28 sps:$4 sm:$0xff]  }
 0x759   :  { %v20157_v29 = vpack.c.bf16 %v10722_v18, %v10722_v18  ;;  %v19261_v18 = vld [vmem:[#allocation8 + $0x194] ss:$28 sps:$4 sm:$0xff]  }
 0x75a   :  { %v20155_v16 = vpack.c.bf16 %v10723_v50, %v10723_v50  ;;  %v19264_v50 = vld [vmem:[#allocation8 + $0x1cc] ss:$28 sps:$4 sm:$0xff]  }
 0x75c   :  { %13347 = vmatprep.mubr.bf16.mxu1 %v20155_v16  ;;  %13675 = vmatprep.mubr.bf16.mxu0 %v20155_v16 }
 0x75d   :  { %13348 = vmatmul.mubr.bf16.vlgmr.msra.gmra.mrb[52].mxu1 %v20157_v29  ;;  %13676 = vmatmul.mubr.bf16.vlgmr.msra.gmra.mrb[8].mxu0 %v20157_v29 }
 0x75e   :  { %13357 = vmatpush1.bf16.msra.mxu1 %v19190_v57  ;;  %13685 = vmatpush1.bf16.msra.mxu0 %v19193_v46  ;;  %v19262_v57 = vld [vmem:[#allocation8 + $0x1c8] ss:$28 sps:$4 sm:$0xff]  }
 0x75f   :  { %13358 = vmatprep.subr.bf16.mxu1 %v19198_v48  ;;  %13686 = vmatprep.subr.bf16.mxu0 %v19201_v13  ;;  %v19267_v46 = vld [vmem:[#allocation8 + $0x204] ss:$28 sps:$4 sm:$0xff]   ;;  %v19270_v13 = vld [vmem:[#allocation8 + $0x23c] ss:$28 sps:$4 sm:$0xff]  }
 0x760   :  { %13388 = vmatprep.mubr.bf16.mxu1 %v19717_v20  ;;  %13716 = vmatprep.mubr.bf16.mxu0 %v19717_v20  ;;  %v19265_v48 = vld [vmem:[#allocation8 + $0x200] ss:$28 sps:$4 sm:$0xff]  }
 0x762   :  { %13359 = vmatpush1.bf16.msra.mxu1 %v19196_v44  ;;  %13687 = vmatpush1.bf16.msra.mxu0 %v19199_v32  ;;  %v19268_v44 = vld [vmem:[#allocation8 + $0x238] ss:$28 sps:$4 sm:$0xff]  }
 0x763   :  { %13360 = vmatprep.subr.bf16.mxu1 %v19204_v52  ;;  %13688 = vmatprep.subr.bf16.mxu0 %v19207_v53  ;;  %v19273_v32 = vld [vmem:[#allocation8 + $0x274] ss:$28 sps:$4 sm:$0xff]   ;;  %v19276_v53 = vld [vmem:[#allocation8 + $0x2ac] ss:$28 sps:$4 sm:$0xff]  }
 0x764   :  { %v19271_v52 = vld [vmem:[#allocation8 + $0x270] ss:$28 sps:$4 sm:$0xff]  }
 0x766   :  { %13361 = vmatpush1.bf16.msra.mxu1 %v19202_v6  ;;  %13689 = vmatpush1.bf16.msra.mxu0 %v19205_v1  ;;  %v19274_v6 = vld [vmem:[#allocation8 + $0x2a8] ss:$28 sps:$4 sm:$0xff]  }
 0x767   :  { %13362 = vmatprep.subr.bf16.mxu1 %v19210_v3  ;;  %13690 = vmatprep.subr.bf16.mxu0 %v19213_v22  ;;  %v19279_v1 = vld [vmem:[#allocation8 + $0x2e4] ss:$28 sps:$4 sm:$0xff]   ;;  %v19282_v22 = vld [vmem:[#allocation8 + $0x31c] ss:$28 sps:$4 sm:$0xff]  }
 0x768   :  { %v19277_v3 = vld [vmem:[#allocation8 + $0x2e0] ss:$28 sps:$4 sm:$0xff]  }
 0x76a   :  { %13363 = vmatpush1.bf16.msra.mxu1 %v19208_v36  ;;  %13691 = vmatpush1.bf16.msra.mxu0 %v19211_v61  ;;  %v19280_v36 = vld [vmem:[#allocation8 + $0x318] ss:$28 sps:$4 sm:$0xff]  }
 0x76b   :  { %13364 = vmatprep.subr.bf16.mxu1 %v19216_v40  ;;  %13692 = vmatprep.subr.bf16.mxu0 %v19219_v4  ;;  %v19285_v61 = vld [vmem:[#allocation8 + $0x354] ss:$28 sps:$4 sm:$0xff]   ;;  %v19288_v4 = vld [vmem:[#allocation8 + $0x38c] ss:$28 sps:$4 sm:$0xff]  }
 0x76c   :  { %v19283_v40 = vld [vmem:[#allocation8 + $0x350] ss:$28 sps:$4 sm:$0xff]  }
 0x76e   :  { %13365 = vmatpush1.bf16.msra.mxu1 %v19214_v5  ;;  %13693 = vmatpush1.bf16.msra.mxu0 %v19217_v8  ;;  %v19286_v5 = vld [vmem:[#allocation8 + $0x388] ss:$28 sps:$4 sm:$0xff]  }
 0x76f   :  { %13366 = vmatprep.subr.bf16.mxu1 %v19222_v14  ;;  %13694 = vmatprep.subr.bf16.mxu0 %v19225_v24  ;;  %v19291_v8 = vld [vmem:[#allocation8 + $0x3c4] ss:$28 sps:$4 sm:$0xff]   ;;  %v19294_v24 = vld [vmem:[#allocation8 + $0x3fc] ss:$28 sps:$4 sm:$0xff]  }
 0x770   :  { %v19289_v14 = vld [vmem:[#allocation8 + $0x3c0] ss:$28 sps:$4 sm:$0xff]  }
 0x772   :  { %13367 = vmatpush1.bf16.msra.mxu1 %v19220_v11  ;;  %13695 = vmatpush1.bf16.msra.mxu0 %v19223_v49  ;;  %v19292_v11 = vld [vmem:[#allocation8 + $0x3f8] ss:$28 sps:$4 sm:$0xff]  }
 0x773   :  { %13368 = vmatprep.subr.bf16.mxu1 %v19228_v15  ;;  %13696 = vmatprep.subr.bf16.mxu0 %v19231_v55  ;;  %v19297_v49 = vld [vmem:[#allocation8 + $0x434] ss:$28 sps:$4 sm:$0xff]   ;;  %v19300_v55 = vld [vmem:[#allocation8 + $0x46c] ss:$28 sps:$4 sm:$0xff]  }
 0x774   :  { %v19295_v15 = vld [vmem:[#allocation8 + $0x430] ss:$28 sps:$4 sm:$0xff]  }
 0x776   :  { %13369 = vmatpush1.bf16.msra.mxu1 %v19226_v60  ;;  %13697 = vmatpush1.bf16.msra.mxu0 %v19229_v56  ;;  %v19298_v60 = vld [vmem:[#allocation8 + $0x468] ss:$28 sps:$4 sm:$0xff]  }
 0x777   :  { %13370 = vmatprep.subr.bf16.mxu1 %v19234_v47  ;;  %13698 = vmatprep.subr.bf16.mxu0 %v19237_v2  ;;  %v19303_v56 = vld [vmem:[#allocation8 + $0x4a4] ss:$28 sps:$4 sm:$0xff]   ;;  %v19306_v2 = vld [vmem:[#allocation8 + $0x4dc] ss:$28 sps:$4 sm:$0xff]  }
 0x778   :  { %v19301_v47 = vld [vmem:[#allocation8 + $0x4a0] ss:$28 sps:$4 sm:$0xff]  }
 0x77a   :  { %13371 = vmatpush1.bf16.msra.mxu1 %v19232_v37  ;;  %13699 = vmatpush1.bf16.msra.mxu0 %v19235_v0  ;;  %v19304_v37 = vld [vmem:[#allocation8 + $0x4d8] ss:$28 sps:$4 sm:$0xff]  }
 0x77b   :  { %13397 = vmatprep.subr.bf16.mxu1 %v19240_v19  ;;  %v19309_v0 = vld [vmem:[#allocation8 + $0x514] ss:$28 sps:$4 sm:$0xff]   ;;  %v19312_v19 = vld [vmem:[#allocation8 + $0x54c] ss:$28 sps:$4 sm:$0xff]  }
 0x77d   :  { %13389 = vmatmul.mubr.bf16.vlgmr.msra.gmra.mrb[52].mxu1 %v20166_v25  ;;  %13717 = vmatmul.mubr.bf16.vlgmr.msra.gmra.mrb[8].mxu0 %v20166_v25 }
 0x77e   :  { %13398 = vmatpush1.bf16.msra.mxu1 %v19238_v34  ;;  %13429 = vmatprep.mubr.bf16.mxu1 %v20098_v12  ;;  %v19310_v34 = vld [vmem:[#allocation8 + $0x548] ss:$28 sps:$4 sm:$0xff]  }
 0x77f   :  { %13399 = vmatprep.subr.bf16.mxu1 %v19243_v59  ;;  %v19315_v59 = vld [vmem:[#allocation8 + $0x584] ss:$28 sps:$4 sm:$0xff]  }
 0x782   :  { %13400 = vmatpush1.bf16.msra.mxu1 %v19241_v27  ;;  %v19313_v27 = vld [vmem:[#allocation8 + $0x580] ss:$28 sps:$4 sm:$0xff]  }
 0x783   :  { %13401 = vmatprep.subr.bf16.mxu1 %v19246_v23  ;;  %v19318_v23 = vld [vmem:[#allocation8 + $0x5bc] ss:$28 sps:$4 sm:$0xff]  }
 0x786   :  { %13402 = vmatpush1.bf16.msra.mxu1 %v19244_v28  ;;  %v19316_v28 = vld [vmem:[#allocation8 + $0x5b8] ss:$28 sps:$4 sm:$0xff]  }
 0x787   :  { %13403 = vmatprep.subr.bf16.mxu1 %v19249_v21  ;;  %v19321_v21 = vld [vmem:[#allocation8 + $0x5f4] ss:$28 sps:$4 sm:$0xff]  }
 0x78a   :  { %13404 = vmatpush1.bf16.msra.mxu1 %v19247_v51  ;;  %v19319_v51 = vld [vmem:[#allocation8 + $0x5f0] ss:$28 sps:$4 sm:$0xff]  }
 0x78b   :  { %13405 = vmatprep.subr.bf16.mxu1 %v19252_v63  ;;  %v19324_v63 = vld [vmem:[#allocation8 + $0x62c] ss:$28 sps:$4 sm:$0xff]  }
 0x78e   :  { %13406 = vmatpush1.bf16.msra.mxu1 %v19250_v41  ;;  %v19322_v41 = vld [vmem:[#allocation8 + $0x628] ss:$28 sps:$4 sm:$0xff]  }
 0x78f   :  { %13407 = vmatprep.subr.bf16.mxu1 %v19255_v38  ;;  %v19327_v38 = vld [vmem:[#allocation8 + $0x664] ss:$28 sps:$4 sm:$0xff]  }
 0x792   :  { %13408 = vmatpush1.bf16.msra.mxu1 %v19253_v9  ;;  %v19325_v9 = vld [vmem:[#allocation8 + $0x660] ss:$28 sps:$4 sm:$0xff]  }
 0x793   :  { %13409 = vmatprep.subr.bf16.mxu1 %v19258_v10  ;;  %v19330_v10 = vld [vmem:[#allocation8 + $0x69c] ss:$28 sps:$4 sm:$0xff]  }
 0x796   :  { %13410 = vmatpush1.bf16.msra.mxu1 %v19256_v7  ;;  %v19328_v7 = vld [vmem:[#allocation8 + $0x698] ss:$28 sps:$4 sm:$0xff]  }
 0x797   :  { %13411 = vmatprep.subr.bf16.mxu1 %v19261_v18  ;;  %v19333_v18 = vld [vmem:[#allocation8 + $0x6d4] ss:$28 sps:$4 sm:$0xff]  }
 0x79a   :  { %13412 = vmatpush1.bf16.msra.mxu1 %v19259_v45  ;;  %v19331_v45 = vld [vmem:[#allocation8 + $0x6d0] ss:$28 sps:$4 sm:$0xff]  }
 0x79b   :  { %13413 = vmatprep.subr.bf16.mxu1 %v19264_v50  ;;  %v19336_v50 = vld [vmem:[#allocation8 + $0x70c] ss:$28 sps:$4 sm:$0xff]  }
 0x79e   :  { %13414 = vmatpush1.bf16.msra.mxu1 %v19262_v57  ;;  %v19334_v57 = vld [vmem:[#allocation8 + $0x708] ss:$28 sps:$4 sm:$0xff]  }
 0x79f   :  { %13415 = vmatprep.subr.bf16.mxu1 %v19267_v46  ;;  %v19339_v46 = vld [vmem:[#allocation8 + $0x744] ss:$28 sps:$4 sm:$0xff]  }
 0x7a2   :  { %13416 = vmatpush1.bf16.msra.mxu1 %v19265_v48  ;;  %v19337_v48 = vld [vmem:[#allocation8 + $0x740] ss:$28 sps:$4 sm:$0xff]  }
 0x7a3   :  { %13417 = vmatprep.subr.bf16.mxu1 %v19270_v13  ;;  %v19342_v13 = vld [vmem:[#allocation8 + $0x77c] ss:$28 sps:$4 sm:$0xff]  }
 0x7a6   :  { %13418 = vmatpush1.bf16.msra.mxu1 %v19268_v44  ;;  %v19340_v44 = vld [vmem:[#allocation8 + $0x778] ss:$28 sps:$4 sm:$0xff]  }
 0x7a7   :  { %13419 = vmatprep.subr.bf16.mxu1 %v19273_v32  ;;  %v19345_v32 = vld [vmem:[#allocation8 + $0x7b4] ss:$28 sps:$4 sm:$0xff]  }
 0x7aa   :  { %13420 = vmatpush1.bf16.msra.mxu1 %v19271_v52  ;;  %v19343_v52 = vld [vmem:[#allocation8 + $0x7b0] ss:$28 sps:$4 sm:$0xff]  }
 0x7ab   :  { %13421 = vmatprep.subr.bf16.mxu1 %v19276_v53  ;;  %v19348_v53 = vld [vmem:[#allocation8 + $0x7ec] ss:$28 sps:$4 sm:$0xff]  }
 0x7ae   :  { %13422 = vmatpush1.bf16.msra.mxu1 %v19274_v6  ;;  %v19346_v6 = vld [vmem:[#allocation8 + $0x7e8] ss:$28 sps:$4 sm:$0xff]  }
 0x7af   :  { %13423 = vmatprep.subr.bf16.mxu1 %v19279_v1  ;;  %v19351_v1 = vld [vmem:[#allocation8 + $0x824] ss:$28 sps:$4 sm:$0xff]  }
 0x7b2   :  { %13424 = vmatpush1.bf16.msra.mxu1 %v19277_v3  ;;  %v19349_v3 = vld [vmem:[#allocation8 + $0x820] ss:$28 sps:$4 sm:$0xff]  }
 0x7b3   :  { %13425 = vmatprep.subr.bf16.mxu1 %v19282_v22  ;;  %v19354_v22 = vld [vmem:[#allocation8 + $0x85c] ss:$28 sps:$4 sm:$0xff]  }
 0x7b6   :  { %13426 = vmatpush1.bf16.msra.mxu1 %v19280_v36  ;;  %v19352_v36 = vld [vmem:[#allocation8 + $0x858] ss:$28 sps:$4 sm:$0xff]  }
 0x7b7   :  { %13427 = vmatprep.subr.bf16.mxu1 %v19285_v61  ;;  %v19357_v61 = vld [vmem:[#allocation8 + $0x894] ss:$28 sps:$4 sm:$0xff]  }
 0x7ba   :  { %13428 = vmatpush1.bf16.msra.mxu1 %v19283_v40  ;;  %v19355_v40 = vld [vmem:[#allocation8 + $0x890] ss:$28 sps:$4 sm:$0xff]  }
 0x7bb   :  { %13438 = vmatprep.subr.bf16.mxu1 %v19288_v4  ;;  %v19360_v4 = vld [vmem:[#allocation8 + $0x8cc] ss:$28 sps:$4 sm:$0xff]  }
 0x7bd   :  { %13430 = vmatmul.mubr.bf16.vlgmr.msra.gmra.mrb[56].mxu1 %v20114_v33 }
 0x7be   :  { %13439 = vmatpush1.bf16.msra.mxu1 %v19286_v5  ;;  %13470 = vmatprep.mubr.bf16.mxu1 %v20116_v35  ;;  %v19358_v5 = vld [vmem:[#allocation8 + $0x8c8] ss:$28 sps:$4 sm:$0xff]  }
 0x7bf   :  { %13440 = vmatprep.subr.bf16.mxu1 %v19291_v8  ;;  %v19363_v8 = vld [vmem:[#allocation8 + $0x904] ss:$28 sps:$4 sm:$0xff]  }
 0x7c2   :  { %13441 = vmatpush1.bf16.msra.mxu1 %v19289_v14  ;;  %v19361_v14 = vld [vmem:[#allocation8 + $0x900] ss:$28 sps:$4 sm:$0xff]  }
 0x7c3   :  { %13442 = vmatprep.subr.bf16.mxu1 %v19294_v24  ;;  %v19366_v24 = vld [vmem:[#allocation8 + $0x93c] ss:$28 sps:$4 sm:$0xff]  }
 0x7c6   :  { %13443 = vmatpush1.bf16.msra.mxu1 %v19292_v11  ;;  %v19364_v11 = vld [vmem:[#allocation8 + $0x938] ss:$28 sps:$4 sm:$0xff]  }
 0x7c7   :  { %13444 = vmatprep.subr.bf16.mxu1 %v19297_v49  ;;  %v19369_v49 = vld [vmem:[#allocation8 + $0x974] ss:$28 sps:$4 sm:$0xff]  }
 0x7ca   :  { %13445 = vmatpush1.bf16.msra.mxu1 %v19295_v15  ;;  %v19367_v15 = vld [vmem:[#allocation8 + $0x970] ss:$28 sps:$4 sm:$0xff]  }
 0x7cb   :  { %13446 = vmatprep.subr.bf16.mxu1 %v19300_v55  ;;  %v19372_v55 = vld [vmem:[#allocation8 + $0x9ac] ss:$28 sps:$4 sm:$0xff]  }
 0x7ce   :  { %13447 = vmatpush1.bf16.msra.mxu1 %v19298_v60  ;;  %v19370_v60 = vld [vmem:[#allocation8 + $0x9a8] ss:$28 sps:$4 sm:$0xff]  }
 0x7cf   :  { %13448 = vmatprep.subr.bf16.mxu1 %v19303_v56  ;;  %v19375_v56 = vld [vmem:[#allocation8 + $0x9e4] ss:$28 sps:$4 sm:$0xff]  }
 0x7d2   :  { %13449 = vmatpush1.bf16.msra.mxu1 %v19301_v47  ;;  %v19373_v47 = vld [vmem:[#allocation8 + $0x9e0] ss:$28 sps:$4 sm:$0xff]  }
 0x7d3   :  { %13450 = vmatprep.subr.bf16.mxu1 %v19306_v2  ;;  %v19378_v2 = vld [vmem:[#allocation8 + $0xa1c] ss:$28 sps:$4 sm:$0xff]  }
 0x7d6   :  { %13451 = vmatpush1.bf16.msra.mxu1 %v19304_v37  ;;  %v19376_v37 = vld [vmem:[#allocation8 + $0xa18] ss:$28 sps:$4 sm:$0xff]  }
 0x7d7   :  { %13452 = vmatprep.subr.bf16.mxu1 %v19309_v0  ;;  %v19381_v0 = vld [vmem:[#allocation8 + $0xa54] ss:$28 sps:$4 sm:$0xff]  }
 0x7da   :  { %13453 = vmatpush1.bf16.msra.mxu1 %v19307_v17  ;;  %v19379_v17 = vld [vmem:[#allocation8 + $0xa50] ss:$28 sps:$4 sm:$0xff]  }
 0x7db   :  { %13454 = vmatprep.subr.bf16.mxu1 %v19312_v19  ;;  %v19384_v19 = vld [vmem:[#allocation8 + $0xa8c] ss:$28 sps:$4 sm:$0xff]  }
 0x7de   :  { %13455 = vmatpush1.bf16.msra.mxu1 %v19310_v34  ;;  %v19382_v34 = vld [vmem:[#allocation8 + $0xa88] ss:$28 sps:$4 sm:$0xff]  }
 0x7df   :  { %13456 = vmatprep.subr.bf16.mxu1 %v19315_v59  ;;  %v19387_v59 = vld [vmem:[#allocation8 + $0xac4] ss:$28 sps:$4 sm:$0xff]  }
 0x7e2   :  { %13457 = vmatpush1.bf16.msra.mxu1 %v19313_v27  ;;  %v19385_v27 = vld [vmem:[#allocation8 + $0xac0] ss:$28 sps:$4 sm:$0xff]  }
 0x7e3   :  { %13458 = vmatprep.subr.bf16.mxu1 %v19318_v23  ;;  %v19390_v23 = vld [vmem:[#allocation8 + $0xafc] ss:$28 sps:$4 sm:$0xff]  }
 0x7e6   :  { %13459 = vmatpush1.bf16.msra.mxu1 %v19316_v28  ;;  %v19388_v28 = vld [vmem:[#allocation8 + $0xaf8] ss:$28 sps:$4 sm:$0xff]  }
 0x7e7   :  { %13460 = vmatprep.subr.bf16.mxu1 %v19321_v21  ;;  %v19393_v21 = vld [vmem:[#allocation8 + $0xb34] ss:$28 sps:$4 sm:$0xff]  }
 0x7ea   :  { %13461 = vmatpush1.bf16.msra.mxu1 %v19319_v51  ;;  %v19391_v51 = vld [vmem:[#allocation8 + $0xb30] ss:$28 sps:$4 sm:$0xff]  }
 0x7eb   :  { %13462 = vmatprep.subr.bf16.mxu1 %v19324_v63  ;;  %v19396_v63 = vld [vmem:[#allocation8 + $0xb6c] ss:$28 sps:$4 sm:$0xff]  }
 0x7ee   :  { %13463 = vmatpush1.bf16.msra.mxu1 %v19322_v41  ;;  %v19394_v41 = vld [vmem:[#allocation8 + $0xb68] ss:$28 sps:$4 sm:$0xff]  }
 0x7ef   :  { %13464 = vmatprep.subr.bf16.mxu1 %v19327_v38  ;;  %v19399_v38 = vld [vmem:[#allocation8 + $0xba4] ss:$28 sps:$4 sm:$0xff]  }
 0x7f2   :  { %13465 = vmatpush1.bf16.msra.mxu1 %v19325_v9  ;;  %v19397_v9 = vld [vmem:[#allocation8 + $0xba0] ss:$28 sps:$4 sm:$0xff]  }
 0x7f3   :  { %13466 = vmatprep.subr.bf16.mxu1 %v19330_v10  ;;  %v19402_v10 = vld [vmem:[#allocation8 + $0xbdc] ss:$28 sps:$4 sm:$0xff]  }
 0x7f6   :  { %13467 = vmatpush1.bf16.msra.mxu1 %v19328_v7 }
 0x7f7   :  { %13468 = vmatprep.subr.bf16.mxu1 %v19333_v18 }
 0x7fa   :  { %13469 = vmatpush1.bf16.msra.mxu1 %v19331_v45 }
 0x7fb   :  { %13479 = vmatprep.subr.bf16.mxu1 %v19336_v50 }
 0x7fd   :  { %13471 = vmatmul.mubr.bf16.vlgmr.msra.gmra.mrb[56].mxu1 %v20131_v30 }
 0x7fe   :  { %13480 = vmatpush1.bf16.msra.mxu1 %v19334_v57  ;;  %13511 = vmatprep.mubr.bf16.mxu1 %v20155_v16 }
 0x7ff   :  { %13481 = vmatprep.subr.bf16.mxu1 %v19339_v46  ;;  %v19400_v46 = vld [vmem:[#allocation8 + $0xbd8] ss:$28 sps:$4 sm:$0xff]  }
 0x802   :  { %13482 = vmatpush1.bf16.msra.mxu1 %v19337_v48 }
 0x803   :  { %13483 = vmatprep.subr.bf16.mxu1 %v19342_v13 }
 0x806   :  { %13484 = vmatpush1.bf16.msra.mxu1 %v19340_v44  ;;  %v19405_v44 = vld [vmem:[#allocation8 + $0xc14] ss:$28 sps:$4 sm:$0xff]  }
 0x807   :  { %13485 = vmatprep.subr.bf16.mxu1 %v19345_v32  ;;  %v19403_v32 = vld [vmem:[#allocation8 + $0xc10] ss:$28 sps:$4 sm:$0xff]  }
 0x80a   :  { %13486 = vmatpush1.bf16.msra.mxu1 %v19343_v52  ;;  %v19406_v52 = vld [vmem:[#allocation8 + $0x1d8] ss:$28 sps:$4 sm:$0xff]  }
 0x80b   :  { %13487 = vmatprep.subr.bf16.mxu1 %v19348_v53  ;;  %v19407_v53 = vld [vmem:[#allocation8 + $0x18] ss:$28 sps:$4 sm:$0xff]  }
 0x80e   :  { %13488 = vmatpush1.bf16.msra.mxu1 %v19346_v6  ;;  %v19408_v6 = vld [vmem:[#allocation8 + $0x210] ss:$28 sps:$4 sm:$0xff]  }
 0x80f   :  { %13489 = vmatprep.subr.bf16.mxu1 %v19351_v1  ;;  %v19409_v1 = vld [vmem:[#allocation8 + $0x50] ss:$28 sps:$4 sm:$0xff]  }
 0x812   :  { %13490 = vmatpush1.bf16.msra.mxu1 %v19349_v3  ;;  %v19410_v3 = vld [vmem:[#allocation8 + $0x248] ss:$28 sps:$4 sm:$0xff]  }
 0x813   :  { %13491 = vmatprep.subr.bf16.mxu1 %v19354_v22  ;;  %v19411_v22 = vld [vmem:[#allocation8 + $0x88] ss:$28 sps:$4 sm:$0xff]  }
 0x816   :  { %13492 = vmatpush1.bf16.msra.mxu1 %v19352_v36  ;;  %v19412_v36 = vld [vmem:[#allocation8 + $0x280] ss:$28 sps:$4 sm:$0xff]  }
 0x817   :  { %13493 = vmatprep.subr.bf16.mxu1 %v19357_v61  ;;  %v19413_v61 = vld [vmem:[#allocation8 + $0xc0] ss:$28 sps:$4 sm:$0xff]  }
 0x81a   :  { %13494 = vmatpush1.bf16.msra.mxu1 %v19355_v40  ;;  %v19414_v40 = vld [vmem:[#allocation8 + $0x2b8] ss:$28 sps:$4 sm:$0xff]  }
 0x81b   :  { %13495 = vmatprep.subr.bf16.mxu1 %v19360_v4  ;;  %v19415_v4 = vld [vmem:[#allocation8 + $0xf8] ss:$28 sps:$4 sm:$0xff]  }
 0x81e   :  { %13496 = vmatpush1.bf16.msra.mxu1 %v19358_v5  ;;  %v19416_v5 = vld [vmem:[#allocation8 + $0x2f0] ss:$28 sps:$4 sm:$0xff]  }
 0x81f   :  { %13497 = vmatprep.subr.bf16.mxu1 %v19363_v8  ;;  %v19417_v8 = vld [vmem:[#allocation8 + $0x130] ss:$28 sps:$4 sm:$0xff]  }
 0x822   :  { %13498 = vmatpush1.bf16.msra.mxu1 %v19361_v14  ;;  %v19418_v14 = vld [vmem:[#allocation8 + $0x328] ss:$28 sps:$4 sm:$0xff]  }
 0x823   :  { %13499 = vmatprep.subr.bf16.mxu1 %v19366_v24  ;;  %v19420_v24 = vld [vmem:[#allocation8 + $0x360] ss:$28 sps:$4 sm:$0xff]  }
 0x826   :  { %13500 = vmatpush1.bf16.msra.mxu1 %v19364_v11  ;;  %v19421_v11 = vld [vmem:[#allocation8 + $0x1a0] ss:$28 sps:$4 sm:$0xff]  }
 0x827   :  { %13501 = vmatprep.subr.bf16.mxu1 %v19369_v49  ;;  %v19422_v49 = vld [vmem:[#allocation8 + $0x558] ss:$28 sps:$4 sm:$0xff]  }
 0x82a   :  { %13502 = vmatpush1.bf16.msra.mxu1 %v19367_v15  ;;  %v19423_v15 = vld [vmem:[#allocation8 + $0x398] ss:$28 sps:$4 sm:$0xff]  }
 0x82b   :  { %13503 = vmatprep.subr.bf16.mxu1 %v19372_v55  ;;  %v19424_v55 = vld [vmem:[#allocation8 + $0x590] ss:$28 sps:$4 sm:$0xff]  }
 0x82e   :  { %13504 = vmatpush1.bf16.msra.mxu1 %v19370_v60  ;;  %v19425_v60 = vld [vmem:[#allocation8 + $0x3d0] ss:$28 sps:$4 sm:$0xff]  }
 0x82f   :  { %13505 = vmatprep.subr.bf16.mxu1 %v19375_v56  ;;  %v19426_v56 = vld [vmem:[#allocation8 + $0x5c8] ss:$28 sps:$4 sm:$0xff]  }
 0x832   :  { %13506 = vmatpush1.bf16.msra.mxu1 %v19373_v47  ;;  %v19427_v47 = vld [vmem:[#allocation8 + $0x408] ss:$28 sps:$4 sm:$0xff]  }
 0x833   :  { %13507 = vmatprep.subr.bf16.mxu1 %v19378_v2  ;;  %v19428_v2 = vld [vmem:[#allocation8 + $0x600] ss:$28 sps:$4 sm:$0xff]  }
 0x836   :  { %13508 = vmatpush1.bf16.msra.mxu1 %v19376_v37  ;;  %v19429_v37 = vld [vmem:[#allocation8 + $0x440] ss:$28 sps:$4 sm:$0xff]  }
 0x837   :  { %13509 = vmatprep.subr.bf16.mxu1 %v19381_v0  ;;  %v19430_v0 = vld [vmem:[#allocation8 + $0x638] ss:$28 sps:$4 sm:$0xff]  }
 0x83a   :  { %13510 = vmatpush1.bf16.msra.mxu1 %v19379_v17  ;;  %v19431_v17 = vld [vmem:[#allocation8 + $0x478] ss:$28 sps:$4 sm:$0xff]  }
 0x83b   :  { %13520 = vmatprep.subr.bf16.mxu1 %v19384_v19  ;;  %v19432_v19 = vld [vmem:[#allocation8 + $0x670] ss:$28 sps:$4 sm:$0xff]  }
 0x83d   :  { %13512 = vmatmul.mubr.bf16.vlgmr.msra.gmra.mrb[56].mxu1 %v20157_v29 }
 0x83e   :  { %13521 = vmatpush1.bf16.msra.mxu1 %v19382_v34  ;;  %13552 = vmatprep.mubr.bf16.mxu1 %v19717_v20  ;;  %v19434_v34 = vld [vmem:[#allocation8 + $0x6a8] ss:$28 sps:$4 sm:$0xff]  }
 0x83f   :  { %13522 = vmatprep.subr.bf16.mxu1 %v19387_v59  ;;  %v19436_v59 = vld [vmem:[#allocation8 + $0x6e0] ss:$28 sps:$4 sm:$0xff]  }
 0x842   :  { %13523 = vmatpush1.bf16.msra.mxu1 %v19385_v27  ;;  %v19437_v27 = vld [vmem:[#allocation8 + $0x520] ss:$28 sps:$4 sm:$0xff]  }
 0x843   :  { %13524 = vmatprep.subr.bf16.mxu1 %v19390_v23  ;;  %v19492_v23 = vld [vmem:[#allocation11 + $0xc0] sm:$0xff]  }
 0x844   :  { %16687 = vmatprep.subr.bf16.mxu0 %v19492_v23  ;;  %v19469_v23 = vld [vmem:[#allocation11 + $0x18] sm:$0xff]  }
 0x846   :  { %13525 = vmatpush1.bf16.msra.mxu1 %v19388_v28  ;;  %v19438_v28 = vld [vmem:[#allocation8 + $0x8d8] ss:$28 sps:$4 sm:$0xff]  }
 0x847   :  { %13526 = vmatprep.subr.bf16.mxu1 %v19393_v21  ;;  %v19494_v21 = vld [vmem:[#allocation11 + $0x80] sm:$0xff]  }
 0x848   :  { %16688 = vmatpush3.bf16.msra.mxu0 %v19494_v21  ;;  %v19471_v21 = vld [vmem:[#allocation11 + $0x20] sm:$0xff]  }
 0x84a   :  { %13527 = vmatpush1.bf16.msra.mxu1 %v19391_v51  ;;  %v19439_v51 = vld [vmem:[#allocation8 + $0x718] ss:$28 sps:$4 sm:$0xff]  }
 0x84b   :  { %13528 = vmatprep.subr.bf16.mxu1 %v19396_v63  ;;  %v19496_v63 = vld [vmem:[#allocation11 + $0xc8] sm:$0xff]  }
 0x84c   :  { %16689 = vmatprep.subr.bf16.mxu0 %v19496_v63  ;;  %v19473_v63 = vld [vmem:[#allocation11 + $0x28] sm:$0xff]  }
 0x84e   :  { %13529 = vmatpush1.bf16.msra.mxu1 %v19394_v41  ;;  %v19440_v41 = vld [vmem:[#allocation8 + $0x910] ss:$28 sps:$4 sm:$0xff]  }
 0x84f   :  { %13530 = vmatprep.subr.bf16.mxu1 %v19399_v38  ;;  %v19497_v38 = vld [vmem:[#allocation11 + $0x88] sm:$0xff]  }
 0x850   :  { %v20177_v7 = vpop.f32.mrb[52].mxu1  ;;  %v20179_v20 = vpop.f32.mrb[8].mxu0  ;;  %16690 = vmatpush3.bf16.msra.mxu0 %v19497_v38 }
 0x851   :  { %v20181_v18 = vpop.f32.mrb[53].mxu1  ;;  %v20183_v45 = vpop.f32.mrb[9].mxu0 }
 0x852   :  { %v13394_v50 = vpop.f32.mrb[54].mxu1  ;;  %13531 = vmatpush1.bf16.msra.mxu1 %v19397_v9  ;;  %v13722_v57 = vpop.f32.mrb[10].mxu0  ;;  %v19498_v9 = vld [vmem:[#allocation11 + $0xd0] sm:$0xff]  }
 0x853   :  { %v13395_v48 = vpop.f32.mrb[55].mxu1  ;;  %v13723_v13 = vpop.f32.mrb[11].mxu0  ;;  %13532 = vmatprep.subr.bf16.mxu1 %v19402_v10  ;;  %v19441_v10 = vld [vmem:[#allocation8 + $0x750] ss:$28 sps:$4 sm:$0xff]   ;;  %v19442_v50 = vld [vmem:[#allocation8 + $0x948] ss:$28 sps:$4 sm:$0xff]   ;;  %16691 = vmatprep.subr.bf16.mxu0 %v19498_v9 }
 0x854   :  { %v19499_v57 = vld [vmem:[#allocation11 + $0x90] sm:$0xff]   ;;  %v19443_v48 = vld [vmem:[#allocation8 + $0x788] ss:$28 sps:$4 sm:$0xff]  }
 0x855   :  { %v19444_v13 = vld [vmem:[#allocation8 + $0x980] ss:$28 sps:$4 sm:$0xff]   ;;  %16692 = vmatpush3.bf16.msra.mxu0 %v19499_v57 }
 0x856   :  { %13533 = vmatpush1.bf16.msra.mxu1 %v19400_v46  ;;  %v19500_v46 = vld [vmem:[#allocation11 + $0xd8] sm:$0xff]   ;;  %v19475_v9 = vld [vmem:[#allocation11 + $0x30] sm:$0xff]  }
 0x857   :  { %13534 = vmatprep.subr.bf16.mxu1 %v19405_v44  ;;  %v19501_v44 = vld [vmem:[#allocation11 + $0x98] sm:$0xff]   ;;  %16693 = vmatprep.subr.bf16.mxu0 %v19500_v46 }
 0x858   :  { %v19477_v46 = vld [vmem:[#allocation11 + $0x38] sm:$0xff]  }
 0x859   :  { %16694 = vmatpush3.bf16.msra.mxu0 %v19501_v44  ;;  %v19479_v44 = vld [vmem:[#allocation11 + $0x100] sm:$0xff]  }
 0x85a   :  { %13535 = vmatpush1.bf16.msra.mxu1 %v19403_v32  ;;  %v19502_v32 = vld [vmem:[#allocation11 + $0xe0] sm:$0xff]  }
 0x85b   :  { %16590 = vmatprep.subr.bf16.mxu1 %v19406_v52  ;;  %v19446_v52 = vld [vmem:[#allocation8 + $0x9b8] ss:$28 sps:$4 sm:$0xff]   ;;  %16695 = vmatprep.subr.bf16.mxu0 %v19502_v32 }
 0x85d   :  { %13553 = vmatmul.mubr.bf16.vlgmr.msra.gmra.mrb[56].mxu1 %v20166_v25 }
 0x85e   :  { %16591 = vmatpush3.bf16.msra.mxu1 %v19407_v53  ;;  %13757 = vmatprep.mubr.bf16.mxu1 %v20098_v12  ;;  %v19419_v12 = vld [vmem:[#allocation8 + $0x168] ss:$28 sps:$4 sm:$0xff]   ;;  %v19504_v53 = vld [vmem:[#allocation11 + $0xe8] sm:$0xff]  }
 0x85f   :  { %16592 = vmatprep.subr.bf16.mxu1 %v19408_v6  ;;  %v19447_v6 = vld [vmem:[#allocation8 + $0x7f8] ss:$28 sps:$4 sm:$0xff]  }
 0x862   :  { %16593 = vmatpush3.bf16.msra.mxu1 %v19409_v1  ;;  %v19448_v1 = vld [vmem:[#allocation8 + $0x9f0] ss:$28 sps:$4 sm:$0xff]  }
 0x863   :  { %16594 = vmatprep.subr.bf16.mxu1 %v19410_v3  ;;  %v19505_v3 = vld [vmem:[#allocation11 + $0xa8] sm:$0xff]  }
 0x866   :  { %16595 = vmatpush3.bf16.msra.mxu1 %v19411_v22  ;;  %v19449_v22 = vld [vmem:[#allocation8 + $0x830] ss:$28 sps:$4 sm:$0xff]  }
 0x867   :  { %16596 = vmatprep.subr.bf16.mxu1 %v19412_v36  ;;  %v19450_v36 = vld [vmem:[#allocation8 + $0xa28] ss:$28 sps:$4 sm:$0xff]  }
 0x86a   :  { %16597 = vmatpush3.bf16.msra.mxu1 %v19413_v61  ;;  %v19506_v61 = vld [vmem:[#allocation11 + $0xf0] sm:$0xff]  }
 0x86b   :  { %16598 = vmatprep.subr.bf16.mxu1 %v19414_v40  ;;  %v19507_v40 = vld [vmem:[#allocation11 + $0xb0] sm:$0xff]  }
 0x86e   :  { %16599 = vmatpush3.bf16.msra.mxu1 %v19415_v4  ;;  %v19451_v4 = vld [vmem:[#allocation8 + $0x868] ss:$28 sps:$4 sm:$0xff]  }
 0x86f   :  { %16600 = vmatprep.subr.bf16.mxu1 %v19416_v5  ;;  %v19452_v5 = vld [vmem:[#allocation8 + $0xa60] ss:$28 sps:$4 sm:$0xff]  }
 0x872   :  { %16601 = vmatpush3.bf16.msra.mxu1 %v19417_v8  ;;  %v19508_v8 = vld [vmem:[#allocation11 + $0xf8] sm:$0xff]  }
 0x873   :  { %16602 = vmatprep.subr.bf16.mxu1 %v19418_v14  ;;  %v19509_v14 = vld [vmem:[#allocation11 + $0xb8] sm:$0xff]  }
 0x876   :  { %16603 = vmatpush3.bf16.msra.mxu1 %v19419_v12  ;;  %v19453_v12 = vld [vmem:[#allocation8 + $0x8a0] ss:$28 sps:$4 sm:$0xff]  }
 0x877   :  { %16604 = vmatprep.subr.bf16.mxu1 %v19420_v24  ;;  %v19718_v24 = vmov 0.0  }
 0x87a   :  { %16605 = vmatpush3.bf16.msra.mxu1 %v19421_v11  ;;  %v19454_v11 = vld [vmem:[#allocation8 + $0xa98] ss:$28 sps:$4 sm:$0xff]  }
 0x87b   :  { %16612 = vmatprep.subr.bf16.mxu1 %v19422_v49  ;;  %v19455_v49 = vld [vmem:[#allocation8 + $0xad0] ss:$28 sps:$4 sm:$0xff]  }
 0x87d   :  { %13758 = vmatmul.mubr.bf16.vlgmr.msra.gmra.mrb[60].mxu1 %v20114_v33  ;;  %v19433_v33 = vld [vmem:[#allocation8 + $0x4b0] ss:$28 sps:$4 sm:$0xff]  }
 0x87e   :  { %16613 = vmatpush3.bf16.msra.mxu1 %v19423_v15  ;;  %13797 = vmatprep.mubr.bf16.mxu1 %v20116_v35  ;;  %v19435_v35 = vld [vmem:[#allocation8 + $0x4e8] ss:$28 sps:$4 sm:$0xff]  }
 0x87f   :  { %16614 = vmatprep.subr.bf16.mxu1 %v19424_v55  ;;  %v19456_v15 = vld [vmem:[#allocation8 + $0xb08] ss:$28 sps:$4 sm:$0xff]   ;;  %v19457_v55 = vld [vmem:[#allocation8 + $0xb40] ss:$28 sps:$4 sm:$0xff]  }
 0x882   :  { %16615 = vmatpush3.bf16.msra.mxu1 %v19425_v60  ;;  %v19458_v60 = vld [vmem:[#allocation8 + $0xb78] ss:$28 sps:$4 sm:$0xff]  }
 0x883   :  { %16616 = vmatprep.subr.bf16.mxu1 %v19426_v56  ;;  %v19459_v56 = vld [vmem:[#allocation8 + $0xbb0] ss:$28 sps:$4 sm:$0xff]  }
 0x886   :  { %16617 = vmatpush3.bf16.msra.mxu1 %v19427_v47 }
 0x887   :  { %16618 = vmatprep.subr.bf16.mxu1 %v19428_v2  ;;  %v19460_v2 = vld [vmem:[#allocation8 + $0xbe8] ss:$28 sps:$4 sm:$0xff]  }
 0x88a   :  { %16619 = vmatpush3.bf16.msra.mxu1 %v19429_v37 }
 0x88b   :  { %16620 = vmatprep.subr.bf16.mxu1 %v19430_v0  ;;  %v19461_v0 = vld [vmem:[#allocation8 + $0xc20] ss:$28 sps:$4 sm:$0xff]  }
 0x88e   :  { %16621 = vmatpush3.bf16.msra.mxu1 %v19431_v17  ;;  %v19462_v17 = vld [vmem:[#allocation11 + $0x40] sm:$0xff]  }
 0x88f   :  { %16622 = vmatprep.subr.bf16.mxu1 %v19432_v19 }
 0x892   :  { %16623 = vmatpush3.bf16.msra.mxu1 %v19433_v33  ;;  %v19463_v33 = vld [vmem:[#allocation11] sm:$0xff]  }
 0x893   :  { %16624 = vmatprep.subr.bf16.mxu1 %v19434_v34  ;;  %v19464_v34 = vld [vmem:[#allocation11 + $0x48] sm:$0xff]  }
 0x896   :  { %16625 = vmatpush3.bf16.msra.mxu1 %v19435_v35 }
 0x897   :  { %16626 = vmatprep.subr.bf16.mxu1 %v19436_v59  ;;  %v19466_v59 = vld [vmem:[#allocation11 + $0x50] sm:$0xff]  }
 0x89a   :  { %16627 = vmatpush3.bf16.msra.mxu1 %v19437_v27  ;;  %v19468_v27 = vld [vmem:[#allocation11 + $0x58] sm:$0xff]  }
 0x89b   :  { %16634 = vmatprep.subr.bf16.mxu1 %v19438_v28  ;;  %v19470_v28 = vld [vmem:[#allocation11 + $0x60] sm:$0xff]  }
 0x89d   :  { %13798 = vmatmul.mubr.bf16.vlgmr.msra.gmra.mrb[64].mxu1 %v20131_v30  ;;  %v19445_v30 = vld [vmem:[#allocation8 + $0x7c0] ss:$28 sps:$4 sm:$0xff]  }
 0x89e   :  { %16635 = vmatpush3.bf16.msra.mxu1 %v19439_v51  ;;  %13837 = vmatprep.mubr.bf16.mxu1 %v20155_v16  ;;  %v19503_v16 = vld [vmem:[#allocation11 + $0xa0] sm:$0xff]   ;;  %v19472_v51 = vld [vmem:[#allocation11 + $0x68] sm:$0xff]  }
 0x89f   :  { %16636 = vmatprep.subr.bf16.mxu1 %v19440_v41  ;;  %16696 = vmatpush3.bf16.msra.mxu0 %v19503_v16  ;;  %v19474_v41 = vld [vmem:[#allocation11 + $0x70] sm:$0xff]   ;;  %v19484_v16 = vld [vmem:[#allocation11 + $0x158] sm:$0xff]  }
 0x8a0   :  { %16697 = vmatprep.subr.bf16.mxu0 %v19504_v53  ;;  %v19485_v53 = vld [vmem:[#allocation11 + $0x118] sm:$0xff]  }
 0x8a2   :  { %16637 = vmatpush3.bf16.msra.mxu1 %v19441_v10 }
 0x8a3   :  { %16638 = vmatprep.subr.bf16.mxu1 %v19442_v50  ;;  %16698 = vmatpush3.bf16.msra.mxu0 %v19505_v3  ;;  %v19476_v50 = vld [vmem:[#allocation11 + $0x78] sm:$0xff]   ;;  %v19488_v3 = vld [vmem:[#allocation11 + $0x168] sm:$0xff]  }
 0x8a4   :  { %16699 = vmatprep.subr.bf16.mxu0 %v19506_v61  ;;  %v19490_v61 = vld [vmem:[#allocation11 + $0x170] sm:$0xff]  }
 0x8a6   :  { %16639 = vmatpush3.bf16.msra.mxu1 %v19443_v48 }
 0x8a7   :  { %16640 = vmatprep.subr.bf16.mxu1 %v19444_v13  ;;  %16700 = vmatpush3.bf16.msra.mxu0 %v19507_v40  ;;  %v19478_v13 = vld [vmem:[#allocation11 + $0x140] sm:$0xff]   ;;  %v19491_v40 = vld [vmem:[#allocation11 + $0x130] sm:$0xff]  }
 0x8a8   :  { %16701 = vmatprep.subr.bf16.mxu0 %v19508_v8  ;;  %v19495_v8 = vld [vmem:[#allocation11 + $0x138] sm:$0xff]  }
 0x8aa   :  { %16641 = vmatpush3.bf16.msra.mxu1 %v19445_v30  ;;  %v19480_v30 = vld [vmem:[#allocation11 + $0x148] sm:$0xff]  }
 0x8ab   :  { %16642 = vmatprep.subr.bf16.mxu1 %v19446_v52  ;;  %16702 = vmatpush3.bf16.msra.mxu0 %v19509_v14  ;;  %v19482_v52 = vld [vmem:[#allocation11 + $0x150] sm:$0xff]  }
 0x8ac   :  { %16760 = vmatprep.subr.bf16.mxu0 %v19718_v24 }
 0x8ae   :  { %16643 = vmatpush3.bf16.msra.mxu1 %v19447_v6  ;;  %v19486_v6 = vld [vmem:[#allocation11 + $0x160] sm:$0xff]  }
 0x8af   :  { %16644 = vmatprep.subr.bf16.mxu1 %v19448_v1  ;;  %v19487_v1 = vld [vmem:[#allocation11 + $0x120] sm:$0xff]  }
 0x8b2   :  { %16645 = vmatpush3.bf16.msra.mxu1 %v19449_v22  ;;  %v19489_v22 = vld [vmem:[#allocation11 + $0x128] sm:$0xff]  }
 0x8b3   :  { %16646 = vmatprep.subr.bf16.mxu1 %v19450_v36 }
 0x8b6   :  { %16647 = vmatpush3.bf16.msra.mxu1 %v19451_v4 }
 0x8b7   :  { %16648 = vmatprep.subr.bf16.mxu1 %v19452_v5  ;;  %v19493_v5 = vld [vmem:[#allocation11 + $0x178] sm:$0xff]  }
 0x8ba   :  { %16649 = vmatpush3.bf16.msra.mxu1 %v19453_v12 }
 0x8bb   :  { %16740 = vmatprep.subr.bf16.mxu1 %v19718_v24 }
 0x8bd   :  { %13838 = vmatmul.mubr.bf16.vlgmr.msra.gmra.mrb[68].mxu1 %v20157_v29  ;;  %v20200_v29 = vld [vmem:[#allocation10] sm:$0xff] }
 0x8be   :  { %16741 = vmatpush3.bf16.msra.mxu1 %v19454_v11  ;;  %16756 = vmatprep.mubr.msk.bf16.mxu1 %vm19719_vm0, %v19718_v24  ;;  %v11189_v47 = vrot.slane %v20200_v29, %v1821_v39  ;;  %v19465_v39 = vld [vmem:[#allocation11 + $0x8] sm:$0xff]   ;;  %v11205_v38 = vrot.slane %v20200_v29, %v1837_v58  ;;  %v11201_v36 = vrot.slane %v20200_v29, %v1833_v31 }
 0x8bf   :  { %16742 = vmatprep.subr.bf16.mxu1 %v19718_v24  ;;  %v11193_v11 = vrot.slane %v20200_v29, %v1825_v26  ;;  %v11197_v31 = vrot.slane %v20200_v29, %v1829_v42  ;;  %v19512_v42 = vld [vmem:[#allocation11 + $0x190] sm:$0xff]   ;;  %v19513_v26 = vld [vmem:[#allocation11 + $0x198] sm:$0xff]  }
 0x8c0   :  { %v16787_v37 = vadd.f32 %v20181_v18, %v11189_v47  ;;  %v19467_v18 = vld [vmem:[#allocation11 + $0x10] sm:$0xff]   ;;  %v16791_v57 = vadd.f32 %v20183_v45, %v11205_v38  ;;  %v16790_v4 = vadd.f32 %v20179_v20, %v11201_v36  ;;  %v16269_v36 = vld [vmem:[#allocation13] ss:$0 sm:$0xff] }
 0x8c1   :  { %v19483_v45 = vld [vmem:[#allocation11 + $0x110] sm:$0xff]  }
 0x8c2   :  { %16743 = vmatpush3.bf16.msra.mxu1 %v19455_v49  ;;  %v13886_v19 = vmax.f32 %v16787_v37, 0.0  ;;  %v13889_v14 = vmax.f32 %v16790_v4, 0.0 }
 0x8c3   :  { %16744 = vmatprep.subr.bf16.mxu1 %v19718_v24 }
 0x8c4   :  { %v13893_v35 = vpack.c.bf16 %v13886_v19, %v13886_v19  ;;  %v13896_v12 = vpack.c.bf16 %v13889_v14, %v13889_v14  ;;  %v19511_v19 = vld [vmem:[#allocation11 + $0x188] sm:$0xff]  }
 0x8c6   :  { %16745 = vmatpush3.bf16.msra.mxu1 %v19456_v15 }
 0x8c7   :  { %16746 = vmatprep.subr.bf16.mxu1 %v19718_v24 }
 0x8ca   :  { %16747 = vmatpush3.bf16.msra.mxu1 %v19457_v55 }
 0x8cb   :  { %16748 = vmatprep.subr.bf16.mxu1 %v19718_v24 }
 0x8ce   :  { %16749 = vmatpush3.bf16.msra.mxu1 %v19458_v60 }
 0x8cf   :  { %16750 = vmatprep.subr.bf16.mxu1 %v19718_v24 }
 0x8d2   :  { %16751 = vmatpush3.bf16.msra.mxu1 %v19459_v56 }
 0x8d3   :  { %16752 = vmatprep.subr.bf16.mxu1 %v19718_v24 }
 0x8d6   :  { %16753 = vmatpush3.bf16.msra.mxu1 %v19460_v2 }
 0x8d7   :  { %16754 = vmatprep.subr.bf16.mxu1 %v19718_v24 }
 0x8da   :  { %16755 = vmatpush3.bf16.msra.mxu1 %v19461_v0  ;;  %v19510_v0 = vld [vmem:[#allocation11 + $0x180] sm:$0xff]  }
 0x8db   :  { %16665 = vmatprep.subr.bf16.mxu1 %v19462_v17 }
 0x8dd   :  { %16757 = vmatmul.mubr.bf16.vlgmr.msra.gmra.mrb[72].mxu1 %v20166_v25  ;;  %v11185_v25 = vrot.slane %v20200_v29, %v1817_v62  ;;  %v13890_v62 = vmax.f32 %v16791_v57, 0.0 }
 0x8de   :  { %16666 = vmatpush3.bf16.msra.mxu1 %v19463_v33  ;;  %14386 = vmatprep.mubr.bf16.mxu1 %v13893_v35  ;;  %v19514_v33 = vld [vmem:[#allocation11 + $0x1a0] sm:$0xff]   ;;  %v19516_v35 = vld [vmem:[#allocation11 + $0x1b0] sm:$0xff]  }
 0x8df   :  { %16667 = vmatprep.subr.bf16.mxu1 %v19464_v34  ;;  %v16786_v10 = vadd.f32 %v20177_v7, %v11185_v25  ;;  %v13897_v58 = vpack.c.bf16 %v13890_v62, %v13890_v62  ;;  %v19481_v7 = vld [vmem:[#allocation11 + $0x108] sm:$0xff]  }
 0x8e0   :  { %v19515_v34 = vld [vmem:[#allocation11 + $0x1a8] sm:$0xff]  }
 0x8e1   :  { %v13885_v48 = vmax.f32 %v16786_v10, 0.0 }
 0x8e2   :  { %16668 = vmatpush3.bf16.msra.mxu1 %v19465_v39 }
 0x8e3   :  { %16669 = vmatprep.subr.bf16.mxu1 %v19466_v59  ;;  %v13892_v32 = vpack.c.bf16 %v13885_v48, %v13885_v48 }
 0x8e6   :  { %16670 = vmatpush3.bf16.msra.mxu1 %v19467_v18 }
 0x8e7   :  { %16671 = vmatprep.subr.bf16.mxu1 %v19468_v27 }
 0x8ea   :  { %16672 = vmatpush3.bf16.msra.mxu1 %v19469_v23  ;;  %v19517_v23 = vld [vmem:[#allocation11 + $0x1b8] sm:$0xff]  }
 0x8eb   :  { %16673 = vmatprep.subr.bf16.mxu1 %v19470_v28 }
 0x8ee   :  { %16674 = vmatpush3.bf16.msra.mxu1 %v19471_v21  ;;  %v11209_v21 = vrot.slane %v20200_v29, %v1841_v54 }
 0x8ef   :  { %16675 = vmatprep.subr.bf16.mxu1 %v19472_v51 }
 0x8f2   :  { %16676 = vmatpush3.bf16.msra.mxu1 %v19473_v63 }
 0x8f3   :  { %16677 = vmatprep.subr.bf16.mxu1 %v19474_v41 }
 0x8f6   :  { %16678 = vmatpush3.bf16.msra.mxu1 %v19475_v9 }
 0x8f7   :  { %16679 = vmatprep.subr.bf16.mxu1 %v19476_v50 }
 0x8fa   :  { %16680 = vmatpush3.bf16.msra.mxu1 %v19477_v46 }
 0x8fb   :  { %16709 = vmatprep.subr.bf16.mxu1 %v19478_v13 }
 0x8fd   :  { %14387 = vmatmul.mubr.bf16.vlgmr.msra.gmra.mrb[76].mxu1 %v13892_v32 }
 0x8fe   :  { %16710 = vmatpush3.bf16.msra.mxu1 %v19479_v44  ;;  %14466 = vmatprep.mubr.bf16.mxu1 %v13897_v58 }
 0x8ff   :  { %16711 = vmatprep.subr.bf16.mxu1 %v19480_v30 }
 0x902   :  { %16712 = vmatpush3.bf16.msra.mxu1 %v19481_v7 }
 0x903   :  { %16713 = vmatprep.subr.bf16.mxu1 %v19482_v52 }
 0x906   :  { %16714 = vmatpush3.bf16.msra.mxu1 %v19483_v45 }
 0x907   :  { %16715 = vmatprep.subr.bf16.mxu1 %v19484_v16 }
 0x90a   :  { %16716 = vmatpush3.bf16.msra.mxu1 %v19485_v53 }
 0x90b   :  { %16717 = vmatprep.subr.bf16.mxu1 %v19486_v6 }
 0x90e   :  { %16718 = vmatpush3.bf16.msra.mxu1 %v19487_v1 }
 0x90f   :  { %16719 = vmatprep.subr.bf16.mxu1 %v19488_v3 }
 0x912   :  { %16720 = vmatpush3.bf16.msra.mxu1 %v19489_v22 }
 0x913   :  { %16721 = vmatprep.subr.bf16.mxu1 %v19490_v61 }
 0x916   :  { %16722 = vmatpush3.bf16.msra.mxu1 %v19491_v40 }
 0x917   :  { %16723 = vmatprep.subr.bf16.mxu1 %v19493_v5 }
 0x91a   :  { %16724 = vmatpush3.bf16.msra.mxu1 %v19495_v8 }
 0x91d   :  { %14467 = vmatmul.mubr.bf16.vlgmr.msra.gmra.mrb[80].mxu1 %v13896_v12 }
 0x930   :  { %v13554_v49 = vpop.f32.mrb[56].mxu1 }
 0x931   :  { %v16788_v15 = vadd.f32 %v13554_v49, %v11193_v11  ;;  %v13556_v20 = vpop.f32.mrb[57].mxu1 }
 0x932   :  { %v16789_v55 = vadd.f32 %v13556_v20, %v11197_v31  ;;  %v13558_v60 = vpop.f32.mrb[58].mxu1 }
 0x933   :  { %v13887_v56 = vmax.f32 %v16788_v15, 0.0  ;;  %v13559_v47 = vpop.f32.mrb[59].mxu1 }
 0x934   :  { %v13888_v2 = vmax.f32 %v16789_v55, 0.0 }
 0x935   :  { %v13894_v17 = vpack.c.bf16 %v13887_v56, %v13887_v56 }
 0x936   :  { %v13895_v37 = vpack.c.bf16 %v13888_v2, %v13888_v2 }
 0x938   :  { %14426 = vmatprep.mubr.bf16.mxu0 %v13895_v37 }
 0x939   :  { %14427 = vmatmul.mubr.bf16.vlgmr.msra.gmra.mrb[12].mxu0 %v13894_v17 }
 0x93a   :  { %16761 = vmatpush3.bf16.msra.mxu0 %v19510_v0  ;;  %16776 = vmatprep.mubr.msk.bf16.mxu0 %vm19719_vm0, %v19718_v24 }
 0x93b   :  { %16762 = vmatprep.subr.bf16.mxu0 %v19718_v24 }
 0x93e   :  { %16763 = vmatpush3.bf16.msra.mxu0 %v19511_v19 }
 0x93f   :  { %16764 = vmatprep.subr.bf16.mxu0 %v19718_v24 }
 0x942   :  { %16765 = vmatpush3.bf16.msra.mxu0 %v19512_v42 }
 0x943   :  { %16766 = vmatprep.subr.bf16.mxu0 %v19718_v24 }
 0x946   :  { %16767 = vmatpush3.bf16.msra.mxu0 %v19513_v26 }
 0x947   :  { %16768 = vmatprep.subr.bf16.mxu0 %v19718_v24 }
 0x94a   :  { %16769 = vmatpush3.bf16.msra.mxu0 %v19514_v33 }
 0x94b   :  { %16770 = vmatprep.subr.bf16.mxu0 %v19718_v24 }
 0x94e   :  { %16771 = vmatpush3.bf16.msra.mxu0 %v19515_v34 }
 0x94f   :  { %16772 = vmatprep.subr.bf16.mxu0 %v19718_v24 }
 0x950   :  { %v16606_v39 = vpop.f32.mrb[60].mxu1 }
 0x951   :  { %v16607_v59 = vpop.f32.mrb[61].mxu1 }
 0x952   :  { %v16608_v18 = vadd.f32 %v16607_v59, %v16606_v39  ;;  %v16609_v27 = vpop.f32.mrb[62].mxu1  ;;  %16773 = vmatpush3.bf16.msra.mxu0 %v19516_v35 }
 0x953   :  { %v16610_v28 = vpop.f32.mrb[63].mxu1  ;;  %16774 = vmatprep.subr.bf16.mxu0 %v19718_v24 }
 0x954   :  { %v13760_v25 = vadd.f32 %v16608_v18, %v11209_v21 }
 0x956   :  { %16775 = vmatpush3.bf16.msra.mxu0 %v19517_v23 }
 0x970   :  { %v16628_v51 = vpop.f32.mrb[64].mxu1 }
 0x971   :  { %v16629_v63 = vpop.f32.mrb[65].mxu1 }
 0x972   :  { %v16630_v41 = vadd.f32 %v16629_v63, %v16628_v51  ;;  %v16631_v38 = vpop.f32.mrb[66].mxu1 }
 0x973   :  { %v16632_v9 = vpop.f32.mrb[67].mxu1 }
 0x974   :  { %v13800_v10 = vadd.f32 %v16630_v41, %v13760_v25 }
 0x990   :  { %v16650_v50 = vpop.f32.mrb[68].mxu1 }
 0x991   :  { %v16651_v57 = vpop.f32.mrb[69].mxu1 }
 0x992   :  { %v16652_v46 = vadd.f32 %v16651_v57, %v16650_v50  ;;  %v16653_v48 = vpop.f32.mrb[70].mxu1 }
 0x993   :  { %v16654_v13 = vpop.f32.mrb[71].mxu1 }
 0x994   :  { %v13840_v62 = vadd.f32 %v16652_v46, %v13800_v10 }
 0x9b0   :  { %v13879_v44 = vpop.f32.mrb[72].mxu1 }
 0x9b1   :  { %v13880_v24 = vadd.f32 %v13879_v44, %v13840_v62  ;;  %v16758_v32 = vpop.f32.mrb[73].mxu1 }
 0x9b2   :  { %v13882_v30 = vpop.f32.mrb[74].mxu1 }
 0x9b3   :  { %v13891_v43 = vmax.f32 %v13880_v24, 0.0  ;;  %v16759_v58 = vpop.f32.mrb[75].mxu1 }
 0x9b5   :  { %v13898_v54 = vpack.c.bf16 %v13891_v43, %v13891_v43 }
 0x9b7   :  { %16777 = vmatmul.mubr.bf16.vlgmr.msra.gmra.mrb[16].mxu0 %v13898_v54 }
 0x9d0   :  { %v16681_v29 = vpop.f32.mrb[76].mxu1 }
 0x9d1   :  { %v16682_v7 = vpop.f32.mrb[77].mxu1 }
 0x9d2   :  { %v16683_v52 = vadd.f32 %v16682_v7, %v16681_v29  ;;  %v16684_v45 = vpop.f32.mrb[78].mxu1 }
 0x9d3   :  { %v16685_v16 = vpop.f32.mrb[79].mxu1 }
 0x9d4   :  { %v14389_v4 = vadd.f32 %v16683_v52, %v16269_v36 }
 0x9f0   :  { %v16725_v53 = vpop.f32.mrb[80].mxu1 }
 0x9f1   :  { %v16726_v6 = vpop.f32.mrb[81].mxu1 }
 0x9f2   :  { %v16727_v1 = vadd.f32 %v16726_v6, %v16725_v53  ;;  %v16728_v3 = vpop.f32.mrb[82].mxu1 }
 0x9f3   :  { %v16729_v22 = vpop.f32.mrb[83].mxu1 }
 0xa0c   :  { %v16703_v61 = vpop.f32.mrb[12].mxu0 }
 0xa0d   :  { %v16704_v40 = vpop.f32.mrb[13].mxu0 }
 0xa0e   :  { %v16705_v5 = vadd.f32 %v16704_v40, %v16703_v61  ;;  %v16706_v8 = vpop.f32.mrb[14].mxu0 }
 0xa0f   :  { %v16707_v14 = vpop.f32.mrb[15].mxu0 }
 0xa10   :  { %v14429_v12 = vadd.f32 %v16705_v5, %v14389_v4 }
 0xa12   :  { %v14469_v11 = vadd.f32 %v16727_v1, %v14429_v12 }
 0xa8a   :  { %v14508_v31 = vpop.f32.mrb[16].mxu0 }
 0xa8b   :  { %v14509_v49 = vadd.f32 %v14508_v31, %v14469_v11  ;;  %v16778_v15 = vpop.f32.mrb[17].mxu0 }
 0xa8c   :  { %v14511_v20 = vpop.f32.mrb[18].mxu0 }
 0xa8d   :  { %14514 = vst [vmem:[#allocation14] sm:$0x3] %v14509_v49  ;;  %v16779_v55 = vpop.f32.mrb[19].mxu0 }
 0xa8e   :  { %19684 = shalt.err (!%p19681_p4)
}
 0xa8f   :  { %s19685_s15 = scalar_lea.hbm %s20259_s7, 32 }
 0xa90   :  { %p19686_p5 = scmp.ne.s32.totalorder %s20259_s7, %s19685_s15  ;;  %p19689_p6 = scmp.lt.u32.totalorder %s19685_s15, %s20259_s7 }
 0xa92   :  { %p19691_p7 = pnand %p19689_p6, %p19686_p5 }
 0xa94   :  { %19694 = shalt.err (!%p19691_p7)
}
 0xa95   :  { %14524 = dma.vmem_to_hbm [thread:$0]  %s14522_s3, 32, %s20259_s7, [#allocation4]  }
 0xa96   :  { %19703 = dma.done.wait [#allocation4], 32  }
 0xa97   :  { %19704 = vsyncadd [#allocation4], 4294967264 }
 0xa98   :  { %14528 = vsyncpa [#allocation3], 1 }
 0xa99   :  { %14529 = vsyncpa [#allocation6], 1 }
 0xa9a   :  { %14530 = vsyncpa [#allocation9], 1 }
 0xa9b   :  { %14531 = vsyncpa [#allocation12], 1 }
 0xa9c   :  { %14532 = vsyncpa [#allocation4], 1 }

</bundles_post_ra>
